<compile_context>
chip_gen: v5e
topology: v5e:2x2
jax: 0.10.0
libtpu: 0.0.40
codegen_flags: <defaults>
</compile_context>

<pallas_src>
import math
from functools import partial

import jax
import jax.numpy as jnp
from jax import lax
from jax.experimental import pallas as pl
from jax.experimental.pallas import tpu as pltpu


def _layernorm(y, gamma, beta, eps=1e-5):
    mu = jnp.mean(y, axis=-1, keepdims=True)
    var = jnp.mean((y - mu) ** 2, axis=-1, keepdims=True)
    return (y - mu) * lax.rsqrt(var + eps) * gamma + beta


def _gelu_exact(y):
    # nn.GELU() default: exact erf formulation (matches PyTorch bit-for-bit math).
    return 0.5 * y * (1.0 + lax.erf(y * (1.0 / math.sqrt(2.0))))


def transformer_block_kernel(
    x_ref, wqkv_ref, bqkv_ref, wo_ref, bo_ref,
    ln1w_ref, ln1b_ref, ln2w_ref, ln2b_ref,
    w1_ref, b1_ref, w2_ref, b2_ref,
    o_ref, *, num_heads, head_mode, mlp_chunk,
):
    bb, T, D = x_ref.shape                       # (batch_block, seq, hidden)
    M = bb * T
    H = num_heads
    hd = D // H

    x = x_ref[...].reshape(M, D)                 # f32 residual stream
    xb = x.astype(jnp.bfloat16)

    # --- fused QKV projection (1/sqrt(hd) already folded into the Q columns) ---
    qkv = jnp.dot(xb, wqkv_ref[...],
                  preferred_element_type=jnp.float32) + bqkv_ref[...]   # (M, 3D) f32

    # --- causal additive bias, (T, T), shared across sequences and heads ---
    row = lax.broadcasted_iota(jnp.int32, (T, T), 0)
    col = lax.broadcasted_iota(jnp.int32, (T, T), 1)
    bias = jnp.where(col <= row, 0.0, -1e30).astype(jnp.float32)

    q = qkv[:, :D]
    k = qkv[:, D:2 * D]
    v = qkv[:, 2 * D:]

    if head_mode == "loop":
        # Proven fallback path: static per-head loop (still deferred-normalized).
        outs = []
        for h in range(H):
            sl = slice(h * hd, (h + 1) * hd)
            qh = q[:, sl].reshape(bb, T, hd).astype(jnp.bfloat16)
            kh = k[:, sl].reshape(bb, T, hd).astype(jnp.bfloat16)
            vh = v[:, sl].reshape(bb, T, hd).astype(jnp.bfloat16)
            s = jnp.einsum('bqd,bkd->bqk', qh, kh,
                           preferred_element_type=jnp.float32) + bias
            m = jnp.max(s, axis=-1, keepdims=True)
            p = jnp.exp(s - m)
            l = jnp.sum(p, axis=-1, keepdims=True)
            oh = jnp.einsum('bqk,bkd->bqd', p.astype(jnp.bfloat16), vh,
                            preferred_element_type=jnp.float32)
            oh = oh * pl.reciprocal(l, approx=True)           # deferred normalization
            outs.append(oh.reshape(M, hd))
        attn = jnp.concatenate(outs, axis=-1)                 # (M, D) f32
    else:
        # Head-batched path: one relayout per operand, one batched einsum pair.
        def to_heads(z):
            z4 = z.reshape(bb, T, H, hd)
            if head_mode == "einshape":
                z4 = pltpu.einshape("bthd->bhtd", z4)
            else:
                z4 = jnp.swapaxes(z4, 1, 2)                   # (bb, H, T, hd)
            return z4.reshape(bb * H, T, hd).astype(jnp.bfloat16)

        qh, kh, vh = to_heads(q), to_heads(k), to_heads(v)
        s = jnp.einsum('bqd,bkd->bqk', qh, kh,
                       preferred_element_type=jnp.float32) + bias        # (bbH, T, T)
        m = jnp.max(s, axis=-1, keepdims=True)
        p = jnp.exp(s - m)
        l = jnp.sum(p, axis=-1, keepdims=True)
        o = jnp.einsum('bqk,bkd->bqd', p.astype(jnp.bfloat16), vh,
                       preferred_element_type=jnp.float32)               # (bbH, T, hd)
        o = o * pl.reciprocal(l, approx=True)                 # deferred normalization
        o4 = o.reshape(bb, H, T, hd)
        if head_mode == "einshape":
            o4 = pltpu.einshape("bhtd->bthd", o4)
        else:
            o4 = jnp.swapaxes(o4, 1, 2)
        attn = o4.reshape(M, D)

    attn = jnp.dot(attn.astype(jnp.bfloat16), wo_ref[...],
                   preferred_element_type=jnp.float32) + bo_ref[...]

    # --- postnorm residual 1 (f32) ---
    y = _layernorm(x + attn, ln1w_ref[...], ln1b_ref[...])

    # --- MLP: Linear(D,4D) -> GELU(exact) -> Linear(4D,D), hidden dim chunked ---
    yb = y.astype(jnp.bfloat16)
    D4 = 4 * D
    acc = None
    for c0 in range(0, D4, mlp_chunk):                        # static slices -> free
        c1 = c0 + mlp_chunk
        h1 = jnp.dot(yb, w1_ref[:, c0:c1],
                     preferred_element_type=jnp.float32) + b1_ref[:, c0:c1]
        h1 = _gelu_exact(h1)
        part = jnp.dot(h1.astype(jnp.bfloat16), w2_ref[c0:c1, :],
                       preferred_element_type=jnp.float32)
        acc = part if acc is None else acc + part
    h2 = acc + b2_ref[...]

    # --- postnorm residual 2 ---
    z = _layernorm(y + h2, ln2w_ref[...], ln2b_ref[...])
    o_ref[...] = z.reshape(bb, T, D)


_PARAM_ORDER = ("wqkv", "bqkv", "wo", "bo", "ln1w", "ln1b",
                "ln2w", "ln2b", "w1", "b1", "w2", "b2")


def _tpu_config():
    """Derive VMEM budget / block sizing from the actual chip generation."""
    try:
        cap = getattr(pltpu.get_tpu_info(), "vmem_capacity_bytes", None)
    except Exception:
        cap = None
    if not cap:
        cap = 64 * 1024 * 1024                 # conservative (v7x-sized) default
    try:
        kind = jax.devices()[0].device_kind.lower()
    except Exception:
        kind = ""
    multi_tc = ("v7" in kind) or ("v4" in kind) or ("v5p" in kind)
    vmem_limit = int(cap * 3 // 4)             # ~48 MiB on 64 MiB parts, ~96 MiB on 128 MiB
    target_rows = 512 if cap >= 96 * 1024 * 1024 else 256
    return vmem_limit, target_rows, (2 if multi_tc else 1)


def _choose_batch_block(B, T, target_rows, min_steps):
    """Pack sequences per grid step to target `target_rows` MXU rows, keeping
    >= min_steps grid steps (min_steps=2 only on multi-TensorCore parts)."""
    bb = max(1, min(B, target_rows // max(T, 1)))
    if bb > 1 and B // bb < min_steps:
        bb = max(1, B // min_steps)
    while B % bb:
        bb -= 1
    return bb


def _mlp_chunk(hidden4, max_chunk=2048):
    """Largest lane-aligned divisor of 4*D that is <= max_chunk."""
    if hidden4 <= max_chunk:
        return hidden4
    for c in range(max_chunk, 127, -128):
        if hidden4 % c == 0:
            return c
    return hidden4


def transformer_block(x, params, num_heads, batch_block=None):
    B, T, D = x.shape
    vmem_limit, target_rows, min_steps = _tpu_config()
    if batch_block is None:
        batch_block = _choose_batch_block(B, T, target_rows, min_steps)
    assert B % batch_block == 0
    grid = (B // batch_block,)
    weights = [params[k] for k in _PARAM_ORDER]
    chunk = _mlp_chunk(4 * D)

    def build(head_mode, single_buffer):
        in_specs = [pl.BlockSpec((batch_block, T, D), lambda b: (b, 0, 0))]
        for w in weights:
            kwargs = {}
            if single_buffer:
                # Grid-invariant weights: one resident buffer, no double-buffering.
                kwargs["pipeline_mode"] = pl.Buffered(1)
            in_specs.append(
                pl.BlockSpec(w.shape, lambda b, n=w.ndim: (0,) * n, **kwargs))
        out_spec = pl.BlockSpec((batch_block, T, D), lambda b: (b, 0, 0))
        return pl.pallas_call(
            partial(transformer_block_kernel, num_heads=num_heads,
                    head_mode=head_mode, mlp_chunk=chunk),
            out_shape=jax.ShapeDtypeStruct((B, T, D), jnp.float32),
            grid_spec=pltpu.PrefetchScalarGridSpec(
                num_scalar_prefetch=0,
                grid=grid,
                in_specs=in_specs,
                out_specs=out_spec,
            ),
            compiler_params=pltpu.CompilerParams(
                dimension_semantics=("parallel",),
                vmem_limit_bytes=vmem_limit,
            ),
        )

    # Compatibility cascade: prefer the fully optimized configuration, fall back if
    # the installed Mosaic rejects single-buffer specs or in-kernel head relayouts.
    last_err = None
    for head_mode in ("transpose", "einshape", "loop"):
        for single_buffer in (True, False):
            try:
                return build(head_mode, single_buffer)(x, *weights)
            except Exception as e:      # lowering/compat failure -> try next config
                last_err = e
    raise last_err


def init_params(key, hidden_dim, num_heads):
    D = hidden_dim
    hd = D // num_heads
    ks = jax.random.split(key, 12)
    s = 0.05
    n = lambda k, shape: jax.random.normal(k, shape, jnp.float32) * s
    bf = lambda a: a.astype(jnp.bfloat16)

    wqkv = n(ks[0], (D, 3 * D))
    bqkv = n(ks[1], (1, 3 * D))
    # Fold the 1/sqrt(hd) attention scale into the Q projection (weight AND bias):
    # softmax(((x Wq + bq)/sqrt(hd)) (x Wk + bk)^T) == softmax((x Wq' + bq')(x Wk + bk)^T)
    # with Wq' = Wq/sqrt(hd), bq' = bq/sqrt(hd)  -> no per-step scale in the kernel.
    scale = 1.0 / math.sqrt(hd)
    wqkv = wqkv.at[:, :D].multiply(scale)
    bqkv = bqkv.at[:, :D].multiply(scale)

    return {
        # attention in_proj (fused q,k,v), pre-transposed to (D, 3D), bf16
        "wqkv": bf(wqkv),
        "bqkv": bqkv,
        # attention out_proj, pre-transposed to (D, D), bf16
        "wo": bf(n(ks[2], (D, D))),
        "bo": n(ks[3], (1, D)),
        # layer norms (nontrivial affine params, f32 for VPU math)
        "ln1w": 1.0 + n(ks[4], (1, D)),
        "ln1b": n(ks[5], (1, D)),
        "ln2w": 1.0 + n(ks[6], (1, D)),
        "ln2b": n(ks[7], (1, D)),
        # mlp: Linear(D, 4D) + GELU + Linear(4D, D), pre-transposed, bf16
        "w1": bf(n(ks[8], (D, 4 * D))),
        "b1": n(ks[9], (1, 4 * D)),
        "w2": bf(n(ks[10], (4 * D, D))),
        "b2": n(ks[11], (1, D)),
    }


def reference(x, p, num_heads):
    """Pure-JAX f32 reference matching the PyTorch postnorm TransformerBlock
    (eval mode). The 1/sqrt(hd) scale is pre-folded into wqkv/bqkv (init_params),
    so the composite below equals nn.MultiheadAttention with the corresponding
    unscaled weights."""
    B, T, D = x.shape
    hd = D // num_heads
    W = lambda k: p[k].astype(jnp.float32)

    def ln(y, g, b, eps=1e-5):
        mu = jnp.mean(y, axis=-1, keepdims=True)
        var = jnp.mean((y - mu) ** 2, axis=-1, keepdims=True)
        return (y - mu) / jnp.sqrt(var + eps) * g + b

    qkv = x @ W("wqkv") + p["bqkv"]
    q, k, v = jnp.split(qkv, 3, axis=-1)
    split = lambda z: z.reshape(B, T, num_heads, hd).transpose(0, 2, 1, 3)
    qh, kh, vh = split(q), split(k), split(v)
    s = jnp.einsum("bhtd,bhsd->bhts", qh, kh)      # scale already folded into Wq/bq
    mask = jnp.tril(jnp.ones((T, T), bool))
    s = jnp.where(mask, s, -jnp.inf)
    a = jax.nn.softmax(s, axis=-1)
    o = jnp.einsum("bhts,bhsd->bhtd", a, vh).transpose(0, 2, 1, 3).reshape(B, T, D)
    o = o @ W("wo") + p["bo"]
    y = ln(x + o, p["ln1w"], p["ln1b"])
    h = jax.nn.gelu(y @ W("w1") + p["b1"], approximate=False)
    h = h @ W("w2") + p["b2"]
    return ln(y + h, p["ln2w"], p["ln2b"])


if __name__ == "__main__":
    B, T, D, H = 2, 8, 32, 4   # batch, seq_len, hidden_dim, num_heads

    root = jax.random.PRNGKey(0)
    kx, kp = jax.random.split(root)
    x = jax.random.normal(kx, (B, T, D), jnp.float32)
    params = init_params(kp, D, H)

    out = transformer_block(x, params, num_heads=H)
    out = jax.block_until_ready(out)

    ref = reference(x, params, num_heads=H)
    assert out.shape == (B, T, D)
    assert jnp.all(jnp.isfinite(out))
    # bf16 matmul operands (f32 accumulation) + approx reciprocal vs f32 reference
    # -> relaxed tolerance.
    assert jnp.allclose(out, ref, atol=3e-2, rtol=3e-2), (
        f"max abs err = {float(jnp.max(jnp.abs(out - ref)))}")

    print("KERNEL_OK")
</pallas_src>

<mosaic_0001>
module attributes {stable_mosaic.version = 11 : i64} {
  func.func @transformer_block_kernel(%arg0: i32, %arg1: memref<2x8x32xf32, #tpu.memory_space<vmem>>, %arg2: memref<32x96xbf16, #tpu.memory_space<vmem>>, %arg3: memref<1x96xf32, #tpu.memory_space<vmem>>, %arg4: memref<32x32xbf16, #tpu.memory_space<vmem>>, %arg5: memref<1x32xf32, #tpu.memory_space<vmem>>, %arg6: memref<1x32xf32, #tpu.memory_space<vmem>>, %arg7: memref<1x32xf32, #tpu.memory_space<vmem>>, %arg8: memref<1x32xf32, #tpu.memory_space<vmem>>, %arg9: memref<1x32xf32, #tpu.memory_space<vmem>>, %arg10: memref<32x128xbf16, #tpu.memory_space<vmem>>, %arg11: memref<1x128xf32, #tpu.memory_space<vmem>>, %arg12: memref<128x32xbf16, #tpu.memory_space<vmem>>, %arg13: memref<1x32xf32, #tpu.memory_space<vmem>>, %arg14: memref<2x8x32xf32, #tpu.memory_space<vmem>>) attributes {dimension_semantics = [#tpu.dimension_semantics<parallel>], iteration_bounds = array<i64: 1>, scalar_prefetch = 0 : i64, scratch_operands = 0 : i64, tpu.core_type = #tpu.core_type<tc>, window_params = [{transform_indices = @transform_0, window_bounds = array<i64: 2, 8, 32>}, {pipeline_mode = #tpu.pipeline_mode<synchronous>, transform_indices = @transform_1, window_bounds = array<i64: 32, 96>}, {pipeline_mode = #tpu.pipeline_mode<synchronous>, transform_indices = @transform_2, window_bounds = array<i64: 1, 96>}, {pipeline_mode = #tpu.pipeline_mode<synchronous>, transform_indices = @transform_3, window_bounds = array<i64: 32, 32>}, {pipeline_mode = #tpu.pipeline_mode<synchronous>, transform_indices = @transform_4, window_bounds = array<i64: 1, 32>}, {pipeline_mode = #tpu.pipeline_mode<synchronous>, transform_indices = @transform_5, window_bounds = array<i64: 1, 32>}, {pipeline_mode = #tpu.pipeline_mode<synchronous>, transform_indices = @transform_6, window_bounds = array<i64: 1, 32>}, {pipeline_mode = #tpu.pipeline_mode<synchronous>, transform_indices = @transform_7, window_bounds = array<i64: 1, 32>}, {pipeline_mode = #tpu.pipeline_mode<synchronous>, transform_indices = @transform_8, window_bounds = array<i64: 1, 32>}, {pipeline_mode = #tpu.pipeline_mode<synchronous>, transform_indices = @transform_9, window_bounds = array<i64: 32, 128>}, {pipeline_mode = #tpu.pipeline_mode<synchronous>, transform_indices = @transform_10, window_bounds = array<i64: 1, 128>}, {pipeline_mode = #tpu.pipeline_mode<synchronous>, transform_indices = @transform_11, window_bounds = array<i64: 128, 32>}, {pipeline_mode = #tpu.pipeline_mode<synchronous>, transform_indices = @transform_12, window_bounds = array<i64: 1, 32>}, {transform_indices = @transform_13, window_bounds = array<i64: 2, 8, 32>}]} {
    %c0 = arith.constant 0 : index
    %c0_0 = arith.constant 0 : index
    %c0_1 = arith.constant 0 : index
    %0 = vector.load %arg1[%c0, %c0_0, %c0_1] : memref<2x8x32xf32, #tpu.memory_space<vmem>>, vector<2x8x32xf32>
    %1 = vector.shape_cast %0 : vector<2x8x32xf32> to vector<16x32xf32>
    %2 = arith.truncf %1 : vector<16x32xf32> to vector<16x32xbf16>
    %c0_2 = arith.constant 0 : index
    %c0_3 = arith.constant 0 : index
    %3 = vector.load %arg2[%c0_2, %c0_3] : memref<32x96xbf16, #tpu.memory_space<vmem>>, vector<32x96xbf16>
    %cst = arith.constant dense<0.000000e+00> : vector<16x96xf32>
    %4 = tpu.matmul %2, %3, %cst {dimension_numbers = #tpu.dot_dimension_numbers<[1], [0], [0], [1], [0, 0, 1, 1], [], []>} : vector<16x32xbf16>, vector<32x96xbf16>, vector<16x96xf32> -> vector<16x96xf32>
    %c0_4 = arith.constant 0 : index
    %c0_5 = arith.constant 0 : index
    %5 = vector.load %arg3[%c0_4, %c0_5] : memref<1x96xf32, #tpu.memory_space<vmem>>, vector<1x96xf32>
    %6 = vector.broadcast %5 : vector<1x96xf32> to vector<16x96xf32>
    %7 = arith.addf %4, %6 : vector<16x96xf32>
    %8 = tpu.iota {dimensions = array<i32: 0>} : vector<8x8xi32>
    %9 = tpu.iota {dimensions = array<i32: 1>} : vector<8x8xi32>
    %10 = arith.cmpi sle, %9, %8 : vector<8x8xi32>
    %cst_6 = arith.constant 0.000000e+00 : f32
    %cst_7 = arith.constant -1.000000e+30 : f32
    %11 = vector.broadcast %cst_6 : f32 to vector<8x8xf32>
    %12 = vector.broadcast %cst_7 : f32 to vector<8x8xf32>
    %13 = arith.select %10, %11, %12 : vector<8x8xi1>, vector<8x8xf32>
    %14 = vector.extract_strided_slice %7 {offsets = [0, 0], sizes = [16, 32], strides = [1, 1]} : vector<16x96xf32> to vector<16x32xf32>
    %15 = vector.extract_strided_slice %7 {offsets = [0, 32], sizes = [16, 32], strides = [1, 1]} : vector<16x96xf32> to vector<16x32xf32>
    %16 = vector.extract_strided_slice %7 {offsets = [0, 64], sizes = [16, 32], strides = [1, 1]} : vector<16x96xf32> to vector<16x32xf32>
    %17 = vector.shape_cast %14 : vector<16x32xf32> to vector<2x8x4x8xf32>
    %18 = tpu.transpose %17, [0, 2, 1, 3] : vector<2x8x4x8xf32> -> vector<2x4x8x8xf32>
    %19 = vector.shape_cast %18 : vector<2x4x8x8xf32> to vector<8x8x8xf32>
    %20 = arith.truncf %19 : vector<8x8x8xf32> to vector<8x8x8xbf16>
    %21 = vector.shape_cast %15 : vector<16x32xf32> to vector<2x8x4x8xf32>
    %22 = tpu.transpose %21, [0, 2, 1, 3] : vector<2x8x4x8xf32> -> vector<2x4x8x8xf32>
    %23 = vector.shape_cast %22 : vector<2x4x8x8xf32> to vector<8x8x8xf32>
    %24 = arith.truncf %23 : vector<8x8x8xf32> to vector<8x8x8xbf16>
    %25 = vector.shape_cast %16 : vector<16x32xf32> to vector<2x8x4x8xf32>
    %26 = tpu.transpose %25, [0, 2, 1, 3] : vector<2x8x4x8xf32> -> vector<2x4x8x8xf32>
    %27 = vector.shape_cast %26 : vector<2x4x8x8xf32> to vector<8x8x8xf32>
    %28 = arith.truncf %27 : vector<8x8x8xf32> to vector<8x8x8xbf16>
    "tpu.trace_start"() <{level = 10 : i32, message = "bqd,bkd->bqk"}> : () -> ()
    %cst_8 = arith.constant dense<0.000000e+00> : vector<8x8x8xf32>
    %29 = tpu.matmul %20, %24, %cst_8 {dimension_numbers = #tpu.dot_dimension_numbers<[2], [2], [1], [1], [0, 0, 0, 1, 1, 1], [0], [0]>} : vector<8x8x8xbf16>, vector<8x8x8xbf16>, vector<8x8x8xf32> -> vector<8x8x8xf32>
    "tpu.trace_stop"() : () -> ()
    %30 = vector.shape_cast %13 : vector<8x8xf32> to vector<1x8x8xf32>
    %31 = vector.broadcast %30 : vector<1x8x8xf32> to vector<8x8x8xf32>
    %32 = arith.addf %29, %31 : vector<8x8x8xf32>
    %cst_9 = arith.constant dense<0xFF800000> : vector<8x8xf32>
    %33 = vector.multi_reduction <maximumf>, %32, %cst_9 [2] : vector<8x8x8xf32> to vector<8x8xf32>
    %34 = vector.shape_cast %33 : vector<8x8xf32> to vector<8x8x1xf32>
    %35 = vector.broadcast %34 : vector<8x8x1xf32> to vector<8x8x8xf32>
    %36 = arith.subf %32, %35 : vector<8x8x8xf32>
    %37 = math.exp %36 : vector<8x8x8xf32>
    %cst_10 = arith.constant dense<0.000000e+00> : vector<8x8xf32>
    %38 = vector.multi_reduction <add>, %37, %cst_10 [2] : vector<8x8x8xf32> to vector<8x8xf32>
    %39 = vector.shape_cast %38 : vector<8x8xf32> to vector<8x8x1xf32>
    %40 = arith.truncf %37 : vector<8x8x8xf32> to vector<8x8x8xbf16>
    "tpu.trace_start"() <{level = 10 : i32, message = "bqk,bkd->bqd"}> : () -> ()
    %cst_11 = arith.constant dense<0.000000e+00> : vector<8x8x8xf32>
    %41 = tpu.matmul %40, %28, %cst_11 {dimension_numbers = #tpu.dot_dimension_numbers<[2], [1], [1], [2], [0, 0, 0, 1, 1, 2], [0], [0]>} : vector<8x8x8xbf16>, vector<8x8x8xbf16>, vector<8x8x8xf32> -> vector<8x8x8xf32>
    "tpu.trace_stop"() : () -> ()
    %42 = tpu.reciprocal %39 {approx = true} : vector<8x8x1xf32> -> vector<8x8x1xf32>
    %43 = vector.broadcast %42 : vector<8x8x1xf32> to vector<8x8x8xf32>
    %44 = arith.mulf %41, %43 : vector<8x8x8xf32>
    %45 = vector.shape_cast %44 : vector<8x8x8xf32> to vector<2x4x8x8xf32>
    %46 = tpu.transpose %45, [0, 2, 1, 3] : vector<2x4x8x8xf32> -> vector<2x8x4x8xf32>
    %47 = vector.shape_cast %46 : vector<2x8x4x8xf32> to vector<16x32xf32>
    %48 = arith.truncf %47 : vector<16x32xf32> to vector<16x32xbf16>
    %c0_12 = arith.constant 0 : index
    %c0_13 = arith.constant 0 : index
    %49 = vector.load %arg4[%c0_12, %c0_13] : memref<32x32xbf16, #tpu.memory_space<vmem>>, vector<32x32xbf16>
    %cst_14 = arith.constant dense<0.000000e+00> : vector<16x32xf32>
    %50 = tpu.matmul %48, %49, %cst_14 {dimension_numbers = #tpu.dot_dimension_numbers<[1], [0], [0], [1], [0, 0, 1, 1], [], []>} : vector<16x32xbf16>, vector<32x32xbf16>, vector<16x32xf32> -> vector<16x32xf32>
    %c0_15 = arith.constant 0 : index
    %c0_16 = arith.constant 0 : index
    %51 = vector.load %arg5[%c0_15, %c0_16] : memref<1x32xf32, #tpu.memory_space<vmem>>, vector<1x32xf32>
    %52 = vector.broadcast %51 : vector<1x32xf32> to vector<16x32xf32>
    %53 = arith.addf %50, %52 : vector<16x32xf32>
    %54 = arith.addf %1, %53 : vector<16x32xf32>
    %c0_17 = arith.constant 0 : index
    %c0_18 = arith.constant 0 : index
    %55 = vector.load %arg6[%c0_17, %c0_18] : memref<1x32xf32, #tpu.memory_space<vmem>>, vector<1x32xf32>
    %c0_19 = arith.constant 0 : index
    %c0_20 = arith.constant 0 : index
    %56 = vector.load %arg7[%c0_19, %c0_20] : memref<1x32xf32, #tpu.memory_space<vmem>>, vector<1x32xf32>
    %cst_21 = arith.constant dense<0.000000e+00> : vector<16xf32>
    %57 = vector.multi_reduction <add>, %54, %cst_21 [1] : vector<16x32xf32> to vector<16xf32>
    %58 = vector.shape_cast %57 : vector<16xf32> to vector<16x1xf32>
    %cst_22 = arith.constant 3.200000e+01 : f32
    %59 = vector.broadcast %cst_22 : f32 to vector<16x1xf32>
    %60 = arith.divf %58, %59 : vector<16x1xf32>
    %61 = vector.broadcast %60 : vector<16x1xf32> to vector<16x32xf32>
    %62 = arith.subf %54, %61 : vector<16x32xf32>
    %63 = arith.mulf %62, %62 : vector<16x32xf32>
    %cst_23 = arith.constant dense<0.000000e+00> : vector<16xf32>
    %64 = vector.multi_reduction <add>, %63, %cst_23 [1] : vector<16x32xf32> to vector<16xf32>
    %65 = vector.shape_cast %64 : vector<16xf32> to vector<16x1xf32>
    %cst_24 = arith.constant 3.200000e+01 : f32
    %66 = vector.broadcast %cst_24 : f32 to vector<16x1xf32>
    %67 = arith.divf %65, %66 : vector<16x1xf32>
    %68 = vector.broadcast %60 : vector<16x1xf32> to vector<16x32xf32>
    %69 = arith.subf %54, %68 : vector<16x32xf32>
    %cst_25 = arith.constant 9.99999974E-6 : f32
    %70 = vector.broadcast %cst_25 : f32 to vector<16x1xf32>
    %71 = arith.addf %67, %70 : vector<16x1xf32>
    %72 = math.rsqrt %71 : vector<16x1xf32>
    %73 = vector.broadcast %72 : vector<16x1xf32> to vector<16x32xf32>
    %74 = arith.mulf %69, %73 : vector<16x32xf32>
    %75 = vector.broadcast %55 : vector<1x32xf32> to vector<16x32xf32>
    %76 = arith.mulf %74, %75 : vector<16x32xf32>
    %77 = vector.broadcast %56 : vector<1x32xf32> to vector<16x32xf32>
    %78 = arith.addf %76, %77 : vector<16x32xf32>
    %79 = arith.truncf %78 : vector<16x32xf32> to vector<16x32xbf16>
    %c0_26 = arith.constant 0 : index
    %c0_27 = arith.constant 0 : index
    %80 = vector.load %arg10[%c0_26, %c0_27] : memref<32x128xbf16, #tpu.memory_space<vmem>>, vector<32x128xbf16>
    %cst_28 = arith.constant dense<0.000000e+00> : vector<16x128xf32>
    %81 = tpu.matmul %79, %80, %cst_28 {dimension_numbers = #tpu.dot_dimension_numbers<[1], [0], [0], [1], [0, 0, 1, 1], [], []>} : vector<16x32xbf16>, vector<32x128xbf16>, vector<16x128xf32> -> vector<16x128xf32>
    %c0_29 = arith.constant 0 : index
    %c0_30 = arith.constant 0 : index
    %82 = vector.load %arg11[%c0_29, %c0_30] : memref<1x128xf32, #tpu.memory_space<vmem>>, vector<1x128xf32>
    %83 = vector.broadcast %82 : vector<1x128xf32> to vector<16x128xf32>
    %84 = arith.addf %81, %83 : vector<16x128xf32>
    %cst_31 = arith.constant 5.000000e-01 : f32
    %85 = vector.broadcast %cst_31 : f32 to vector<16x128xf32>
    %86 = arith.mulf %85, %84 : vector<16x128xf32>
    %cst_32 = arith.constant 0.707106769 : f32
    %87 = vector.broadcast %cst_32 : f32 to vector<16x128xf32>
    %88 = arith.mulf %84, %87 : vector<16x128xf32>
    %89 = math.erf %88 : vector<16x128xf32>
    %cst_33 = arith.constant 1.000000e+00 : f32
    %90 = vector.broadcast %cst_33 : f32 to vector<16x128xf32>
    %91 = arith.addf %90, %89 : vector<16x128xf32>
    %92 = arith.mulf %86, %91 : vector<16x128xf32>
    %93 = arith.truncf %92 : vector<16x128xf32> to vector<16x128xbf16>
    %c0_34 = arith.constant 0 : index
    %c0_35 = arith.constant 0 : index
    %94 = vector.load %arg12[%c0_34, %c0_35] : memref<128x32xbf16, #tpu.memory_space<vmem>>, vector<128x32xbf16>
    %cst_36 = arith.constant dense<0.000000e+00> : vector<16x32xf32>
    %95 = tpu.matmul %93, %94, %cst_36 {dimension_numbers = #tpu.dot_dimension_numbers<[1], [0], [0], [1], [0, 0, 1, 1], [], []>} : vector<16x128xbf16>, vector<128x32xbf16>, vector<16x32xf32> -> vector<16x32xf32>
    %c0_37 = arith.constant 0 : index
    %c0_38 = arith.constant 0 : index
    %96 = vector.load %arg13[%c0_37, %c0_38] : memref<1x32xf32, #tpu.memory_space<vmem>>, vector<1x32xf32>
    %97 = vector.broadcast %96 : vector<1x32xf32> to vector<16x32xf32>
    %98 = arith.addf %95, %97 : vector<16x32xf32>
    %99 = arith.addf %78, %98 : vector<16x32xf32>
    %c0_39 = arith.constant 0 : index
    %c0_40 = arith.constant 0 : index
    %100 = vector.load %arg8[%c0_39, %c0_40] : memref<1x32xf32, #tpu.memory_space<vmem>>, vector<1x32xf32>
    %c0_41 = arith.constant 0 : index
    %c0_42 = arith.constant 0 : index
    %101 = vector.load %arg9[%c0_41, %c0_42] : memref<1x32xf32, #tpu.memory_space<vmem>>, vector<1x32xf32>
    %cst_43 = arith.constant dense<0.000000e+00> : vector<16xf32>
    %102 = vector.multi_reduction <add>, %99, %cst_43 [1] : vector<16x32xf32> to vector<16xf32>
    %103 = vector.shape_cast %102 : vector<16xf32> to vector<16x1xf32>
    %cst_44 = arith.constant 3.200000e+01 : f32
    %104 = vector.broadcast %cst_44 : f32 to vector<16x1xf32>
    %105 = arith.divf %103, %104 : vector<16x1xf32>
    %106 = vector.broadcast %105 : vector<16x1xf32> to vector<16x32xf32>
    %107 = arith.subf %99, %106 : vector<16x32xf32>
    %108 = arith.mulf %107, %107 : vector<16x32xf32>
    %cst_45 = arith.constant dense<0.000000e+00> : vector<16xf32>
    %109 = vector.multi_reduction <add>, %108, %cst_45 [1] : vector<16x32xf32> to vector<16xf32>
    %110 = vector.shape_cast %109 : vector<16xf32> to vector<16x1xf32>
    %cst_46 = arith.constant 3.200000e+01 : f32
    %111 = vector.broadcast %cst_46 : f32 to vector<16x1xf32>
    %112 = arith.divf %110, %111 : vector<16x1xf32>
    %113 = vector.broadcast %105 : vector<16x1xf32> to vector<16x32xf32>
    %114 = arith.subf %99, %113 : vector<16x32xf32>
    %cst_47 = arith.constant 9.99999974E-6 : f32
    %115 = vector.broadcast %cst_47 : f32 to vector<16x1xf32>
    %116 = arith.addf %112, %115 : vector<16x1xf32>
    %117 = math.rsqrt %116 : vector<16x1xf32>
    %118 = vector.broadcast %117 : vector<16x1xf32> to vector<16x32xf32>
    %119 = arith.mulf %114, %118 : vector<16x32xf32>
    %120 = vector.broadcast %100 : vector<1x32xf32> to vector<16x32xf32>
    %121 = arith.mulf %119, %120 : vector<16x32xf32>
    %122 = vector.broadcast %101 : vector<1x32xf32> to vector<16x32xf32>
    %123 = arith.addf %121, %122 : vector<16x32xf32>
    %124 = vector.shape_cast %123 : vector<16x32xf32> to vector<2x8x32xf32>
    %c0_48 = arith.constant 0 : index
    %c0_49 = arith.constant 0 : index
    %c0_50 = arith.constant 0 : index
    %125 = vector.load %arg14[%c0_48, %c0_49, %c0_50] : memref<2x8x32xf32, #tpu.memory_space<vmem>>, vector<2x8x32xf32>
    tpu.vector_store %arg14[%c0_48, %c0_49, %c0_50], %124 {strides = array<i32>} : memref<2x8x32xf32, #tpu.memory_space<vmem>>, vector<2x8x32xf32>,
    return
  }
  func.func @transform_0(%arg0: i32) -> (i32, i32, i32) {
    %c0_i32 = arith.constant 0 : i32
    %c0_i32_0 = arith.constant 0 : i32
    %c0_i32_1 = arith.constant 0 : i32
    return %arg0, %c0_i32, %c0_i32_0 : i32, i32, i32
  }
  func.func @transform_1(%arg0: i32) -> (i32, i32) {
    %c0_i32 = arith.constant 0 : i32
    %c0_i32_0 = arith.constant 0 : i32
    %c0_i32_1 = arith.constant 0 : i32
    return %c0_i32, %c0_i32_0 : i32, i32
  }
  func.func @transform_2(%arg0: i32) -> (i32, i32) {
    %c0_i32 = arith.constant 0 : i32
    %c0_i32_0 = arith.constant 0 : i32
    %c0_i32_1 = arith.constant 0 : i32
    return %c0_i32, %c0_i32_0 : i32, i32
  }
  func.func @transform_3(%arg0: i32) -> (i32, i32) {
    %c0_i32 = arith.constant 0 : i32
    %c0_i32_0 = arith.constant 0 : i32
    %c0_i32_1 = arith.constant 0 : i32
    return %c0_i32, %c0_i32_0 : i32, i32
  }
  func.func @transform_4(%arg0: i32) -> (i32, i32) {
    %c0_i32 = arith.constant 0 : i32
    %c0_i32_0 = arith.constant 0 : i32
    %c0_i32_1 = arith.constant 0 : i32
    return %c0_i32, %c0_i32_0 : i32, i32
  }
  func.func @transform_5(%arg0: i32) -> (i32, i32) {
    %c0_i32 = arith.constant 0 : i32
    %c0_i32_0 = arith.constant 0 : i32
    %c0_i32_1 = arith.constant 0 : i32
    return %c0_i32, %c0_i32_0 : i32, i32
  }
  func.func @transform_6(%arg0: i32) -> (i32, i32) {
    %c0_i32 = arith.constant 0 : i32
    %c0_i32_0 = arith.constant 0 : i32
    %c0_i32_1 = arith.constant 0 : i32
    return %c0_i32, %c0_i32_0 : i32, i32
  }
  func.func @transform_7(%arg0: i32) -> (i32, i32) {
    %c0_i32 = arith.constant 0 : i32
    %c0_i32_0 = arith.constant 0 : i32
    %c0_i32_1 = arith.constant 0 : i32
    return %c0_i32, %c0_i32_0 : i32, i32
  }
  func.func @transform_8(%arg0: i32) -> (i32, i32) {
    %c0_i32 = arith.constant 0 : i32
    %c0_i32_0 = arith.constant 0 : i32
    %c0_i32_1 = arith.constant 0 : i32
    return %c0_i32, %c0_i32_0 : i32, i32
  }
  func.func @transform_9(%arg0: i32) -> (i32, i32) {
    %c0_i32 = arith.constant 0 : i32
    %c0_i32_0 = arith.constant 0 : i32
    %c0_i32_1 = arith.constant 0 : i32
    return %c0_i32, %c0_i32_0 : i32, i32
  }
  func.func @transform_10(%arg0: i32) -> (i32, i32) {
    %c0_i32 = arith.constant 0 : i32
    %c0_i32_0 = arith.constant 0 : i32
    %c0_i32_1 = arith.constant 0 : i32
    return %c0_i32, %c0_i32_0 : i32, i32
  }
  func.func @transform_11(%arg0: i32) -> (i32, i32) {
    %c0_i32 = arith.constant 0 : i32
    %c0_i32_0 = arith.constant 0 : i32
    %c0_i32_1 = arith.constant 0 : i32
    return %c0_i32, %c0_i32_0 : i32, i32
  }
  func.func @transform_12(%arg0: i32) -> (i32, i32) {
    %c0_i32 = arith.constant 0 : i32
    %c0_i32_0 = arith.constant 0 : i32
    %c0_i32_1 = arith.constant 0 : i32
    return %c0_i32, %c0_i32_0 : i32, i32
  }
  func.func @transform_13(%arg0: i32) -> (i32, i32, i32) {
    %c0_i32 = arith.constant 0 : i32
    %c0_i32_0 = arith.constant 0 : i32
    %c0_i32_1 = arith.constant 0 : i32
    return %arg0, %c0_i32, %c0_i32_0 : i32, i32, i32
  }
}

module attributes {stable_mosaic.version = 11 : i64} {
  func.func @transformer_block_kernel(%arg0: i32, %arg1: memref<2x8x32xf32, #tpu.memory_space<vmem>>, %arg2: memref<32x96xbf16, #tpu.memory_space<vmem>>, %arg3: memref<1x96xf32, #tpu.memory_space<vmem>>, %arg4: memref<32x32xbf16, #tpu.memory_space<vmem>>, %arg5: memref<1x32xf32, #tpu.memory_space<vmem>>, %arg6: memref<1x32xf32, #tpu.memory_space<vmem>>, %arg7: memref<1x32xf32, #tpu.memory_space<vmem>>, %arg8: memref<1x32xf32, #tpu.memory_space<vmem>>, %arg9: memref<1x32xf32, #tpu.memory_space<vmem>>, %arg10: memref<32x128xbf16, #tpu.memory_space<vmem>>, %arg11: memref<1x128xf32, #tpu.memory_space<vmem>>, %arg12: memref<128x32xbf16, #tpu.memory_space<vmem>>, %arg13: memref<1x32xf32, #tpu.memory_space<vmem>>, %arg14: memref<2x8x32xf32, #tpu.memory_space<vmem>>) attributes {dimension_semantics = [#tpu.dimension_semantics<parallel>], iteration_bounds = array<i64: 1>, scalar_prefetch = 0 : i64, scratch_operands = 0 : i64, tpu.core_type = #tpu.core_type<tc>, window_params = [{transform_indices = @transform_0, window_bounds = array<i64: 2, 8, 32>}, {pipeline_mode = #tpu.pipeline_mode<synchronous>, transform_indices = @transform_1, window_bounds = array<i64: 32, 96>}, {pipeline_mode = #tpu.pipeline_mode<synchronous>, transform_indices = @transform_2, window_bounds = array<i64: 1, 96>}, {pipeline_mode = #tpu.pipeline_mode<synchronous>, transform_indices = @transform_3, window_bounds = array<i64: 32, 32>}, {pipeline_mode = #tpu.pipeline_mode<synchronous>, transform_indices = @transform_4, window_bounds = array<i64: 1, 32>}, {pipeline_mode = #tpu.pipeline_mode<synchronous>, transform_indices = @transform_5, window_bounds = array<i64: 1, 32>}, {pipeline_mode = #tpu.pipeline_mode<synchronous>, transform_indices = @transform_6, window_bounds = array<i64: 1, 32>}, {pipeline_mode = #tpu.pipeline_mode<synchronous>, transform_indices = @transform_7, window_bounds = array<i64: 1, 32>}, {pipeline_mode = #tpu.pipeline_mode<synchronous>, transform_indices = @transform_8, window_bounds = array<i64: 1, 32>}, {pipeline_mode = #tpu.pipeline_mode<synchronous>, transform_indices = @transform_9, window_bounds = array<i64: 32, 128>}, {pipeline_mode = #tpu.pipeline_mode<synchronous>, transform_indices = @transform_10, window_bounds = array<i64: 1, 128>}, {pipeline_mode = #tpu.pipeline_mode<synchronous>, transform_indices = @transform_11, window_bounds = array<i64: 128, 32>}, {pipeline_mode = #tpu.pipeline_mode<synchronous>, transform_indices = @transform_12, window_bounds = array<i64: 1, 32>}, {transform_indices = @transform_13, window_bounds = array<i64: 2, 8, 32>}]} {
    %c0 = arith.constant 0 : index
    %c0_0 = arith.constant 0 : index
    %c0_1 = arith.constant 0 : index
    %0 = vector.load %arg1[%c0, %c0_0, %c0_1] : memref<2x8x32xf32, #tpu.memory_space<vmem>>, vector<2x8x32xf32>
    %1 = vector.shape_cast %0 : vector<2x8x32xf32> to vector<16x32xf32>
    %2 = arith.truncf %1 : vector<16x32xf32> to vector<16x32xbf16>
    %c0_2 = arith.constant 0 : index
    %c0_3 = arith.constant 0 : index
    %3 = vector.load %arg2[%c0_2, %c0_3] : memref<32x96xbf16, #tpu.memory_space<vmem>>, vector<32x96xbf16>
    %cst = arith.constant dense<0.000000e+00> : vector<16x96xf32>
    %4 = tpu.matmul %2, %3, %cst {dimension_numbers = #tpu.dot_dimension_numbers<[1], [0], [0], [1], [0, 0, 1, 1], [], []>} : vector<16x32xbf16>, vector<32x96xbf16>, vector<16x96xf32> -> vector<16x96xf32>
    %c0_4 = arith.constant 0 : index
    %c0_5 = arith.constant 0 : index
    %5 = vector.load %arg3[%c0_4, %c0_5] : memref<1x96xf32, #tpu.memory_space<vmem>>, vector<1x96xf32>
    %6 = vector.broadcast %5 : vector<1x96xf32> to vector<16x96xf32>
    %7 = arith.addf %4, %6 : vector<16x96xf32>
    %8 = tpu.iota {dimensions = array<i32: 0>} : vector<8x8xi32>
    %9 = tpu.iota {dimensions = array<i32: 1>} : vector<8x8xi32>
    %10 = arith.cmpi sle, %9, %8 : vector<8x8xi32>
    %cst_6 = arith.constant 0.000000e+00 : f32
    %cst_7 = arith.constant -1.000000e+30 : f32
    %11 = vector.broadcast %cst_6 : f32 to vector<8x8xf32>
    %12 = vector.broadcast %cst_7 : f32 to vector<8x8xf32>
    %13 = arith.select %10, %11, %12 : vector<8x8xi1>, vector<8x8xf32>
    %14 = vector.extract_strided_slice %7 {offsets = [0, 0], sizes = [16, 32], strides = [1, 1]} : vector<16x96xf32> to vector<16x32xf32>
    %15 = vector.extract_strided_slice %7 {offsets = [0, 32], sizes = [16, 32], strides = [1, 1]} : vector<16x96xf32> to vector<16x32xf32>
    %16 = vector.extract_strided_slice %7 {offsets = [0, 64], sizes = [16, 32], strides = [1, 1]} : vector<16x96xf32> to vector<16x32xf32>
    %17 = vector.shape_cast %14 : vector<16x32xf32> to vector<2x8x4x8xf32>
    %18 = tpu.transpose %17, [0, 2, 1, 3] : vector<2x8x4x8xf32> -> vector<2x4x8x8xf32>
    %19 = vector.shape_cast %18 : vector<2x4x8x8xf32> to vector<8x8x8xf32>
    %20 = arith.truncf %19 : vector<8x8x8xf32> to vector<8x8x8xbf16>
    %21 = vector.shape_cast %15 : vector<16x32xf32> to vector<2x8x4x8xf32>
    %22 = tpu.transpose %21, [0, 2, 1, 3] : vector<2x8x4x8xf32> -> vector<2x4x8x8xf32>
    %23 = vector.shape_cast %22 : vector<2x4x8x8xf32> to vector<8x8x8xf32>
    %24 = arith.truncf %23 : vector<8x8x8xf32> to vector<8x8x8xbf16>
    %25 = vector.shape_cast %16 : vector<16x32xf32> to vector<2x8x4x8xf32>
    %26 = tpu.transpose %25, [0, 2, 1, 3] : vector<2x8x4x8xf32> -> vector<2x4x8x8xf32>
    %27 = vector.shape_cast %26 : vector<2x4x8x8xf32> to vector<8x8x8xf32>
    %28 = arith.truncf %27 : vector<8x8x8xf32> to vector<8x8x8xbf16>
    "tpu.trace_start"() <{level = 10 : i32, message = "bqd,bkd->bqk"}> : () -> ()
    %cst_8 = arith.constant dense<0.000000e+00> : vector<8x8x8xf32>
    %29 = tpu.matmul %20, %24, %cst_8 {dimension_numbers = #tpu.dot_dimension_numbers<[2], [2], [1], [1], [0, 0, 0, 1, 1, 1], [0], [0]>} : vector<8x8x8xbf16>, vector<8x8x8xbf16>, vector<8x8x8xf32> -> vector<8x8x8xf32>
    "tpu.trace_stop"() : () -> ()
    %30 = vector.shape_cast %13 : vector<8x8xf32> to vector<1x8x8xf32>
    %31 = vector.broadcast %30 : vector<1x8x8xf32> to vector<8x8x8xf32>
    %32 = arith.addf %29, %31 : vector<8x8x8xf32>
    %cst_9 = arith.constant dense<0xFF800000> : vector<8x8xf32>
    %33 = vector.multi_reduction <maximumf>, %32, %cst_9 [2] : vector<8x8x8xf32> to vector<8x8xf32>
    %34 = vector.shape_cast %33 : vector<8x8xf32> to vector<8x8x1xf32>
    %35 = vector.broadcast %34 : vector<8x8x1xf32> to vector<8x8x8xf32>
    %36 = arith.subf %32, %35 : vector<8x8x8xf32>
    %37 = math.exp %36 : vector<8x8x8xf32>
    %cst_10 = arith.constant dense<0.000000e+00> : vector<8x8xf32>
    %38 = vector.multi_reduction <add>, %37, %cst_10 [2] : vector<8x8x8xf32> to vector<8x8xf32>
    %39 = vector.shape_cast %38 : vector<8x8xf32> to vector<8x8x1xf32>
    %40 = arith.truncf %37 : vector<8x8x8xf32> to vector<8x8x8xbf16>
    "tpu.trace_start"() <{level = 10 : i32, message = "bqk,bkd->bqd"}> : () -> ()
    %cst_11 = arith.constant dense<0.000000e+00> : vector<8x8x8xf32>
    %41 = tpu.matmul %40, %28, %cst_11 {dimension_numbers = #tpu.dot_dimension_numbers<[2], [1], [1], [2], [0, 0, 0, 1, 1, 2], [0], [0]>} : vector<8x8x8xbf16>, vector<8x8x8xbf16>, vector<8x8x8xf32> -> vector<8x8x8xf32>
    "tpu.trace_stop"() : () -> ()
    %42 = tpu.reciprocal %39 {approx = true} : vector<8x8x1xf32> -> vector<8x8x1xf32>
    %43 = vector.broadcast %42 : vector<8x8x1xf32> to vector<8x8x8xf32>
    %44 = arith.mulf %41, %43 : vector<8x8x8xf32>
    %45 = vector.shape_cast %44 : vector<8x8x8xf32> to vector<2x4x8x8xf32>
    %46 = tpu.transpose %45, [0, 2, 1, 3] : vector<2x4x8x8xf32> -> vector<2x8x4x8xf32>
    %47 = vector.shape_cast %46 : vector<2x8x4x8xf32> to vector<16x32xf32>
    %48 = arith.truncf %47 : vector<16x32xf32> to vector<16x32xbf16>
    %c0_12 = arith.constant 0 : index
    %c0_13 = arith.constant 0 : index
    %49 = vector.load %arg4[%c0_12, %c0_13] : memref<32x32xbf16, #tpu.memory_space<vmem>>, vector<32x32xbf16>
    %cst_14 = arith.constant dense<0.000000e+00> : vector<16x32xf32>
    %50 = tpu.matmul %48, %49, %cst_14 {dimension_numbers = #tpu.dot_dimension_numbers<[1], [0], [0], [1], [0, 0, 1, 1], [], []>} : vector<16x32xbf16>, vector<32x32xbf16>, vector<16x32xf32> -> vector<16x32xf32>
    %c0_15 = arith.constant 0 : index
    %c0_16 = arith.constant 0 : index
    %51 = vector.load %arg5[%c0_15, %c0_16] : memref<1x32xf32, #tpu.memory_space<vmem>>, vector<1x32xf32>
    %52 = vector.broadcast %51 : vector<1x32xf32> to vector<16x32xf32>
    %53 = arith.addf %50, %52 : vector<16x32xf32>
    %54 = arith.addf %1, %53 : vector<16x32xf32>
    %c0_17 = arith.constant 0 : index
    %c0_18 = arith.constant 0 : index
    %55 = vector.load %arg6[%c0_17, %c0_18] : memref<1x32xf32, #tpu.memory_space<vmem>>, vector<1x32xf32>
    %c0_19 = arith.constant 0 : index
    %c0_20 = arith.constant 0 : index
    %56 = vector.load %arg7[%c0_19, %c0_20] : memref<1x32xf32, #tpu.memory_space<vmem>>, vector<1x32xf32>
    %cst_21 = arith.constant dense<0.000000e+00> : vector<16xf32>
    %57 = vector.multi_reduction <add>, %54, %cst_21 [1] : vector<16x32xf32> to vector<16xf32>
    %58 = vector.shape_cast %57 : vector<16xf32> to vector<16x1xf32>
    %cst_22 = arith.constant 3.200000e+01 : f32
    %59 = vector.broadcast %cst_22 : f32 to vector<16x1xf32>
    %60 = arith.divf %58, %59 : vector<16x1xf32>
    %61 = vector.broadcast %60 : vector<16x1xf32> to vector<16x32xf32>
    %62 = arith.subf %54, %61 : vector<16x32xf32>
    %63 = arith.mulf %62, %62 : vector<16x32xf32>
    %cst_23 = arith.constant dense<0.000000e+00> : vector<16xf32>
    %64 = vector.multi_reduction <add>, %63, %cst_23 [1] : vector<16x32xf32> to vector<16xf32>
    %65 = vector.shape_cast %64 : vector<16xf32> to vector<16x1xf32>
    %cst_24 = arith.constant 3.200000e+01 : f32
    %66 = vector.broadcast %cst_24 : f32 to vector<16x1xf32>
    %67 = arith.divf %65, %66 : vector<16x1xf32>
    %68 = vector.broadcast %60 : vector<16x1xf32> to vector<16x32xf32>
    %69 = arith.subf %54, %68 : vector<16x32xf32>
    %cst_25 = arith.constant 9.99999974E-6 : f32
    %70 = vector.broadcast %cst_25 : f32 to vector<16x1xf32>
    %71 = arith.addf %67, %70 : vector<16x1xf32>
    %72 = math.rsqrt %71 : vector<16x1xf32>
    %73 = vector.broadcast %72 : vector<16x1xf32> to vector<16x32xf32>
    %74 = arith.mulf %69, %73 : vector<16x32xf32>
    %75 = vector.broadcast %55 : vector<1x32xf32> to vector<16x32xf32>
    %76 = arith.mulf %74, %75 : vector<16x32xf32>
    %77 = vector.broadcast %56 : vector<1x32xf32> to vector<16x32xf32>
    %78 = arith.addf %76, %77 : vector<16x32xf32>
    %79 = arith.truncf %78 : vector<16x32xf32> to vector<16x32xbf16>
    %c0_26 = arith.constant 0 : index
    %c0_27 = arith.constant 0 : index
    %80 = vector.load %arg10[%c0_26, %c0_27] : memref<32x128xbf16, #tpu.memory_space<vmem>>, vector<32x128xbf16>
    %cst_28 = arith.constant dense<0.000000e+00> : vector<16x128xf32>
    %81 = tpu.matmul %79, %80, %cst_28 {dimension_numbers = #tpu.dot_dimension_numbers<[1], [0], [0], [1], [0, 0, 1, 1], [], []>} : vector<16x32xbf16>, vector<32x128xbf16>, vector<16x128xf32> -> vector<16x128xf32>
    %c0_29 = arith.constant 0 : index
    %c0_30 = arith.constant 0 : index
    %82 = vector.load %arg11[%c0_29, %c0_30] : memref<1x128xf32, #tpu.memory_space<vmem>>, vector<1x128xf32>
    %83 = vector.broadcast %82 : vector<1x128xf32> to vector<16x128xf32>
    %84 = arith.addf %81, %83 : vector<16x128xf32>
    %cst_31 = arith.constant 5.000000e-01 : f32
    %85 = vector.broadcast %cst_31 : f32 to vector<16x128xf32>
    %86 = arith.mulf %85, %84 : vector<16x128xf32>
    %cst_32 = arith.constant 0.707106769 : f32
    %87 = vector.broadcast %cst_32 : f32 to vector<16x128xf32>
    %88 = arith.mulf %84, %87 : vector<16x128xf32>
    %89 = math.erf %88 : vector<16x128xf32>
    %cst_33 = arith.constant 1.000000e+00 : f32
    %90 = vector.broadcast %cst_33 : f32 to vector<16x128xf32>
    %91 = arith.addf %90, %89 : vector<16x128xf32>
    %92 = arith.mulf %86, %91 : vector<16x128xf32>
    %93 = arith.truncf %92 : vector<16x128xf32> to vector<16x128xbf16>
    %c0_34 = arith.constant 0 : index
    %c0_35 = arith.constant 0 : index
    %94 = vector.load %arg12[%c0_34, %c0_35] : memref<128x32xbf16, #tpu.memory_space<vmem>>, vector<128x32xbf16>
    %cst_36 = arith.constant dense<0.000000e+00> : vector<16x32xf32>
    %95 = tpu.matmul %93, %94, %cst_36 {dimension_numbers = #tpu.dot_dimension_numbers<[1], [0], [0], [1], [0, 0, 1, 1], [], []>} : vector<16x128xbf16>, vector<128x32xbf16>, vector<16x32xf32> -> vector<16x32xf32>
    %c0_37 = arith.constant 0 : index
    %c0_38 = arith.constant 0 : index
    %96 = vector.load %arg13[%c0_37, %c0_38] : memref<1x32xf32, #tpu.memory_space<vmem>>, vector<1x32xf32>
    %97 = vector.broadcast %96 : vector<1x32xf32> to vector<16x32xf32>
    %98 = arith.addf %95, %97 : vector<16x32xf32>
    %99 = arith.addf %78, %98 : vector<16x32xf32>
    %c0_39 = arith.constant 0 : index
    %c0_40 = arith.constant 0 : index
    %100 = vector.load %arg8[%c0_39, %c0_40] : memref<1x32xf32, #tpu.memory_space<vmem>>, vector<1x32xf32>
    %c0_41 = arith.constant 0 : index
    %c0_42 = arith.constant 0 : index
    %101 = vector.load %arg9[%c0_41, %c0_42] : memref<1x32xf32, #tpu.memory_space<vmem>>, vector<1x32xf32>
    %cst_43 = arith.constant dense<0.000000e+00> : vector<16xf32>
    %102 = vector.multi_reduction <add>, %99, %cst_43 [1] : vector<16x32xf32> to vector<16xf32>
    %103 = vector.shape_cast %102 : vector<16xf32> to vector<16x1xf32>
    %cst_44 = arith.constant 3.200000e+01 : f32
    %104 = vector.broadcast %cst_44 : f32 to vector<16x1xf32>
    %105 = arith.divf %103, %104 : vector<16x1xf32>
    %106 = vector.broadcast %105 : vector<16x1xf32> to vector<16x32xf32>
    %107 = arith.subf %99, %106 : vector<16x32xf32>
    %108 = arith.mulf %107, %107 : vector<16x32xf32>
    %cst_45 = arith.constant dense<0.000000e+00> : vector<16xf32>
    %109 = vector.multi_reduction <add>, %108, %cst_45 [1] : vector<16x32xf32> to vector<16xf32>
    %110 = vector.shape_cast %109 : vector<16xf32> to vector<16x1xf32>
    %cst_46 = arith.constant 3.200000e+01 : f32
    %111 = vector.broadcast %cst_46 : f32 to vector<16x1xf32>
    %112 = arith.divf %110, %111 : vector<16x1xf32>
    %113 = vector.broadcast %105 : vector<16x1xf32> to vector<16x32xf32>
    %114 = arith.subf %99, %113 : vector<16x32xf32>
    %cst_47 = arith.constant 9.99999974E-6 : f32
    %115 = vector.broadcast %cst_47 : f32 to vector<16x1xf32>
    %116 = arith.addf %112, %115 : vector<16x1xf32>
    %117 = math.rsqrt %116 : vector<16x1xf32>
    %118 = vector.broadcast %117 : vector<16x1xf32> to vector<16x32xf32>
    %119 = arith.mulf %114, %118 : vector<16x32xf32>
    %120 = vector.broadcast %100 : vector<1x32xf32> to vector<16x32xf32>
    %121 = arith.mulf %119, %120 : vector<16x32xf32>
    %122 = vector.broadcast %101 : vector<1x32xf32> to vector<16x32xf32>
    %123 = arith.addf %121, %122 : vector<16x32xf32>
    %124 = vector.shape_cast %123 : vector<16x32xf32> to vector<2x8x32xf32>
    %c0_48 = arith.constant 0 : index
    %c0_49 = arith.constant 0 : index
    %c0_50 = arith.constant 0 : index
    %125 = vector.load %arg14[%c0_48, %c0_49, %c0_50] : memref<2x8x32xf32, #tpu.memory_space<vmem>>, vector<2x8x32xf32>
    tpu.vector_store %arg14[%c0_48, %c0_49, %c0_50], %124 {strides = array<i32>} : memref<2x8x32xf32, #tpu.memory_space<vmem>>, vector<2x8x32xf32>,
    return
  }
  func.func @transform_0(%arg0: i32) -> (i32, i32, i32) {
    %c0_i32 = arith.constant 0 : i32
    %c0_i32_0 = arith.constant 0 : i32
    %c0_i32_1 = arith.constant 0 : i32
    return %arg0, %c0_i32, %c0_i32_0 : i32, i32, i32
  }
  func.func @transform_1(%arg0: i32) -> (i32, i32) {
    %c0_i32 = arith.constant 0 : i32
    %c0_i32_0 = arith.constant 0 : i32
    %c0_i32_1 = arith.constant 0 : i32
    return %c0_i32, %c0_i32_0 : i32, i32
  }
  func.func @transform_2(%arg0: i32) -> (i32, i32) {
    %c0_i32 = arith.constant 0 : i32
    %c0_i32_0 = arith.constant 0 : i32
    %c0_i32_1 = arith.constant 0 : i32
    return %c0_i32, %c0_i32_0 : i32, i32
  }
  func.func @transform_3(%arg0: i32) -> (i32, i32) {
    %c0_i32 = arith.constant 0 : i32
    %c0_i32_0 = arith.constant 0 : i32
    %c0_i32_1 = arith.constant 0 : i32
    return %c0_i32, %c0_i32_0 : i32, i32
  }
  func.func @transform_4(%arg0: i32) -> (i32, i32) {
    %c0_i32 = arith.constant 0 : i32
    %c0_i32_0 = arith.constant 0 : i32
    %c0_i32_1 = arith.constant 0 : i32
    return %c0_i32, %c0_i32_0 : i32, i32
  }
  func.func @transform_5(%arg0: i32) -> (i32, i32) {
    %c0_i32 = arith.constant 0 : i32
    %c0_i32_0 = arith.constant 0 : i32
    %c0_i32_1 = arith.constant 0 : i32
    return %c0_i32, %c0_i32_0 : i32, i32
  }
  func.func @transform_6(%arg0: i32) -> (i32, i32) {
    %c0_i32 = arith.constant 0 : i32
    %c0_i32_0 = arith.constant 0 : i32
    %c0_i32_1 = arith.constant 0 : i32
    return %c0_i32, %c0_i32_0 : i32, i32
  }
  func.func @transform_7(%arg0: i32) -> (i32, i32) {
    %c0_i32 = arith.constant 0 : i32
    %c0_i32_0 = arith.constant 0 : i32
    %c0_i32_1 = arith.constant 0 : i32
    return %c0_i32, %c0_i32_0 : i32, i32
  }
  func.func @transform_8(%arg0: i32) -> (i32, i32) {
    %c0_i32 = arith.constant 0 : i32
    %c0_i32_0 = arith.constant 0 : i32
    %c0_i32_1 = arith.constant 0 : i32
    return %c0_i32, %c0_i32_0 : i32, i32
  }
  func.func @transform_9(%arg0: i32) -> (i32, i32) {
    %c0_i32 = arith.constant 0 : i32
    %c0_i32_0 = arith.constant 0 : i32
    %c0_i32_1 = arith.constant 0 : i32
    return %c0_i32, %c0_i32_0 : i32, i32
  }
  func.func @transform_10(%arg0: i32) -> (i32, i32) {
    %c0_i32 = arith.constant 0 : i32
    %c0_i32_0 = arith.constant 0 : i32
    %c0_i32_1 = arith.constant 0 : i32
    return %c0_i32, %c0_i32_0 : i32, i32
  }
  func.func @transform_11(%arg0: i32) -> (i32, i32) {
    %c0_i32 = arith.constant 0 : i32
    %c0_i32_0 = arith.constant 0 : i32
    %c0_i32_1 = arith.constant 0 : i32
    return %c0_i32, %c0_i32_0 : i32, i32
  }
  func.func @transform_12(%arg0: i32) -> (i32, i32) {
    %c0_i32 = arith.constant 0 : i32
    %c0_i32_0 = arith.constant 0 : i32
    %c0_i32_1 = arith.constant 0 : i32
    return %c0_i32, %c0_i32_0 : i32, i32
  }
  func.func @transform_13(%arg0: i32) -> (i32, i32, i32) {
    %c0_i32 = arith.constant 0 : i32
    %c0_i32_0 = arith.constant 0 : i32
    %c0_i32_1 = arith.constant 0 : i32
    return %arg0, %c0_i32, %c0_i32_0 : i32, i32, i32
  }
}

module attributes {stable_mosaic.version = 11 : i64} {
  func.func @transformer_block_kernel(%arg0: i32, %arg1: memref<2x8x32xf32, #tpu.memory_space<vmem>>, %arg2: memref<32x96xbf16, #tpu.memory_space<vmem>>, %arg3: memref<1x96xf32, #tpu.memory_space<vmem>>, %arg4: memref<32x32xbf16, #tpu.memory_space<vmem>>, %arg5: memref<1x32xf32, #tpu.memory_space<vmem>>, %arg6: memref<1x32xf32, #tpu.memory_space<vmem>>, %arg7: memref<1x32xf32, #tpu.memory_space<vmem>>, %arg8: memref<1x32xf32, #tpu.memory_space<vmem>>, %arg9: memref<1x32xf32, #tpu.memory_space<vmem>>, %arg10: memref<32x128xbf16, #tpu.memory_space<vmem>>, %arg11: memref<1x128xf32, #tpu.memory_space<vmem>>, %arg12: memref<128x32xbf16, #tpu.memory_space<vmem>>, %arg13: memref<1x32xf32, #tpu.memory_space<vmem>>, %arg14: memref<2x8x32xf32, #tpu.memory_space<vmem>>) attributes {dimension_semantics = [#tpu.dimension_semantics<parallel>], iteration_bounds = array<i64: 1>, scalar_prefetch = 0 : i64, scratch_operands = 0 : i64, tpu.core_type = #tpu.core_type<tc>, window_params = [{transform_indices = @transform_0, window_bounds = array<i64: 2, 8, 32>}, {pipeline_mode = #tpu.pipeline_mode<synchronous>, transform_indices = @transform_1, window_bounds = array<i64: 32, 96>}, {pipeline_mode = #tpu.pipeline_mode<synchronous>, transform_indices = @transform_2, window_bounds = array<i64: 1, 96>}, {pipeline_mode = #tpu.pipeline_mode<synchronous>, transform_indices = @transform_3, window_bounds = array<i64: 32, 32>}, {pipeline_mode = #tpu.pipeline_mode<synchronous>, transform_indices = @transform_4, window_bounds = array<i64: 1, 32>}, {pipeline_mode = #tpu.pipeline_mode<synchronous>, transform_indices = @transform_5, window_bounds = array<i64: 1, 32>}, {pipeline_mode = #tpu.pipeline_mode<synchronous>, transform_indices = @transform_6, window_bounds = array<i64: 1, 32>}, {pipeline_mode = #tpu.pipeline_mode<synchronous>, transform_indices = @transform_7, window_bounds = array<i64: 1, 32>}, {pipeline_mode = #tpu.pipeline_mode<synchronous>, transform_indices = @transform_8, window_bounds = array<i64: 1, 32>}, {pipeline_mode = #tpu.pipeline_mode<synchronous>, transform_indices = @transform_9, window_bounds = array<i64: 32, 128>}, {pipeline_mode = #tpu.pipeline_mode<synchronous>, transform_indices = @transform_10, window_bounds = array<i64: 1, 128>}, {pipeline_mode = #tpu.pipeline_mode<synchronous>, transform_indices = @transform_11, window_bounds = array<i64: 128, 32>}, {pipeline_mode = #tpu.pipeline_mode<synchronous>, transform_indices = @transform_12, window_bounds = array<i64: 1, 32>}, {transform_indices = @transform_13, window_bounds = array<i64: 2, 8, 32>}]} {
    %c0 = arith.constant 0 : index
    %c0_0 = arith.constant 0 : index
    %c0_1 = arith.constant 0 : index
    %0 = vector.load %arg1[%c0, %c0_0, %c0_1] : memref<2x8x32xf32, #tpu.memory_space<vmem>>, vector<2x8x32xf32>
    %1 = vector.shape_cast %0 : vector<2x8x32xf32> to vector<16x32xf32>
    %2 = arith.truncf %1 : vector<16x32xf32> to vector<16x32xbf16>
    %c0_2 = arith.constant 0 : index
    %c0_3 = arith.constant 0 : index
    %3 = vector.load %arg2[%c0_2, %c0_3] : memref<32x96xbf16, #tpu.memory_space<vmem>>, vector<32x96xbf16>
    %cst = arith.constant dense<0.000000e+00> : vector<16x96xf32>
    %4 = tpu.matmul %2, %3, %cst {dimension_numbers = #tpu.dot_dimension_numbers<[1], [0], [0], [1], [0, 0, 1, 1], [], []>} : vector<16x32xbf16>, vector<32x96xbf16>, vector<16x96xf32> -> vector<16x96xf32>
    %c0_4 = arith.constant 0 : index
    %c0_5 = arith.constant 0 : index
    %5 = vector.load %arg3[%c0_4, %c0_5] : memref<1x96xf32, #tpu.memory_space<vmem>>, vector<1x96xf32>
    %6 = vector.broadcast %5 : vector<1x96xf32> to vector<16x96xf32>
    %7 = arith.addf %4, %6 : vector<16x96xf32>
    %8 = tpu.iota {dimensions = array<i32: 0>} : vector<8x8xi32>
    %9 = tpu.iota {dimensions = array<i32: 1>} : vector<8x8xi32>
    %10 = arith.cmpi sle, %9, %8 : vector<8x8xi32>
    %cst_6 = arith.constant 0.000000e+00 : f32
    %cst_7 = arith.constant -1.000000e+30 : f32
    %11 = vector.broadcast %cst_6 : f32 to vector<8x8xf32>
    %12 = vector.broadcast %cst_7 : f32 to vector<8x8xf32>
    %13 = arith.select %10, %11, %12 : vector<8x8xi1>, vector<8x8xf32>
    %14 = vector.extract_strided_slice %7 {offsets = [0, 0], sizes = [16, 32], strides = [1, 1]} : vector<16x96xf32> to vector<16x32xf32>
    %15 = vector.extract_strided_slice %7 {offsets = [0, 32], sizes = [16, 32], strides = [1, 1]} : vector<16x96xf32> to vector<16x32xf32>
    %16 = vector.extract_strided_slice %7 {offsets = [0, 64], sizes = [16, 32], strides = [1, 1]} : vector<16x96xf32> to vector<16x32xf32>
    %17 = vector.shape_cast %14 : vector<16x32xf32> to vector<2x8x4x8xf32>
    %18 = tpu.transpose %17, [0, 2, 1, 3] : vector<2x8x4x8xf32> -> vector<2x4x8x8xf32>
    %19 = vector.shape_cast %18 : vector<2x4x8x8xf32> to vector<8x8x8xf32>
    %20 = arith.truncf %19 : vector<8x8x8xf32> to vector<8x8x8xbf16>
    %21 = vector.shape_cast %15 : vector<16x32xf32> to vector<2x8x4x8xf32>
    %22 = tpu.transpose %21, [0, 2, 1, 3] : vector<2x8x4x8xf32> -> vector<2x4x8x8xf32>
    %23 = vector.shape_cast %22 : vector<2x4x8x8xf32> to vector<8x8x8xf32>
    %24 = arith.truncf %23 : vector<8x8x8xf32> to vector<8x8x8xbf16>
    %25 = vector.shape_cast %16 : vector<16x32xf32> to vector<2x8x4x8xf32>
    %26 = tpu.transpose %25, [0, 2, 1, 3] : vector<2x8x4x8xf32> -> vector<2x4x8x8xf32>
    %27 = vector.shape_cast %26 : vector<2x4x8x8xf32> to vector<8x8x8xf32>
    %28 = arith.truncf %27 : vector<8x8x8xf32> to vector<8x8x8xbf16>
    "tpu.trace_start"() <{level = 10 : i32, message = "bqd,bkd->bqk"}> : () -> ()
    %cst_8 = arith.constant dense<0.000000e+00> : vector<8x8x8xf32>
    %29 = tpu.matmul %20, %24, %cst_8 {dimension_numbers = #tpu.dot_dimension_numbers<[2], [2], [1], [1], [0, 0, 0, 1, 1, 1], [0], [0]>} : vector<8x8x8xbf16>, vector<8x8x8xbf16>, vector<8x8x8xf32> -> vector<8x8x8xf32>
    "tpu.trace_stop"() : () -> ()
    %30 = vector.shape_cast %13 : vector<8x8xf32> to vector<1x8x8xf32>
    %31 = vector.broadcast %30 : vector<1x8x8xf32> to vector<8x8x8xf32>
    %32 = arith.addf %29, %31 : vector<8x8x8xf32>
    %cst_9 = arith.constant dense<0xFF800000> : vector<8x8xf32>
    %33 = vector.multi_reduction <maximumf>, %32, %cst_9 [2] : vector<8x8x8xf32> to vector<8x8xf32>
    %34 = vector.shape_cast %33 : vector<8x8xf32> to vector<8x8x1xf32>
    %35 = vector.broadcast %34 : vector<8x8x1xf32> to vector<8x8x8xf32>
    %36 = arith.subf %32, %35 : vector<8x8x8xf32>
    %37 = math.exp %36 : vector<8x8x8xf32>
    %cst_10 = arith.constant dense<0.000000e+00> : vector<8x8xf32>
    %38 = vector.multi_reduction <add>, %37, %cst_10 [2] : vector<8x8x8xf32> to vector<8x8xf32>
    %39 = vector.shape_cast %38 : vector<8x8xf32> to vector<8x8x1xf32>
    %40 = arith.truncf %37 : vector<8x8x8xf32> to vector<8x8x8xbf16>
    "tpu.trace_start"() <{level = 10 : i32, message = "bqk,bkd->bqd"}> : () -> ()
    %cst_11 = arith.constant dense<0.000000e+00> : vector<8x8x8xf32>
    %41 = tpu.matmul %40, %28, %cst_11 {dimension_numbers = #tpu.dot_dimension_numbers<[2], [1], [1], [2], [0, 0, 0, 1, 1, 2], [0], [0]>} : vector<8x8x8xbf16>, vector<8x8x8xbf16>, vector<8x8x8xf32> -> vector<8x8x8xf32>
    "tpu.trace_stop"() : () -> ()
    %42 = tpu.reciprocal %39 {approx = true} : vector<8x8x1xf32> -> vector<8x8x1xf32>
    %43 = vector.broadcast %42 : vector<8x8x1xf32> to vector<8x8x8xf32>
    %44 = arith.mulf %41, %43 : vector<8x8x8xf32>
    %45 = vector.shape_cast %44 : vector<8x8x8xf32> to vector<2x4x8x8xf32>
    %46 = tpu.transpose %45, [0, 2, 1, 3] : vector<2x4x8x8xf32> -> vector<2x8x4x8xf32>
    %47 = vector.shape_cast %46 : vector<2x8x4x8xf32> to vector<16x32xf32>
    %48 = arith.truncf %47 : vector<16x32xf32> to vector<16x32xbf16>
    %c0_12 = arith.constant 0 : index
    %c0_13 = arith.constant 0 : index
    %49 = vector.load %arg4[%c0_12, %c0_13] : memref<32x32xbf16, #tpu.memory_space<vmem>>, vector<32x32xbf16>
    %cst_14 = arith.constant dense<0.000000e+00> : vector<16x32xf32>
    %50 = tpu.matmul %48, %49, %cst_14 {dimension_numbers = #tpu.dot_dimension_numbers<[1], [0], [0], [1], [0, 0, 1, 1], [], []>} : vector<16x32xbf16>, vector<32x32xbf16>, vector<16x32xf32> -> vector<16x32xf32>
    %c0_15 = arith.constant 0 : index
    %c0_16 = arith.constant 0 : index
    %51 = vector.load %arg5[%c0_15, %c0_16] : memref<1x32xf32, #tpu.memory_space<vmem>>, vector<1x32xf32>
    %52 = vector.broadcast %51 : vector<1x32xf32> to vector<16x32xf32>
    %53 = arith.addf %50, %52 : vector<16x32xf32>
    %54 = arith.addf %1, %53 : vector<16x32xf32>
    %c0_17 = arith.constant 0 : index
    %c0_18 = arith.constant 0 : index
    %55 = vector.load %arg6[%c0_17, %c0_18] : memref<1x32xf32, #tpu.memory_space<vmem>>, vector<1x32xf32>
    %c0_19 = arith.constant 0 : index
    %c0_20 = arith.constant 0 : index
    %56 = vector.load %arg7[%c0_19, %c0_20] : memref<1x32xf32, #tpu.memory_space<vmem>>, vector<1x32xf32>
    %cst_21 = arith.constant dense<0.000000e+00> : vector<16xf32>
    %57 = vector.multi_reduction <add>, %54, %cst_21 [1] : vector<16x32xf32> to vector<16xf32>
    %58 = vector.shape_cast %57 : vector<16xf32> to vector<16x1xf32>
    %cst_22 = arith.constant 3.200000e+01 : f32
    %59 = vector.broadcast %cst_22 : f32 to vector<16x1xf32>
    %60 = arith.divf %58, %59 : vector<16x1xf32>
    %61 = vector.broadcast %60 : vector<16x1xf32> to vector<16x32xf32>
    %62 = arith.subf %54, %61 : vector<16x32xf32>
    %63 = arith.mulf %62, %62 : vector<16x32xf32>
    %cst_23 = arith.constant dense<0.000000e+00> : vector<16xf32>
    %64 = vector.multi_reduction <add>, %63, %cst_23 [1] : vector<16x32xf32> to vector<16xf32>
    %65 = vector.shape_cast %64 : vector<16xf32> to vector<16x1xf32>
    %cst_24 = arith.constant 3.200000e+01 : f32
    %66 = vector.broadcast %cst_24 : f32 to vector<16x1xf32>
    %67 = arith.divf %65, %66 : vector<16x1xf32>
    %68 = vector.broadcast %60 : vector<16x1xf32> to vector<16x32xf32>
    %69 = arith.subf %54, %68 : vector<16x32xf32>
    %cst_25 = arith.constant 9.99999974E-6 : f32
    %70 = vector.broadcast %cst_25 : f32 to vector<16x1xf32>
    %71 = arith.addf %67, %70 : vector<16x1xf32>
    %72 = math.rsqrt %71 : vector<16x1xf32>
    %73 = vector.broadcast %72 : vector<16x1xf32> to vector<16x32xf32>
    %74 = arith.mulf %69, %73 : vector<16x32xf32>
    %75 = vector.broadcast %55 : vector<1x32xf32> to vector<16x32xf32>
    %76 = arith.mulf %74, %75 : vector<16x32xf32>
    %77 = vector.broadcast %56 : vector<1x32xf32> to vector<16x32xf32>
    %78 = arith.addf %76, %77 : vector<16x32xf32>
    %79 = arith.truncf %78 : vector<16x32xf32> to vector<16x32xbf16>
    %c0_26 = arith.constant 0 : index
    %c0_27 = arith.constant 0 : index
    %80 = vector.load %arg10[%c0_26, %c0_27] : memref<32x128xbf16, #tpu.memory_space<vmem>>, vector<32x128xbf16>
    %cst_28 = arith.constant dense<0.000000e+00> : vector<16x128xf32>
    %81 = tpu.matmul %79, %80, %cst_28 {dimension_numbers = #tpu.dot_dimension_numbers<[1], [0], [0], [1], [0, 0, 1, 1], [], []>} : vector<16x32xbf16>, vector<32x128xbf16>, vector<16x128xf32> -> vector<16x128xf32>
    %c0_29 = arith.constant 0 : index
    %c0_30 = arith.constant 0 : index
    %82 = vector.load %arg11[%c0_29, %c0_30] : memref<1x128xf32, #tpu.memory_space<vmem>>, vector<1x128xf32>
    %83 = vector.broadcast %82 : vector<1x128xf32> to vector<16x128xf32>
    %84 = arith.addf %81, %83 : vector<16x128xf32>
    %cst_31 = arith.constant 5.000000e-01 : f32
    %85 = vector.broadcast %cst_31 : f32 to vector<16x128xf32>
    %86 = arith.mulf %85, %84 : vector<16x128xf32>
    %cst_32 = arith.constant 0.707106769 : f32
    %87 = vector.broadcast %cst_32 : f32 to vector<16x128xf32>
    %88 = arith.mulf %84, %87 : vector<16x128xf32>
    %89 = math.erf %88 : vector<16x128xf32>
    %cst_33 = arith.constant 1.000000e+00 : f32
    %90 = vector.broadcast %cst_33 : f32 to vector<16x128xf32>
    %91 = arith.addf %90, %89 : vector<16x128xf32>
    %92 = arith.mulf %86, %91 : vector<16x128xf32>
    %93 = arith.truncf %92 : vector<16x128xf32> to vector<16x128xbf16>
    %c0_34 = arith.constant 0 : index
    %c0_35 = arith.constant 0 : index
    %94 = vector.load %arg12[%c0_34, %c0_35] : memref<128x32xbf16, #tpu.memory_space<vmem>>, vector<128x32xbf16>
    %cst_36 = arith.constant dense<0.000000e+00> : vector<16x32xf32>
    %95 = tpu.matmul %93, %94, %cst_36 {dimension_numbers = #tpu.dot_dimension_numbers<[1], [0], [0], [1], [0, 0, 1, 1], [], []>} : vector<16x128xbf16>, vector<128x32xbf16>, vector<16x32xf32> -> vector<16x32xf32>
    %c0_37 = arith.constant 0 : index
    %c0_38 = arith.constant 0 : index
    %96 = vector.load %arg13[%c0_37, %c0_38] : memref<1x32xf32, #tpu.memory_space<vmem>>, vector<1x32xf32>
    %97 = vector.broadcast %96 : vector<1x32xf32> to vector<16x32xf32>
    %98 = arith.addf %95, %97 : vector<16x32xf32>
    %99 = arith.addf %78, %98 : vector<16x32xf32>
    %c0_39 = arith.constant 0 : index
    %c0_40 = arith.constant 0 : index
    %100 = vector.load %arg8[%c0_39, %c0_40] : memref<1x32xf32, #tpu.memory_space<vmem>>, vector<1x32xf32>
    %c0_41 = arith.constant 0 : index
    %c0_42 = arith.constant 0 : index
    %101 = vector.load %arg9[%c0_41, %c0_42] : memref<1x32xf32, #tpu.memory_space<vmem>>, vector<1x32xf32>
    %cst_43 = arith.constant dense<0.000000e+00> : vector<16xf32>
    %102 = vector.multi_reduction <add>, %99, %cst_43 [1] : vector<16x32xf32> to vector<16xf32>
    %103 = vector.shape_cast %102 : vector<16xf32> to vector<16x1xf32>
    %cst_44 = arith.constant 3.200000e+01 : f32
    %104 = vector.broadcast %cst_44 : f32 to vector<16x1xf32>
    %105 = arith.divf %103, %104 : vector<16x1xf32>
    %106 = vector.broadcast %105 : vector<16x1xf32> to vector<16x32xf32>
    %107 = arith.subf %99, %106 : vector<16x32xf32>
    %108 = arith.mulf %107, %107 : vector<16x32xf32>
    %cst_45 = arith.constant dense<0.000000e+00> : vector<16xf32>
    %109 = vector.multi_reduction <add>, %108, %cst_45 [1] : vector<16x32xf32> to vector<16xf32>
    %110 = vector.shape_cast %109 : vector<16xf32> to vector<16x1xf32>
    %cst_46 = arith.constant 3.200000e+01 : f32
    %111 = vector.broadcast %cst_46 : f32 to vector<16x1xf32>
    %112 = arith.divf %110, %111 : vector<16x1xf32>
    %113 = vector.broadcast %105 : vector<16x1xf32> to vector<16x32xf32>
    %114 = arith.subf %99, %113 : vector<16x32xf32>
    %cst_47 = arith.constant 9.99999974E-6 : f32
    %115 = vector.broadcast %cst_47 : f32 to vector<16x1xf32>
    %116 = arith.addf %112, %115 : vector<16x1xf32>
    %117 = math.rsqrt %116 : vector<16x1xf32>
    %118 = vector.broadcast %117 : vector<16x1xf32> to vector<16x32xf32>
    %119 = arith.mulf %114, %118 : vector<16x32xf32>
    %120 = vector.broadcast %100 : vector<1x32xf32> to vector<16x32xf32>
    %121 = arith.mulf %119, %120 : vector<16x32xf32>
    %122 = vector.broadcast %101 : vector<1x32xf32> to vector<16x32xf32>
    %123 = arith.addf %121, %122 : vector<16x32xf32>
    %124 = vector.shape_cast %123 : vector<16x32xf32> to vector<2x8x32xf32>
    %c0_48 = arith.constant 0 : index
    %c0_49 = arith.constant 0 : index
    %c0_50 = arith.constant 0 : index
    %125 = vector.load %arg14[%c0_48, %c0_49, %c0_50] : memref<2x8x32xf32, #tpu.memory_space<vmem>>, vector<2x8x32xf32>
    tpu.vector_store %arg14[%c0_48, %c0_49, %c0_50], %124 {strides = array<i32>} : memref<2x8x32xf32, #tpu.memory_space<vmem>>, vector<2x8x32xf32>,
    return
  }
  func.func @transform_0(%arg0: i32) -> (i32, i32, i32) {
    %c0_i32 = arith.constant 0 : i32
    %c0_i32_0 = arith.constant 0 : i32
    %c0_i32_1 = arith.constant 0 : i32
    return %arg0, %c0_i32, %c0_i32_0 : i32, i32, i32
  }
  func.func @transform_1(%arg0: i32) -> (i32, i32) {
    %c0_i32 = arith.constant 0 : i32
    %c0_i32_0 = arith.constant 0 : i32
    %c0_i32_1 = arith.constant 0 : i32
    return %c0_i32, %c0_i32_0 : i32, i32
  }
  func.func @transform_2(%arg0: i32) -> (i32, i32) {
    %c0_i32 = arith.constant 0 : i32
    %c0_i32_0 = arith.constant 0 : i32
    %c0_i32_1 = arith.constant 0 : i32
    return %c0_i32, %c0_i32_0 : i32, i32
  }
  func.func @transform_3(%arg0: i32) -> (i32, i32) {
    %c0_i32 = arith.constant 0 : i32
    %c0_i32_0 = arith.constant 0 : i32
    %c0_i32_1 = arith.constant 0 : i32
    return %c0_i32, %c0_i32_0 : i32, i32
  }
  func.func @transform_4(%arg0: i32) -> (i32, i32) {
    %c0_i32 = arith.constant 0 : i32
    %c0_i32_0 = arith.constant 0 : i32
    %c0_i32_1 = arith.constant 0 : i32
    return %c0_i32, %c0_i32_0 : i32, i32
  }
  func.func @transform_5(%arg0: i32) -> (i32, i32) {
    %c0_i32 = arith.constant 0 : i32
    %c0_i32_0 = arith.constant 0 : i32
    %c0_i32_1 = arith.constant 0 : i32
    return %c0_i32, %c0_i32_0 : i32, i32
  }
  func.func @transform_6(%arg0: i32) -> (i32, i32) {
    %c0_i32 = arith.constant 0 : i32
    %c0_i32_0 = arith.constant 0 : i32
    %c0_i32_1 = arith.constant 0 : i32
    return %c0_i32, %c0_i32_0 : i32, i32
  }
  func.func @transform_7(%arg0: i32) -> (i32, i32) {
    %c0_i32 = arith.constant 0 : i32
    %c0_i32_0 = arith.constant 0 : i32
    %c0_i32_1 = arith.constant 0 : i32
    return %c0_i32, %c0_i32_0 : i32, i32
  }
  func.func @transform_8(%arg0: i32) -> (i32, i32) {
    %c0_i32 = arith.constant 0 : i32
    %c0_i32_0 = arith.constant 0 : i32
    %c0_i32_1 = arith.constant 0 : i32
    return %c0_i32, %c0_i32_0 : i32, i32
  }
  func.func @transform_9(%arg0: i32) -> (i32, i32) {
    %c0_i32 = arith.constant 0 : i32
    %c0_i32_0 = arith.constant 0 : i32
    %c0_i32_1 = arith.constant 0 : i32
    return %c0_i32, %c0_i32_0 : i32, i32
  }
  func.func @transform_10(%arg0: i32) -> (i32, i32) {
    %c0_i32 = arith.constant 0 : i32
    %c0_i32_0 = arith.constant 0 : i32
    %c0_i32_1 = arith.constant 0 : i32
    return %c0_i32, %c0_i32_0 : i32, i32
  }
  func.func @transform_11(%arg0: i32) -> (i32, i32) {
    %c0_i32 = arith.constant 0 : i32
    %c0_i32_0 = arith.constant 0 : i32
    %c0_i32_1 = arith.constant 0 : i32
    return %c0_i32, %c0_i32_0 : i32, i32
  }
  func.func @transform_12(%arg0: i32) -> (i32, i32) {
    %c0_i32 = arith.constant 0 : i32
    %c0_i32_0 = arith.constant 0 : i32
    %c0_i32_1 = arith.constant 0 : i32
    return %c0_i32, %c0_i32_0 : i32, i32
  }
  func.func @transform_13(%arg0: i32) -> (i32, i32, i32) {
    %c0_i32 = arith.constant 0 : i32
    %c0_i32_0 = arith.constant 0 : i32
    %c0_i32_1 = arith.constant 0 : i32
    return %arg0, %c0_i32, %c0_i32_0 : i32, i32, i32
  }
}

module attributes {stable_mosaic.version = 11 : i64} {
  func.func @transformer_block_kernel(%arg0: i32, %arg1: memref<2x8x32xf32, #tpu.memory_space<vmem>>, %arg2: memref<32x96xbf16, #tpu.memory_space<vmem>>, %arg3: memref<1x96xf32, #tpu.memory_space<vmem>>, %arg4: memref<32x32xbf16, #tpu.memory_space<vmem>>, %arg5: memref<1x32xf32, #tpu.memory_space<vmem>>, %arg6: memref<1x32xf32, #tpu.memory_space<vmem>>, %arg7: memref<1x32xf32, #tpu.memory_space<vmem>>, %arg8: memref<1x32xf32, #tpu.memory_space<vmem>>, %arg9: memref<1x32xf32, #tpu.memory_space<vmem>>, %arg10: memref<32x128xbf16, #tpu.memory_space<vmem>>, %arg11: memref<1x128xf32, #tpu.memory_space<vmem>>, %arg12: memref<128x32xbf16, #tpu.memory_space<vmem>>, %arg13: memref<1x32xf32, #tpu.memory_space<vmem>>, %arg14: memref<2x8x32xf32, #tpu.memory_space<vmem>>) attributes {dimension_semantics = [#tpu.dimension_semantics<parallel>], iteration_bounds = array<i64: 1>, scalar_prefetch = 0 : i64, scratch_operands = 0 : i64, tpu.core_type = #tpu.core_type<tc>, window_params = [{transform_indices = @transform_0, window_bounds = array<i64: 2, 8, 32>}, {pipeline_mode = #tpu.pipeline_mode<synchronous>, transform_indices = @transform_1, window_bounds = array<i64: 32, 96>}, {pipeline_mode = #tpu.pipeline_mode<synchronous>, transform_indices = @transform_2, window_bounds = array<i64: 1, 96>}, {pipeline_mode = #tpu.pipeline_mode<synchronous>, transform_indices = @transform_3, window_bounds = array<i64: 32, 32>}, {pipeline_mode = #tpu.pipeline_mode<synchronous>, transform_indices = @transform_4, window_bounds = array<i64: 1, 32>}, {pipeline_mode = #tpu.pipeline_mode<synchronous>, transform_indices = @transform_5, window_bounds = array<i64: 1, 32>}, {pipeline_mode = #tpu.pipeline_mode<synchronous>, transform_indices = @transform_6, window_bounds = array<i64: 1, 32>}, {pipeline_mode = #tpu.pipeline_mode<synchronous>, transform_indices = @transform_7, window_bounds = array<i64: 1, 32>}, {pipeline_mode = #tpu.pipeline_mode<synchronous>, transform_indices = @transform_8, window_bounds = array<i64: 1, 32>}, {pipeline_mode = #tpu.pipeline_mode<synchronous>, transform_indices = @transform_9, window_bounds = array<i64: 32, 128>}, {pipeline_mode = #tpu.pipeline_mode<synchronous>, transform_indices = @transform_10, window_bounds = array<i64: 1, 128>}, {pipeline_mode = #tpu.pipeline_mode<synchronous>, transform_indices = @transform_11, window_bounds = array<i64: 128, 32>}, {pipeline_mode = #tpu.pipeline_mode<synchronous>, transform_indices = @transform_12, window_bounds = array<i64: 1, 32>}, {transform_indices = @transform_13, window_bounds = array<i64: 2, 8, 32>}]} {
    %c0 = arith.constant 0 : index
    %c0_0 = arith.constant 0 : index
    %c0_1 = arith.constant 0 : index
    %0 = vector.load %arg1[%c0, %c0_0, %c0_1] : memref<2x8x32xf32, #tpu.memory_space<vmem>>, vector<2x8x32xf32>
    %1 = vector.shape_cast %0 : vector<2x8x32xf32> to vector<16x32xf32>
    %2 = arith.truncf %1 : vector<16x32xf32> to vector<16x32xbf16>
    %c0_2 = arith.constant 0 : index
    %c0_3 = arith.constant 0 : index
    %3 = vector.load %arg2[%c0_2, %c0_3] : memref<32x96xbf16, #tpu.memory_space<vmem>>, vector<32x96xbf16>
    %cst = arith.constant dense<0.000000e+00> : vector<16x96xf32>
    %4 = tpu.matmul %2, %3, %cst {dimension_numbers = #tpu.dot_dimension_numbers<[1], [0], [0], [1], [0, 0, 1, 1], [], []>} : vector<16x32xbf16>, vector<32x96xbf16>, vector<16x96xf32> -> vector<16x96xf32>
    %c0_4 = arith.constant 0 : index
    %c0_5 = arith.constant 0 : index
    %5 = vector.load %arg3[%c0_4, %c0_5] : memref<1x96xf32, #tpu.memory_space<vmem>>, vector<1x96xf32>
    %6 = vector.broadcast %5 : vector<1x96xf32> to vector<16x96xf32>
    %7 = arith.addf %4, %6 : vector<16x96xf32>
    %8 = tpu.iota {dimensions = array<i32: 0>} : vector<8x8xi32>
    %9 = tpu.iota {dimensions = array<i32: 1>} : vector<8x8xi32>
    %10 = arith.cmpi sle, %9, %8 : vector<8x8xi32>
    %cst_6 = arith.constant 0.000000e+00 : f32
    %cst_7 = arith.constant -1.000000e+30 : f32
    %11 = vector.broadcast %cst_6 : f32 to vector<8x8xf32>
    %12 = vector.broadcast %cst_7 : f32 to vector<8x8xf32>
    %13 = arith.select %10, %11, %12 : vector<8x8xi1>, vector<8x8xf32>
    %14 = vector.extract_strided_slice %7 {offsets = [0, 0], sizes = [16, 32], strides = [1, 1]} : vector<16x96xf32> to vector<16x32xf32>
    %15 = vector.extract_strided_slice %7 {offsets = [0, 32], sizes = [16, 32], strides = [1, 1]} : vector<16x96xf32> to vector<16x32xf32>
    %16 = vector.extract_strided_slice %7 {offsets = [0, 64], sizes = [16, 32], strides = [1, 1]} : vector<16x96xf32> to vector<16x32xf32>
    %17 = vector.shape_cast %14 : vector<16x32xf32> to vector<2x8x4x8xf32>
    %18 = tpu.transpose %17, [0, 2, 1, 3] : vector<2x8x4x8xf32> -> vector<2x4x8x8xf32>
    %19 = vector.shape_cast %18 : vector<2x4x8x8xf32> to vector<8x8x8xf32>
    %20 = arith.truncf %19 : vector<8x8x8xf32> to vector<8x8x8xbf16>
    %21 = vector.shape_cast %15 : vector<16x32xf32> to vector<2x8x4x8xf32>
    %22 = tpu.transpose %21, [0, 2, 1, 3] : vector<2x8x4x8xf32> -> vector<2x4x8x8xf32>
    %23 = vector.shape_cast %22 : vector<2x4x8x8xf32> to vector<8x8x8xf32>
    %24 = arith.truncf %23 : vector<8x8x8xf32> to vector<8x8x8xbf16>
    %25 = vector.shape_cast %16 : vector<16x32xf32> to vector<2x8x4x8xf32>
    %26 = tpu.transpose %25, [0, 2, 1, 3] : vector<2x8x4x8xf32> -> vector<2x4x8x8xf32>
    %27 = vector.shape_cast %26 : vector<2x4x8x8xf32> to vector<8x8x8xf32>
    %28 = arith.truncf %27 : vector<8x8x8xf32> to vector<8x8x8xbf16>
    "tpu.trace_start"() <{level = 10 : i32, message = "bqd,bkd->bqk"}> : () -> ()
    %cst_8 = arith.constant dense<0.000000e+00> : vector<8x8x8xf32>
    %29 = tpu.matmul %20, %24, %cst_8 {dimension_numbers = #tpu.dot_dimension_numbers<[2], [2], [1], [1], [0, 0, 0, 1, 1, 1], [0], [0]>} : vector<8x8x8xbf16>, vector<8x8x8xbf16>, vector<8x8x8xf32> -> vector<8x8x8xf32>
    "tpu.trace_stop"() : () -> ()
    %30 = vector.shape_cast %13 : vector<8x8xf32> to vector<1x8x8xf32>
    %31 = vector.broadcast %30 : vector<1x8x8xf32> to vector<8x8x8xf32>
    %32 = arith.addf %29, %31 : vector<8x8x8xf32>
    %cst_9 = arith.constant dense<0xFF800000> : vector<8x8xf32>
    %33 = vector.multi_reduction <maximumf>, %32, %cst_9 [2] : vector<8x8x8xf32> to vector<8x8xf32>
    %34 = vector.shape_cast %33 : vector<8x8xf32> to vector<8x8x1xf32>
    %35 = vector.broadcast %34 : vector<8x8x1xf32> to vector<8x8x8xf32>
    %36 = arith.subf %32, %35 : vector<8x8x8xf32>
    %37 = math.exp %36 : vector<8x8x8xf32>
    %cst_10 = arith.constant dense<0.000000e+00> : vector<8x8xf32>
    %38 = vector.multi_reduction <add>, %37, %cst_10 [2] : vector<8x8x8xf32> to vector<8x8xf32>
    %39 = vector.shape_cast %38 : vector<8x8xf32> to vector<8x8x1xf32>
    %40 = arith.truncf %37 : vector<8x8x8xf32> to vector<8x8x8xbf16>
    "tpu.trace_start"() <{level = 10 : i32, message = "bqk,bkd->bqd"}> : () -> ()
    %cst_11 = arith.constant dense<0.000000e+00> : vector<8x8x8xf32>
    %41 = tpu.matmul %40, %28, %cst_11 {dimension_numbers = #tpu.dot_dimension_numbers<[2], [1], [1], [2], [0, 0, 0, 1, 1, 2], [0], [0]>} : vector<8x8x8xbf16>, vector<8x8x8xbf16>, vector<8x8x8xf32> -> vector<8x8x8xf32>
    "tpu.trace_stop"() : () -> ()
    %42 = tpu.reciprocal %39 {approx = true} : vector<8x8x1xf32> -> vector<8x8x1xf32>
    %43 = vector.broadcast %42 : vector<8x8x1xf32> to vector<8x8x8xf32>
    %44 = arith.mulf %41, %43 : vector<8x8x8xf32>
    %45 = vector.shape_cast %44 : vector<8x8x8xf32> to vector<2x4x8x8xf32>
    %46 = tpu.transpose %45, [0, 2, 1, 3] : vector<2x4x8x8xf32> -> vector<2x8x4x8xf32>
    %47 = vector.shape_cast %46 : vector<2x8x4x8xf32> to vector<16x32xf32>
    %48 = arith.truncf %47 : vector<16x32xf32> to vector<16x32xbf16>
    %c0_12 = arith.constant 0 : index
    %c0_13 = arith.constant 0 : index
    %49 = vector.load %arg4[%c0_12, %c0_13] : memref<32x32xbf16, #tpu.memory_space<vmem>>, vector<32x32xbf16>
    %cst_14 = arith.constant dense<0.000000e+00> : vector<16x32xf32>
    %50 = tpu.matmul %48, %49, %cst_14 {dimension_numbers = #tpu.dot_dimension_numbers<[1], [0], [0], [1], [0, 0, 1, 1], [], []>} : vector<16x32xbf16>, vector<32x32xbf16>, vector<16x32xf32> -> vector<16x32xf32>
    %c0_15 = arith.constant 0 : index
    %c0_16 = arith.constant 0 : index
    %51 = vector.load %arg5[%c0_15, %c0_16] : memref<1x32xf32, #tpu.memory_space<vmem>>, vector<1x32xf32>
    %52 = vector.broadcast %51 : vector<1x32xf32> to vector<16x32xf32>
    %53 = arith.addf %50, %52 : vector<16x32xf32>
    %54 = arith.addf %1, %53 : vector<16x32xf32>
    %c0_17 = arith.constant 0 : index
    %c0_18 = arith.constant 0 : index
    %55 = vector.load %arg6[%c0_17, %c0_18] : memref<1x32xf32, #tpu.memory_space<vmem>>, vector<1x32xf32>
    %c0_19 = arith.constant 0 : index
    %c0_20 = arith.constant 0 : index
    %56 = vector.load %arg7[%c0_19, %c0_20] : memref<1x32xf32, #tpu.memory_space<vmem>>, vector<1x32xf32>
    %cst_21 = arith.constant dense<0.000000e+00> : vector<16xf32>
    %57 = vector.multi_reduction <add>, %54, %cst_21 [1] : vector<16x32xf32> to vector<16xf32>
    %58 = vector.shape_cast %57 : vector<16xf32> to vector<16x1xf32>
    %cst_22 = arith.constant 3.200000e+01 : f32
    %59 = vector.broadcast %cst_22 : f32 to vector<16x1xf32>
    %60 = arith.divf %58, %59 : vector<16x1xf32>
    %61 = vector.broadcast %60 : vector<16x1xf32> to vector<16x32xf32>
    %62 = arith.subf %54, %61 : vector<16x32xf32>
    %63 = arith.mulf %62, %62 : vector<16x32xf32>
    %cst_23 = arith.constant dense<0.000000e+00> : vector<16xf32>
    %64 = vector.multi_reduction <add>, %63, %cst_23 [1] : vector<16x32xf32> to vector<16xf32>
    %65 = vector.shape_cast %64 : vector<16xf32> to vector<16x1xf32>
    %cst_24 = arith.constant 3.200000e+01 : f32
    %66 = vector.broadcast %cst_24 : f32 to vector<16x1xf32>
    %67 = arith.divf %65, %66 : vector<16x1xf32>
    %68 = vector.broadcast %60 : vector<16x1xf32> to vector<16x32xf32>
    %69 = arith.subf %54, %68 : vector<16x32xf32>
    %cst_25 = arith.constant 9.99999974E-6 : f32
    %70 = vector.broadcast %cst_25 : f32 to vector<16x1xf32>
    %71 = arith.addf %67, %70 : vector<16x1xf32>
    %72 = math.rsqrt %71 : vector<16x1xf32>
    %73 = vector.broadcast %72 : vector<16x1xf32> to vector<16x32xf32>
    %74 = arith.mulf %69, %73 : vector<16x32xf32>
    %75 = vector.broadcast %55 : vector<1x32xf32> to vector<16x32xf32>
    %76 = arith.mulf %74, %75 : vector<16x32xf32>
    %77 = vector.broadcast %56 : vector<1x32xf32> to vector<16x32xf32>
    %78 = arith.addf %76, %77 : vector<16x32xf32>
    %79 = arith.truncf %78 : vector<16x32xf32> to vector<16x32xbf16>
    %c0_26 = arith.constant 0 : index
    %c0_27 = arith.constant 0 : index
    %80 = vector.load %arg10[%c0_26, %c0_27] : memref<32x128xbf16, #tpu.memory_space<vmem>>, vector<32x128xbf16>
    %cst_28 = arith.constant dense<0.000000e+00> : vector<16x128xf32>
    %81 = tpu.matmul %79, %80, %cst_28 {dimension_numbers = #tpu.dot_dimension_numbers<[1], [0], [0], [1], [0, 0, 1, 1], [], []>} : vector<16x32xbf16>, vector<32x128xbf16>, vector<16x128xf32> -> vector<16x128xf32>
    %c0_29 = arith.constant 0 : index
    %c0_30 = arith.constant 0 : index
    %82 = vector.load %arg11[%c0_29, %c0_30] : memref<1x128xf32, #tpu.memory_space<vmem>>, vector<1x128xf32>
    %83 = vector.broadcast %82 : vector<1x128xf32> to vector<16x128xf32>
    %84 = arith.addf %81, %83 : vector<16x128xf32>
    %cst_31 = arith.constant 5.000000e-01 : f32
    %85 = vector.broadcast %cst_31 : f32 to vector<16x128xf32>
    %86 = arith.mulf %85, %84 : vector<16x128xf32>
    %cst_32 = arith.constant 0.707106769 : f32
    %87 = vector.broadcast %cst_32 : f32 to vector<16x128xf32>
    %88 = arith.mulf %84, %87 : vector<16x128xf32>
    %89 = math.erf %88 : vector<16x128xf32>
    %cst_33 = arith.constant 1.000000e+00 : f32
    %90 = vector.broadcast %cst_33 : f32 to vector<16x128xf32>
    %91 = arith.addf %90, %89 : vector<16x128xf32>
    %92 = arith.mulf %86, %91 : vector<16x128xf32>
    %93 = arith.truncf %92 : vector<16x128xf32> to vector<16x128xbf16>
    %c0_34 = arith.constant 0 : index
    %c0_35 = arith.constant 0 : index
    %94 = vector.load %arg12[%c0_34, %c0_35] : memref<128x32xbf16, #tpu.memory_space<vmem>>, vector<128x32xbf16>
    %cst_36 = arith.constant dense<0.000000e+00> : vector<16x32xf32>
    %95 = tpu.matmul %93, %94, %cst_36 {dimension_numbers = #tpu.dot_dimension_numbers<[1], [0], [0], [1], [0, 0, 1, 1], [], []>} : vector<16x128xbf16>, vector<128x32xbf16>, vector<16x32xf32> -> vector<16x32xf32>
    %c0_37 = arith.constant 0 : index
    %c0_38 = arith.constant 0 : index
    %96 = vector.load %arg13[%c0_37, %c0_38] : memref<1x32xf32, #tpu.memory_space<vmem>>, vector<1x32xf32>
    %97 = vector.broadcast %96 : vector<1x32xf32> to vector<16x32xf32>
    %98 = arith.addf %95, %97 : vector<16x32xf32>
    %99 = arith.addf %78, %98 : vector<16x32xf32>
    %c0_39 = arith.constant 0 : index
    %c0_40 = arith.constant 0 : index
    %100 = vector.load %arg8[%c0_39, %c0_40] : memref<1x32xf32, #tpu.memory_space<vmem>>, vector<1x32xf32>
    %c0_41 = arith.constant 0 : index
    %c0_42 = arith.constant 0 : index
    %101 = vector.load %arg9[%c0_41, %c0_42] : memref<1x32xf32, #tpu.memory_space<vmem>>, vector<1x32xf32>
    %cst_43 = arith.constant dense<0.000000e+00> : vector<16xf32>
    %102 = vector.multi_reduction <add>, %99, %cst_43 [1] : vector<16x32xf32> to vector<16xf32>
    %103 = vector.shape_cast %102 : vector<16xf32> to vector<16x1xf32>
    %cst_44 = arith.constant 3.200000e+01 : f32
    %104 = vector.broadcast %cst_44 : f32 to vector<16x1xf32>
    %105 = arith.divf %103, %104 : vector<16x1xf32>
    %106 = vector.broadcast %105 : vector<16x1xf32> to vector<16x32xf32>
    %107 = arith.subf %99, %106 : vector<16x32xf32>
    %108 = arith.mulf %107, %107 : vector<16x32xf32>
    %cst_45 = arith.constant dense<0.000000e+00> : vector<16xf32>
    %109 = vector.multi_reduction <add>, %108, %cst_45 [1] : vector<16x32xf32> to vector<16xf32>
    %110 = vector.shape_cast %109 : vector<16xf32> to vector<16x1xf32>
    %cst_46 = arith.constant 3.200000e+01 : f32
    %111 = vector.broadcast %cst_46 : f32 to vector<16x1xf32>
    %112 = arith.divf %110, %111 : vector<16x1xf32>
    %113 = vector.broadcast %105 : vector<16x1xf32> to vector<16x32xf32>
    %114 = arith.subf %99, %113 : vector<16x32xf32>
    %cst_47 = arith.constant 9.99999974E-6 : f32
    %115 = vector.broadcast %cst_47 : f32 to vector<16x1xf32>
    %116 = arith.addf %112, %115 : vector<16x1xf32>
    %117 = math.rsqrt %116 : vector<16x1xf32>
    %118 = vector.broadcast %117 : vector<16x1xf32> to vector<16x32xf32>
    %119 = arith.mulf %114, %118 : vector<16x32xf32>
    %120 = vector.broadcast %100 : vector<1x32xf32> to vector<16x32xf32>
    %121 = arith.mulf %119, %120 : vector<16x32xf32>
    %122 = vector.broadcast %101 : vector<1x32xf32> to vector<16x32xf32>
    %123 = arith.addf %121, %122 : vector<16x32xf32>
    %124 = vector.shape_cast %123 : vector<16x32xf32> to vector<2x8x32xf32>
    %c0_48 = arith.constant 0 : index
    %c0_49 = arith.constant 0 : index
    %c0_50 = arith.constant 0 : index
    %125 = vector.load %arg14[%c0_48, %c0_49, %c0_50] : memref<2x8x32xf32, #tpu.memory_space<vmem>>, vector<2x8x32xf32>
    tpu.vector_store %arg14[%c0_48, %c0_49, %c0_50], %124 {strides = array<i32>} : memref<2x8x32xf32, #tpu.memory_space<vmem>>, vector<2x8x32xf32>,
    return
  }
  func.func @transform_0(%arg0: i32) -> (i32, i32, i32) {
    %c0_i32 = arith.constant 0 : i32
    %c0_i32_0 = arith.constant 0 : i32
    %c0_i32_1 = arith.constant 0 : i32
    return %arg0, %c0_i32, %c0_i32_0 : i32, i32, i32
  }
  func.func @transform_1(%arg0: i32) -> (i32, i32) {
    %c0_i32 = arith.constant 0 : i32
    %c0_i32_0 = arith.constant 0 : i32
    %c0_i32_1 = arith.constant 0 : i32
    return %c0_i32, %c0_i32_0 : i32, i32
  }
  func.func @transform_2(%arg0: i32) -> (i32, i32) {
    %c0_i32 = arith.constant 0 : i32
    %c0_i32_0 = arith.constant 0 : i32
    %c0_i32_1 = arith.constant 0 : i32
    return %c0_i32, %c0_i32_0 : i32, i32
  }
  func.func @transform_3(%arg0: i32) -> (i32, i32) {
    %c0_i32 = arith.constant 0 : i32
    %c0_i32_0 = arith.constant 0 : i32
    %c0_i32_1 = arith.constant 0 : i32
    return %c0_i32, %c0_i32_0 : i32, i32
  }
  func.func @transform_4(%arg0: i32) -> (i32, i32) {
    %c0_i32 = arith.constant 0 : i32
    %c0_i32_0 = arith.constant 0 : i32
    %c0_i32_1 = arith.constant 0 : i32
    return %c0_i32, %c0_i32_0 : i32, i32
  }
  func.func @transform_5(%arg0: i32) -> (i32, i32) {
    %c0_i32 = arith.constant 0 : i32
    %c0_i32_0 = arith.constant 0 : i32
    %c0_i32_1 = arith.constant 0 : i32
    return %c0_i32, %c0_i32_0 : i32, i32
  }
  func.func @transform_6(%arg0: i32) -> (i32, i32) {
    %c0_i32 = arith.constant 0 : i32
    %c0_i32_0 = arith.constant 0 : i32
    %c0_i32_1 = arith.constant 0 : i32
    return %c0_i32, %c0_i32_0 : i32, i32
  }
  func.func @transform_7(%arg0: i32) -> (i32, i32) {
    %c0_i32 = arith.constant 0 : i32
    %c0_i32_0 = arith.constant 0 : i32
    %c0_i32_1 = arith.constant 0 : i32
    return %c0_i32, %c0_i32_0 : i32, i32
  }
  func.func @transform_8(%arg0: i32) -> (i32, i32) {
    %c0_i32 = arith.constant 0 : i32
    %c0_i32_0 = arith.constant 0 : i32
    %c0_i32_1 = arith.constant 0 : i32
    return %c0_i32, %c0_i32_0 : i32, i32
  }
  func.func @transform_9(%arg0: i32) -> (i32, i32) {
    %c0_i32 = arith.constant 0 : i32
    %c0_i32_0 = arith.constant 0 : i32
    %c0_i32_1 = arith.constant 0 : i32
    return %c0_i32, %c0_i32_0 : i32, i32
  }
  func.func @transform_10(%arg0: i32) -> (i32, i32) {
    %c0_i32 = arith.constant 0 : i32
    %c0_i32_0 = arith.constant 0 : i32
    %c0_i32_1 = arith.constant 0 : i32
    return %c0_i32, %c0_i32_0 : i32, i32
  }
  func.func @transform_11(%arg0: i32) -> (i32, i32) {
    %c0_i32 = arith.constant 0 : i32
    %c0_i32_0 = arith.constant 0 : i32
    %c0_i32_1 = arith.constant 0 : i32
    return %c0_i32, %c0_i32_0 : i32, i32
  }
  func.func @transform_12(%arg0: i32) -> (i32, i32) {
    %c0_i32 = arith.constant 0 : i32
    %c0_i32_0 = arith.constant 0 : i32
    %c0_i32_1 = arith.constant 0 : i32
    return %c0_i32, %c0_i32_0 : i32, i32
  }
  func.func @transform_13(%arg0: i32) -> (i32, i32, i32) {
    %c0_i32 = arith.constant 0 : i32
    %c0_i32_0 = arith.constant 0 : i32
    %c0_i32_1 = arith.constant 0 : i32
    return %arg0, %c0_i32, %c0_i32_0 : i32, i32, i32
  }
}

module attributes {stable_mosaic.version = 11 : i64} {
  func.func @transformer_block_kernel(%arg0: i32, %arg1: memref<2x8x32xf32, #tpu.memory_space<vmem>>, %arg2: memref<32x96xbf16, #tpu.memory_space<vmem>>, %arg3: memref<1x96xf32, #tpu.memory_space<vmem>>, %arg4: memref<32x32xbf16, #tpu.memory_space<vmem>>, %arg5: memref<1x32xf32, #tpu.memory_space<vmem>>, %arg6: memref<1x32xf32, #tpu.memory_space<vmem>>, %arg7: memref<1x32xf32, #tpu.memory_space<vmem>>, %arg8: memref<1x32xf32, #tpu.memory_space<vmem>>, %arg9: memref<1x32xf32, #tpu.memory_space<vmem>>, %arg10: memref<32x128xbf16, #tpu.memory_space<vmem>>, %arg11: memref<1x128xf32, #tpu.memory_space<vmem>>, %arg12: memref<128x32xbf16, #tpu.memory_space<vmem>>, %arg13: memref<1x32xf32, #tpu.memory_space<vmem>>, %arg14: memref<2x8x32xf32, #tpu.memory_space<vmem>>) attributes {dimension_semantics = [#tpu.dimension_semantics<parallel>], iteration_bounds = array<i64: 1>, scalar_prefetch = 0 : i64, scratch_operands = 0 : i64, tpu.core_type = #tpu.core_type<tc>, window_params = [{transform_indices = @transform_0, window_bounds = array<i64: 2, 8, 32>}, {pipeline_mode = #tpu.pipeline_mode<synchronous>, transform_indices = @transform_1, window_bounds = array<i64: 32, 96>}, {pipeline_mode = #tpu.pipeline_mode<synchronous>, transform_indices = @transform_2, window_bounds = array<i64: 1, 96>}, {pipeline_mode = #tpu.pipeline_mode<synchronous>, transform_indices = @transform_3, window_bounds = array<i64: 32, 32>}, {pipeline_mode = #tpu.pipeline_mode<synchronous>, transform_indices = @transform_4, window_bounds = array<i64: 1, 32>}, {pipeline_mode = #tpu.pipeline_mode<synchronous>, transform_indices = @transform_5, window_bounds = array<i64: 1, 32>}, {pipeline_mode = #tpu.pipeline_mode<synchronous>, transform_indices = @transform_6, window_bounds = array<i64: 1, 32>}, {pipeline_mode = #tpu.pipeline_mode<synchronous>, transform_indices = @transform_7, window_bounds = array<i64: 1, 32>}, {pipeline_mode = #tpu.pipeline_mode<synchronous>, transform_indices = @transform_8, window_bounds = array<i64: 1, 32>}, {pipeline_mode = #tpu.pipeline_mode<synchronous>, transform_indices = @transform_9, window_bounds = array<i64: 32, 128>}, {pipeline_mode = #tpu.pipeline_mode<synchronous>, transform_indices = @transform_10, window_bounds = array<i64: 1, 128>}, {pipeline_mode = #tpu.pipeline_mode<synchronous>, transform_indices = @transform_11, window_bounds = array<i64: 128, 32>}, {pipeline_mode = #tpu.pipeline_mode<synchronous>, transform_indices = @transform_12, window_bounds = array<i64: 1, 32>}, {transform_indices = @transform_13, window_bounds = array<i64: 2, 8, 32>}]} {
    %c0 = arith.constant 0 : index
    %c0_0 = arith.constant 0 : index
    %c0_1 = arith.constant 0 : index
    %0 = vector.load %arg1[%c0, %c0_0, %c0_1] : memref<2x8x32xf32, #tpu.memory_space<vmem>>, vector<2x8x32xf32>
    %1 = vector.shape_cast %0 : vector<2x8x32xf32> to vector<16x32xf32>
    %2 = arith.truncf %1 : vector<16x32xf32> to vector<16x32xbf16>
    %c0_2 = arith.constant 0 : index
    %c0_3 = arith.constant 0 : index
    %3 = vector.load %arg2[%c0_2, %c0_3] : memref<32x96xbf16, #tpu.memory_space<vmem>>, vector<32x96xbf16>
    %cst = arith.constant dense<0.000000e+00> : vector<16x96xf32>
    %4 = tpu.matmul %2, %3, %cst {dimension_numbers = #tpu.dot_dimension_numbers<[1], [0], [0], [1], [0, 0, 1, 1], [], []>} : vector<16x32xbf16>, vector<32x96xbf16>, vector<16x96xf32> -> vector<16x96xf32>
    %c0_4 = arith.constant 0 : index
    %c0_5 = arith.constant 0 : index
    %5 = vector.load %arg3[%c0_4, %c0_5] : memref<1x96xf32, #tpu.memory_space<vmem>>, vector<1x96xf32>
    %6 = vector.broadcast %5 : vector<1x96xf32> to vector<16x96xf32>
    %7 = arith.addf %4, %6 : vector<16x96xf32>
    %8 = tpu.iota {dimensions = array<i32: 0>} : vector<8x8xi32>
    %9 = tpu.iota {dimensions = array<i32: 1>} : vector<8x8xi32>
    %10 = arith.cmpi sle, %9, %8 : vector<8x8xi32>
    %cst_6 = arith.constant 0.000000e+00 : f32
    %cst_7 = arith.constant -1.000000e+30 : f32
    %11 = vector.broadcast %cst_6 : f32 to vector<8x8xf32>
    %12 = vector.broadcast %cst_7 : f32 to vector<8x8xf32>
    %13 = arith.select %10, %11, %12 : vector<8x8xi1>, vector<8x8xf32>
    %14 = vector.extract_strided_slice %7 {offsets = [0, 0], sizes = [16, 32], strides = [1, 1]} : vector<16x96xf32> to vector<16x32xf32>
    %15 = vector.extract_strided_slice %7 {offsets = [0, 32], sizes = [16, 32], strides = [1, 1]} : vector<16x96xf32> to vector<16x32xf32>
    %16 = vector.extract_strided_slice %7 {offsets = [0, 64], sizes = [16, 32], strides = [1, 1]} : vector<16x96xf32> to vector<16x32xf32>
    %17 = vector.extract_strided_slice %14 {offsets = [0, 0], sizes = [16, 8], strides = [1, 1]} : vector<16x32xf32> to vector<16x8xf32>
    %18 = vector.shape_cast %17 : vector<16x8xf32> to vector<2x8x8xf32>
    %19 = arith.truncf %18 : vector<2x8x8xf32> to vector<2x8x8xbf16>
    %20 = vector.extract_strided_slice %15 {offsets = [0, 0], sizes = [16, 8], strides = [1, 1]} : vector<16x32xf32> to vector<16x8xf32>
    %21 = vector.shape_cast %20 : vector<16x8xf32> to vector<2x8x8xf32>
    %22 = arith.truncf %21 : vector<2x8x8xf32> to vector<2x8x8xbf16>
    %23 = vector.extract_strided_slice %16 {offsets = [0, 0], sizes = [16, 8], strides = [1, 1]} : vector<16x32xf32> to vector<16x8xf32>
    %24 = vector.shape_cast %23 : vector<16x8xf32> to vector<2x8x8xf32>
    %25 = arith.truncf %24 : vector<2x8x8xf32> to vector<2x8x8xbf16>
    "tpu.trace_start"() <{level = 10 : i32, message = "bqd,bkd->bqk"}> : () -> ()
    %cst_8 = arith.constant dense<0.000000e+00> : vector<2x8x8xf32>
    %26 = tpu.matmul %19, %22, %cst_8 {dimension_numbers = #tpu.dot_dimension_numbers<[2], [2], [1], [1], [0, 0, 0, 1, 1, 1], [0], [0]>} : vector<2x8x8xbf16>, vector<2x8x8xbf16>, vector<2x8x8xf32> -> vector<2x8x8xf32>
    "tpu.trace_stop"() : () -> ()
    %27 = vector.shape_cast %13 : vector<8x8xf32> to vector<1x8x8xf32>
    %28 = vector.broadcast %27 : vector<1x8x8xf32> to vector<2x8x8xf32>
    %29 = arith.addf %26, %28 : vector<2x8x8xf32>
    %cst_9 = arith.constant dense<0xFF800000> : vector<2x8xf32>
    %30 = vector.multi_reduction <maximumf>, %29, %cst_9 [2] : vector<2x8x8xf32> to vector<2x8xf32>
    %31 = vector.shape_cast %30 : vector<2x8xf32> to vector<2x8x1xf32>
    %32 = vector.broadcast %31 : vector<2x8x1xf32> to vector<2x8x8xf32>
    %33 = arith.subf %29, %32 : vector<2x8x8xf32>
    %34 = math.exp %33 : vector<2x8x8xf32>
    %cst_10 = arith.constant dense<0.000000e+00> : vector<2x8xf32>
    %35 = vector.multi_reduction <add>, %34, %cst_10 [2] : vector<2x8x8xf32> to vector<2x8xf32>
    %36 = vector.shape_cast %35 : vector<2x8xf32> to vector<2x8x1xf32>
    %37 = arith.truncf %34 : vector<2x8x8xf32> to vector<2x8x8xbf16>
    "tpu.trace_start"() <{level = 10 : i32, message = "bqk,bkd->bqd"}> : () -> ()
    %cst_11 = arith.constant dense<0.000000e+00> : vector<2x8x8xf32>
    %38 = tpu.matmul %37, %25, %cst_11 {dimension_numbers = #tpu.dot_dimension_numbers<[2], [1], [1], [2], [0, 0, 0, 1, 1, 2], [0], [0]>} : vector<2x8x8xbf16>, vector<2x8x8xbf16>, vector<2x8x8xf32> -> vector<2x8x8xf32>
    "tpu.trace_stop"() : () -> ()
    %39 = tpu.reciprocal %36 {approx = true} : vector<2x8x1xf32> -> vector<2x8x1xf32>
    %40 = vector.broadcast %39 : vector<2x8x1xf32> to vector<2x8x8xf32>
    %41 = arith.mulf %38, %40 : vector<2x8x8xf32>
    %42 = vector.shape_cast %41 : vector<2x8x8xf32> to vector<16x8xf32>
    %43 = vector.extract_strided_slice %14 {offsets = [0, 8], sizes = [16, 8], strides = [1, 1]} : vector<16x32xf32> to vector<16x8xf32>
    %44 = vector.shape_cast %43 : vector<16x8xf32> to vector<2x8x8xf32>
    %45 = arith.truncf %44 : vector<2x8x8xf32> to vector<2x8x8xbf16>
    %46 = vector.extract_strided_slice %15 {offsets = [0, 8], sizes = [16, 8], strides = [1, 1]} : vector<16x32xf32> to vector<16x8xf32>
    %47 = vector.shape_cast %46 : vector<16x8xf32> to vector<2x8x8xf32>
    %48 = arith.truncf %47 : vector<2x8x8xf32> to vector<2x8x8xbf16>
    %49 = vector.extract_strided_slice %16 {offsets = [0, 8], sizes = [16, 8], strides = [1, 1]} : vector<16x32xf32> to vector<16x8xf32>
    %50 = vector.shape_cast %49 : vector<16x8xf32> to vector<2x8x8xf32>
    %51 = arith.truncf %50 : vector<2x8x8xf32> to vector<2x8x8xbf16>
    "tpu.trace_start"() <{level = 10 : i32, message = "bqd,bkd->bqk"}> : () -> ()
    %cst_12 = arith.constant dense<0.000000e+00> : vector<2x8x8xf32>
    %52 = tpu.matmul %45, %48, %cst_12 {dimension_numbers = #tpu.dot_dimension_numbers<[2], [2], [1], [1], [0, 0, 0, 1, 1, 1], [0], [0]>} : vector<2x8x8xbf16>, vector<2x8x8xbf16>, vector<2x8x8xf32> -> vector<2x8x8xf32>
    "tpu.trace_stop"() : () -> ()
    %53 = vector.shape_cast %13 : vector<8x8xf32> to vector<1x8x8xf32>
    %54 = vector.broadcast %53 : vector<1x8x8xf32> to vector<2x8x8xf32>
    %55 = arith.addf %52, %54 : vector<2x8x8xf32>
    %cst_13 = arith.constant dense<0xFF800000> : vector<2x8xf32>
    %56 = vector.multi_reduction <maximumf>, %55, %cst_13 [2] : vector<2x8x8xf32> to vector<2x8xf32>
    %57 = vector.shape_cast %56 : vector<2x8xf32> to vector<2x8x1xf32>
    %58 = vector.broadcast %57 : vector<2x8x1xf32> to vector<2x8x8xf32>
    %59 = arith.subf %55, %58 : vector<2x8x8xf32>
    %60 = math.exp %59 : vector<2x8x8xf32>
    %cst_14 = arith.constant dense<0.000000e+00> : vector<2x8xf32>
    %61 = vector.multi_reduction <add>, %60, %cst_14 [2] : vector<2x8x8xf32> to vector<2x8xf32>
    %62 = vector.shape_cast %61 : vector<2x8xf32> to vector<2x8x1xf32>
    %63 = arith.truncf %60 : vector<2x8x8xf32> to vector<2x8x8xbf16>
    "tpu.trace_start"() <{level = 10 : i32, message = "bqk,bkd->bqd"}> : () -> ()
    %cst_15 = arith.constant dense<0.000000e+00> : vector<2x8x8xf32>
    %64 = tpu.matmul %63, %51, %cst_15 {dimension_numbers = #tpu.dot_dimension_numbers<[2], [1], [1], [2], [0, 0, 0, 1, 1, 2], [0], [0]>} : vector<2x8x8xbf16>, vector<2x8x8xbf16>, vector<2x8x8xf32> -> vector<2x8x8xf32>
    "tpu.trace_stop"() : () -> ()
    %65 = tpu.reciprocal %62 {approx = true} : vector<2x8x1xf32> -> vector<2x8x1xf32>
    %66 = vector.broadcast %65 : vector<2x8x1xf32> to vector<2x8x8xf32>
    %67 = arith.mulf %64, %66 : vector<2x8x8xf32>
    %68 = vector.shape_cast %67 : vector<2x8x8xf32> to vector<16x8xf32>
    %69 = vector.extract_strided_slice %14 {offsets = [0, 16], sizes = [16, 8], strides = [1, 1]} : vector<16x32xf32> to vector<16x8xf32>
    %70 = vector.shape_cast %69 : vector<16x8xf32> to vector<2x8x8xf32>
    %71 = arith.truncf %70 : vector<2x8x8xf32> to vector<2x8x8xbf16>
    %72 = vector.extract_strided_slice %15 {offsets = [0, 16], sizes = [16, 8], strides = [1, 1]} : vector<16x32xf32> to vector<16x8xf32>
    %73 = vector.shape_cast %72 : vector<16x8xf32> to vector<2x8x8xf32>
    %74 = arith.truncf %73 : vector<2x8x8xf32> to vector<2x8x8xbf16>
    %75 = vector.extract_strided_slice %16 {offsets = [0, 16], sizes = [16, 8], strides = [1, 1]} : vector<16x32xf32> to vector<16x8xf32>
    %76 = vector.shape_cast %75 : vector<16x8xf32> to vector<2x8x8xf32>
    %77 = arith.truncf %76 : vector<2x8x8xf32> to vector<2x8x8xbf16>
    "tpu.trace_start"() <{level = 10 : i32, message = "bqd,bkd->bqk"}> : () -> ()
    %cst_16 = arith.constant dense<0.000000e+00> : vector<2x8x8xf32>
    %78 = tpu.matmul %71, %74, %cst_16 {dimension_numbers = #tpu.dot_dimension_numbers<[2], [2], [1], [1], [0, 0, 0, 1, 1, 1], [0], [0]>} : vector<2x8x8xbf16>, vector<2x8x8xbf16>, vector<2x8x8xf32> -> vector<2x8x8xf32>
    "tpu.trace_stop"() : () -> ()
    %79 = vector.shape_cast %13 : vector<8x8xf32> to vector<1x8x8xf32>
    %80 = vector.broadcast %79 : vector<1x8x8xf32> to vector<2x8x8xf32>
    %81 = arith.addf %78, %80 : vector<2x8x8xf32>
    %cst_17 = arith.constant dense<0xFF800000> : vector<2x8xf32>
    %82 = vector.multi_reduction <maximumf>, %81, %cst_17 [2] : vector<2x8x8xf32> to vector<2x8xf32>
    %83 = vector.shape_cast %82 : vector<2x8xf32> to vector<2x8x1xf32>
    %84 = vector.broadcast %83 : vector<2x8x1xf32> to vector<2x8x8xf32>
    %85 = arith.subf %81, %84 : vector<2x8x8xf32>
    %86 = math.exp %85 : vector<2x8x8xf32>
    %cst_18 = arith.constant dense<0.000000e+00> : vector<2x8xf32>
    %87 = vector.multi_reduction <add>, %86, %cst_18 [2] : vector<2x8x8xf32> to vector<2x8xf32>
    %88 = vector.shape_cast %87 : vector<2x8xf32> to vector<2x8x1xf32>
    %89 = arith.truncf %86 : vector<2x8x8xf32> to vector<2x8x8xbf16>
    "tpu.trace_start"() <{level = 10 : i32, message = "bqk,bkd->bqd"}> : () -> ()
    %cst_19 = arith.constant dense<0.000000e+00> : vector<2x8x8xf32>
    %90 = tpu.matmul %89, %77, %cst_19 {dimension_numbers = #tpu.dot_dimension_numbers<[2], [1], [1], [2], [0, 0, 0, 1, 1, 2], [0], [0]>} : vector<2x8x8xbf16>, vector<2x8x8xbf16>, vector<2x8x8xf32> -> vector<2x8x8xf32>
    "tpu.trace_stop"() : () -> ()
    %91 = tpu.reciprocal %88 {approx = true} : vector<2x8x1xf32> -> vector<2x8x1xf32>
    %92 = vector.broadcast %91 : vector<2x8x1xf32> to vector<2x8x8xf32>
    %93 = arith.mulf %90, %92 : vector<2x8x8xf32>
    %94 = vector.shape_cast %93 : vector<2x8x8xf32> to vector<16x8xf32>
    %95 = vector.extract_strided_slice %14 {offsets = [0, 24], sizes = [16, 8], strides = [1, 1]} : vector<16x32xf32> to vector<16x8xf32>
    %96 = vector.shape_cast %95 : vector<16x8xf32> to vector<2x8x8xf32>
    %97 = arith.truncf %96 : vector<2x8x8xf32> to vector<2x8x8xbf16>
    %98 = vector.extract_strided_slice %15 {offsets = [0, 24], sizes = [16, 8], strides = [1, 1]} : vector<16x32xf32> to vector<16x8xf32>
    %99 = vector.shape_cast %98 : vector<16x8xf32> to vector<2x8x8xf32>
    %100 = arith.truncf %99 : vector<2x8x8xf32> to vector<2x8x8xbf16>
    %101 = vector.extract_strided_slice %16 {offsets = [0, 24], sizes = [16, 8], strides = [1, 1]} : vector<16x32xf32> to vector<16x8xf32>
    %102 = vector.shape_cast %101 : vector<16x8xf32> to vector<2x8x8xf32>
    %103 = arith.truncf %102 : vector<2x8x8xf32> to vector<2x8x8xbf16>
    "tpu.trace_start"() <{level = 10 : i32, message = "bqd,bkd->bqk"}> : () -> ()
    %cst_20 = arith.constant dense<0.000000e+00> : vector<2x8x8xf32>
    %104 = tpu.matmul %97, %100, %cst_20 {dimension_numbers = #tpu.dot_dimension_numbers<[2], [2], [1], [1], [0, 0, 0, 1, 1, 1], [0], [0]>} : vector<2x8x8xbf16>, vector<2x8x8xbf16>, vector<2x8x8xf32> -> vector<2x8x8xf32>
    "tpu.trace_stop"() : () -> ()
    %105 = vector.shape_cast %13 : vector<8x8xf32> to vector<1x8x8xf32>
    %106 = vector.broadcast %105 : vector<1x8x8xf32> to vector<2x8x8xf32>
    %107 = arith.addf %104, %106 : vector<2x8x8xf32>
    %cst_21 = arith.constant dense<0xFF800000> : vector<2x8xf32>
    %108 = vector.multi_reduction <maximumf>, %107, %cst_21 [2] : vector<2x8x8xf32> to vector<2x8xf32>
    %109 = vector.shape_cast %108 : vector<2x8xf32> to vector<2x8x1xf32>
    %110 = vector.broadcast %109 : vector<2x8x1xf32> to vector<2x8x8xf32>
    %111 = arith.subf %107, %110 : vector<2x8x8xf32>
    %112 = math.exp %111 : vector<2x8x8xf32>
    %cst_22 = arith.constant dense<0.000000e+00> : vector<2x8xf32>
    %113 = vector.multi_reduction <add>, %112, %cst_22 [2] : vector<2x8x8xf32> to vector<2x8xf32>
    %114 = vector.shape_cast %113 : vector<2x8xf32> to vector<2x8x1xf32>
    %115 = arith.truncf %112 : vector<2x8x8xf32> to vector<2x8x8xbf16>
    "tpu.trace_start"() <{level = 10 : i32, message = "bqk,bkd->bqd"}> : () -> ()
    %cst_23 = arith.constant dense<0.000000e+00> : vector<2x8x8xf32>
    %116 = tpu.matmul %115, %103, %cst_23 {dimension_numbers = #tpu.dot_dimension_numbers<[2], [1], [1], [2], [0, 0, 0, 1, 1, 2], [0], [0]>} : vector<2x8x8xbf16>, vector<2x8x8xbf16>, vector<2x8x8xf32> -> vector<2x8x8xf32>
    "tpu.trace_stop"() : () -> ()
    %117 = tpu.reciprocal %114 {approx = true} : vector<2x8x1xf32> -> vector<2x8x1xf32>
    %118 = vector.broadcast %117 : vector<2x8x1xf32> to vector<2x8x8xf32>
    %119 = arith.mulf %116, %118 : vector<2x8x8xf32>
    %120 = vector.shape_cast %119 : vector<2x8x8xf32> to vector<16x8xf32>
    %121 = tpu.concatenate %42, %68, %94, %120 in 1 : vector<16x8xf32>, vector<16x8xf32>, vector<16x8xf32>, vector<16x8xf32> -> vector<16x32xf32>
    %122 = arith.truncf %121 : vector<16x32xf32> to vector<16x32xbf16>
    %c0_24 = arith.constant 0 : index
    %c0_25 = arith.constant 0 : index
    %123 = vector.load %arg4[%c0_24, %c0_25] : memref<32x32xbf16, #tpu.memory_space<vmem>>, vector<32x32xbf16>
    %cst_26 = arith.constant dense<0.000000e+00> : vector<16x32xf32>
    %124 = tpu.matmul %122, %123, %cst_26 {dimension_numbers = #tpu.dot_dimension_numbers<[1], [0], [0], [1], [0, 0, 1, 1], [], []>} : vector<16x32xbf16>, vector<32x32xbf16>, vector<16x32xf32> -> vector<16x32xf32>
    %c0_27 = arith.constant 0 : index
    %c0_28 = arith.constant 0 : index
    %125 = vector.load %arg5[%c0_27, %c0_28] : memref<1x32xf32, #tpu.memory_space<vmem>>, vector<1x32xf32>
    %126 = vector.broadcast %125 : vector<1x32xf32> to vector<16x32xf32>
    %127 = arith.addf %124, %126 : vector<16x32xf32>
    %128 = arith.addf %1, %127 : vector<16x32xf32>
    %c0_29 = arith.constant 0 : index
    %c0_30 = arith.constant 0 : index
    %129 = vector.load %arg6[%c0_29, %c0_30] : memref<1x32xf32, #tpu.memory_space<vmem>>, vector<1x32xf32>
    %c0_31 = arith.constant 0 : index
    %c0_32 = arith.constant 0 : index
    %130 = vector.load %arg7[%c0_31, %c0_32] : memref<1x32xf32, #tpu.memory_space<vmem>>, vector<1x32xf32>
    %cst_33 = arith.constant dense<0.000000e+00> : vector<16xf32>
    %131 = vector.multi_reduction <add>, %128, %cst_33 [1] : vector<16x32xf32> to vector<16xf32>
    %132 = vector.shape_cast %131 : vector<16xf32> to vector<16x1xf32>
    %cst_34 = arith.constant 3.200000e+01 : f32
    %133 = vector.broadcast %cst_34 : f32 to vector<16x1xf32>
    %134 = arith.divf %132, %133 : vector<16x1xf32>
    %135 = vector.broadcast %134 : vector<16x1xf32> to vector<16x32xf32>
    %136 = arith.subf %128, %135 : vector<16x32xf32>
    %137 = arith.mulf %136, %136 : vector<16x32xf32>
    %cst_35 = arith.constant dense<0.000000e+00> : vector<16xf32>
    %138 = vector.multi_reduction <add>, %137, %cst_35 [1] : vector<16x32xf32> to vector<16xf32>
    %139 = vector.shape_cast %138 : vector<16xf32> to vector<16x1xf32>
    %cst_36 = arith.constant 3.200000e+01 : f32
    %140 = vector.broadcast %cst_36 : f32 to vector<16x1xf32>
    %141 = arith.divf %139, %140 : vector<16x1xf32>
    %142 = vector.broadcast %134 : vector<16x1xf32> to vector<16x32xf32>
    %143 = arith.subf %128, %142 : vector<16x32xf32>
    %cst_37 = arith.constant 9.99999974E-6 : f32
    %144 = vector.broadcast %cst_37 : f32 to vector<16x1xf32>
    %145 = arith.addf %141, %144 : vector<16x1xf32>
    %146 = math.rsqrt %145 : vector<16x1xf32>
    %147 = vector.broadcast %146 : vector<16x1xf32> to vector<16x32xf32>
    %148 = arith.mulf %143, %147 : vector<16x32xf32>
    %149 = vector.broadcast %129 : vector<1x32xf32> to vector<16x32xf32>
    %150 = arith.mulf %148, %149 : vector<16x32xf32>
    %151 = vector.broadcast %130 : vector<1x32xf32> to vector<16x32xf32>
    %152 = arith.addf %150, %151 : vector<16x32xf32>
    %153 = arith.truncf %152 : vector<16x32xf32> to vector<16x32xbf16>
    %c0_38 = arith.constant 0 : index
    %c0_39 = arith.constant 0 : index
    %154 = vector.load %arg10[%c0_38, %c0_39] : memref<32x128xbf16, #tpu.memory_space<vmem>>, vector<32x128xbf16>
    %cst_40 = arith.constant dense<0.000000e+00> : vector<16x128xf32>
    %155 = tpu.matmul %153, %154, %cst_40 {dimension_numbers = #tpu.dot_dimension_numbers<[1], [0], [0], [1], [0, 0, 1, 1], [], []>} : vector<16x32xbf16>, vector<32x128xbf16>, vector<16x128xf32> -> vector<16x128xf32>
    %c0_41 = arith.constant 0 : index
    %c0_42 = arith.constant 0 : index
    %156 = vector.load %arg11[%c0_41, %c0_42] : memref<1x128xf32, #tpu.memory_space<vmem>>, vector<1x128xf32>
    %157 = vector.broadcast %156 : vector<1x128xf32> to vector<16x128xf32>
    %158 = arith.addf %155, %157 : vector<16x128xf32>
    %cst_43 = arith.constant 5.000000e-01 : f32
    %159 = vector.broadcast %cst_43 : f32 to vector<16x128xf32>
    %160 = arith.mulf %159, %158 : vector<16x128xf32>
    %cst_44 = arith.constant 0.707106769 : f32
    %161 = vector.broadcast %cst_44 : f32 to vector<16x128xf32>
    %162 = arith.mulf %158, %161 : vector<16x128xf32>
    %163 = math.erf %162 : vector<16x128xf32>
    %cst_45 = arith.constant 1.000000e+00 : f32
    %164 = vector.broadcast %cst_45 : f32 to vector<16x128xf32>
    %165 = arith.addf %164, %163 : vector<16x128xf32>
    %166 = arith.mulf %160, %165 : vector<16x128xf32>
    %167 = arith.truncf %166 : vector<16x128xf32> to vector<16x128xbf16>
    %c0_46 = arith.constant 0 : index
    %c0_47 = arith.constant 0 : index
    %168 = vector.load %arg12[%c0_46, %c0_47] : memref<128x32xbf16, #tpu.memory_space<vmem>>, vector<128x32xbf16>
    %cst_48 = arith.constant dense<0.000000e+00> : vector<16x32xf32>
    %169 = tpu.matmul %167, %168, %cst_48 {dimension_numbers = #tpu.dot_dimension_numbers<[1], [0], [0], [1], [0, 0, 1, 1], [], []>} : vector<16x128xbf16>, vector<128x32xbf16>, vector<16x32xf32> -> vector<16x32xf32>
    %c0_49 = arith.constant 0 : index
    %c0_50 = arith.constant 0 : index
    %170 = vector.load %arg13[%c0_49, %c0_50] : memref<1x32xf32, #tpu.memory_space<vmem>>, vector<1x32xf32>
    %171 = vector.broadcast %170 : vector<1x32xf32> to vector<16x32xf32>
    %172 = arith.addf %169, %171 : vector<16x32xf32>
    %173 = arith.addf %152, %172 : vector<16x32xf32>
    %c0_51 = arith.constant 0 : index
    %c0_52 = arith.constant 0 : index
    %174 = vector.load %arg8[%c0_51, %c0_52] : memref<1x32xf32, #tpu.memory_space<vmem>>, vector<1x32xf32>
    %c0_53 = arith.constant 0 : index
    %c0_54 = arith.constant 0 : index
    %175 = vector.load %arg9[%c0_53, %c0_54] : memref<1x32xf32, #tpu.memory_space<vmem>>, vector<1x32xf32>
    %cst_55 = arith.constant dense<0.000000e+00> : vector<16xf32>
    %176 = vector.multi_reduction <add>, %173, %cst_55 [1] : vector<16x32xf32> to vector<16xf32>
    %177 = vector.shape_cast %176 : vector<16xf32> to vector<16x1xf32>
    %cst_56 = arith.constant 3.200000e+01 : f32
    %178 = vector.broadcast %cst_56 : f32 to vector<16x1xf32>
    %179 = arith.divf %177, %178 : vector<16x1xf32>
    %180 = vector.broadcast %179 : vector<16x1xf32> to vector<16x32xf32>
    %181 = arith.subf %173, %180 : vector<16x32xf32>
    %182 = arith.mulf %181, %181 : vector<16x32xf32>
    %cst_57 = arith.constant dense<0.000000e+00> : vector<16xf32>
    %183 = vector.multi_reduction <add>, %182, %cst_57 [1] : vector<16x32xf32> to vector<16xf32>
    %184 = vector.shape_cast %183 : vector<16xf32> to vector<16x1xf32>
    %cst_58 = arith.constant 3.200000e+01 : f32
    %185 = vector.broadcast %cst_58 : f32 to vector<16x1xf32>
    %186 = arith.divf %184, %185 : vector<16x1xf32>
    %187 = vector.broadcast %179 : vector<16x1xf32> to vector<16x32xf32>
    %188 = arith.subf %173, %187 : vector<16x32xf32>
    %cst_59 = arith.constant 9.99999974E-6 : f32
    %189 = vector.broadcast %cst_59 : f32 to vector<16x1xf32>
    %190 = arith.addf %186, %189 : vector<16x1xf32>
    %191 = math.rsqrt %190 : vector<16x1xf32>
    %192 = vector.broadcast %191 : vector<16x1xf32> to vector<16x32xf32>
    %193 = arith.mulf %188, %192 : vector<16x32xf32>
    %194 = vector.broadcast %174 : vector<1x32xf32> to vector<16x32xf32>
    %195 = arith.mulf %193, %194 : vector<16x32xf32>
    %196 = vector.broadcast %175 : vector<1x32xf32> to vector<16x32xf32>
    %197 = arith.addf %195, %196 : vector<16x32xf32>
    %198 = vector.shape_cast %197 : vector<16x32xf32> to vector<2x8x32xf32>
    %c0_60 = arith.constant 0 : index
    %c0_61 = arith.constant 0 : index
    %c0_62 = arith.constant 0 : index
    %199 = vector.load %arg14[%c0_60, %c0_61, %c0_62] : memref<2x8x32xf32, #tpu.memory_space<vmem>>, vector<2x8x32xf32>
    tpu.vector_store %arg14[%c0_60, %c0_61, %c0_62], %198 {strides = array<i32>} : memref<2x8x32xf32, #tpu.memory_space<vmem>>, vector<2x8x32xf32>,
    return
  }
  func.func @transform_0(%arg0: i32) -> (i32, i32, i32) {
    %c0_i32 = arith.constant 0 : i32
    %c0_i32_0 = arith.constant 0 : i32
    %c0_i32_1 = arith.constant 0 : i32
    return %arg0, %c0_i32, %c0_i32_0 : i32, i32, i32
  }
  func.func @transform_1(%arg0: i32) -> (i32, i32) {
    %c0_i32 = arith.constant 0 : i32
    %c0_i32_0 = arith.constant 0 : i32
    %c0_i32_1 = arith.constant 0 : i32
    return %c0_i32, %c0_i32_0 : i32, i32
  }
  func.func @transform_2(%arg0: i32) -> (i32, i32) {
    %c0_i32 = arith.constant 0 : i32
    %c0_i32_0 = arith.constant 0 : i32
    %c0_i32_1 = arith.constant 0 : i32
    return %c0_i32, %c0_i32_0 : i32, i32
  }
  func.func @transform_3(%arg0: i32) -> (i32, i32) {
    %c0_i32 = arith.constant 0 : i32
    %c0_i32_0 = arith.constant 0 : i32
    %c0_i32_1 = arith.constant 0 : i32
    return %c0_i32, %c0_i32_0 : i32, i32
  }
  func.func @transform_4(%arg0: i32) -> (i32, i32) {
    %c0_i32 = arith.constant 0 : i32
    %c0_i32_0 = arith.constant 0 : i32
    %c0_i32_1 = arith.constant 0 : i32
    return %c0_i32, %c0_i32_0 : i32, i32
  }
  func.func @transform_5(%arg0: i32) -> (i32, i32) {
    %c0_i32 = arith.constant 0 : i32
    %c0_i32_0 = arith.constant 0 : i32
    %c0_i32_1 = arith.constant 0 : i32
    return %c0_i32, %c0_i32_0 : i32, i32
  }
  func.func @transform_6(%arg0: i32) -> (i32, i32) {
    %c0_i32 = arith.constant 0 : i32
    %c0_i32_0 = arith.constant 0 : i32
    %c0_i32_1 = arith.constant 0 : i32
    return %c0_i32, %c0_i32_0 : i32, i32
  }
  func.func @transform_7(%arg0: i32) -> (i32, i32) {
    %c0_i32 = arith.constant 0 : i32
    %c0_i32_0 = arith.constant 0 : i32
    %c0_i32_1 = arith.constant 0 : i32
    return %c0_i32, %c0_i32_0 : i32, i32
  }
  func.func @transform_8(%arg0: i32) -> (i32, i32) {
    %c0_i32 = arith.constant 0 : i32
    %c0_i32_0 = arith.constant 0 : i32
    %c0_i32_1 = arith.constant 0 : i32
    return %c0_i32, %c0_i32_0 : i32, i32
  }
  func.func @transform_9(%arg0: i32) -> (i32, i32) {
    %c0_i32 = arith.constant 0 : i32
    %c0_i32_0 = arith.constant 0 : i32
    %c0_i32_1 = arith.constant 0 : i32
    return %c0_i32, %c0_i32_0 : i32, i32
  }
  func.func @transform_10(%arg0: i32) -> (i32, i32) {
    %c0_i32 = arith.constant 0 : i32
    %c0_i32_0 = arith.constant 0 : i32
    %c0_i32_1 = arith.constant 0 : i32
    return %c0_i32, %c0_i32_0 : i32, i32
  }
  func.func @transform_11(%arg0: i32) -> (i32, i32) {
    %c0_i32 = arith.constant 0 : i32
    %c0_i32_0 = arith.constant 0 : i32
    %c0_i32_1 = arith.constant 0 : i32
    return %c0_i32, %c0_i32_0 : i32, i32
  }
  func.func @transform_12(%arg0: i32) -> (i32, i32) {
    %c0_i32 = arith.constant 0 : i32
    %c0_i32_0 = arith.constant 0 : i32
    %c0_i32_1 = arith.constant 0 : i32
    return %c0_i32, %c0_i32_0 : i32, i32
  }
  func.func @transform_13(%arg0: i32) -> (i32, i32, i32) {
    %c0_i32 = arith.constant 0 : i32
    %c0_i32_0 = arith.constant 0 : i32
    %c0_i32_1 = arith.constant 0 : i32
    return %arg0, %c0_i32, %c0_i32_0 : i32, i32, i32
  }
}

module attributes {stable_mosaic.version = 11 : i64} {
  func.func @transformer_block_kernel(%arg0: i32, %arg1: memref<2x8x32xf32, #tpu.memory_space<vmem>>, %arg2: memref<32x96xbf16, #tpu.memory_space<vmem>>, %arg3: memref<1x96xf32, #tpu.memory_space<vmem>>, %arg4: memref<32x32xbf16, #tpu.memory_space<vmem>>, %arg5: memref<1x32xf32, #tpu.memory_space<vmem>>, %arg6: memref<1x32xf32, #tpu.memory_space<vmem>>, %arg7: memref<1x32xf32, #tpu.memory_space<vmem>>, %arg8: memref<1x32xf32, #tpu.memory_space<vmem>>, %arg9: memref<1x32xf32, #tpu.memory_space<vmem>>, %arg10: memref<32x128xbf16, #tpu.memory_space<vmem>>, %arg11: memref<1x128xf32, #tpu.memory_space<vmem>>, %arg12: memref<128x32xbf16, #tpu.memory_space<vmem>>, %arg13: memref<1x32xf32, #tpu.memory_space<vmem>>, %arg14: memref<2x8x32xf32, #tpu.memory_space<vmem>>) attributes {dimension_semantics = [#tpu.dimension_semantics<parallel>], iteration_bounds = array<i64: 1>, scalar_prefetch = 0 : i64, scratch_operands = 0 : i64, tpu.core_type = #tpu.core_type<tc>, window_params = [{transform_indices = @transform_0, window_bounds = array<i64: 2, 8, 32>}, {pipeline_mode = #tpu.pipeline_mode<synchronous>, transform_indices = @transform_1, window_bounds = array<i64: 32, 96>}, {pipeline_mode = #tpu.pipeline_mode<synchronous>, transform_indices = @transform_2, window_bounds = array<i64: 1, 96>}, {pipeline_mode = #tpu.pipeline_mode<synchronous>, transform_indices = @transform_3, window_bounds = array<i64: 32, 32>}, {pipeline_mode = #tpu.pipeline_mode<synchronous>, transform_indices = @transform_4, window_bounds = array<i64: 1, 32>}, {pipeline_mode = #tpu.pipeline_mode<synchronous>, transform_indices = @transform_5, window_bounds = array<i64: 1, 32>}, {pipeline_mode = #tpu.pipeline_mode<synchronous>, transform_indices = @transform_6, window_bounds = array<i64: 1, 32>}, {pipeline_mode = #tpu.pipeline_mode<synchronous>, transform_indices = @transform_7, window_bounds = array<i64: 1, 32>}, {pipeline_mode = #tpu.pipeline_mode<synchronous>, transform_indices = @transform_8, window_bounds = array<i64: 1, 32>}, {pipeline_mode = #tpu.pipeline_mode<synchronous>, transform_indices = @transform_9, window_bounds = array<i64: 32, 128>}, {pipeline_mode = #tpu.pipeline_mode<synchronous>, transform_indices = @transform_10, window_bounds = array<i64: 1, 128>}, {pipeline_mode = #tpu.pipeline_mode<synchronous>, transform_indices = @transform_11, window_bounds = array<i64: 128, 32>}, {pipeline_mode = #tpu.pipeline_mode<synchronous>, transform_indices = @transform_12, window_bounds = array<i64: 1, 32>}, {transform_indices = @transform_13, window_bounds = array<i64: 2, 8, 32>}]} {
    %c0 = arith.constant 0 : index
    %c0_0 = arith.constant 0 : index
    %c0_1 = arith.constant 0 : index
    %0 = vector.load %arg1[%c0, %c0_0, %c0_1] : memref<2x8x32xf32, #tpu.memory_space<vmem>>, vector<2x8x32xf32>
    %1 = vector.shape_cast %0 : vector<2x8x32xf32> to vector<16x32xf32>
    %2 = arith.truncf %1 : vector<16x32xf32> to vector<16x32xbf16>
    %c0_2 = arith.constant 0 : index
    %c0_3 = arith.constant 0 : index
    %3 = vector.load %arg2[%c0_2, %c0_3] : memref<32x96xbf16, #tpu.memory_space<vmem>>, vector<32x96xbf16>
    %cst = arith.constant dense<0.000000e+00> : vector<16x96xf32>
    %4 = tpu.matmul %2, %3, %cst {dimension_numbers = #tpu.dot_dimension_numbers<[1], [0], [0], [1], [0, 0, 1, 1], [], []>} : vector<16x32xbf16>, vector<32x96xbf16>, vector<16x96xf32> -> vector<16x96xf32>
    %c0_4 = arith.constant 0 : index
    %c0_5 = arith.constant 0 : index
    %5 = vector.load %arg3[%c0_4, %c0_5] : memref<1x96xf32, #tpu.memory_space<vmem>>, vector<1x96xf32>
    %6 = vector.broadcast %5 : vector<1x96xf32> to vector<16x96xf32>
    %7 = arith.addf %4, %6 : vector<16x96xf32>
    %8 = tpu.iota {dimensions = array<i32: 0>} : vector<8x8xi32>
    %9 = tpu.iota {dimensions = array<i32: 1>} : vector<8x8xi32>
    %10 = arith.cmpi sle, %9, %8 : vector<8x8xi32>
    %cst_6 = arith.constant 0.000000e+00 : f32
    %cst_7 = arith.constant -1.000000e+30 : f32
    %11 = vector.broadcast %cst_6 : f32 to vector<8x8xf32>
    %12 = vector.broadcast %cst_7 : f32 to vector<8x8xf32>
    %13 = arith.select %10, %11, %12 : vector<8x8xi1>, vector<8x8xf32>
    %14 = vector.extract_strided_slice %7 {offsets = [0, 0], sizes = [16, 32], strides = [1, 1]} : vector<16x96xf32> to vector<16x32xf32>
    %15 = vector.extract_strided_slice %7 {offsets = [0, 32], sizes = [16, 32], strides = [1, 1]} : vector<16x96xf32> to vector<16x32xf32>
    %16 = vector.extract_strided_slice %7 {offsets = [0, 64], sizes = [16, 32], strides = [1, 1]} : vector<16x96xf32> to vector<16x32xf32>
    %17 = vector.extract_strided_slice %14 {offsets = [0, 0], sizes = [16, 8], strides = [1, 1]} : vector<16x32xf32> to vector<16x8xf32>
    %18 = vector.shape_cast %17 : vector<16x8xf32> to vector<2x8x8xf32>
    %19 = arith.truncf %18 : vector<2x8x8xf32> to vector<2x8x8xbf16>
    %20 = vector.extract_strided_slice %15 {offsets = [0, 0], sizes = [16, 8], strides = [1, 1]} : vector<16x32xf32> to vector<16x8xf32>
    %21 = vector.shape_cast %20 : vector<16x8xf32> to vector<2x8x8xf32>
    %22 = arith.truncf %21 : vector<2x8x8xf32> to vector<2x8x8xbf16>
    %23 = vector.extract_strided_slice %16 {offsets = [0, 0], sizes = [16, 8], strides = [1, 1]} : vector<16x32xf32> to vector<16x8xf32>
    %24 = vector.shape_cast %23 : vector<16x8xf32> to vector<2x8x8xf32>
    %25 = arith.truncf %24 : vector<2x8x8xf32> to vector<2x8x8xbf16>
    "tpu.trace_start"() <{level = 10 : i32, message = "bqd,bkd->bqk"}> : () -> ()
    %cst_8 = arith.constant dense<0.000000e+00> : vector<2x8x8xf32>
    %26 = tpu.matmul %19, %22, %cst_8 {dimension_numbers = #tpu.dot_dimension_numbers<[2], [2], [1], [1], [0, 0, 0, 1, 1, 1], [0], [0]>} : vector<2x8x8xbf16>, vector<2x8x8xbf16>, vector<2x8x8xf32> -> vector<2x8x8xf32>
    "tpu.trace_stop"() : () -> ()
    %27 = vector.shape_cast %13 : vector<8x8xf32> to vector<1x8x8xf32>
    %28 = vector.broadcast %27 : vector<1x8x8xf32> to vector<2x8x8xf32>
    %29 = arith.addf %26, %28 : vector<2x8x8xf32>
    %cst_9 = arith.constant dense<0xFF800000> : vector<2x8xf32>
    %30 = vector.multi_reduction <maximumf>, %29, %cst_9 [2] : vector<2x8x8xf32> to vector<2x8xf32>
    %31 = vector.shape_cast %30 : vector<2x8xf32> to vector<2x8x1xf32>
    %32 = vector.broadcast %31 : vector<2x8x1xf32> to vector<2x8x8xf32>
    %33 = arith.subf %29, %32 : vector<2x8x8xf32>
    %34 = math.exp %33 : vector<2x8x8xf32>
    %cst_10 = arith.constant dense<0.000000e+00> : vector<2x8xf32>
    %35 = vector.multi_reduction <add>, %34, %cst_10 [2] : vector<2x8x8xf32> to vector<2x8xf32>
    %36 = vector.shape_cast %35 : vector<2x8xf32> to vector<2x8x1xf32>
    %37 = arith.truncf %34 : vector<2x8x8xf32> to vector<2x8x8xbf16>
    "tpu.trace_start"() <{level = 10 : i32, message = "bqk,bkd->bqd"}> : () -> ()
    %cst_11 = arith.constant dense<0.000000e+00> : vector<2x8x8xf32>
    %38 = tpu.matmul %37, %25, %cst_11 {dimension_numbers = #tpu.dot_dimension_numbers<[2], [1], [1], [2], [0, 0, 0, 1, 1, 2], [0], [0]>} : vector<2x8x8xbf16>, vector<2x8x8xbf16>, vector<2x8x8xf32> -> vector<2x8x8xf32>
    "tpu.trace_stop"() : () -> ()
    %39 = tpu.reciprocal %36 {approx = true} : vector<2x8x1xf32> -> vector<2x8x1xf32>
    %40 = vector.broadcast %39 : vector<2x8x1xf32> to vector<2x8x8xf32>
    %41 = arith.mulf %38, %40 : vector<2x8x8xf32>
    %42 = vector.shape_cast %41 : vector<2x8x8xf32> to vector<16x8xf32>
    %43 = vector.extract_strided_slice %14 {offsets = [0, 8], sizes = [16, 8], strides = [1, 1]} : vector<16x32xf32> to vector<16x8xf32>
    %44 = vector.shape_cast %43 : vector<16x8xf32> to vector<2x8x8xf32>
    %45 = arith.truncf %44 : vector<2x8x8xf32> to vector<2x8x8xbf16>
    %46 = vector.extract_strided_slice %15 {offsets = [0, 8], sizes = [16, 8], strides = [1, 1]} : vector<16x32xf32> to vector<16x8xf32>
    %47 = vector.shape_cast %46 : vector<16x8xf32> to vector<2x8x8xf32>
    %48 = arith.truncf %47 : vector<2x8x8xf32> to vector<2x8x8xbf16>
    %49 = vector.extract_strided_slice %16 {offsets = [0, 8], sizes = [16, 8], strides = [1, 1]} : vector<16x32xf32> to vector<16x8xf32>
    %50 = vector.shape_cast %49 : vector<16x8xf32> to vector<2x8x8xf32>
    %51 = arith.truncf %50 : vector<2x8x8xf32> to vector<2x8x8xbf16>
    "tpu.trace_start"() <{level = 10 : i32, message = "bqd,bkd->bqk"}> : () -> ()
    %cst_12 = arith.constant dense<0.000000e+00> : vector<2x8x8xf32>
    %52 = tpu.matmul %45, %48, %cst_12 {dimension_numbers = #tpu.dot_dimension_numbers<[2], [2], [1], [1], [0, 0, 0, 1, 1, 1], [0], [0]>} : vector<2x8x8xbf16>, vector<2x8x8xbf16>, vector<2x8x8xf32> -> vector<2x8x8xf32>
    "tpu.trace_stop"() : () -> ()
    %53 = vector.shape_cast %13 : vector<8x8xf32> to vector<1x8x8xf32>
    %54 = vector.broadcast %53 : vector<1x8x8xf32> to vector<2x8x8xf32>
    %55 = arith.addf %52, %54 : vector<2x8x8xf32>
    %cst_13 = arith.constant dense<0xFF800000> : vector<2x8xf32>
    %56 = vector.multi_reduction <maximumf>, %55, %cst_13 [2] : vector<2x8x8xf32> to vector<2x8xf32>
    %57 = vector.shape_cast %56 : vector<2x8xf32> to vector<2x8x1xf32>
    %58 = vector.broadcast %57 : vector<2x8x1xf32> to vector<2x8x8xf32>
    %59 = arith.subf %55, %58 : vector<2x8x8xf32>
    %60 = math.exp %59 : vector<2x8x8xf32>
    %cst_14 = arith.constant dense<0.000000e+00> : vector<2x8xf32>
    %61 = vector.multi_reduction <add>, %60, %cst_14 [2] : vector<2x8x8xf32> to vector<2x8xf32>
    %62 = vector.shape_cast %61 : vector<2x8xf32> to vector<2x8x1xf32>
    %63 = arith.truncf %60 : vector<2x8x8xf32> to vector<2x8x8xbf16>
    "tpu.trace_start"() <{level = 10 : i32, message = "bqk,bkd->bqd"}> : () -> ()
    %cst_15 = arith.constant dense<0.000000e+00> : vector<2x8x8xf32>
    %64 = tpu.matmul %63, %51, %cst_15 {dimension_numbers = #tpu.dot_dimension_numbers<[2], [1], [1], [2], [0, 0, 0, 1, 1, 2], [0], [0]>} : vector<2x8x8xbf16>, vector<2x8x8xbf16>, vector<2x8x8xf32> -> vector<2x8x8xf32>
    "tpu.trace_stop"() : () -> ()
    %65 = tpu.reciprocal %62 {approx = true} : vector<2x8x1xf32> -> vector<2x8x1xf32>
    %66 = vector.broadcast %65 : vector<2x8x1xf32> to vector<2x8x8xf32>
    %67 = arith.mulf %64, %66 : vector<2x8x8xf32>
    %68 = vector.shape_cast %67 : vector<2x8x8xf32> to vector<16x8xf32>
    %69 = vector.extract_strided_slice %14 {offsets = [0, 16], sizes = [16, 8], strides = [1, 1]} : vector<16x32xf32> to vector<16x8xf32>
    %70 = vector.shape_cast %69 : vector<16x8xf32> to vector<2x8x8xf32>
    %71 = arith.truncf %70 : vector<2x8x8xf32> to vector<2x8x8xbf16>
    %72 = vector.extract_strided_slice %15 {offsets = [0, 16], sizes = [16, 8], strides = [1, 1]} : vector<16x32xf32> to vector<16x8xf32>
    %73 = vector.shape_cast %72 : vector<16x8xf32> to vector<2x8x8xf32>
    %74 = arith.truncf %73 : vector<2x8x8xf32> to vector<2x8x8xbf16>
    %75 = vector.extract_strided_slice %16 {offsets = [0, 16], sizes = [16, 8], strides = [1, 1]} : vector<16x32xf32> to vector<16x8xf32>
    %76 = vector.shape_cast %75 : vector<16x8xf32> to vector<2x8x8xf32>
    %77 = arith.truncf %76 : vector<2x8x8xf32> to vector<2x8x8xbf16>
    "tpu.trace_start"() <{level = 10 : i32, message = "bqd,bkd->bqk"}> : () -> ()
    %cst_16 = arith.constant dense<0.000000e+00> : vector<2x8x8xf32>
    %78 = tpu.matmul %71, %74, %cst_16 {dimension_numbers = #tpu.dot_dimension_numbers<[2], [2], [1], [1], [0, 0, 0, 1, 1, 1], [0], [0]>} : vector<2x8x8xbf16>, vector<2x8x8xbf16>, vector<2x8x8xf32> -> vector<2x8x8xf32>
    "tpu.trace_stop"() : () -> ()
    %79 = vector.shape_cast %13 : vector<8x8xf32> to vector<1x8x8xf32>
    %80 = vector.broadcast %79 : vector<1x8x8xf32> to vector<2x8x8xf32>
    %81 = arith.addf %78, %80 : vector<2x8x8xf32>
    %cst_17 = arith.constant dense<0xFF800000> : vector<2x8xf32>
    %82 = vector.multi_reduction <maximumf>, %81, %cst_17 [2] : vector<2x8x8xf32> to vector<2x8xf32>
    %83 = vector.shape_cast %82 : vector<2x8xf32> to vector<2x8x1xf32>
    %84 = vector.broadcast %83 : vector<2x8x1xf32> to vector<2x8x8xf32>
    %85 = arith.subf %81, %84 : vector<2x8x8xf32>
    %86 = math.exp %85 : vector<2x8x8xf32>
    %cst_18 = arith.constant dense<0.000000e+00> : vector<2x8xf32>
    %87 = vector.multi_reduction <add>, %86, %cst_18 [2] : vector<2x8x8xf32> to vector<2x8xf32>
    %88 = vector.shape_cast %87 : vector<2x8xf32> to vector<2x8x1xf32>
    %89 = arith.truncf %86 : vector<2x8x8xf32> to vector<2x8x8xbf16>
    "tpu.trace_start"() <{level = 10 : i32, message = "bqk,bkd->bqd"}> : () -> ()
    %cst_19 = arith.constant dense<0.000000e+00> : vector<2x8x8xf32>
    %90 = tpu.matmul %89, %77, %cst_19 {dimension_numbers = #tpu.dot_dimension_numbers<[2], [1], [1], [2], [0, 0, 0, 1, 1, 2], [0], [0]>} : vector<2x8x8xbf16>, vector<2x8x8xbf16>, vector<2x8x8xf32> -> vector<2x8x8xf32>
    "tpu.trace_stop"() : () -> ()
    %91 = tpu.reciprocal %88 {approx = true} : vector<2x8x1xf32> -> vector<2x8x1xf32>
    %92 = vector.broadcast %91 : vector<2x8x1xf32> to vector<2x8x8xf32>
    %93 = arith.mulf %90, %92 : vector<2x8x8xf32>
    %94 = vector.shape_cast %93 : vector<2x8x8xf32> to vector<16x8xf32>
    %95 = vector.extract_strided_slice %14 {offsets = [0, 24], sizes = [16, 8], strides = [1, 1]} : vector<16x32xf32> to vector<16x8xf32>
    %96 = vector.shape_cast %95 : vector<16x8xf32> to vector<2x8x8xf32>
    %97 = arith.truncf %96 : vector<2x8x8xf32> to vector<2x8x8xbf16>
    %98 = vector.extract_strided_slice %15 {offsets = [0, 24], sizes = [16, 8], strides = [1, 1]} : vector<16x32xf32> to vector<16x8xf32>
    %99 = vector.shape_cast %98 : vector<16x8xf32> to vector<2x8x8xf32>
    %100 = arith.truncf %99 : vector<2x8x8xf32> to vector<2x8x8xbf16>
    %101 = vector.extract_strided_slice %16 {offsets = [0, 24], sizes = [16, 8], strides = [1, 1]} : vector<16x32xf32> to vector<16x8xf32>
    %102 = vector.shape_cast %101 : vector<16x8xf32> to vector<2x8x8xf32>
    %103 = arith.truncf %102 : vector<2x8x8xf32> to vector<2x8x8xbf16>
    "tpu.trace_start"() <{level = 10 : i32, message = "bqd,bkd->bqk"}> : () -> ()
    %cst_20 = arith.constant dense<0.000000e+00> : vector<2x8x8xf32>
    %104 = tpu.matmul %97, %100, %cst_20 {dimension_numbers = #tpu.dot_dimension_numbers<[2], [2], [1], [1], [0, 0, 0, 1, 1, 1], [0], [0]>} : vector<2x8x8xbf16>, vector<2x8x8xbf16>, vector<2x8x8xf32> -> vector<2x8x8xf32>
    "tpu.trace_stop"() : () -> ()
    %105 = vector.shape_cast %13 : vector<8x8xf32> to vector<1x8x8xf32>
    %106 = vector.broadcast %105 : vector<1x8x8xf32> to vector<2x8x8xf32>
    %107 = arith.addf %104, %106 : vector<2x8x8xf32>
    %cst_21 = arith.constant dense<0xFF800000> : vector<2x8xf32>
    %108 = vector.multi_reduction <maximumf>, %107, %cst_21 [2] : vector<2x8x8xf32> to vector<2x8xf32>
    %109 = vector.shape_cast %108 : vector<2x8xf32> to vector<2x8x1xf32>
    %110 = vector.broadcast %109 : vector<2x8x1xf32> to vector<2x8x8xf32>
    %111 = arith.subf %107, %110 : vector<2x8x8xf32>
    %112 = math.exp %111 : vector<2x8x8xf32>
    %cst_22 = arith.constant dense<0.000000e+00> : vector<2x8xf32>
    %113 = vector.multi_reduction <add>, %112, %cst_22 [2] : vector<2x8x8xf32> to vector<2x8xf32>
    %114 = vector.shape_cast %113 : vector<2x8xf32> to vector<2x8x1xf32>
    %115 = arith.truncf %112 : vector<2x8x8xf32> to vector<2x8x8xbf16>
    "tpu.trace_start"() <{level = 10 : i32, message = "bqk,bkd->bqd"}> : () -> ()
    %cst_23 = arith.constant dense<0.000000e+00> : vector<2x8x8xf32>
    %116 = tpu.matmul %115, %103, %cst_23 {dimension_numbers = #tpu.dot_dimension_numbers<[2], [1], [1], [2], [0, 0, 0, 1, 1, 2], [0], [0]>} : vector<2x8x8xbf16>, vector<2x8x8xbf16>, vector<2x8x8xf32> -> vector<2x8x8xf32>
    "tpu.trace_stop"() : () -> ()
    %117 = tpu.reciprocal %114 {approx = true} : vector<2x8x1xf32> -> vector<2x8x1xf32>
    %118 = vector.broadcast %117 : vector<2x8x1xf32> to vector<2x8x8xf32>
    %119 = arith.mulf %116, %118 : vector<2x8x8xf32>
    %120 = vector.shape_cast %119 : vector<2x8x8xf32> to vector<16x8xf32>
    %121 = tpu.concatenate %42, %68, %94, %120 in 1 : vector<16x8xf32>, vector<16x8xf32>, vector<16x8xf32>, vector<16x8xf32> -> vector<16x32xf32>
    %122 = arith.truncf %121 : vector<16x32xf32> to vector<16x32xbf16>
    %c0_24 = arith.constant 0 : index
    %c0_25 = arith.constant 0 : index
    %123 = vector.load %arg4[%c0_24, %c0_25] : memref<32x32xbf16, #tpu.memory_space<vmem>>, vector<32x32xbf16>
    %cst_26 = arith.constant dense<0.000000e+00> : vector<16x32xf32>
    %124 = tpu.matmul %122, %123, %cst_26 {dimension_numbers = #tpu.dot_dimension_numbers<[1], [0], [0], [1], [0, 0, 1, 1], [], []>} : vector<16x32xbf16>, vector<32x32xbf16>, vector<16x32xf32> -> vector<16x32xf32>
    %c0_27 = arith.constant 0 : index
    %c0_28 = arith.constant 0 : index
    %125 = vector.load %arg5[%c0_27, %c0_28] : memref<1x32xf32, #tpu.memory_space<vmem>>, vector<1x32xf32>
    %126 = vector.broadcast %125 : vector<1x32xf32> to vector<16x32xf32>
    %127 = arith.addf %124, %126 : vector<16x32xf32>
    %128 = arith.addf %1, %127 : vector<16x32xf32>
    %c0_29 = arith.constant 0 : index
    %c0_30 = arith.constant 0 : index
    %129 = vector.load %arg6[%c0_29, %c0_30] : memref<1x32xf32, #tpu.memory_space<vmem>>, vector<1x32xf32>
    %c0_31 = arith.constant 0 : index
    %c0_32 = arith.constant 0 : index
    %130 = vector.load %arg7[%c0_31, %c0_32] : memref<1x32xf32, #tpu.memory_space<vmem>>, vector<1x32xf32>
    %cst_33 = arith.constant dense<0.000000e+00> : vector<16xf32>
    %131 = vector.multi_reduction <add>, %128, %cst_33 [1] : vector<16x32xf32> to vector<16xf32>
    %132 = vector.shape_cast %131 : vector<16xf32> to vector<16x1xf32>
    %cst_34 = arith.constant 3.200000e+01 : f32
    %133 = vector.broadcast %cst_34 : f32 to vector<16x1xf32>
    %134 = arith.divf %132, %133 : vector<16x1xf32>
    %135 = vector.broadcast %134 : vector<16x1xf32> to vector<16x32xf32>
    %136 = arith.subf %128, %135 : vector<16x32xf32>
    %137 = arith.mulf %136, %136 : vector<16x32xf32>
    %cst_35 = arith.constant dense<0.000000e+00> : vector<16xf32>
    %138 = vector.multi_reduction <add>, %137, %cst_35 [1] : vector<16x32xf32> to vector<16xf32>
    %139 = vector.shape_cast %138 : vector<16xf32> to vector<16x1xf32>
    %cst_36 = arith.constant 3.200000e+01 : f32
    %140 = vector.broadcast %cst_36 : f32 to vector<16x1xf32>
    %141 = arith.divf %139, %140 : vector<16x1xf32>
    %142 = vector.broadcast %134 : vector<16x1xf32> to vector<16x32xf32>
    %143 = arith.subf %128, %142 : vector<16x32xf32>
    %cst_37 = arith.constant 9.99999974E-6 : f32
    %144 = vector.broadcast %cst_37 : f32 to vector<16x1xf32>
    %145 = arith.addf %141, %144 : vector<16x1xf32>
    %146 = math.rsqrt %145 : vector<16x1xf32>
    %147 = vector.broadcast %146 : vector<16x1xf32> to vector<16x32xf32>
    %148 = arith.mulf %143, %147 : vector<16x32xf32>
    %149 = vector.broadcast %129 : vector<1x32xf32> to vector<16x32xf32>
    %150 = arith.mulf %148, %149 : vector<16x32xf32>
    %151 = vector.broadcast %130 : vector<1x32xf32> to vector<16x32xf32>
    %152 = arith.addf %150, %151 : vector<16x32xf32>
    %153 = arith.truncf %152 : vector<16x32xf32> to vector<16x32xbf16>
    %c0_38 = arith.constant 0 : index
    %c0_39 = arith.constant 0 : index
    %154 = vector.load %arg10[%c0_38, %c0_39] : memref<32x128xbf16, #tpu.memory_space<vmem>>, vector<32x128xbf16>
    %cst_40 = arith.constant dense<0.000000e+00> : vector<16x128xf32>
    %155 = tpu.matmul %153, %154, %cst_40 {dimension_numbers = #tpu.dot_dimension_numbers<[1], [0], [0], [1], [0, 0, 1, 1], [], []>} : vector<16x32xbf16>, vector<32x128xbf16>, vector<16x128xf32> -> vector<16x128xf32>
    %c0_41 = arith.constant 0 : index
    %c0_42 = arith.constant 0 : index
    %156 = vector.load %arg11[%c0_41, %c0_42] : memref<1x128xf32, #tpu.memory_space<vmem>>, vector<1x128xf32>
    %157 = vector.broadcast %156 : vector<1x128xf32> to vector<16x128xf32>
    %158 = arith.addf %155, %157 : vector<16x128xf32>
    %cst_43 = arith.constant 5.000000e-01 : f32
    %159 = vector.broadcast %cst_43 : f32 to vector<16x128xf32>
    %160 = arith.mulf %159, %158 : vector<16x128xf32>
    %cst_44 = arith.constant 0.707106769 : f32
    %161 = vector.broadcast %cst_44 : f32 to vector<16x128xf32>
    %162 = arith.mulf %158, %161 : vector<16x128xf32>
    %163 = math.erf %162 : vector<16x128xf32>
    %cst_45 = arith.constant 1.000000e+00 : f32
    %164 = vector.broadcast %cst_45 : f32 to vector<16x128xf32>
    %165 = arith.addf %164, %163 : vector<16x128xf32>
    %166 = arith.mulf %160, %165 : vector<16x128xf32>
    %167 = arith.truncf %166 : vector<16x128xf32> to vector<16x128xbf16>
    %c0_46 = arith.constant 0 : index
    %c0_47 = arith.constant 0 : index
    %168 = vector.load %arg12[%c0_46, %c0_47] : memref<128x32xbf16, #tpu.memory_space<vmem>>, vector<128x32xbf16>
    %cst_48 = arith.constant dense<0.000000e+00> : vector<16x32xf32>
    %169 = tpu.matmul %167, %168, %cst_48 {dimension_numbers = #tpu.dot_dimension_numbers<[1], [0], [0], [1], [0, 0, 1, 1], [], []>} : vector<16x128xbf16>, vector<128x32xbf16>, vector<16x32xf32> -> vector<16x32xf32>
    %c0_49 = arith.constant 0 : index
    %c0_50 = arith.constant 0 : index
    %170 = vector.load %arg13[%c0_49, %c0_50] : memref<1x32xf32, #tpu.memory_space<vmem>>, vector<1x32xf32>
    %171 = vector.broadcast %170 : vector<1x32xf32> to vector<16x32xf32>
    %172 = arith.addf %169, %171 : vector<16x32xf32>
    %173 = arith.addf %152, %172 : vector<16x32xf32>
    %c0_51 = arith.constant 0 : index
    %c0_52 = arith.constant 0 : index
    %174 = vector.load %arg8[%c0_51, %c0_52] : memref<1x32xf32, #tpu.memory_space<vmem>>, vector<1x32xf32>
    %c0_53 = arith.constant 0 : index
    %c0_54 = arith.constant 0 : index
    %175 = vector.load %arg9[%c0_53, %c0_54] : memref<1x32xf32, #tpu.memory_space<vmem>>, vector<1x32xf32>
    %cst_55 = arith.constant dense<0.000000e+00> : vector<16xf32>
    %176 = vector.multi_reduction <add>, %173, %cst_55 [1] : vector<16x32xf32> to vector<16xf32>
    %177 = vector.shape_cast %176 : vector<16xf32> to vector<16x1xf32>
    %cst_56 = arith.constant 3.200000e+01 : f32
    %178 = vector.broadcast %cst_56 : f32 to vector<16x1xf32>
    %179 = arith.divf %177, %178 : vector<16x1xf32>
    %180 = vector.broadcast %179 : vector<16x1xf32> to vector<16x32xf32>
    %181 = arith.subf %173, %180 : vector<16x32xf32>
    %182 = arith.mulf %181, %181 : vector<16x32xf32>
    %cst_57 = arith.constant dense<0.000000e+00> : vector<16xf32>
    %183 = vector.multi_reduction <add>, %182, %cst_57 [1] : vector<16x32xf32> to vector<16xf32>
    %184 = vector.shape_cast %183 : vector<16xf32> to vector<16x1xf32>
    %cst_58 = arith.constant 3.200000e+01 : f32
    %185 = vector.broadcast %cst_58 : f32 to vector<16x1xf32>
    %186 = arith.divf %184, %185 : vector<16x1xf32>
    %187 = vector.broadcast %179 : vector<16x1xf32> to vector<16x32xf32>
    %188 = arith.subf %173, %187 : vector<16x32xf32>
    %cst_59 = arith.constant 9.99999974E-6 : f32
    %189 = vector.broadcast %cst_59 : f32 to vector<16x1xf32>
    %190 = arith.addf %186, %189 : vector<16x1xf32>
    %191 = math.rsqrt %190 : vector<16x1xf32>
    %192 = vector.broadcast %191 : vector<16x1xf32> to vector<16x32xf32>
    %193 = arith.mulf %188, %192 : vector<16x32xf32>
    %194 = vector.broadcast %174 : vector<1x32xf32> to vector<16x32xf32>
    %195 = arith.mulf %193, %194 : vector<16x32xf32>
    %196 = vector.broadcast %175 : vector<1x32xf32> to vector<16x32xf32>
    %197 = arith.addf %195, %196 : vector<16x32xf32>
    %198 = vector.shape_cast %197 : vector<16x32xf32> to vector<2x8x32xf32>
    %c0_60 = arith.constant 0 : index
    %c0_61 = arith.constant 0 : index
    %c0_62 = arith.constant 0 : index
    %199 = vector.load %arg14[%c0_60, %c0_61, %c0_62] : memref<2x8x32xf32, #tpu.memory_space<vmem>>, vector<2x8x32xf32>
    tpu.vector_store %arg14[%c0_60, %c0_61, %c0_62], %198 {strides = array<i32>} : memref<2x8x32xf32, #tpu.memory_space<vmem>>, vector<2x8x32xf32>,
    return
  }
  func.func @transform_0(%arg0: i32) -> (i32, i32, i32) {
    %c0_i32 = arith.constant 0 : i32
    %c0_i32_0 = arith.constant 0 : i32
    %c0_i32_1 = arith.constant 0 : i32
    return %arg0, %c0_i32, %c0_i32_0 : i32, i32, i32
  }
  func.func @transform_1(%arg0: i32) -> (i32, i32) {
    %c0_i32 = arith.constant 0 : i32
    %c0_i32_0 = arith.constant 0 : i32
    %c0_i32_1 = arith.constant 0 : i32
    return %c0_i32, %c0_i32_0 : i32, i32
  }
  func.func @transform_2(%arg0: i32) -> (i32, i32) {
    %c0_i32 = arith.constant 0 : i32
    %c0_i32_0 = arith.constant 0 : i32
    %c0_i32_1 = arith.constant 0 : i32
    return %c0_i32, %c0_i32_0 : i32, i32
  }
  func.func @transform_3(%arg0: i32) -> (i32, i32) {
    %c0_i32 = arith.constant 0 : i32
    %c0_i32_0 = arith.constant 0 : i32
    %c0_i32_1 = arith.constant 0 : i32
    return %c0_i32, %c0_i32_0 : i32, i32
  }
  func.func @transform_4(%arg0: i32) -> (i32, i32) {
    %c0_i32 = arith.constant 0 : i32
    %c0_i32_0 = arith.constant 0 : i32
    %c0_i32_1 = arith.constant 0 : i32
    return %c0_i32, %c0_i32_0 : i32, i32
  }
  func.func @transform_5(%arg0: i32) -> (i32, i32) {
    %c0_i32 = arith.constant 0 : i32
    %c0_i32_0 = arith.constant 0 : i32
    %c0_i32_1 = arith.constant 0 : i32
    return %c0_i32, %c0_i32_0 : i32, i32
  }
  func.func @transform_6(%arg0: i32) -> (i32, i32) {
    %c0_i32 = arith.constant 0 : i32
    %c0_i32_0 = arith.constant 0 : i32
    %c0_i32_1 = arith.constant 0 : i32
    return %c0_i32, %c0_i32_0 : i32, i32
  }
  func.func @transform_7(%arg0: i32) -> (i32, i32) {
    %c0_i32 = arith.constant 0 : i32
    %c0_i32_0 = arith.constant 0 : i32
    %c0_i32_1 = arith.constant 0 : i32
    return %c0_i32, %c0_i32_0 : i32, i32
  }
  func.func @transform_8(%arg0: i32) -> (i32, i32) {
    %c0_i32 = arith.constant 0 : i32
    %c0_i32_0 = arith.constant 0 : i32
    %c0_i32_1 = arith.constant 0 : i32
    return %c0_i32, %c0_i32_0 : i32, i32
  }
  func.func @transform_9(%arg0: i32) -> (i32, i32) {
    %c0_i32 = arith.constant 0 : i32
    %c0_i32_0 = arith.constant 0 : i32
    %c0_i32_1 = arith.constant 0 : i32
    return %c0_i32, %c0_i32_0 : i32, i32
  }
  func.func @transform_10(%arg0: i32) -> (i32, i32) {
    %c0_i32 = arith.constant 0 : i32
    %c0_i32_0 = arith.constant 0 : i32
    %c0_i32_1 = arith.constant 0 : i32
    return %c0_i32, %c0_i32_0 : i32, i32
  }
  func.func @transform_11(%arg0: i32) -> (i32, i32) {
    %c0_i32 = arith.constant 0 : i32
    %c0_i32_0 = arith.constant 0 : i32
    %c0_i32_1 = arith.constant 0 : i32
    return %c0_i32, %c0_i32_0 : i32, i32
  }
  func.func @transform_12(%arg0: i32) -> (i32, i32) {
    %c0_i32 = arith.constant 0 : i32
    %c0_i32_0 = arith.constant 0 : i32
    %c0_i32_1 = arith.constant 0 : i32
    return %c0_i32, %c0_i32_0 : i32, i32
  }
  func.func @transform_13(%arg0: i32) -> (i32, i32, i32) {
    %c0_i32 = arith.constant 0 : i32
    %c0_i32_0 = arith.constant 0 : i32
    %c0_i32_1 = arith.constant 0 : i32
    return %arg0, %c0_i32, %c0_i32_0 : i32, i32, i32
  }
}

</mosaic_0001>

<bundles_post_ra>
// kernel: tpu_custom_call.1
= control target key start
LH: loop header
LB: loop body
LE: loop exit
PB: predicated region body
PF: predicated region fallthrough
CT: control target
= control target key end

     0   :  { %s2926_s0 = inlined_call_operand.vmem [shape: f32[2,8,32], index: 0, kind: input, shape index: {}]   ;;  %s2927_s1 = inlined_call_operand.vmem [shape: bf16[32,96], index: 1, kind: input, shape index: {}]   ;;  %s2928_s2 = inlined_call_operand.vmem [shape: f32[1,96], index: 2, kind: input, shape index: {}]   ;;  %s2929_s3 = inlined_call_operand.vmem [shape: bf16[32,32], index: 3, kind: input, shape index: {}]   ;;  %s2930_s4 = inlined_call_operand.vmem [shape: f32[1,32], index: 4, kind: input, shape index: {}]   ;;  %s2931_s5 = inlined_call_operand.vmem [shape: f32[1,32], index: 5, kind: input, shape index: {}]   ;;  %s2932_s6 = inlined_call_operand.vmem [shape: f32[1,32], index: 6, kind: input, shape index: {}]   ;;  %s2933_s7 = inlined_call_operand.vmem [shape: f32[1,32], index: 7, kind: input, shape index: {}]   ;;  %s2934_s8 = inlined_call_operand.vmem [shape: f32[1,32], index: 8, kind: input, shape index: {}]   ;;  %s2935_s9 = inlined_call_operand.vmem [shape: bf16[32,128], index: 9, kind: input, shape index: {}]   ;;  %s2936_s10 = inlined_call_operand.vmem [shape: f32[1,128], index: 10, kind: input, shape index: {}]   ;;  %s2937_s11 = inlined_call_operand.vmem [shape: bf16[128,32], index: 11, kind: input, shape index: {}]   ;;  %s2938_s12 = inlined_call_operand.vmem [shape: f32[1,32], index: 12, kind: input, shape index: {}]   ;;  %s2939_s13 = inlined_call_operand.hbm [shape: f32[2,8,32], index: 13, kind: output, shape index: {}]  }
   0x1   :  { %v1968_v0 = vld [vmem:[%s2927_s1 + $0x8] sm:$0xff]  ;;  %v1967_v1 = vld [vmem:[%s2927_s1] sm:$0xff] }
   0x2   :  { %v46_v2 = vld [vmem:[%s2926_s0] sm:$0xff]  ;;  %v47_v3 = vld [vmem:[%s2926_s0 + $0x8] sm:$0xff]  ;;  %79 = vmatpush.bf16.msra.mxu0 %v1968_v0 }
   0x3   :  { %18 = vsyncpa [#allocation3], 0  ;;  %v48_v4 = vpack.c.bf16 %v47_v3, %v46_v2  ;;  %vm69_vm0 = vcmask 261120   ;;  %v2050_v5 = vld [vmem:[%s2928_s2] ss:$0 sm:$0xff]  ;;  %s2132_s1 = smov 104  }
   0x4   :  { %s2133_s18 = smov 120   ;;  %s2134_s19 = smov 112   ;;  %vm114_vm1 = vcmask 1047556   ;;  %v2135_v16 = vmov 1983009808   ;;  %vm846_vm2 = vcmask 64512  }
   0x5   :  { %v119_v17 = vunpack.c.l.s4 %v2135_v16  ;;  %s2136_s2 = smov 96   ;;  %v2137_v26 = vmov 1934713408   ;;  %s2138_s20 = smov 64   ;;  %vm1082_vm3 = vcmask 1043456   ;;  %vm1494_vm5 = vcmask 130048  }
   0x6   :  { %80 = vmatpush.bf16.msra.mxu0 %v1967_v1  ;;  %v143_v27 = vunpack.c.l.s4 %v2137_v26  ;;  %s2140_s21 = smov 24   ;;  %s2141_s22 = smov 16   ;;  %vm1497_vm6 = vcmask 195584  }
   0x7   :  { %v2241_v20 = vunpack.c.0.s8 %v119_v17  ;;  %s2142_s23 = smov 8  }
   0x8   :  { %v2256_v38 = vunpack.c.0.s8 %v143_v27 }
   0x9   :  { %1898 = vmatmul.msk.bf16.vlgmr.msra.gmra.mxu0 %vm69_vm0, %v48_v4 }
  0x86   :  { %v82_v6 = vpop.f32.mrf.mxu0 }
  0x87   :  { %v83_v7 = vadd.f32 %v2050_v5, %v82_v6 }
  0x89   :  { %107 = vrot.lane.b32.xlu1 %v83_v7, %s2132_s1  ;;  %95 = vrot.lane.b32.xlu0 %v83_v7, %s2133_s18  ;;  %v116_v24 = vrot.slane %v83_v7, 4 }
  0x8e   :  { %v84_v8 = vpop.f32.mrf.mxu0 }
  0x8f   :  { %v2232_v9 = vadd.f32 %v2050_v5, %v84_v8 }
  0x91   :  { %103 = vrot.lane.b32.xlu2 %v2232_v9, %s2134_s19  ;;  %97 = vrot.lane.b32.xlu1 %v2232_v9, %s2133_s18  ;;  %s1878_s18 = sshll.u32 %s2939_s13, 4  ;;  %s1879_s18 = int_to_ptr.hbm [resolvable:$true] %s1878_s18 }
  0x92   :  { %101 = vrot.lane.b32.xlu0 %v83_v7, %s2134_s19  ;;  %s2144_s19 = smov [#allocation2]  }
  0x99   :  { %109 = vrot.lane.b32.xlu2 %v2232_v9, %s2132_s1 }
  0xeb   :  { %v2237_v10 = vpop.permute.xlu2 %103 }
  0xf3   :  { %v2243_v21 = vpop.permute.xlu2 %109 }
  0xf4   :  { %v2010_v30 = vpack.i.bf16 %v2243_v21, %v2237_v10 }
  0xfb   :  { %v108_v11 = vpop.permute.xlu1 %107  ;;  %v96_v12 = vpop.permute.xlu0 %95 }
  0xfc   :  { %v126_v13 = vrot.slane %v108_v11, 4  ;;  %v128_v14 = vrot.slane %v96_v12, 4  ;;  %v1995_v15 = vpack.i.bf16 %v96_v12, %v83_v7 }
  0xfe   :  { %v127_v18 = vsel %vm114_vm1, %v126_v13, %v96_v12  ;;  %v129_v19 = vsel %vm114_vm1, %v108_v11, %v128_v14  ;;  %1996 = vrot.lane.b32.xlu0 %v1995_v15, %s2136_s2 }
  0xff   :  { %v137_v22 = vperm.slane %v129_v19, %v2241_v20  ;;  %v133_v25 = vperm.slane %v127_v18, %v2241_v20 }
 0x101   :  { %v150_v35 = vrot.slane %v137_v22, 4  ;;  %v138_v37 = vrot.slane %v133_v25, 4 }
 0x103   :  { %v2246_v23 = vpop.permute.xlu1 %97 }
 0x104   :  { %v102_v28 = vpop.permute.xlu0 %101  ;;  %v2005_v29 = vpack.i.bf16 %v2246_v23, %v2232_v9 }
 0x105   :  { %v113_v31 = vrot.slane %v102_v28, 4  ;;  %v117_v32 = vsel %vm114_vm1, %v102_v28, %v116_v24  ;;  %v2000_v33 = vpack.i.bf16 %v108_v11, %v102_v28 }
 0x106   :  { %v125_v34 = vperm.slane %v117_v32, %v2241_v20  ;;  %2006 = vrot.lane.b32.xlu2 %v2005_v29, %s2136_s2  ;;  %2011 = vrot.lane.b32.xlu0 %v2010_v30, %s2136_s2 }
 0x107   :  { %v115_v36 = vsel %vm114_vm1, %v113_v31, %v83_v7  ;;  %2001 = vrot.lane.b32.xlu1 %v2000_v33, %s2136_s2  ;;  %v184_v31 = vrot.slane %v2246_v23, 4 }
 0x108   :  { %v121_v39 = vperm.slane %v115_v36, %v2241_v20  ;;  %v152_v40 = vrot.slane %v125_v34, 4  ;;  %v151_v41 = vsel %vm114_vm1, %v150_v35, %v125_v34  ;;  %v182_v34 = vrot.slane %v2243_v21, 4 }
 0x109   :  { %v157_v45 = vperm.slane %v151_v41, %v2256_v38  ;;  %v185_v35 = vsel %vm114_vm1, %v2243_v21, %v184_v31 }
 0x10a   :  { %v139_v42 = vsel %vm114_vm1, %v138_v37, %v121_v39  ;;  %v140_v43 = vrot.slane %v121_v39, 4  ;;  %v153_v44 = vsel %vm114_vm1, %v137_v22, %v152_v40  ;;  %v183_v37 = vsel %vm114_vm1, %v182_v34, %v2246_v23 }
 0x10b   :  { %v145_v47 = vperm.slane %v139_v42, %v2256_v38  ;;  %v161_v48 = vperm.slane %v153_v44, %v2256_v38  ;;  %v166_v50 = vrot.slane %v157_v45, 4  ;;  %v193_v40 = vperm.slane %v185_v35, %v2241_v20 }
 0x10c   :  { %v141_v46 = vsel %vm114_vm1, %v133_v25, %v140_v43  ;;  %v189_v41 = vperm.slane %v183_v37, %v2241_v20 }
 0x10d   :  { %v149_v49 = vperm.slane %v141_v46, %v2256_v38  ;;  %v168_v51 = vrot.slane %v161_v48, 4  ;;  %v162_v52 = vrot.slane %v145_v47, 4  ;;  %v167_v60 = vsel %vm114_vm1, 0.0, %v166_v50 }
 0x10e   :  { %2026 = vrot.lane.b32.xlu0 %v2005_v29, %s2138_s20  ;;  %2021 = vrot.lane.b32.xlu2 %v2000_v33, %s2138_s20  ;;  %v170_v29 = vrot.slane %v2237_v10, 4  ;;  %v206_v43 = vrot.slane %v193_v40, 4  ;;  %v194_v44 = vrot.slane %v189_v41, 4 }
 0x10f   :  { %2016 = vrot.lane.b32.xlu1 %v1995_v15, %s2138_s20  ;;  %v164_v53 = vrot.slane %v149_v49, 4  ;;  %v169_v54 = vsel %vm114_vm1, 0.0, %v168_v51  ;;  %v237_v55 = vsel %vm114_vm1, %v168_v51, %v157_v45  ;;  %v163_v63 = vsel %vm114_vm1, 0.0, %v162_v52 }
 0x110   :  { %v241_v56 = vperm.slane %v237_v55, %v2241_v20  ;;  %v242_v57 = vrot.slane %v169_v54, 4  ;;  %v171_v33 = vsel %vm114_vm1, %v170_v29, %v2232_v9 }
 0x111   :  { %v165_v58 = vsel %vm114_vm1, 0.0, %v164_v53  ;;  %v226_v59 = vsel %vm114_vm1, %v164_v53, %v145_v47  ;;  %v177_v39 = vperm.slane %v171_v33, %v2241_v20 }
 0x112   :  { %v230_v61 = vperm.slane %v226_v59, %v2241_v20  ;;  %v231_v62 = vrot.slane %v165_v58, 4  ;;  %v243_v0 = vsel %vm114_vm1, %v242_v57, %v167_v60  ;;  %v262_v1 = vrot.slane %v241_v56, 4 }
 0x113   :  { %v247_v3 = vperm.slane %v243_v0, %v2241_v20  ;;  %v196_v42 = vrot.slane %v177_v39, 4  ;;  %v195_v47 = vsel %vm114_vm1, %v194_v44, %v177_v39 }
 0x114   :  { %v232_v2 = vsel %vm114_vm1, %v231_v62, %v163_v63  ;;  %v250_v4 = vrot.slane %v230_v61, 4  ;;  %v201_v50 = vperm.slane %v195_v47, %v2256_v38 }
 0x115   :  { %v236_v5 = vperm.slane %v232_v2, %v2241_v20  ;;  %v263_v6 = vsel %vm114_vm1, %v247_v3, %v262_v1  ;;  %v260_v7 = vrot.slane %v247_v3, 4  ;;  %v197_v45 = vsel %vm114_vm1, %v189_v41, %v196_v42 }
 0x116   :  { %2031 = vrot.lane.b32.xlu2 %v2010_v30, %s2138_s20  ;;  %v271_v11 = vperm.slane %v263_v6, %v2256_v38  ;;  %v172_v30 = vrot.slane %v2232_v9, 4  ;;  %v205_v46 = vperm.slane %v197_v45, %v2256_v38  ;;  %v218_v54 = vrot.slane %v201_v50, 4 }
 0x117   :  { %v251_v8 = vsel %vm114_vm1, %v236_v5, %v250_v4  ;;  %v248_v12 = vrot.slane %v236_v5, 4  ;;  %v261_v14 = vsel %vm114_vm1, %v260_v7, %v241_v56 }
 0x118   :  { %v259_v13 = vperm.slane %v251_v8, %v2256_v38  ;;  %v276_v15 = vrot.slane %v271_v11, 4  ;;  %v267_v17 = vperm.slane %v261_v14, %v2256_v38  ;;  %v173_v32 = vsel %vm114_vm1, %v2237_v10, %v172_v30 }
 0x119   :  { %v249_v16 = vsel %vm114_vm1, %v248_v12, %v230_v61  ;;  %v181_v36 = vperm.slane %v173_v32, %v2241_v20  ;;  %v220_v51 = vrot.slane %v205_v46, 4  ;;  %v219_v62 = vsel %vm114_vm1, 0.0, %v218_v54 }
 0x11a   :  { %v278_v18 = vrot.slane %v259_v13, 4  ;;  %v255_v19 = vperm.slane %v249_v16, %v2256_v38  ;;  %v2288_v22 = vsel %vm114_vm1, %v276_v15, %v259_v13  ;;  %v272_v24 = vrot.slane %v267_v17, 4 }
 0x11b   :  { %v208_v10 = vrot.slane %v181_v36, 4  ;;  %v207_v23 = vsel %vm114_vm1, %v206_v43, %v181_v36  ;;  %v221_v55 = vsel %vm114_vm1, 0.0, %v220_v51  ;;  %v280_v59 = vsel %vm114_vm1, %v220_v51, %v201_v50 }
 0x11c   :  { %v2291_v25 = vsel %vm114_vm1, %v271_v11, %v278_v18  ;;  %v274_v26 = vrot.slane %v255_v19, 4  ;;  %v2294_v27 = vsel %vm114_vm1, %v272_v24, %v255_v19  ;;  %v213_v48 = vperm.slane %v207_v23, %v2256_v38 }
 0x11d   :  { %v209_v9 = vsel %vm114_vm1, %v193_v40, %v208_v10  ;;  %v285_v60 = vrot.slane %v221_v55, 4  ;;  %v284_v0 = vperm.slane %v280_v59, %v2241_v20  ;;  %v336_v40 = vpack.c.bf16 %v2288_v22, %v2288_v22 }
 0x11e   :  { %v2297_v28 = vsel %vm114_vm1, %v267_v17, %v274_v26  ;;  %v217_v21 = vperm.slane %v209_v9, %v2256_v38  ;;  %v222_v52 = vrot.slane %v213_v48, 4  ;;  %v334_v10 = vpack.c.bf16 %v2294_v27, %v2294_v27 }
 0x11f   :  { %v286_v2 = vsel %vm114_vm1, %v285_v60, %v219_v62  ;;  %v304_v6 = vrot.slane %v284_v0, 4  ;;  %v337_v42 = vpack.c.bf16 %v2291_v25, %v2291_v25  ;;  %v335_v43 = vpack.c.bf16 %v2297_v28, %v2297_v28 }
 0x120   :  { %v224_v49 = vrot.slane %v217_v21, 4  ;;  %v223_v58 = vsel %vm114_vm1, 0.0, %v222_v52  ;;  %v290_v5 = vperm.slane %v286_v2, %v2241_v20 }
 0x122   :  { %v225_v53 = vsel %vm114_vm1, 0.0, %v224_v49  ;;  %v291_v56 = vsel %vm114_vm1, %v224_v49, %v213_v48  ;;  %v305_v11 = vsel %vm114_vm1, %v290_v5, %v304_v6  ;;  %v302_v14 = vrot.slane %v290_v5, 4 }
 0x123   :  { %v296_v57 = vrot.slane %v225_v53, 4  ;;  %v295_v63 = vperm.slane %v291_v56, %v2241_v20  ;;  %v313_v13 = vperm.slane %v305_v11, %v2256_v38 }
 0x124   :  { %v303_v24 = vsel %vm114_vm1, %v302_v14, %v284_v0 }
 0x125   :  { %v297_v1 = vsel %vm114_vm1, %v296_v57, %v223_v58  ;;  %v316_v4 = vrot.slane %v295_v63, 4  ;;  %v332_v19 = vrot.slane %v313_v13, 4  ;;  %v2357_v36 = vperm.slane %v303_v24, %v2256_v38 }
 0x126   :  { %v301_v3 = vperm.slane %v297_v1, %v2241_v20 }
 0x128   :  { %v317_v8 = vsel %vm114_vm1, %v301_v3, %v316_v4  ;;  %v314_v15 = vrot.slane %v301_v3, 4 }
 0x129   :  { %v325_v12 = vperm.slane %v317_v8, %v2256_v38 }
 0x12a   :  { %v315_v26 = vsel %vm114_vm1, %v314_v15, %v295_v63 }
 0x12b   :  { %v330_v17 = vrot.slane %v325_v12, 4  ;;  %v2362_v41 = vsel %vm114_vm1, %v325_v12, %v332_v19  ;;  %v2371_v9 = vperm.slane %v315_v26, %v2256_v38 }
 0x12d   :  { %v2354_v35 = vsel %vm114_vm1, %v330_v17, %v313_v13 }
 0x160   :  { %v2328_v61 = vpop.permute.xlu2 %2006 }
 0x161   :  { %v2009_v29 = vunpack.i.h.bf16 %v2328_v61  ;;  %v2008_v30 = vunpack.i.l.bf16 %v2328_v61 }
 0x163   :  { %v436_v44 = vrot.slane %v2009_v29, 4  ;;  %v424_v45 = vrot.slane %v2008_v30, 4 }
 0x168   :  { %v2337_v7 = vpop.permute.xlu2 %2021 }
 0x169   :  { %v2024_v31 = vunpack.i.h.bf16 %v2337_v7  ;;  %v2023_v32 = vunpack.i.l.bf16 %v2337_v7 }
 0x16b   :  { %v2375_v21 = vrot.slane %v2024_v31, 4  ;;  %v2379_v46 = vrot.slane %v2023_v32, 4 }
 0x170   :  { %v1997_v16 = vpop.permute.xlu0 %1996  ;;  %v2343_v18 = vpop.permute.xlu2 %2031 }
 0x171   :  { %v2034_v33 = vunpack.i.h.bf16 %v2343_v18  ;;  %v2033_v34 = vunpack.i.l.bf16 %v2343_v18  ;;  %v1999_v37 = vunpack.i.h.bf16 %v1997_v16  ;;  %v1998_v39 = vunpack.i.l.bf16 %v1997_v16 }
 0x173   :  { %v2383_v47 = vrot.slane %v2034_v33, 4  ;;  %v2387_v48 = vrot.slane %v2033_v34, 4  ;;  %v380_v52 = vrot.slane %v1999_v37, 4  ;;  %v368_v53 = vrot.slane %v1998_v39, 4 }
 0x178   :  { %v2012_v23 = vpop.permute.xlu0 %2011 }
 0x179   :  { %v2002_v49 = vpop.permute.xlu1 %2001  ;;  %v2014_v50 = vunpack.i.h.bf16 %v2012_v23  ;;  %v2013_v51 = vunpack.i.l.bf16 %v2012_v23 }
 0x17a   :  { %v2004_v54 = vunpack.i.h.bf16 %v2002_v49  ;;  %v2003_v55 = vunpack.i.l.bf16 %v2002_v49 }
 0x17b   :  { %v434_v56 = vrot.slane %v2014_v50, 4  ;;  %v437_v57 = vsel %vm114_vm1, %v2014_v50, %v436_v44  ;;  %v422_v58 = vrot.slane %v2013_v51, 4  ;;  %v425_v59 = vsel %vm114_vm1, %v2013_v51, %v424_v45 }
 0x17c   :  { %v378_v60 = vrot.slane %v2004_v54, 4  ;;  %v366_v61 = vrot.slane %v2003_v55, 4  ;;  %v369_v62 = vsel %vm114_vm1, %v2003_v55, %v368_v53  ;;  %v381_v63 = vsel %vm114_vm1, %v2004_v54, %v380_v52 }
 0x17d   :  { %v377_v0 = vperm.slane %v369_v62, %v2241_v20  ;;  %v389_v1 = vperm.slane %v381_v63, %v2241_v20  ;;  %v435_v2 = vsel %vm114_vm1, %v434_v56, %v2009_v29  ;;  %v445_v3 = vperm.slane %v437_v57, %v2241_v20 }
 0x17e   :  { %v367_v4 = vsel %vm114_vm1, %v366_v61, %v1998_v39  ;;  %v379_v5 = vsel %vm114_vm1, %v378_v60, %v1999_v37  ;;  %v441_v6 = vperm.slane %v435_v2, %v2241_v20  ;;  %v423_v8 = vsel %vm114_vm1, %v422_v58, %v2008_v30 }
 0x17f   :  { %v373_v11 = vperm.slane %v367_v4, %v2241_v20  ;;  %v385_v12 = vperm.slane %v379_v5, %v2241_v20  ;;  %v402_v13 = vrot.slane %v389_v1, 4  ;;  %v404_v14 = vrot.slane %v377_v0, 4 }
 0x180   :  { %v446_v15 = vrot.slane %v441_v6, 4  ;;  %v458_v16 = vrot.slane %v445_v3, 4  ;;  %v429_v17 = vperm.slane %v423_v8, %v2241_v20  ;;  %v433_v19 = vperm.slane %v425_v59, %v2241_v20 }
 0x181   :  { %v390_v24 = vrot.slane %v385_v12, 4  ;;  %v392_v26 = vrot.slane %v373_v11, 4  ;;  %v403_v29 = vsel %vm114_vm1, %v402_v13, %v377_v0  ;;  %v405_v37 = vsel %vm114_vm1, %v389_v1, %v404_v14  ;;  %v2017_v60 = vpop.permute.xlu1 %2016  ;;  %v2027_v1 = vpop.permute.xlu0 %2026 }
 0x182   :  { %v2408_v30 = vperm.slane %v403_v29, %v2256_v38  ;;  %v413_v39 = vperm.slane %v405_v37, %v2256_v38  ;;  %v447_v44 = vsel %vm114_vm1, %v446_v15, %v429_v17  ;;  %v448_v45 = vrot.slane %v429_v17, 4 }
 0x183   :  { %v391_v23 = vsel %vm114_vm1, %v390_v24, %v373_v11  ;;  %v393_v49 = vsel %vm114_vm1, %v385_v12, %v392_v26  ;;  %v2415_v50 = vperm.slane %v447_v44, %v2256_v38  ;;  %v459_v51 = vsel %vm114_vm1, %v458_v16, %v433_v19 }
 0x184   :  { %v2419_v52 = vperm.slane %v391_v23, %v2256_v38  ;;  %v401_v53 = vperm.slane %v393_v49, %v2256_v38  ;;  %v418_v54 = vrot.slane %v2408_v30, 4  ;;  %v2423_v55 = vrot.slane %v413_v39, 4 }
 0x185   :  { %v449_v56 = vsel %vm114_vm1, %v441_v6, %v448_v45  ;;  %v460_v57 = vrot.slane %v433_v19, 4  ;;  %v465_v58 = vperm.slane %v459_v51, %v2256_v38  ;;  %v470_v59 = vrot.slane %v2415_v50, 4 }
 0x186   :  { %v414_v61 = vrot.slane %v2419_v52, 4  ;;  %v2429_v62 = vrot.slane %v401_v53, 4  ;;  %v2432_v63 = vsel %vm114_vm1, 0.0, %v418_v54  ;;  %v2436_v0 = vsel %vm114_vm1, 0.0, %v2423_v55 }
 0x187   :  { %v494_v2 = vrot.slane %v2436_v0, 4  ;;  %v457_v4 = vperm.slane %v449_v56, %v2256_v38  ;;  %v461_v5 = vsel %vm114_vm1, %v445_v3, %v460_v57  ;;  %v474_v6 = vrot.slane %v465_v58, 4 }
 0x188   :  { %v2443_v8 = vsel %vm114_vm1, 0.0, %v2429_v62  ;;  %v469_v11 = vperm.slane %v461_v5, %v2256_v38  ;;  %v2019_v12 = vunpack.i.h.bf16 %v2017_v60  ;;  %v2018_v13 = vunpack.i.l.bf16 %v2017_v60 }
 0x189   :  { %v2446_v14 = vrot.slane %v457_v4, 4  ;;  %v2449_v15 = vsel %vm114_vm1, 0.0, %v474_v6  ;;  %v2029_v16 = vunpack.i.h.bf16 %v2027_v1  ;;  %v2028_v17 = vunpack.i.l.bf16 %v2027_v1 }
 0x18a   :  { %v476_v19 = vrot.slane %v469_v11, 4  ;;  %v631_v3 = vsel %vm114_vm1, %v2375_v21, %v2019_v12  ;;  %v632_v24 = vrot.slane %v2019_v12, 4  ;;  %v619_v26 = vsel %vm114_vm1, %v2379_v46, %v2018_v13 }
 0x18b   :  { %v2457_v29 = vsel %vm114_vm1, 0.0, %v2446_v14  ;;  %v637_v37 = vperm.slane %v631_v3, %v2241_v20  ;;  %v620_v39 = vrot.slane %v2018_v13, 4  ;;  %v625_v44 = vperm.slane %v619_v26, %v2241_v20 }
 0x18c   :  { %v2462_v45 = vsel %vm114_vm1, 0.0, %v476_v19  ;;  %v537_v23 = vrot.slane %v2457_v29, 4  ;;  %v2466_v21 = vsel %vm114_vm1, %v476_v19, %v465_v58  ;;  %v633_v46 = vsel %vm114_vm1, %v2024_v31, %v632_v24 }
 0x18d   :  { %v548_v49 = vrot.slane %v2462_v45, 4  ;;  %v641_v51 = vperm.slane %v633_v46, %v2241_v20  ;;  %v642_v53 = vrot.slane %v637_v37, 4  ;;  %v621_v54 = vsel %vm114_vm1, %v2023_v32, %v620_v39 }
 0x18e   :  { %v629_v56 = vperm.slane %v621_v54, %v2241_v20  ;;  %v644_v57 = vrot.slane %v625_v44, 4  ;;  %v687_v58 = vsel %vm114_vm1, %v2383_v47, %v2029_v16  ;;  %v688_v60 = vrot.slane %v2029_v16, 4 }
 0x18f   :  { %v654_v1 = vrot.slane %v641_v51, 4  ;;  %v643_v4 = vsel %vm114_vm1, %v642_v53, %v625_v44  ;;  %v693_v31 = vperm.slane %v687_v58, %v2241_v20  ;;  %v675_v5 = vsel %vm114_vm1, %v2387_v48, %v2028_v17 }
 0x190   :  { %v645_v6 = vsel %vm114_vm1, %v637_v37, %v644_v57  ;;  %v649_v7 = vperm.slane %v643_v4, %v2256_v38  ;;  %v656_v32 = vrot.slane %v629_v56, 4  ;;  %v689_v11 = vsel %vm114_vm1, %v2034_v33, %v688_v60 }
 0x191   :  { %v653_v47 = vperm.slane %v645_v6, %v2256_v38  ;;  %v655_v12 = vsel %vm114_vm1, %v654_v1, %v629_v56  ;;  %v697_v13 = vperm.slane %v689_v11, %v2241_v20  ;;  %v698_v16 = vrot.slane %v693_v31, 4 }
 0x192   :  { %v657_v19 = vsel %vm114_vm1, %v641_v51, %v656_v32  ;;  %v661_v48 = vperm.slane %v655_v12, %v2256_v38  ;;  %v666_v3 = vrot.slane %v649_v7, 4  ;;  %v676_v24 = vrot.slane %v2028_v17, 4 }
 0x193   :  { %v665_v26 = vperm.slane %v657_v19, %v2256_v38  ;;  %v668_v37 = vrot.slane %v653_v47, 4  ;;  %v710_v39 = vrot.slane %v697_v13, 4  ;;  %v681_v44 = vperm.slane %v675_v5, %v2241_v20 }
 0x194   :  { %v2496_v33 = vsel %vm114_vm1, 0.0, %v666_v3  ;;  %v670_v46 = vrot.slane %v661_v48, 4  ;;  %v677_v53 = vsel %vm114_vm1, %v2033_v34, %v676_v24  ;;  %v415_v51 = vsel %vm114_vm1, 0.0, %v414_v61 }
 0x195   :  { %v2503_v54 = vsel %vm114_vm1, 0.0, %v668_v37  ;;  %v672_v17 = vrot.slane %v665_v26, 4  ;;  %v2506_v56 = vsel %vm114_vm1, %v668_v37, %v649_v7  ;;  %v685_v57 = vperm.slane %v677_v53, %v2241_v20 }
 0x196   :  { %v2510_v58 = vsel %vm114_vm1, 0.0, %v670_v46  ;;  %v735_v60 = vrot.slane %v2503_v54, 4  ;;  %v699_v18 = vsel %vm114_vm1, %v698_v16, %v681_v44  ;;  %v700_v1 = vrot.slane %v681_v44, 4 }
 0x197   :  { %v2515_v34 = vsel %vm114_vm1, 0.0, %v672_v17  ;;  %v2518_v61 = vsel %vm114_vm1, %v672_v17, %v661_v48  ;;  %v705_v4 = vperm.slane %v699_v18, %v2256_v38  ;;  %v711_v5 = vsel %vm114_vm1, %v710_v39, %v685_v57 }
 0x198   :  { %v746_v6 = vrot.slane %v2515_v34, 4  ;;  %v701_v7 = vsel %vm114_vm1, %v693_v31, %v700_v1  ;;  %v712_v32 = vrot.slane %v685_v57, 4  ;;  %v717_v11 = vperm.slane %v711_v5, %v2256_v38 }
 0x199   :  { %v709_v47 = vperm.slane %v701_v7, %v2256_v38  ;;  %v722_v12 = vrot.slane %v705_v4, 4  ;;  %v478_v16 = vsel %vm114_vm1, %v2429_v62, %v2419_v52  ;;  %v483_v19 = vrot.slane %v2443_v8, 4 }
 0x19a   :  { %v713_v48 = vsel %vm114_vm1, %v697_v13, %v712_v32  ;;  %v726_v3 = vrot.slane %v717_v11, 4  ;;  %v482_v24 = vperm.slane %v478_v16, %v2241_v20  ;;  %v489_v31 = vsel %vm114_vm1, %v2423_v55, %v2408_v30 }
 0x19b   :  { %v721_v26 = vperm.slane %v713_v48, %v2256_v38  ;;  %v2537_v37 = vsel %vm114_vm1, 0.0, %v722_v12  ;;  %v724_v39 = vrot.slane %v709_v47, 4  ;;  %v484_v44 = vsel %vm114_vm1, %v483_v19, %v415_v51 }
 0x19c   :  { %v2541_v52 = vsel %vm114_vm1, 0.0, %v726_v3  ;;  %v488_v62 = vperm.slane %v484_v44, %v2241_v20  ;;  %v493_v8 = vperm.slane %v489_v31, %v2241_v20  ;;  %v495_v30 = vsel %vm114_vm1, %v494_v2, %v2432_v63 }
 0x19d   :  { %v2550_v55 = vsel %vm114_vm1, 0.0, %v724_v39  ;;  %v728_v13 = vrot.slane %v721_v26, 4  ;;  %v2553_v46 = vsel %vm114_vm1, %v724_v39, %v705_v4  ;;  %v499_v53 = vperm.slane %v495_v30, %v2241_v20 }
 0x19e   :  { %v789_v51 = vrot.slane %v2550_v55, 4  ;;  %v502_v17 = vrot.slane %v482_v24, 4  ;;  %v514_v57 = vrot.slane %v493_v8, 4  ;;  %v471_v63 = vsel %vm114_vm1, 0.0, %v470_v59 }
 0x19f   :  { %v2558_v18 = vsel %vm114_vm1, 0.0, %v728_v13  ;;  %v2561_v0 = vsel %vm114_vm1, %v728_v13, %v717_v11  ;;  %v532_v2 = vsel %vm114_vm1, %v2446_v14, %v2415_v50  ;;  %v538_v59 = vsel %vm114_vm1, %v537_v23, %v471_v63 }
 0x1a0   :  { %v800_v1 = vrot.slane %v2558_v18, 4  ;;  %v503_v4 = vsel %vm114_vm1, %v488_v62, %v502_v17  ;;  %v515_v5 = vsel %vm114_vm1, %v499_v53, %v514_v57  ;;  %v536_v7 = vperm.slane %v532_v2, %v2241_v20 }
 0x1a1   :  { %v511_v32 = vperm.slane %v503_v4, %v2256_v38  ;;  %v523_v11 = vperm.slane %v515_v5, %v2256_v38  ;;  %v547_v47 = vperm.slane %v2466_v21, %v2241_v20  ;;  %v542_v50 = vperm.slane %v538_v59, %v2241_v20 }
 0x1a2   :  { %v549_v14 = vsel %vm114_vm1, %v548_v49, %v2449_v15  ;;  %v556_v12 = vrot.slane %v536_v7, 4  ;;  %v500_v16 = vrot.slane %v488_v62, 4  ;;  %v512_v31 = vrot.slane %v499_v53, 4 }
 0x1a3   :  { %v528_v19 = vrot.slane %v523_v11, 4  ;;  %v553_v48 = vperm.slane %v549_v14, %v2241_v20  ;;  %v568_v3 = vrot.slane %v547_v47, 4  ;;  %v530_v26 = vrot.slane %v511_v32, 4 }
 0x1a4   :  { %v557_v29 = vsel %vm114_vm1, %v542_v50, %v556_v12  ;;  %v501_v23 = vsel %vm114_vm1, %v500_v16, %v482_v24  ;;  %v554_v21 = vrot.slane %v542_v50, 4  ;;  %v513_v30 = vsel %vm114_vm1, %v512_v31, %v493_v8 }
 0x1a5   :  { %v529_v39 = vsel %vm114_vm1, %v528_v19, %v511_v32  ;;  %v565_v44 = vperm.slane %v557_v29, %v2256_v38  ;;  %v569_v45 = vsel %vm114_vm1, %v553_v48, %v568_v3  ;;  %v507_v15 = vperm.slane %v501_v23, %v2256_v38 }
 0x1a6   :  { %v588_v49 = vpack.c.bf16 %v529_v39, %v529_v39  ;;  %v577_v62 = vperm.slane %v569_v45, %v2256_v38  ;;  %v531_v13 = vsel %vm114_vm1, %v523_v11, %v530_v26  ;;  %v519_v24 = vperm.slane %v513_v30, %v2256_v38 }
 0x1a7   :  { %v584_v53 = vrot.slane %v565_v44, 4  ;;  %v589_v17 = vpack.c.bf16 %v531_v13, %v531_v13  ;;  %v555_v57 = vsel %vm114_vm1, %v554_v21, %v536_v7  ;;  %v566_v5 = vrot.slane %v553_v48, 4 }
 0x1a8   :  { %v889_v63 = vsel %vm846_vm2, %v588_v49, 0  ;;  %v582_v2 = vrot.slane %v577_v62, 4  ;;  %v561_v4 = vperm.slane %v555_v57, %v2256_v38  ;;  %v524_v32 = vrot.slane %v519_v24, 4 }
 0x1a9   :  { %898 = vmatpush.bf16.xpose.msra.mxu3 %v889_v63  ;;  %v908_v59 = vsel %vm846_vm2, %v589_v17, 0  ;;  %v585_v8 = vsel %vm114_vm1, %v577_v62, %v584_v53  ;;  %v526_v50 = vrot.slane %v507_v15, 4  ;;  %v567_v14 = vsel %vm114_vm1, %v566_v5, %v547_v47 }
 0x1aa   :  { %v583_v11 = vsel %vm114_vm1, %v582_v2, %v565_v44  ;;  %917 = vmatpush.bf16.xpose.msrb.mxu0 %v908_v59  ;;  %v593_v12 = vpack.c.bf16 %v585_v8, %v585_v8  ;;  %v580_v7 = vrot.slane %v561_v4, 4  ;;  %v525_v19 = vsel %vm114_vm1, %v524_v32, %v507_v15 }
 0x1ab   :  { %v592_v16 = vpack.c.bf16 %v583_v11, %v583_v11  ;;  %v573_v3 = vperm.slane %v567_v14, %v2256_v38  ;;  %v527_v48 = vsel %vm114_vm1, %v519_v24, %v526_v50  ;;  %v586_v31 = vpack.c.bf16 %v525_v19, %v525_v19 }
 0x1ac   :  { %v984_v29 = vsel %vm846_vm2, %v593_v12, 0  ;;  %v587_v23 = vpack.c.bf16 %v527_v48, %v527_v48  ;;  %v734_v26 = vperm.slane %v2506_v56, %v2241_v20  ;;  %v736_v44 = vsel %vm114_vm1, %v735_v60, %v2496_v33 }
 0x1ad   :  { %v965_v21 = vsel %vm846_vm2, %v592_v16, 0  ;;  %v578_v39 = vrot.slane %v573_v3, 4  ;;  %v581_v47 = vsel %vm114_vm1, %v573_v3, %v580_v7  ;;  %v851_v45 = vsel %vm846_vm2, %v586_v31, 0 }
 0x1ae   :  { %v870_v15 = vsel %vm846_vm2, %v587_v23, 0  ;;  %v591_v49 = vpack.c.bf16 %v581_v47, %v581_v47  ;;  %v740_v62 = vperm.slane %v736_v44, %v2241_v20  ;;  %860 = vmatpush.bf16.xpose.msra.mxu1 %v851_v45  ;;  %v745_v30 = vperm.slane %v2518_v61, %v2241_v20 }
 0x1af   :  { %v579_v56 = vsel %vm114_vm1, %v578_v39, %v561_v4  ;;  %879 = vmatpush.bf16.xpose.msra.mxu2 %v870_v15  ;;  %v747_v33 = vsel %vm114_vm1, %v746_v6, %v2510_v58  ;;  %v754_v54 = vrot.slane %v734_v26, 4  ;;  %v788_v6 = vperm.slane %v2553_v46, %v2241_v20 }
 0x1b0   :  { %v590_v60 = vpack.c.bf16 %v579_v56, %v579_v56  ;;  %v946_v13 = vsel %vm846_vm2, %v591_v49, 0  ;;  %1901 = vmatmul.msk.bf16.vlgmr.msra.gmra.mxu3 %vm846_vm2, %v336_v40  ;;  %v751_v53 = vperm.slane %v747_v33, %v2241_v20  ;;  %v766_v34 = vrot.slane %v745_v30, 4 }
 0x1b1   :  { %974 = vmatpush.bf16.xpose.msrb.mxu3 %v965_v21  ;;  %1902 = vmatmul.msk.bf16.vlgmr.msrb.gmra.mxu0 %vm846_vm2, %v337_v42  ;;  %v755_v58 = vsel %vm114_vm1, %v740_v62, %v754_v54  ;;  %v752_v61 = vrot.slane %v740_v62, 4  ;;  %v790_v17 = vsel %vm114_vm1, %v789_v51, %v2537_v37  ;;  %v799_v46 = vperm.slane %v2561_v0, %v2241_v20 }
 0x1b2   :  { %993 = vmatpush.bf16.xpose.msra.mxu0 %v984_v29  ;;  %v927_v22 = vsel %vm846_vm2, %v590_v60, 0  ;;  %v763_v40 = vperm.slane %v755_v58, %v2256_v38  ;;  %v764_v24 = vrot.slane %v751_v53, 4  ;;  %v767_v25 = vsel %vm114_vm1, %v751_v53, %v766_v34 }
 0x1b3   :  { %v753_v42 = vsel %vm114_vm1, %v752_v61, %v734_v26  ;;  %v794_v57 = vperm.slane %v790_v17, %v2241_v20  ;;  %v775_v63 = vperm.slane %v767_v25, %v2256_v38  ;;  %v801_v37 = vsel %vm114_vm1, %v800_v1, %v2541_v52 }
 0x1b4   :  { %v782_v2 = vrot.slane %v763_v40, 4  ;;  %v759_v4 = vperm.slane %v753_v42, %v2256_v38  ;;  %v765_v5 = vsel %vm114_vm1, %v764_v24, %v745_v30  ;;  %v808_v51 = vrot.slane %v788_v6, 4 }
 0x1b5   :  { %v771_v55 = vperm.slane %v765_v5, %v2256_v38  ;;  %v820_v32 = vrot.slane %v799_v46, 4  ;;  %1899 = vmatmul.msk.bf16.vlgmr.msra.gmra.mxu1 %vm846_vm2, %v334_v10  ;;  %v780_v0 = vrot.slane %v775_v63, 4  ;;  %v805_v18 = vperm.slane %v801_v37, %v2241_v20 }
 0x1b6   :  { %936 = vmatpush.bf16.xpose.msrb.mxu1 %v927_v22  ;;  %v783_v59 = vsel %vm114_vm1, %v775_v63, %v782_v2  ;;  %1900 = vmatmul.msk.bf16.vlgmr.msra.gmra.mxu2 %vm846_vm2, %v335_v43  ;;  %v778_v8 = vrot.slane %v759_v4, 4  ;;  %v809_v1 = vsel %vm114_vm1, %v794_v57, %v808_v51  ;;  %v806_v11 = vrot.slane %v794_v57, 4 }
 0x1b7   :  { %955 = vmatpush.bf16.xpose.msrb.mxu2 %v946_v13  ;;  %v841_v50 = vpack.c.bf16 %v783_v59, %v783_v59  ;;  %v776_v52 = vrot.slane %v771_v55, 4  ;;  %v781_v27 = vsel %vm114_vm1, %v780_v0, %v763_v40  ;;  %v817_v14 = vperm.slane %v809_v1, %v2256_v38 }
 0x1b8   :  { %v779_v10 = vsel %vm114_vm1, %v771_v55, %v778_v8  ;;  %v821_v12 = vsel %vm114_vm1, %v805_v18, %v820_v32  ;;  %v840_v7 = vpack.c.bf16 %v781_v27, %v781_v27  ;;  %v807_v48 = vsel %vm114_vm1, %v806_v11, %v788_v6 }
 0x1b9   :  { %v1141_v28 = vsel %vm1082_vm3, %v841_v50, 0  ;;  %v777_v43 = vsel %vm114_vm1, %v776_v52, %v759_v4  ;;  %v839_v16 = vpack.c.bf16 %v779_v10, %v779_v10  ;;  %v829_v3 = vperm.slane %v821_v12, %v2256_v38 }
 0x1ba   :  { %1150 = vmatpush.bf16.msrb.mxu0 %v1141_v28  ;;  %v838_v19 = vpack.c.bf16 %v777_v43, %v777_v43  ;;  %v818_v31 = vrot.slane %v805_v18, 4  ;;  %v1122_v29 = vsel %vm1082_vm3, %v840_v7, 0  ;;  %v813_v26 = vperm.slane %v807_v48, %v2256_v38 }
 0x1bb   :  { %v1103_v23 = vsel %vm1082_vm3, %v839_v16, 0  ;;  %v836_v21 = vrot.slane %v817_v14, 4  ;;  %1131 = vmatpush.bf16.msra.mxu3 %v1122_v29  ;;  %v834_v47 = vrot.slane %v829_v3, 4  ;;  %v328_v45 = vrot.slane %v2357_v36, 4 }
 0x1bc   :  { %v1084_v39 = vsel %vm1082_vm3, %v838_v19, 0  ;;  %v819_v44 = vsel %vm114_vm1, %v818_v31, %v799_v46  ;;  %v326_v15 = vrot.slane %v2371_v9, 4  ;;  %v832_v56 = vrot.slane %v813_v26, 4 }
 0x1bd   :  { %v825_v49 = vperm.slane %v819_v44, %v2256_v38  ;;  %v837_v62 = vsel %vm114_vm1, %v829_v3, %v836_v21  ;;  %v340_v30 = vpack.c.bf16 %v2354_v35, %v2354_v35  ;;  %v835_v33 = vsel %vm114_vm1, %v834_v47, %v817_v14 }
 0x1be   :  { %1093 = vmatpush.bf16.msra.mxu1 %v1084_v39  ;;  %v845_v54 = vpack.c.bf16 %v837_v62, %v837_v62  ;;  %v844_v60 = vpack.c.bf16 %v835_v33, %v835_v33  ;;  %v341_v13 = vpack.c.bf16 %v2362_v41, %v2362_v41  ;;  %v329_v34 = vsel %vm114_vm1, %v2371_v9, %v328_v45 }
 0x1bf   :  { %1112 = vmatpush.bf16.msra.mxu2 %v1103_v23  ;;  %v830_v53 = vrot.slane %v825_v49, 4  ;;  %v833_v58 = vsel %vm114_vm1, %v825_v49, %v832_v56  ;;  %v327_v35 = vsel %vm114_vm1, %v326_v15, %v2357_v36  ;;  %v339_v17 = vpack.c.bf16 %v329_v34, %v329_v34 }
 0x1c0   :  { %1905 = vmatmul.msk.bf16.vlgmr.msrb.gmra.mxu3 %vm846_vm2, %v340_v30  ;;  %v1198_v61 = vsel %vm1082_vm3, %v844_v60, 0  ;;  %v1217_v22 = vsel %vm1082_vm3, %v845_v54, 0  ;;  %v843_v40 = vpack.c.bf16 %v833_v58, %v833_v58  ;;  %v338_v24 = vpack.c.bf16 %v327_v35, %v327_v35 }
 0x1c1   :  { %1906 = vmatmul.msk.bf16.vlgmr.msra.gmra.mxu0 %vm846_vm2, %v341_v13  ;;  %v831_v6 = vsel %vm114_vm1, %v830_v53, %v813_v26  ;;  %1207 = vmatpush.bf16.msrb.mxu3 %v1198_v61  ;;  %v87_v25 = vlaneseq  ;;  %v2139_v63 = vmov -1e+30  }
 0x1c2   :  { %v842_v41 = vpack.c.bf16 %v831_v6, %v831_v6  ;;  %1226 = vmatpush.bf16.msra.mxu0 %v1217_v22  ;;  %v1179_v36 = vsel %vm1082_vm3, %v843_v40, 0 }
 0x1c3   :  { %v88_v42 = vshrl.u32 %v87_v25, 7  ;;  %v90_v57 = vand.u32 127, %v87_v25 }
 0x1c4   :  { %v1160_v9 = vsel %vm1082_vm3, %v842_v41, 0 }
 0x1c5   :  { %1903 = vmatmul.msk.bf16.vlgmr.msrb.gmra.mxu1 %vm846_vm2, %v338_v24  ;;  %vm91_vm4 = vcmp.le.s32.totalorder %v90_v57, %v88_v42 }
 0x1c6   :  { %1904 = vmatmul.msk.bf16.vlgmr.msrb.gmra.mxu2 %vm846_vm2, %v339_v17  ;;  %1169 = vmatpush.bf16.msrb.mxu1 %v1160_v9  ;;  %v92_v2 = vsel %vm91_vm4, 0.0, %v2139_v63 }
 0x1c7   :  { %1188 = vmatpush.bf16.msrb.mxu2 %v1179_v36 }
 0x22e   :  { %v919_v46 = vpop.f32.mrf.mxu0 }
 0x22f   :  { %v920_v8 = vadd.f32 %v919_v46, %v92_v2 }
 0x231   :  { %v1008_v27 = vsel %vm846_vm2, %v920_v8, -inf }
 0x232   :  { %v862_v4 = vpop.f32.mrf.mxu1 }
 0x233   :  { %v900_v5 = vpop.f32.mrf.mxu3  ;;  %v863_v55 = vadd.f32 %v862_v4, %v92_v2 }
 0x234   :  { %v901_v37 = vadd.f32 %v900_v5, %v92_v2 }
 0x235   :  { %v999_v51 = vsel %vm846_vm2, %v863_v55, -inf }
 0x236   :  { %v921_v32 = vpop.f32.mrf.mxu0  ;;  %v1005_v0 = vsel %vm846_vm2, %v901_v37, -inf  ;;  %1000 = vmax.xlane.f32.xlu2 %v999_v51 }
 0x237   :  { %1006 = vmax.xlane.f32.xlu1 %v1005_v0 }
 0x239   :  { %v881_v59 = vpop.f32.mrf.mxu2 }
 0x23a   :  { %v882_v18 = vadd.f32 %v881_v59, %v92_v2  ;;  %v864_v50 = vpop.f32.mrf.mxu1 }
 0x23b   :  { %v902_v52 = vpop.f32.mrf.mxu3 }
 0x23c   :  { %v1002_v1 = vsel %vm846_vm2, %v882_v18, -inf }
 0x23d   :  { %1003 = vmax.xlane.f32.xlu0 %v1002_v1 }
 0x23e   :  { %v995_v11 = vpop.f32.mrf.mxu0 }
 0x23f   :  { %1009 = vmax.xlane.f32.xlu1 %v1008_v27  ;;  %v996_v48 = vadd.f32 %v995_v11, %v92_v2 }
 0x241   :  { %v883_v10 = vpop.f32.mrf.mxu2  ;;  %v1020_v21 = vsel %vm846_vm2, %v996_v48, -inf }
 0x242   :  { %v938_v14 = vpop.f32.mrf.mxu1 }
 0x243   :  { %v976_v12 = vpop.f32.mrf.mxu3  ;;  %v939_v7 = vadd.f32 %v938_v14, %v92_v2 }
 0x244   :  { %v977_v28 = vadd.f32 %v976_v12, %v92_v2 }
 0x245   :  { %v1011_v16 = vsel %vm846_vm2, %v939_v7, -inf }
 0x246   :  { %v997_v43 = vpop.f32.mrf.mxu0  ;;  %v1017_v19 = vsel %vm846_vm2, %v977_v28, -inf }
 0x247   :  { %1012 = vmax.xlane.f32.xlu1 %v1011_v16  ;;  %1018 = vmax.xlane.f32.xlu2 %v1017_v19 }
 0x249   :  { %v957_v3 = vpop.f32.mrf.mxu2 }
 0x24a   :  { %v958_v31 = vadd.f32 %v957_v3, %v92_v2  ;;  %v940_v29 = vpop.f32.mrf.mxu1 }
 0x24b   :  { %v978_v23 = vpop.f32.mrf.mxu3 }
 0x24c   :  { %v1014_v26 = vsel %vm846_vm2, %v958_v31, -inf }
 0x24d   :  { %1015 = vmax.xlane.f32.xlu0 %v1014_v26 }
 0x24f   :  { %1021 = vmax.xlane.f32.xlu2 %v1020_v21 }
 0x251   :  { %v959_v39 = vpop.f32.mrf.mxu2 }
 0x2a9   :  { %v1001_v47 = vpop.xlane.xlu2 %1000 }
 0x2aa   :  { %v1007_v44 = vpop.xlane.xlu1 %1006  ;;  %v1023_v45 = vsub.f32 %v863_v55, %v1001_v47 }
 0x2ab   :  { %v1025_v15 = vsub.f32 %v901_v37, %v1007_v44 }
 0x2ac   :  { %v1031_v49 = vmul.f32 1.442695, %v1023_v45 }
 0x2ad   :  { %v1035_v62 = vmul.f32 1.442695, %v1025_v15 }
 0x2ae   :  { %2058 = vpow2.f32 %v1031_v49 }
 0x2af   :  { %2060 = vpow2.f32 %v1035_v62 }
 0x2b0   :  { %v1004_v56 = vpop.xlane.xlu0 %1003 }
 0x2b1   :  { %v1024_v30 = vsub.f32 %v882_v18, %v1004_v56 }
 0x2b2   :  { %v1010_v33 = vpop.xlane.xlu1 %1009 }
 0x2b3   :  { %v1033_v54 = vmul.f32 1.442695, %v1024_v30  ;;  %v1026_v60 = vsub.f32 %v920_v8, %v1010_v33 }
 0x2b4   :  { %v2059_v13 = vpop.eup %2058 }
 0x2b5   :  { %2062 = vpow2.f32 %v1033_v54  ;;  %v1037_v53 = vmul.f32 1.442695, %v1026_v60  ;;  %v2061_v58 = vpop.eup %2060  ;;  %v1071_v34 = vpack.c.bf16 %v2059_v13, %v2059_v13  ;;  %v1047_v61 = vsel %vm846_vm2, %v2059_v13, 0.0 }
 0x2b6   :  { %v1073_v35 = vpack.c.bf16 %v2061_v58, %v2061_v58  ;;  %1048 = vadd.xlane.f32.xlu2 %v1047_v61  ;;  %v1053_v0 = vsel %vm846_vm2, %v2061_v58, 0.0 }
 0x2b7   :  { %2064 = vpow2.f32 %v1037_v53  ;;  %1907 = vmatmul.msk.bf16.vlgmr.msra.gmra.mxu1 %vm846_vm2, %v1071_v34 }
 0x2b8   :  { %1909 = vmatmul.msk.bf16.vlgmr.msra.gmra.mxu3 %vm846_vm2, %v1073_v35 }
 0x2ba   :  { %v1013_v6 = vpop.xlane.xlu1 %1012  ;;  %v1019_v22 = vpop.xlane.xlu2 %1018 }
 0x2bb   :  { %v2063_v41 = vpop.eup %2062  ;;  %v1027_v40 = vsub.f32 %v939_v7, %v1013_v6  ;;  %v1029_v24 = vsub.f32 %v977_v28, %v1019_v22 }
 0x2bc   :  { %v1072_v17 = vpack.c.bf16 %v2063_v41, %v2063_v41  ;;  %v1050_v11 = vsel %vm846_vm2, %v2063_v41, 0.0 }
 0x2bd   :  { %v2065_v9 = vpop.eup %2064  ;;  %v1039_v36 = vmul.f32 1.442695, %v1027_v40  ;;  %v1043_v25 = vmul.f32 1.442695, %v1029_v24 }
 0x2be   :  { %v1074_v42 = vpack.c.bf16 %v2065_v9, %v2065_v9  ;;  %1908 = vmatmul.msk.bf16.vlgmr.msra.gmra.mxu2 %vm846_vm2, %v1072_v17  ;;  %v1056_v57 = vsel %vm846_vm2, %v2065_v9, 0.0 }
 0x2bf   :  { %2066 = vpow2.f32 %v1039_v36  ;;  %1057 = vadd.xlane.f32.xlu0 %v1056_v57 }
 0x2c0   :  { %2068 = vpow2.f32 %v1043_v25  ;;  %v1016_v46 = vpop.xlane.xlu0 %1015  ;;  %1910 = vmatmul.msk.bf16.vlgmr.msrb.gmra.mxu0 %vm846_vm2, %v1074_v42 }
 0x2c1   :  { %v1028_v63 = vsub.f32 %v958_v31, %v1016_v46 }
 0x2c2   :  { %v1022_v2 = vpop.xlane.xlu2 %1021 }
 0x2c3   :  { %v1041_v4 = vmul.f32 1.442695, %v1028_v63  ;;  %v1030_v5 = vsub.f32 %v996_v48, %v1022_v2 }
 0x2c5   :  { %v2067_v55 = vpop.eup %2066  ;;  %2070 = vpow2.f32 %v1041_v4  ;;  %v1045_v37 = vmul.f32 1.442695, %v1030_v5 }
 0x2c6   :  { %v2069_v51 = vpop.eup %2068  ;;  %v1075_v32 = vpack.c.bf16 %v2067_v55, %v2067_v55  ;;  %v1059_v59 = vsel %vm846_vm2, %v2067_v55, 0.0 }
 0x2c7   :  { %v1077_v8 = vpack.c.bf16 %v2069_v51, %v2069_v51  ;;  %2072 = vpow2.f32 %v1045_v37  ;;  %1054 = vadd.xlane.f32.xlu0 %v1053_v0  ;;  %1060 = vadd.xlane.f32.xlu1 %v1059_v59  ;;  %v1065_v27 = vsel %vm846_vm2, %v2069_v51, 0.0 }
 0x2c8   :  { %1911 = vmatmul.msk.bf16.vlgmr.msrb.gmra.mxu1 %vm846_vm2, %v1075_v32 }
 0x2c9   :  { %1913 = vmatmul.msk.bf16.vlgmr.msrb.gmra.mxu3 %vm846_vm2, %v1077_v8 }
 0x2cb   :  { %v2071_v18 = vpop.eup %2070 }
 0x2cc   :  { %v1076_v50 = vpack.c.bf16 %v2071_v18, %v2071_v18  ;;  %v1062_v14 = vsel %vm846_vm2, %v2071_v18, 0.0 }
 0x2cd   :  { %v2073_v52 = vpop.eup %2072 }
 0x2ce   :  { %v1078_v1 = vpack.c.bf16 %v2073_v52, %v2073_v52  ;;  %1912 = vmatmul.msk.bf16.vlgmr.msrb.gmra.mxu2 %vm846_vm2, %v1076_v50  ;;  %v1068_v10 = vsel %vm846_vm2, %v2073_v52, 0.0 }
 0x2cf   :  { %1051 = vadd.xlane.f32.xlu0 %v1050_v11  ;;  %1066 = vadd.xlane.f32.xlu1 %v1065_v27 }
 0x2d0   :  { %1069 = vadd.xlane.f32.xlu2 %v1068_v10  ;;  %1914 = vmatmul.msk.bf16.vlgmr.msra.gmra.mxu0 %vm846_vm2, %v1078_v1 }
 0x2d7   :  { %1063 = vadd.xlane.f32.xlu1 %v1062_v14 }
 0x329   :  { %v1049_v28 = vpop.xlane.xlu2 %1048 }
 0x32a   :  { %2074 = vrcp.f32 %v1049_v28 }
 0x330   :  { %v2075_v31 = vpop.eup %2074 }
 0x332   :  { %v1058_v12 = vpop.xlane.xlu0 %1057 }
 0x334   :  { %v1095_v7 = vpop.f32.mrf.mxu1 }
 0x335   :  { %v1240_v23 = vmul.f32 %v2075_v31, %v1095_v7 }
 0x337   :  { %v1250_v62 = vrot.slane %v1240_v23, 4 }
 0x33a   :  { %v1055_v43 = vpop.xlane.xlu0 %1054  ;;  %v1061_v16 = vpop.xlane.xlu1 %1060 }
 0x33b   :  { %2076 = vrcp.f32 %v1055_v43  ;;  %v1133_v19 = vpop.f32.mrf.mxu3 }
 0x33c   :  { %v1097_v3 = vpop.f32.mrf.mxu1  ;;  %2078 = vrcp.f32 %v1058_v12 }
 0x33d   :  { %v1152_v48 = vpop.f32.mrf.mxu0  ;;  %2080 = vrcp.f32 %v1061_v16 }
 0x341   :  { %v2077_v29 = vpop.eup %2076  ;;  %v1114_v26 = vpop.f32.mrf.mxu2 }
 0x342   :  { %v1242_v21 = vmul.f32 %v2077_v29, %v1133_v19  ;;  %v1052_v39 = vpop.xlane.xlu0 %1051  ;;  %v1067_v47 = vpop.xlane.xlu1 %1066 }
 0x343   :  { %2082 = vrcp.f32 %v1052_v39  ;;  %v1070_v45 = vpop.xlane.xlu2 %1069  ;;  %v1135_v15 = vpop.f32.mrf.mxu3 }
 0x344   :  { %v1248_v44 = vrot.slane %v1242_v21, 4  ;;  %v2079_v49 = vpop.eup %2078  ;;  %2084 = vrcp.f32 %v1067_v47  ;;  %v1251_v60 = vsel %vm114_vm1, %v1242_v21, %v1250_v62 }
 0x345   :  { %v1154_v56 = vpop.f32.mrf.mxu0  ;;  %v1171_v30 = vpop.f32.mrf.mxu1  ;;  %v1243_v54 = vmul.f32 %v2079_v49, %v1152_v48  ;;  %2086 = vrcp.f32 %v1070_v45  ;;  %v1259_v61 = vperm.slane %v1251_v60, %v2241_v20 }
 0x346   :  { %v1249_v33 = vsel %vm114_vm1, %v1248_v44, %v1240_v23  ;;  %v2081_v13 = vpop.eup %2080 }
 0x347   :  { %v1255_v58 = vperm.slane %v1249_v33, %v2241_v20  ;;  %v1260_v35 = vrot.slane %v1243_v54, 4  ;;  %v1244_v22 = vmul.f32 %v2081_v13, %v1171_v30  ;;  %v1286_v2 = vrot.slane %v1259_v61, 4 }
 0x349   :  { %v2083_v53 = vpop.eup %2082  ;;  %v1116_v34 = vpop.f32.mrf.mxu2  ;;  %v1274_v25 = vrot.slane %v1255_v58, 4  ;;  %v1306_v5 = vrot.slane %v1244_v22, 4 }
 0x34a   :  { %v1241_v6 = vmul.f32 %v2083_v53, %v1114_v26  ;;  %v1064_v41 = vpop.xlane.xlu1 %1063  ;;  %v2085_v40 = vpop.eup %2084 }
 0x34b   :  { %2088 = vrcp.f32 %v1064_v41  ;;  %v2087_v36 = vpop.eup %2086 }
 0x34c   :  { %v1261_v24 = vsel %vm114_vm1, %v1260_v35, %v1241_v6  ;;  %v1262_v17 = vrot.slane %v1241_v6, 4  ;;  %v1209_v9 = vpop.f32.mrf.mxu3 }
 0x34d   :  { %v1267_v42 = vperm.slane %v1261_v24, %v2241_v20  ;;  %v1246_v57 = vmul.f32 %v2085_v40, %v1209_v9  ;;  %v1173_v46 = vpop.f32.mrf.mxu1  ;;  %v1228_v63 = vpop.f32.mrf.mxu0 }
 0x34e   :  { %v1263_v4 = vsel %vm114_vm1, %v1243_v54, %v1262_v17  ;;  %v1247_v55 = vmul.f32 %v2087_v36, %v1228_v63 }
 0x34f   :  { %v1271_v37 = vperm.slane %v1263_v4, %v2241_v20  ;;  %v1272_v51 = vrot.slane %v1267_v42, 4  ;;  %v1275_v32 = vsel %vm114_vm1, %v1267_v42, %v1274_v25  ;;  %v1304_v0 = vrot.slane %v1246_v57, 4 }
 0x350   :  { %v1283_v59 = vperm.slane %v1275_v32, %v2256_v38  ;;  %v1307_v8 = vsel %vm114_vm1, %v1246_v57, %v1306_v5  ;;  %v1316_v16 = vrot.slane %v1247_v55, 4 }
 0x351   :  { %v2089_v18 = vpop.eup %2088  ;;  %v1273_v50 = vsel %vm114_vm1, %v1272_v51, %v1255_v58  ;;  %v1284_v52 = vrot.slane %v1271_v37, 4  ;;  %v1287_v1 = vsel %vm114_vm1, %v1271_v37, %v1286_v2  ;;  %v1305_v11 = vsel %vm114_vm1, %v1304_v0, %v1244_v22  ;;  %v1190_v27 = vpop.f32.mrf.mxu2 }
 0x352   :  { %v1279_v10 = vperm.slane %v1273_v50, %v2256_v38  ;;  %v1295_v14 = vperm.slane %v1287_v1, %v2256_v38  ;;  %v1298_v12 = vrot.slane %v1283_v59, 4  ;;  %v1311_v7 = vperm.slane %v1305_v11, %v2241_v20 }
 0x353   :  { %v1285_v28 = vsel %vm114_vm1, %v1284_v52, %v1259_v61  ;;  %v1315_v43 = vperm.slane %v1307_v8, %v2241_v20  ;;  %v1245_v19 = vmul.f32 %v2089_v18, %v1190_v27 }
 0x354   :  { %v1299_v3 = vsel %vm114_vm1, 0.0, %v1298_v12  ;;  %v1302_v48 = vrot.slane %v1295_v14, 4  ;;  %v1330_v31 = vrot.slane %v1311_v7, 4  ;;  %v1211_v29 = vpop.f32.mrf.mxu3  ;;  %v1291_v23 = vperm.slane %v1285_v28, %v2256_v38 }
 0x355   :  { %v1365_v26 = vrot.slane %v1299_v3, 4  ;;  %v1342_v21 = vrot.slane %v1315_v43, 4  ;;  %v1317_v39 = vsel %vm114_vm1, %v1316_v16, %v1245_v19  ;;  %v1318_v47 = vrot.slane %v1245_v19, 4  ;;  %v1230_v44 = vpop.f32.mrf.mxu0 }
 0x356   :  { %v1323_v45 = vperm.slane %v1317_v39, %v2241_v20  ;;  %v1296_v15 = vrot.slane %v1279_v10, 4  ;;  %v1300_v49 = vrot.slane %v1291_v23, 4  ;;  %v1303_v62 = vsel %vm114_vm1, 0.0, %v1302_v48 }
 0x357   :  { %v1319_v56 = vsel %vm114_vm1, %v1247_v55, %v1318_v47  ;;  %v1360_v30 = vsel %vm114_vm1, %v1298_v12, %v1279_v10  ;;  %v1371_v33 = vsel %vm114_vm1, %v1302_v48, %v1291_v23  ;;  %v1376_v54 = vrot.slane %v1303_v62, 4 }
 0x358   :  { %v1327_v60 = vperm.slane %v1319_v56, %v2241_v20  ;;  %v1328_v13 = vrot.slane %v1323_v45, 4  ;;  %v1331_v53 = vsel %vm114_vm1, %v1323_v45, %v1330_v31  ;;  %v1297_v58 = vsel %vm114_vm1, 0.0, %v1296_v15 }
 0x359   :  { %v1339_v34 = vperm.slane %v1331_v53, %v2256_v38  ;;  %v1192_v61 = vpop.f32.mrf.mxu2  ;;  %v1301_v35 = vsel %vm114_vm1, 0.0, %v1300_v49  ;;  %v1364_v6 = vperm.slane %v1360_v30, %v2241_v20  ;;  %v1366_v22 = vsel %vm114_vm1, %v1365_v26, %v1297_v58 }
 0x35a   :  { %v1329_v41 = vsel %vm114_vm1, %v1328_v13, %v1311_v7  ;;  %v1340_v40 = vrot.slane %v1327_v60, 4  ;;  %v1343_v24 = vsel %vm114_vm1, %v1327_v60, %v1342_v21  ;;  %v1370_v17 = vperm.slane %v1366_v22, %v2241_v20 }
 0x35b   :  { %v1335_v9 = vperm.slane %v1329_v41, %v2256_v38  ;;  %v1351_v36 = vperm.slane %v1343_v24, %v2256_v38  ;;  %v1354_v25 = vrot.slane %v1339_v34, 4  ;;  %v1375_v42 = vperm.slane %v1371_v33, %v2241_v20 }
 0x35c   :  { %v1341_v57 = vsel %vm114_vm1, %v1340_v40, %v1315_v43  ;;  %v1377_v46 = vsel %vm114_vm1, %v1376_v54, %v1301_v35  ;;  %v1384_v63 = vrot.slane %v1364_v6, 4  ;;  %v1382_v2 = vrot.slane %v1370_v17, 4 }
 0x35d   :  { %v1347_v4 = vperm.slane %v1341_v57, %v2256_v38  ;;  %v1352_v5 = vrot.slane %v1335_v9, 4  ;;  %v1355_v55 = vsel %vm114_vm1, 0.0, %v1354_v25  ;;  %v1358_v37 = vrot.slane %v1351_v36, 4  ;;  %v1970_v57 = vld [vmem:[%s2929_s3 + $0x8] sm:$0xff] }
 0x35e   :  { %v1414_v51 = vsel %vm114_vm1, %v1354_v25, %v1335_v9  ;;  %v1419_v32 = vrot.slane %v1355_v55, 4  ;;  %v1381_v0 = vperm.slane %v1377_v46, %v2241_v20  ;;  %v1385_v59 = vsel %vm114_vm1, %v1370_v17, %v1384_v63  ;;  %1530 = vmatpush.bf16.msra.mxu1 %v1970_v57  ;;  %v1969_v46 = vld [vmem:[%s2929_s3] sm:$0xff] }
 0x35f   :  { %v1353_v8 = vsel %vm114_vm1, 0.0, %v1352_v5  ;;  %v1356_v18 = vrot.slane %v1347_v4, 4  ;;  %v1359_v50 = vsel %vm114_vm1, 0.0, %v1358_v37  ;;  %v1418_v52 = vperm.slane %v1414_v51, %v2241_v20 }
 0x360   :  { %v1430_v1 = vrot.slane %v1359_v50, 4  ;;  %v1393_v11 = vperm.slane %v1385_v59, %v2256_v38  ;;  %v1396_v27 = vrot.slane %v1375_v42, 4  ;;  %v1420_v10 = vsel %vm114_vm1, %v1419_v32, %v1353_v8 }
 0x361   :  { %v1357_v14 = vsel %vm114_vm1, 0.0, %v1356_v18  ;;  %v1424_v12 = vperm.slane %v1420_v10, %v2241_v20  ;;  %v1425_v7 = vsel %vm114_vm1, %v1358_v37, %v1347_v4  ;;  %v1438_v28 = vrot.slane %v1418_v52, 4 }
 0x362   :  { %v1397_v43 = vsel %vm114_vm1, %v1381_v0, %v1396_v27  ;;  %v1429_v16 = vperm.slane %v1425_v7, %v2241_v20  ;;  %v1431_v19 = vsel %vm114_vm1, %v1430_v1, %v1357_v14  ;;  %v1383_v29 = vsel %vm114_vm1, %v1382_v2, %v1364_v6  ;;  %1531 = vmatpush.bf16.msra.mxu1 %v1969_v46  ;;  %v2051_v27 = vld [vmem:[%s2930_s4] ss:$0 sm:$0xff] }
 0x363   :  { %v1405_v3 = vperm.slane %v1397_v43, %v2256_v38  ;;  %v1435_v48 = vperm.slane %v1431_v19, %v2241_v20  ;;  %v1439_v31 = vsel %vm114_vm1, %v1424_v12, %v1438_v28  ;;  %v1389_v21 = vperm.slane %v1383_v29, %v2256_v38  ;;  %v2105_v19 = vld [vmem:[%s2926_s0 + $0x8] sm:$0xff] }
 0x364   :  { %v1447_v23 = vperm.slane %v1439_v31, %v2256_v38  ;;  %v1450_v26 = vrot.slane %v1429_v16, 4  ;;  %v1394_v39 = vrot.slane %v1381_v0, 4  ;;  %v1412_v47 = vrot.slane %v1393_v11, 4 }
 0x365   :  { %v1436_v44 = vrot.slane %v1424_v12, 4  ;;  %v1448_v45 = vrot.slane %v1435_v48, 4  ;;  %v1410_v56 = vrot.slane %v1405_v3, 4  ;;  %v1408_v54 = vrot.slane %v1389_v21, 4  ;;  %v2104_v12 = vld [vmem:[%s2926_s0] sm:$0xff] }
 0x366   :  { %v1451_v15 = vsel %vm114_vm1, %v1435_v48, %v1450_v26  ;;  %v1466_v49 = vrot.slane %v1447_v23, 4  ;;  %v1395_v62 = vsel %vm114_vm1, %v1394_v39, %v1375_v42  ;;  %v1413_v53 = vsel %vm114_vm1, %v1405_v3, %v1412_v47 }
 0x367   :  { %v1459_v20 = vperm.slane %v1451_v15, %v2256_v38  ;;  %v1401_v30 = vperm.slane %v1395_v62, %v2256_v38  ;;  %v1437_v33 = vsel %vm114_vm1, %v1436_v44, %v1418_v52  ;;  %v1449_v13 = vsel %vm114_vm1, %v1448_v45, %v1429_v16 }
 0x368   :  { %v1443_v60 = vperm.slane %v1437_v33, %v2256_v38  ;;  %v1455_v6 = vperm.slane %v1449_v13, %v2256_v38  ;;  %v1411_v41 = vsel %vm114_vm1, %v1410_v56, %v1393_v11  ;;  %v2143_v31 = vmov 32.0  }
 0x369   :  { %v1467_v58 = vsel %vm114_vm1, %v1459_v20, %v1466_v49  ;;  %v1464_v34 = vrot.slane %v1459_v20, 4  ;;  %v1406_v61 = vrot.slane %v1401_v30, 4  ;;  %v1409_v9 = vsel %vm114_vm1, %v1401_v30, %v1408_v54 }
 0x36a   :  { %v2045_v35 = vpack.i.bf16 %v1467_v58, %v1413_v53  ;;  %v1462_v22 = vrot.slane %v1443_v60, 4  ;;  %v1460_v36 = vrot.slane %v1455_v6, 4  ;;  %2090 = vrcp.f32 %v2143_v31  ;;  %v1972_v58 = vld [vmem:[%s2935_s9 + $0x8] sm:$0xff] }
 0x36b   :  { %v1465_v40 = vsel %vm114_vm1, %v1464_v34, %v1447_v23  ;;  %v1407_v24 = vsel %vm114_vm1, %v1406_v61, %v1389_v21  ;;  %1633 = vmatpush.bf16.msra.mxu2 %v1972_v58  ;;  %v1971_v34 = vld [vmem:[%s2935_s9] sm:$0xff] }
 0x36c   :  { %2046 = vrot.lane.b32.xlu1 %v2045_v35, %s2140_s21  ;;  %v2040_v17 = vpack.i.bf16 %v1465_v40, %v1411_v41  ;;  %v1463_v25 = vsel %vm114_vm1, %v1455_v6, %v1462_v22  ;;  %v1461_v38 = vsel %vm114_vm1, %v1460_v36, %v1443_v60 }
 0x36d   :  { %v2035_v42 = vpack.i.bf16 %v1463_v25, %v1409_v9 }
 0x36e   :  { %2041 = vrot.lane.b32.xlu0 %v2040_v17, %s2141_s22 }
 0x36f   :  { %2036 = vrot.lane.b32.xlu2 %v2035_v42, %s2142_s23  ;;  %1634 = vmatpush.bf16.msra.mxu2 %v1971_v34  ;;  %v1977_v34 = vld [vmem:[%s2937_s11 + $0x20] sm:$0xff] }
 0x370   :  { %v2091_v29 = vpop.eup %2090 }
 0x371   :  { %v1549_v23 = vmul.f32 32.0, %v2091_v29  ;;  %vm1553_vm7 = vweird.f32 %v2091_v29 }
 0x373   :  { %v1550_v26 = vsub.f32 1.0, %v1549_v23 }
 0x375   :  { %v1551_v21 = vmul.f32 %v2091_v29, %v1550_v26 }
 0x377   :  { %v1552_v39 = vadd.f32 %v2091_v29, %v1551_v21  ;;  %v1979_v21 = vld [vmem:[%s2937_s11 + $0x30] sm:$0xff] }
 0x379   :  { %v2829_v47 = vsel %vm1553_vm7, %v2091_v29, %v1552_v39 }
 0x3c9   :  { %v2037_v63 = vpop.permute.xlu2 %2036 }
 0x3ca   :  { %v2039_v2 = vunpack.i.h.bf16 %v2037_v63  ;;  %v2038_v4 = vunpack.i.l.bf16 %v2037_v63  ;;  %v2052_v63 = vld [vmem:[%s2931_s5] ss:$0 sm:$0xff]  ;;  %s1876_s5 = sshll.u32 %s2144_s19, 4  ;;  %s1877_s5 = int_to_ptr.vmem [resolvable:$true] %s1876_s5 }
 0x3cc   :  { %v1492_v32 = vsel %vm846_vm2, %v1407_v24, %v2038_v4  ;;  %v1493_v0 = vsel %vm846_vm2, %v1461_v38, %v2039_v2 }
 0x3de   :  { %v2047_v5 = vpop.permute.xlu1 %2046 }
 0x3df   :  { %v2049_v59 = vunpack.i.h.bf16 %v2047_v5  ;;  %v2048_v8 = vunpack.i.l.bf16 %v2047_v5 }
 0x3e0   :  { %v2042_v55 = vpop.permute.xlu0 %2041 }
 0x3e1   :  { %v2044_v37 = vunpack.i.h.bf16 %v2042_v55  ;;  %v2043_v51 = vunpack.i.l.bf16 %v2042_v55  ;;  %v2053_v55 = vld [vmem:[%s2932_s6] ss:$0 sm:$0xff] }
 0x3e3   :  { %v1495_v18 = vsel %vm1494_vm5, %v1492_v32, %v2043_v51  ;;  %v1496_v50 = vsel %vm1494_vm5, %v1493_v0, %v2044_v37 }
 0x3e4   :  { %v1498_v52 = vsel %vm1497_vm6, %v1495_v18, %v2048_v8  ;;  %v1499_v1 = vsel %vm1497_vm6, %v1496_v50, %v2049_v59  ;;  %v2054_v18 = vld [vmem:[%s2936_s10] ss:$0 sm:$0xff] }
 0x3e5   :  { %v1500_v11 = vpack.c.bf16 %v1499_v1, %v1498_v52 }
 0x3e7   :  { %1923 = vmatmul.msk.bf16.vlgmr.msra.gmra.mxu1 %vm69_vm0, %v1500_v11 }
 0x464   :  { %v1533_v10 = vpop.f32.mrf.mxu1 }
 0x465   :  { %v1534_v14 = vadd.f32 %v2051_v27, %v1533_v10 }
 0x467   :  { %v1538_v7 = vadd.f32 %v2104_v12, %v1534_v14 }
 0x469   :  { %v1542_v28 = vsel %vm69_vm0, %v1538_v7, 0.0 }
 0x46a   :  { %1543 = vadd.xlane.f32.xlu0 %v1542_v28 }
 0x46c   :  { %v1535_v43 = vpop.f32.mrf.mxu1 }
 0x46d   :  { %v1536_v16 = vadd.f32 %v2051_v27, %v1535_v43 }
 0x46f   :  { %v1539_v3 = vadd.f32 %v2105_v19, %v1536_v16 }
 0x471   :  { %v1545_v48 = vsel %vm69_vm0, %v1539_v3, 0.0 }
 0x472   :  { %1546 = vadd.xlane.f32.xlu2 %v1545_v48 }
 0x4dd   :  { %v1544_v44 = vpop.xlane.xlu0 %1543 }
 0x4de   :  { %v1555_v45 = vmul.f32 %v2829_v47, %v1544_v44 }
 0x4e0   :  { %v1557_v15 = vsub.f32 %v1538_v7, %v1555_v45 }
 0x4e2   :  { %v1559_v49 = vmul.f32 %v1557_v15, %v1557_v15 }
 0x4e4   :  { %v1561_v62 = vsel %vm69_vm0, %v1559_v49, 0.0 }
 0x4e5   :  { %v1547_v20 = vpop.xlane.xlu2 %1546  ;;  %1562 = vadd.xlane.f32.xlu1 %v1561_v62 }
 0x4e6   :  { %v1556_v56 = vmul.f32 %v2829_v47, %v1547_v20 }
 0x4e8   :  { %v1558_v30 = vsub.f32 %v1539_v3, %v1556_v56  ;;  %v1980_v3 = vld [vmem:[%s2937_s11 + $0x38] sm:$0xff]  ;;  %v1978_v56 = vld [vmem:[%s2937_s11 + $0x28] sm:$0xff] }
 0x4e9   :  { %1798 = vmatpush.bf16.msra.mxu3 %v1980_v3 }
 0x4ea   :  { %v1560_v33 = vmul.f32 %v1558_v30, %v1558_v30 }
 0x4ec   :  { %v1564_v54 = vsel %vm69_vm0, %v1560_v33, 0.0 }
 0x4ed   :  { %1565 = vadd.xlane.f32.xlu0 %v1564_v54  ;;  %1799 = vmatpush.bf16.msra.mxu3 %v1979_v21 }
 0x4f1   :  { %1800 = vmatpush.bf16.msra.mxu3 %v1978_v56 }
 0x4f5   :  { %1801 = vmatpush.bf16.msra.mxu3 %v1977_v34 }
 0x558   :  { %v1563_v60 = vpop.xlane.xlu1 %1562 }
 0x559   :  { %v1567_v13 = vmul.f32 %v1563_v60, %v2829_v47 }
 0x55b   :  { %v1569_v53 = vadd.f32 1e-05, %v1567_v13 }
 0x55d   :  { %2092 = vrsqrt.f32 %v1569_v53  ;;  %vm1577_vm9 = vweird.f32 %v1569_v53 }
 0x560   :  { %v1566_v61 = vpop.xlane.xlu0 %1565 }
 0x561   :  { %v1568_v35 = vmul.f32 %v1566_v61, %v2829_v47 }
 0x563   :  { %v2093_v6 = vpop.eup %2092  ;;  %v1570_v22 = vadd.f32 1e-05, %v1568_v35 }
 0x564   :  { %v1572_v41 = vmul.f32 %v2093_v6, %v1569_v53  ;;  %vm1578_vm8 = vweird.f32 %v2093_v6 }
 0x565   :  { %2094 = vrsqrt.f32 %v1570_v22  ;;  %vm1579_vm10 = vmor %vm1577_vm9, %vm1578_vm8  ;;  %vm1587_vm12 = vweird.f32 %v1570_v22 }
 0x566   :  { %v1573_v40 = vmul.f32 %v2093_v6, %v1572_v41 }
 0x568   :  { %v1574_v24 = vmul.f32 0.5, %v1573_v40  ;;  %v1976_v40 = vld [vmem:[%s2937_s11 + $0x18] sm:$0xff] }
 0x569   :  { %1802 = vmatpush.bf16.msra.mxu3 %v1976_v40 }
 0x56a   :  { %v1575_v17 = vsub.f32 1.5, %v1574_v24 }
 0x56b   :  { %v2095_v9 = vpop.eup %2094 }
 0x56c   :  { %v1576_v36 = vmul.f32 %v2093_v6, %v1575_v17  ;;  %v1582_v25 = vmul.f32 %v2095_v9, %v1570_v22  ;;  %vm1588_vm11 = vweird.f32 %v2095_v9 }
 0x56d   :  { %vm1589_vm13 = vmor %vm1587_vm12, %vm1588_vm11 }
 0x56e   :  { %v1583_v42 = vmul.f32 %v2095_v9, %v1582_v25  ;;  %v1580_v38 = vsel %vm1579_vm10, %v2093_v6, %v1576_v36 }
 0x56f   :  { %v1591_v2 = vmul.f32 %v1580_v38, %v1557_v15 }
 0x570   :  { %v1584_v57 = vmul.f32 0.5, %v1583_v42 }
 0x571   :  { %v1596_v37 = vmul.f32 %v2052_v63, %v1591_v2 }
 0x572   :  { %v1585_v46 = vsub.f32 1.5, %v1584_v57 }
 0x573   :  { %v2849_v0 = vadd.f32 %v2053_v55, %v1596_v37  ;;  %v1973_v37 = vld [vmem:[%s2937_s11] sm:$0xff] }
 0x574   :  { %v1586_v4 = vmul.f32 %v2095_v9, %v1585_v46  ;;  %v1974_v46 = vld [vmem:[%s2937_s11 + $0x8] sm:$0xff] }
 0x576   :  { %v1590_v5 = vsel %vm1589_vm13, %v2095_v9, %v1586_v4  ;;  %v1975_v9 = vld [vmem:[%s2937_s11 + $0x10] sm:$0xff] }
 0x577   :  { %v1592_v51 = vmul.f32 %v1590_v5, %v1558_v30  ;;  %1803 = vmatpush.bf16.msra.mxu3 %v1975_v9 }
 0x579   :  { %v1597_v32 = vmul.f32 %v2052_v63, %v1592_v51 }
 0x57b   :  { %v2851_v59 = vadd.f32 %v2053_v55, %v1597_v32  ;;  %1804 = vmatpush.bf16.msra.mxu3 %v1974_v46 }
 0x57d   :  { %v1603_v8 = vpack.c.bf16 %v2851_v59, %v2849_v0 }
 0x57f   :  { %1932 = vmatmul.msk.bf16.vlgmr.msra.gmra.mxu2 %vm69_vm0, %v1603_v8  ;;  %1805 = vmatpush.bf16.msra.mxu3 %v1973_v37 }
 0x602   :  { %v1636_v50 = vpop.f32.mrf.mxu2 }
 0x603   :  { %v2859_v52 = vadd.f32 %v2054_v18, %v1636_v50 }
 0x605   :  { %v2862_v1 = vmul.f32 0.70710677, %v2859_v52  ;;  %v1641_v56 = vmul.f32 0.5, %v2859_v52 }
 0x607   :  { %v1645_v11 = vmul.f32 %v2862_v1, %v2862_v1 }
 0x609   :  { %v1646_v27 = vmin.f32 %v1645_v11, 16.0 }
 0x60a   :  { %v1638_v10 = vpop.f32.mrf.mxu2 }
 0x60b   :  { %v1647_v14 = vmul.f32 2.1237322e-06, %v1646_v27  ;;  %v1658_v12 = vmul.f32 3.8918573e-05, %v1646_v27  ;;  %v2866_v7 = vadd.f32 %v2054_v18, %v1638_v10 }
 0x60d   :  { %v1648_v28 = vadd.f32 0.00028619796, %v1647_v14  ;;  %v1659_v43 = vadd.f32 0.001143296, %v1658_v12  ;;  %v2869_v16 = vmul.f32 0.70710677, %v2866_v7 }
 0x60f   :  { %v1660_v19 = vmul.f32 %v1659_v43, %v1646_v27  ;;  %v1685_v48 = vmul.f32 %v2869_v16, %v2869_v16  ;;  %v1649_v31 = vmul.f32 %v1648_v28, %v1646_v27 }
 0x611   :  { %v1661_v29 = vadd.f32 0.014752088, %v1660_v19  ;;  %v1686_v23 = vmin.f32 %v1685_v48, 16.0  ;;  %v1650_v45 = vadd.f32 0.0036580483, %v1649_v31 }
 0x613   :  { %v1662_v26 = vmul.f32 %v1661_v29, %v1646_v27  ;;  %v1687_v39 = vmul.f32 2.1237322e-06, %v1686_v23  ;;  %v1698_v44 = vmul.f32 3.8918573e-05, %v1686_v23  ;;  %v1651_v54 = vmul.f32 %v1650_v45, %v1646_v27 }
 0x615   :  { %v1663_v15 = vadd.f32 0.112945676, %v1662_v26  ;;  %v1688_v49 = vadd.f32 0.00028619796, %v1687_v39  ;;  %v1699_v62 = vadd.f32 0.001143296, %v1698_v44 }
 0x616   :  { %v1652_v35 = vadd.f32 0.05243302, %v1651_v54 }
 0x617   :  { %v1664_v20 = vmul.f32 %v1663_v15, %v1646_v27  ;;  %v1689_v30 = vmul.f32 %v1688_v49, %v1686_v23  ;;  %v1700_v33 = vmul.f32 %v1699_v62, %v1686_v23 }
 0x618   :  { %v1653_v17 = vmul.f32 %v1652_v35, %v1646_v27 }
 0x619   :  { %v1665_v60 = vadd.f32 0.4994258, %v1664_v20  ;;  %v1690_v13 = vadd.f32 0.0036580483, %v1689_v30  ;;  %v1701_v53 = vadd.f32 0.014752088, %v1700_v33 }
 0x61a   :  { %v1654_v57 = vadd.f32 0.18741608, %v1653_v17  ;;  %v1642_v30 = vmul.f32 0.5, %v2866_v7 }
 0x61b   :  { %v1666_v58 = vmul.f32 %v1665_v60, %v1646_v27  ;;  %v1702_v61 = vmul.f32 %v1701_v53, %v1686_v23  ;;  %v1691_v22 = vmul.f32 %v1690_v13, %v1686_v23  ;;  %v2055_v53 = vld [vmem:[%s2938_s12] ss:$0 sm:$0xff] }
 0x61c   :  { %v1655_v55 = vmul.f32 %v1654_v57, %v1646_v27 }
 0x61d   :  { %v1667_v6 = vadd.f32 1.0, %v1666_v58  ;;  %v1703_v41 = vadd.f32 0.112945676, %v1702_v61  ;;  %v1692_v36 = vadd.f32 0.05243302, %v1691_v22 }
 0x61e   :  { %v1656_v11 = vadd.f32 1.1283791, %v1655_v55 }
 0x61f   :  { %2096 = vrcp.f32 %v1667_v6  ;;  %v1704_v24 = vmul.f32 %v1703_v41, %v1686_v23  ;;  %v1693_v2 = vmul.f32 %v1692_v36, %v1686_v23  ;;  %v1679_v32 = vand.u32 2147483648, %v1667_v6 }
 0x620   :  { %v1677_v18 = vand.u32 2147483647, %v1667_v6  ;;  %vm1673_vm15 = vweird.f32 %v1667_v6  ;;  %v1657_v19 = vmul.f32 %v1656_v11, %v2862_v1 }
 0x621   :  { %v1705_v25 = vadd.f32 0.4994258, %v1704_v24  ;;  %v1694_v8 = vadd.f32 0.18741608, %v1693_v2  ;;  %v1680_v12 = vor.u32 1.1754944e-38, %v1679_v32 }
 0x622   :  { %vm1678_vm2 = vcmp.eq.f32.partialorder %v1677_v18, 8.507059e+37 }
 0x623   :  { %v1706_v42 = vmul.f32 %v1705_v25, %v1686_v23  ;;  %v1695_v28 = vmul.f32 %v1694_v8, %v1686_v23 }
 0x625   :  { %v2097_v38 = vpop.eup %2096  ;;  %v1707_v4 = vadd.f32 1.0, %v1706_v42  ;;  %v1696_v48 = vadd.f32 1.1283791, %v1695_v28 }
 0x626   :  { %v1669_v63 = vmul.f32 %v2097_v38, %v1667_v6  ;;  %vm1674_vm14 = vweird.f32 %v2097_v38 }
 0x627   :  { %2098 = vrcp.f32 %v1707_v4  ;;  %vm1675_vm1 = vmor %vm1673_vm15, %vm1674_vm14  ;;  %v1719_v31 = vand.u32 2147483648, %v1707_v4  ;;  %v1717_v21 = vand.u32 2147483647, %v1707_v4  ;;  %vm1713_vm4 = vweird.f32 %v1707_v4 }
 0x628   :  { %v1670_v5 = vsub.f32 1.0, %v1669_v63  ;;  %v1697_v15 = vmul.f32 %v1696_v48, %v2869_v16 }
 0x629   :  { %v1720_v44 = vor.u32 1.1754944e-38, %v1719_v31  ;;  %vm1718_vm6 = vcmp.eq.f32.partialorder %v1717_v21, 8.507059e+37 }
 0x62a   :  { %v1671_v51 = vmul.f32 %v2097_v38, %v1670_v5 }
 0x62c   :  { %v1672_v50 = vadd.f32 %v2097_v38, %v1671_v51 }
 0x62d   :  { %v2099_v10 = vpop.eup %2098 }
 0x62e   :  { %v1676_v14 = vsel %vm1675_vm1, %v2097_v38, %v1672_v50  ;;  %v1709_v27 = vmul.f32 %v2099_v10, %v1707_v4  ;;  %vm1714_vm3 = vweird.f32 %v2099_v10  ;;  %v2056_v50 = vld [vmem:[%s2933_s7] ss:$0 sm:$0xff] }
 0x62f   :  { %v1681_v43 = vsel %vm1678_vm2, %v1680_v12, %v1676_v14  ;;  %vm1715_vm5 = vmor %vm1713_vm4, %vm1714_vm3  ;;  %v2057_v14 = vld [vmem:[%s2934_s8] ss:$0 sm:$0xff]  ;;  %s2145_s8 = smov 128  }
 0x630   :  { %v1710_v3 = vsub.f32 1.0, %v1709_v27  ;;  %v1682_v29 = vmul.f32 %v1681_v43, %v1657_v19 }
 0x632   :  { %v1711_v26 = vmul.f32 %v2099_v10, %v1710_v3  ;;  %v1933_v45 = vclamps-f32 %v1682_v29, 1.0 }
 0x634   :  { %v1712_v39 = vadd.f32 %v2099_v10, %v1711_v26  ;;  %v1725_v20 = vadd.f32 1.0, %v1933_v45 }
 0x636   :  { %v1716_v23 = vsel %vm1715_vm5, %v2099_v10, %v1712_v39  ;;  %v1727_v54 = vmul.f32 %v1725_v20, %v1641_v56 }
 0x637   :  { %v1721_v49 = vsel %vm1718_vm6, %v1720_v44, %v1716_v23 }
 0x638   :  { %v1722_v62 = vmul.f32 %v1721_v49, %v1697_v15 }
 0x63a   :  { %v1934_v1 = vclamps-f32 %v1722_v62, 1.0 }
 0x63c   :  { %v1726_v33 = vadd.f32 1.0, %v1934_v1 }
 0x63e   :  { %v1728_v60 = vmul.f32 %v1726_v33, %v1642_v30 }
 0x640   :  { %v1729_v13 = vpack.c.bf16 %v1728_v60, %v1727_v54 }
 0x642   :  { %1806 = vmatmul.bf16.vlgmr.msra.gmra.mxu3 %v1729_v13 }
 0x6c5   :  { %v1807_v16 = vpop.f32.mrf.mxu3 }
 0x6c6   :  { %v1808_v58 = vadd.f32 %v2055_v53, %v1807_v16 }
 0x6c8   :  { %v1812_v34 = vadd.f32 %v1808_v58, %v2849_v0 }
 0x6ca   :  { %v1816_v61 = vsel %vm69_vm0, %v1812_v34, 0.0 }
 0x6cb   :  { %1817 = vadd.xlane.f32.xlu2 %v1816_v61 }
 0x6cd   :  { %v1809_v35 = vpop.f32.mrf.mxu3 }
 0x6ce   :  { %v1810_v52 = vadd.f32 %v2055_v53, %v1809_v35 }
 0x6d0   :  { %v1813_v7 = vadd.f32 %v1810_v52, %v2851_v59 }
 0x6d2   :  { %v1819_v6 = vsel %vm69_vm0, %v1813_v7, 0.0 }
 0x6d3   :  { %1820 = vadd.xlane.f32.xlu1 %v1819_v6 }
 0x73e   :  { %v1818_v22 = vpop.xlane.xlu2 %1817 }
 0x73f   :  { %v1822_v41 = vmul.f32 %v1818_v22, %v2829_v47 }
 0x741   :  { %v1824_v40 = vsub.f32 %v1812_v34, %v1822_v41 }
 0x743   :  { %v1826_v24 = vmul.f32 %v1824_v40, %v1824_v40 }
 0x745   :  { %v1828_v17 = vsel %vm69_vm0, %v1826_v24, 0.0 }
 0x746   :  { %v1821_v9 = vpop.xlane.xlu1 %1820  ;;  %1829 = vadd.xlane.f32.xlu0 %v1828_v17 }
 0x747   :  { %v1823_v0 = vmul.f32 %v1821_v9, %v2829_v47 }
 0x749   :  { %v1825_v36 = vsub.f32 %v1813_v7, %v1823_v0 }
 0x74b   :  { %v1827_v25 = vmul.f32 %v1825_v36, %v1825_v36 }
 0x74d   :  { %v1831_v42 = vsel %vm69_vm0, %v1827_v25, 0.0 }
 0x74e   :  { %1832 = vadd.xlane.f32.xlu2 %v1831_v42 }
 0x7b9   :  { %v1830_v59 = vpop.xlane.xlu0 %1829 }
 0x7ba   :  { %v1834_v38 = vmul.f32 %v1830_v59, %v2829_v47 }
 0x7bc   :  { %v1836_v57 = vadd.f32 1e-05, %v1834_v38 }
 0x7be   :  { %2100 = vrsqrt.f32 %v1836_v57  ;;  %vm1844_vm8 = vweird.f32 %v1836_v57 }
 0x7c1   :  { %v1833_v46 = vpop.xlane.xlu2 %1832 }
 0x7c2   :  { %v1835_v63 = vmul.f32 %v1833_v46, %v2829_v47 }
 0x7c4   :  { %v2101_v2 = vpop.eup %2100  ;;  %v1837_v4 = vadd.f32 1e-05, %v1835_v63 }
 0x7c5   :  { %v1839_v5 = vmul.f32 %v2101_v2, %v1836_v57  ;;  %vm1845_vm7 = vweird.f32 %v2101_v2 }
 0x7c6   :  { %2102 = vrsqrt.f32 %v1837_v4  ;;  %vm1846_vm9 = vmor %vm1844_vm8, %vm1845_vm7  ;;  %vm1854_vm11 = vweird.f32 %v1837_v4 }
 0x7c7   :  { %v1840_v55 = vmul.f32 %v2101_v2, %v1839_v5 }
 0x7c9   :  { %v1841_v37 = vmul.f32 0.5, %v1840_v55 }
 0x7cb   :  { %v1842_v51 = vsub.f32 1.5, %v1841_v37 }
 0x7cc   :  { %v2103_v32 = vpop.eup %2102 }
 0x7cd   :  { %v1843_v8 = vmul.f32 %v2101_v2, %v1842_v51  ;;  %v1849_v18 = vmul.f32 %v2103_v32, %v1837_v4  ;;  %vm1855_vm10 = vweird.f32 %v2103_v32 }
 0x7ce   :  { %vm1856_vm12 = vmor %vm1854_vm11, %vm1855_vm10 }
 0x7cf   :  { %v1847_v11 = vsel %vm1846_vm9, %v2101_v2, %v1843_v8  ;;  %v1850_v10 = vmul.f32 %v2103_v32, %v1849_v18 }
 0x7d0   :  { %v1858_v47 = vmul.f32 %v1847_v11, %v1824_v40 }
 0x7d1   :  { %v1851_v12 = vmul.f32 0.5, %v1850_v10 }
 0x7d2   :  { %v1863_v28 = vmul.f32 %v2056_v50, %v1858_v47 }
 0x7d3   :  { %v1852_v27 = vsub.f32 1.5, %v1851_v12 }
 0x7d4   :  { %v1868_v43 = vadd.f32 %v2057_v14, %v1863_v28 }
 0x7d5   :  { %v1853_v19 = vmul.f32 %v2103_v32, %v1852_v27 }
 0x7d6   :  { %1870 = vst.msk [vmem:[#allocation2] sm:$0xff] %vm69_vm0, %v1868_v43 }
 0x7d7   :  { %v1857_v3 = vsel %vm1856_vm12, %v2103_v32, %v1853_v19 }
 0x7d8   :  { %v1859_v48 = vmul.f32 %v1857_v3, %v1825_v36 }
 0x7da   :  { %v1864_v31 = vmul.f32 %v2056_v50, %v1859_v48 }
 0x7dc   :  { %v1869_v29 = vadd.f32 %v2057_v14, %v1864_v31 }
 0x7de   :  { %1871 = vst.msk [vmem:[#allocation2 + $0x8] sm:$0xff] %vm69_vm0, %v1869_v29 }
 0x7df   :  { %1884 = dma.vmem_to_hbm [thread:$0]  %s1877_s5, 256, %s1879_s18, [#allocation3], %s2145_s8, %s2145_s8, %s2142_s23  }
 0x7e0   :  { %2130 = dma.done.wait [#allocation3], 256  }
 0x7e1   :  { %2131 = vsyncadd [#allocation3], 4294967040 }
 0x7e2   :  { %1889 = vsyncpa [#allocation3], 1 }

// kernel: tpu_custom_call.1
= control target key start
LH: loop header
LB: loop body
LE: loop exit
PB: predicated region body
PF: predicated region fallthrough
CT: control target
= control target key end

     0   :  { %s2926_s0 = inlined_call_operand.vmem [shape: f32[2,8,32], index: 0, kind: input, shape index: {}]   ;;  %s2927_s1 = inlined_call_operand.vmem [shape: bf16[32,96], index: 1, kind: input, shape index: {}]   ;;  %s2928_s2 = inlined_call_operand.vmem [shape: f32[1,96], index: 2, kind: input, shape index: {}]   ;;  %s2929_s3 = inlined_call_operand.vmem [shape: bf16[32,32], index: 3, kind: input, shape index: {}]   ;;  %s2930_s4 = inlined_call_operand.vmem [shape: f32[1,32], index: 4, kind: input, shape index: {}]   ;;  %s2931_s5 = inlined_call_operand.vmem [shape: f32[1,32], index: 5, kind: input, shape index: {}]   ;;  %s2932_s6 = inlined_call_operand.vmem [shape: f32[1,32], index: 6, kind: input, shape index: {}]   ;;  %s2933_s7 = inlined_call_operand.vmem [shape: f32[1,32], index: 7, kind: input, shape index: {}]   ;;  %s2934_s8 = inlined_call_operand.vmem [shape: f32[1,32], index: 8, kind: input, shape index: {}]   ;;  %s2935_s9 = inlined_call_operand.vmem [shape: bf16[32,128], index: 9, kind: input, shape index: {}]   ;;  %s2936_s10 = inlined_call_operand.vmem [shape: f32[1,128], index: 10, kind: input, shape index: {}]   ;;  %s2937_s11 = inlined_call_operand.vmem [shape: bf16[128,32], index: 11, kind: input, shape index: {}]   ;;  %s2938_s12 = inlined_call_operand.vmem [shape: f32[1,32], index: 12, kind: input, shape index: {}]   ;;  %s2939_s13 = inlined_call_operand.hbm [shape: f32[2,8,32], index: 13, kind: output, shape index: {}]  }
   0x1   :  { %v1968_v0 = vld [vmem:[%s2927_s1 + $0x8] sm:$0xff]  ;;  %v1967_v1 = vld [vmem:[%s2927_s1] sm:$0xff] }
   0x2   :  { %v46_v2 = vld [vmem:[%s2926_s0] sm:$0xff]  ;;  %v47_v3 = vld [vmem:[%s2926_s0 + $0x8] sm:$0xff]  ;;  %79 = vmatpush.bf16.msra.mxu0 %v1968_v0 }
   0x3   :  { %18 = vsyncpa [#allocation3], 0  ;;  %v48_v4 = vpack.c.bf16 %v47_v3, %v46_v2  ;;  %vm69_vm0 = vcmask 261120   ;;  %v2050_v5 = vld [vmem:[%s2928_s2] ss:$0 sm:$0xff]  ;;  %s2132_s1 = smov 104  }
   0x4   :  { %s2133_s18 = smov 120   ;;  %s2134_s19 = smov 112   ;;  %vm114_vm1 = vcmask 1047556   ;;  %v2135_v16 = vmov 1983009808   ;;  %vm846_vm2 = vcmask 64512  }
   0x5   :  { %v119_v17 = vunpack.c.l.s4 %v2135_v16  ;;  %s2136_s2 = smov 96   ;;  %v2137_v26 = vmov 1934713408   ;;  %s2138_s20 = smov 64   ;;  %vm1082_vm3 = vcmask 1043456   ;;  %vm1494_vm5 = vcmask 130048  }
   0x6   :  { %80 = vmatpush.bf16.msra.mxu0 %v1967_v1  ;;  %v143_v27 = vunpack.c.l.s4 %v2137_v26  ;;  %s2140_s21 = smov 24   ;;  %s2141_s22 = smov 16   ;;  %vm1497_vm6 = vcmask 195584  }
   0x7   :  { %v2241_v20 = vunpack.c.0.s8 %v119_v17  ;;  %s2142_s23 = smov 8  }
   0x8   :  { %v2256_v38 = vunpack.c.0.s8 %v143_v27 }
   0x9   :  { %1898 = vmatmul.msk.bf16.vlgmr.msra.gmra.mxu0 %vm69_vm0, %v48_v4 }
  0x86   :  { %v82_v6 = vpop.f32.mrf.mxu0 }
  0x87   :  { %v83_v7 = vadd.f32 %v2050_v5, %v82_v6 }
  0x89   :  { %107 = vrot.lane.b32.xlu1 %v83_v7, %s2132_s1  ;;  %95 = vrot.lane.b32.xlu0 %v83_v7, %s2133_s18  ;;  %v116_v24 = vrot.slane %v83_v7, 4 }
  0x8e   :  { %v84_v8 = vpop.f32.mrf.mxu0 }
  0x8f   :  { %v2232_v9 = vadd.f32 %v2050_v5, %v84_v8 }
  0x91   :  { %103 = vrot.lane.b32.xlu2 %v2232_v9, %s2134_s19  ;;  %97 = vrot.lane.b32.xlu1 %v2232_v9, %s2133_s18  ;;  %s1878_s18 = sshll.u32 %s2939_s13, 4  ;;  %s1879_s18 = int_to_ptr.hbm [resolvable:$true] %s1878_s18 }
  0x92   :  { %101 = vrot.lane.b32.xlu0 %v83_v7, %s2134_s19  ;;  %s2144_s19 = smov [#allocation2]  }
  0x99   :  { %109 = vrot.lane.b32.xlu2 %v2232_v9, %s2132_s1 }
  0xeb   :  { %v2237_v10 = vpop.permute.xlu2 %103 }
  0xf3   :  { %v2243_v21 = vpop.permute.xlu2 %109 }
  0xf4   :  { %v2010_v30 = vpack.i.bf16 %v2243_v21, %v2237_v10 }
  0xfb   :  { %v108_v11 = vpop.permute.xlu1 %107  ;;  %v96_v12 = vpop.permute.xlu0 %95 }
  0xfc   :  { %v126_v13 = vrot.slane %v108_v11, 4  ;;  %v128_v14 = vrot.slane %v96_v12, 4  ;;  %v1995_v15 = vpack.i.bf16 %v96_v12, %v83_v7 }
  0xfe   :  { %v127_v18 = vsel %vm114_vm1, %v126_v13, %v96_v12  ;;  %v129_v19 = vsel %vm114_vm1, %v108_v11, %v128_v14  ;;  %1996 = vrot.lane.b32.xlu0 %v1995_v15, %s2136_s2 }
  0xff   :  { %v137_v22 = vperm.slane %v129_v19, %v2241_v20  ;;  %v133_v25 = vperm.slane %v127_v18, %v2241_v20 }
 0x101   :  { %v150_v35 = vrot.slane %v137_v22, 4  ;;  %v138_v37 = vrot.slane %v133_v25, 4 }
 0x103   :  { %v2246_v23 = vpop.permute.xlu1 %97 }
 0x104   :  { %v102_v28 = vpop.permute.xlu0 %101  ;;  %v2005_v29 = vpack.i.bf16 %v2246_v23, %v2232_v9 }
 0x105   :  { %v113_v31 = vrot.slane %v102_v28, 4  ;;  %v117_v32 = vsel %vm114_vm1, %v102_v28, %v116_v24  ;;  %v2000_v33 = vpack.i.bf16 %v108_v11, %v102_v28 }
 0x106   :  { %v125_v34 = vperm.slane %v117_v32, %v2241_v20  ;;  %2006 = vrot.lane.b32.xlu2 %v2005_v29, %s2136_s2  ;;  %2011 = vrot.lane.b32.xlu0 %v2010_v30, %s2136_s2 }
 0x107   :  { %v115_v36 = vsel %vm114_vm1, %v113_v31, %v83_v7  ;;  %2001 = vrot.lane.b32.xlu1 %v2000_v33, %s2136_s2  ;;  %v184_v31 = vrot.slane %v2246_v23, 4 }
 0x108   :  { %v121_v39 = vperm.slane %v115_v36, %v2241_v20  ;;  %v152_v40 = vrot.slane %v125_v34, 4  ;;  %v151_v41 = vsel %vm114_vm1, %v150_v35, %v125_v34  ;;  %v182_v34 = vrot.slane %v2243_v21, 4 }
 0x109   :  { %v157_v45 = vperm.slane %v151_v41, %v2256_v38  ;;  %v185_v35 = vsel %vm114_vm1, %v2243_v21, %v184_v31 }
 0x10a   :  { %v139_v42 = vsel %vm114_vm1, %v138_v37, %v121_v39  ;;  %v140_v43 = vrot.slane %v121_v39, 4  ;;  %v153_v44 = vsel %vm114_vm1, %v137_v22, %v152_v40  ;;  %v183_v37 = vsel %vm114_vm1, %v182_v34, %v2246_v23 }
 0x10b   :  { %v145_v47 = vperm.slane %v139_v42, %v2256_v38  ;;  %v161_v48 = vperm.slane %v153_v44, %v2256_v38  ;;  %v166_v50 = vrot.slane %v157_v45, 4  ;;  %v193_v40 = vperm.slane %v185_v35, %v2241_v20 }
 0x10c   :  { %v141_v46 = vsel %vm114_vm1, %v133_v25, %v140_v43  ;;  %v189_v41 = vperm.slane %v183_v37, %v2241_v20 }
 0x10d   :  { %v149_v49 = vperm.slane %v141_v46, %v2256_v38  ;;  %v168_v51 = vrot.slane %v161_v48, 4  ;;  %v162_v52 = vrot.slane %v145_v47, 4  ;;  %v167_v60 = vsel %vm114_vm1, 0.0, %v166_v50 }
 0x10e   :  { %2026 = vrot.lane.b32.xlu0 %v2005_v29, %s2138_s20  ;;  %2021 = vrot.lane.b32.xlu2 %v2000_v33, %s2138_s20  ;;  %v170_v29 = vrot.slane %v2237_v10, 4  ;;  %v206_v43 = vrot.slane %v193_v40, 4  ;;  %v194_v44 = vrot.slane %v189_v41, 4 }
 0x10f   :  { %2016 = vrot.lane.b32.xlu1 %v1995_v15, %s2138_s20  ;;  %v164_v53 = vrot.slane %v149_v49, 4  ;;  %v169_v54 = vsel %vm114_vm1, 0.0, %v168_v51  ;;  %v237_v55 = vsel %vm114_vm1, %v168_v51, %v157_v45  ;;  %v163_v63 = vsel %vm114_vm1, 0.0, %v162_v52 }
 0x110   :  { %v241_v56 = vperm.slane %v237_v55, %v2241_v20  ;;  %v242_v57 = vrot.slane %v169_v54, 4  ;;  %v171_v33 = vsel %vm114_vm1, %v170_v29, %v2232_v9 }
 0x111   :  { %v165_v58 = vsel %vm114_vm1, 0.0, %v164_v53  ;;  %v226_v59 = vsel %vm114_vm1, %v164_v53, %v145_v47  ;;  %v177_v39 = vperm.slane %v171_v33, %v2241_v20 }
 0x112   :  { %v230_v61 = vperm.slane %v226_v59, %v2241_v20  ;;  %v231_v62 = vrot.slane %v165_v58, 4  ;;  %v243_v0 = vsel %vm114_vm1, %v242_v57, %v167_v60  ;;  %v262_v1 = vrot.slane %v241_v56, 4 }
 0x113   :  { %v247_v3 = vperm.slane %v243_v0, %v2241_v20  ;;  %v196_v42 = vrot.slane %v177_v39, 4  ;;  %v195_v47 = vsel %vm114_vm1, %v194_v44, %v177_v39 }
 0x114   :  { %v232_v2 = vsel %vm114_vm1, %v231_v62, %v163_v63  ;;  %v250_v4 = vrot.slane %v230_v61, 4  ;;  %v201_v50 = vperm.slane %v195_v47, %v2256_v38 }
 0x115   :  { %v236_v5 = vperm.slane %v232_v2, %v2241_v20  ;;  %v263_v6 = vsel %vm114_vm1, %v247_v3, %v262_v1  ;;  %v260_v7 = vrot.slane %v247_v3, 4  ;;  %v197_v45 = vsel %vm114_vm1, %v189_v41, %v196_v42 }
 0x116   :  { %2031 = vrot.lane.b32.xlu2 %v2010_v30, %s2138_s20  ;;  %v271_v11 = vperm.slane %v263_v6, %v2256_v38  ;;  %v172_v30 = vrot.slane %v2232_v9, 4  ;;  %v205_v46 = vperm.slane %v197_v45, %v2256_v38  ;;  %v218_v54 = vrot.slane %v201_v50, 4 }
 0x117   :  { %v251_v8 = vsel %vm114_vm1, %v236_v5, %v250_v4  ;;  %v248_v12 = vrot.slane %v236_v5, 4  ;;  %v261_v14 = vsel %vm114_vm1, %v260_v7, %v241_v56 }
 0x118   :  { %v259_v13 = vperm.slane %v251_v8, %v2256_v38  ;;  %v276_v15 = vrot.slane %v271_v11, 4  ;;  %v267_v17 = vperm.slane %v261_v14, %v2256_v38  ;;  %v173_v32 = vsel %vm114_vm1, %v2237_v10, %v172_v30 }
 0x119   :  { %v249_v16 = vsel %vm114_vm1, %v248_v12, %v230_v61  ;;  %v181_v36 = vperm.slane %v173_v32, %v2241_v20  ;;  %v220_v51 = vrot.slane %v205_v46, 4  ;;  %v219_v62 = vsel %vm114_vm1, 0.0, %v218_v54 }
 0x11a   :  { %v278_v18 = vrot.slane %v259_v13, 4  ;;  %v255_v19 = vperm.slane %v249_v16, %v2256_v38  ;;  %v2288_v22 = vsel %vm114_vm1, %v276_v15, %v259_v13  ;;  %v272_v24 = vrot.slane %v267_v17, 4 }
 0x11b   :  { %v208_v10 = vrot.slane %v181_v36, 4  ;;  %v207_v23 = vsel %vm114_vm1, %v206_v43, %v181_v36  ;;  %v221_v55 = vsel %vm114_vm1, 0.0, %v220_v51  ;;  %v280_v59 = vsel %vm114_vm1, %v220_v51, %v201_v50 }
 0x11c   :  { %v2291_v25 = vsel %vm114_vm1, %v271_v11, %v278_v18  ;;  %v274_v26 = vrot.slane %v255_v19, 4  ;;  %v2294_v27 = vsel %vm114_vm1, %v272_v24, %v255_v19  ;;  %v213_v48 = vperm.slane %v207_v23, %v2256_v38 }
 0x11d   :  { %v209_v9 = vsel %vm114_vm1, %v193_v40, %v208_v10  ;;  %v285_v60 = vrot.slane %v221_v55, 4  ;;  %v284_v0 = vperm.slane %v280_v59, %v2241_v20  ;;  %v336_v40 = vpack.c.bf16 %v2288_v22, %v2288_v22 }
 0x11e   :  { %v2297_v28 = vsel %vm114_vm1, %v267_v17, %v274_v26  ;;  %v217_v21 = vperm.slane %v209_v9, %v2256_v38  ;;  %v222_v52 = vrot.slane %v213_v48, 4  ;;  %v334_v10 = vpack.c.bf16 %v2294_v27, %v2294_v27 }
 0x11f   :  { %v286_v2 = vsel %vm114_vm1, %v285_v60, %v219_v62  ;;  %v304_v6 = vrot.slane %v284_v0, 4  ;;  %v337_v42 = vpack.c.bf16 %v2291_v25, %v2291_v25  ;;  %v335_v43 = vpack.c.bf16 %v2297_v28, %v2297_v28 }
 0x120   :  { %v224_v49 = vrot.slane %v217_v21, 4  ;;  %v223_v58 = vsel %vm114_vm1, 0.0, %v222_v52  ;;  %v290_v5 = vperm.slane %v286_v2, %v2241_v20 }
 0x122   :  { %v225_v53 = vsel %vm114_vm1, 0.0, %v224_v49  ;;  %v291_v56 = vsel %vm114_vm1, %v224_v49, %v213_v48  ;;  %v305_v11 = vsel %vm114_vm1, %v290_v5, %v304_v6  ;;  %v302_v14 = vrot.slane %v290_v5, 4 }
 0x123   :  { %v296_v57 = vrot.slane %v225_v53, 4  ;;  %v295_v63 = vperm.slane %v291_v56, %v2241_v20  ;;  %v313_v13 = vperm.slane %v305_v11, %v2256_v38 }
 0x124   :  { %v303_v24 = vsel %vm114_vm1, %v302_v14, %v284_v0 }
 0x125   :  { %v297_v1 = vsel %vm114_vm1, %v296_v57, %v223_v58  ;;  %v316_v4 = vrot.slane %v295_v63, 4  ;;  %v332_v19 = vrot.slane %v313_v13, 4  ;;  %v2357_v36 = vperm.slane %v303_v24, %v2256_v38 }
 0x126   :  { %v301_v3 = vperm.slane %v297_v1, %v2241_v20 }
 0x128   :  { %v317_v8 = vsel %vm114_vm1, %v301_v3, %v316_v4  ;;  %v314_v15 = vrot.slane %v301_v3, 4 }
 0x129   :  { %v325_v12 = vperm.slane %v317_v8, %v2256_v38 }
 0x12a   :  { %v315_v26 = vsel %vm114_vm1, %v314_v15, %v295_v63 }
 0x12b   :  { %v330_v17 = vrot.slane %v325_v12, 4  ;;  %v2362_v41 = vsel %vm114_vm1, %v325_v12, %v332_v19  ;;  %v2371_v9 = vperm.slane %v315_v26, %v2256_v38 }
 0x12d   :  { %v2354_v35 = vsel %vm114_vm1, %v330_v17, %v313_v13 }
 0x160   :  { %v2328_v61 = vpop.permute.xlu2 %2006 }
 0x161   :  { %v2009_v29 = vunpack.i.h.bf16 %v2328_v61  ;;  %v2008_v30 = vunpack.i.l.bf16 %v2328_v61 }
 0x163   :  { %v436_v44 = vrot.slane %v2009_v29, 4  ;;  %v424_v45 = vrot.slane %v2008_v30, 4 }
 0x168   :  { %v2337_v7 = vpop.permute.xlu2 %2021 }
 0x169   :  { %v2024_v31 = vunpack.i.h.bf16 %v2337_v7  ;;  %v2023_v32 = vunpack.i.l.bf16 %v2337_v7 }
 0x16b   :  { %v2375_v21 = vrot.slane %v2024_v31, 4  ;;  %v2379_v46 = vrot.slane %v2023_v32, 4 }
 0x170   :  { %v1997_v16 = vpop.permute.xlu0 %1996  ;;  %v2343_v18 = vpop.permute.xlu2 %2031 }
 0x171   :  { %v2034_v33 = vunpack.i.h.bf16 %v2343_v18  ;;  %v2033_v34 = vunpack.i.l.bf16 %v2343_v18  ;;  %v1999_v37 = vunpack.i.h.bf16 %v1997_v16  ;;  %v1998_v39 = vunpack.i.l.bf16 %v1997_v16 }
 0x173   :  { %v2383_v47 = vrot.slane %v2034_v33, 4  ;;  %v2387_v48 = vrot.slane %v2033_v34, 4  ;;  %v380_v52 = vrot.slane %v1999_v37, 4  ;;  %v368_v53 = vrot.slane %v1998_v39, 4 }
 0x178   :  { %v2012_v23 = vpop.permute.xlu0 %2011 }
 0x179   :  { %v2002_v49 = vpop.permute.xlu1 %2001  ;;  %v2014_v50 = vunpack.i.h.bf16 %v2012_v23  ;;  %v2013_v51 = vunpack.i.l.bf16 %v2012_v23 }
 0x17a   :  { %v2004_v54 = vunpack.i.h.bf16 %v2002_v49  ;;  %v2003_v55 = vunpack.i.l.bf16 %v2002_v49 }
 0x17b   :  { %v434_v56 = vrot.slane %v2014_v50, 4  ;;  %v437_v57 = vsel %vm114_vm1, %v2014_v50, %v436_v44  ;;  %v422_v58 = vrot.slane %v2013_v51, 4  ;;  %v425_v59 = vsel %vm114_vm1, %v2013_v51, %v424_v45 }
 0x17c   :  { %v378_v60 = vrot.slane %v2004_v54, 4  ;;  %v366_v61 = vrot.slane %v2003_v55, 4  ;;  %v369_v62 = vsel %vm114_vm1, %v2003_v55, %v368_v53  ;;  %v381_v63 = vsel %vm114_vm1, %v2004_v54, %v380_v52 }
 0x17d   :  { %v377_v0 = vperm.slane %v369_v62, %v2241_v20  ;;  %v389_v1 = vperm.slane %v381_v63, %v2241_v20  ;;  %v435_v2 = vsel %vm114_vm1, %v434_v56, %v2009_v29  ;;  %v445_v3 = vperm.slane %v437_v57, %v2241_v20 }
 0x17e   :  { %v367_v4 = vsel %vm114_vm1, %v366_v61, %v1998_v39  ;;  %v379_v5 = vsel %vm114_vm1, %v378_v60, %v1999_v37  ;;  %v441_v6 = vperm.slane %v435_v2, %v2241_v20  ;;  %v423_v8 = vsel %vm114_vm1, %v422_v58, %v2008_v30 }
 0x17f   :  { %v373_v11 = vperm.slane %v367_v4, %v2241_v20  ;;  %v385_v12 = vperm.slane %v379_v5, %v2241_v20  ;;  %v402_v13 = vrot.slane %v389_v1, 4  ;;  %v404_v14 = vrot.slane %v377_v0, 4 }
 0x180   :  { %v446_v15 = vrot.slane %v441_v6, 4  ;;  %v458_v16 = vrot.slane %v445_v3, 4  ;;  %v429_v17 = vperm.slane %v423_v8, %v2241_v20  ;;  %v433_v19 = vperm.slane %v425_v59, %v2241_v20 }
 0x181   :  { %v390_v24 = vrot.slane %v385_v12, 4  ;;  %v392_v26 = vrot.slane %v373_v11, 4  ;;  %v403_v29 = vsel %vm114_vm1, %v402_v13, %v377_v0  ;;  %v405_v37 = vsel %vm114_vm1, %v389_v1, %v404_v14  ;;  %v2017_v60 = vpop.permute.xlu1 %2016  ;;  %v2027_v1 = vpop.permute.xlu0 %2026 }
 0x182   :  { %v2408_v30 = vperm.slane %v403_v29, %v2256_v38  ;;  %v413_v39 = vperm.slane %v405_v37, %v2256_v38  ;;  %v447_v44 = vsel %vm114_vm1, %v446_v15, %v429_v17  ;;  %v448_v45 = vrot.slane %v429_v17, 4 }
 0x183   :  { %v391_v23 = vsel %vm114_vm1, %v390_v24, %v373_v11  ;;  %v393_v49 = vsel %vm114_vm1, %v385_v12, %v392_v26  ;;  %v2415_v50 = vperm.slane %v447_v44, %v2256_v38  ;;  %v459_v51 = vsel %vm114_vm1, %v458_v16, %v433_v19 }
 0x184   :  { %v2419_v52 = vperm.slane %v391_v23, %v2256_v38  ;;  %v401_v53 = vperm.slane %v393_v49, %v2256_v38  ;;  %v418_v54 = vrot.slane %v2408_v30, 4  ;;  %v2423_v55 = vrot.slane %v413_v39, 4 }
 0x185   :  { %v449_v56 = vsel %vm114_vm1, %v441_v6, %v448_v45  ;;  %v460_v57 = vrot.slane %v433_v19, 4  ;;  %v465_v58 = vperm.slane %v459_v51, %v2256_v38  ;;  %v470_v59 = vrot.slane %v2415_v50, 4 }
 0x186   :  { %v414_v61 = vrot.slane %v2419_v52, 4  ;;  %v2429_v62 = vrot.slane %v401_v53, 4  ;;  %v2432_v63 = vsel %vm114_vm1, 0.0, %v418_v54  ;;  %v2436_v0 = vsel %vm114_vm1, 0.0, %v2423_v55 }
 0x187   :  { %v494_v2 = vrot.slane %v2436_v0, 4  ;;  %v457_v4 = vperm.slane %v449_v56, %v2256_v38  ;;  %v461_v5 = vsel %vm114_vm1, %v445_v3, %v460_v57  ;;  %v474_v6 = vrot.slane %v465_v58, 4 }
 0x188   :  { %v2443_v8 = vsel %vm114_vm1, 0.0, %v2429_v62  ;;  %v469_v11 = vperm.slane %v461_v5, %v2256_v38  ;;  %v2019_v12 = vunpack.i.h.bf16 %v2017_v60  ;;  %v2018_v13 = vunpack.i.l.bf16 %v2017_v60 }
 0x189   :  { %v2446_v14 = vrot.slane %v457_v4, 4  ;;  %v2449_v15 = vsel %vm114_vm1, 0.0, %v474_v6  ;;  %v2029_v16 = vunpack.i.h.bf16 %v2027_v1  ;;  %v2028_v17 = vunpack.i.l.bf16 %v2027_v1 }
 0x18a   :  { %v476_v19 = vrot.slane %v469_v11, 4  ;;  %v631_v3 = vsel %vm114_vm1, %v2375_v21, %v2019_v12  ;;  %v632_v24 = vrot.slane %v2019_v12, 4  ;;  %v619_v26 = vsel %vm114_vm1, %v2379_v46, %v2018_v13 }
 0x18b   :  { %v2457_v29 = vsel %vm114_vm1, 0.0, %v2446_v14  ;;  %v637_v37 = vperm.slane %v631_v3, %v2241_v20  ;;  %v620_v39 = vrot.slane %v2018_v13, 4  ;;  %v625_v44 = vperm.slane %v619_v26, %v2241_v20 }
 0x18c   :  { %v2462_v45 = vsel %vm114_vm1, 0.0, %v476_v19  ;;  %v537_v23 = vrot.slane %v2457_v29, 4  ;;  %v2466_v21 = vsel %vm114_vm1, %v476_v19, %v465_v58  ;;  %v633_v46 = vsel %vm114_vm1, %v2024_v31, %v632_v24 }
 0x18d   :  { %v548_v49 = vrot.slane %v2462_v45, 4  ;;  %v641_v51 = vperm.slane %v633_v46, %v2241_v20  ;;  %v642_v53 = vrot.slane %v637_v37, 4  ;;  %v621_v54 = vsel %vm114_vm1, %v2023_v32, %v620_v39 }
 0x18e   :  { %v629_v56 = vperm.slane %v621_v54, %v2241_v20  ;;  %v644_v57 = vrot.slane %v625_v44, 4  ;;  %v687_v58 = vsel %vm114_vm1, %v2383_v47, %v2029_v16  ;;  %v688_v60 = vrot.slane %v2029_v16, 4 }
 0x18f   :  { %v654_v1 = vrot.slane %v641_v51, 4  ;;  %v643_v4 = vsel %vm114_vm1, %v642_v53, %v625_v44  ;;  %v693_v31 = vperm.slane %v687_v58, %v2241_v20  ;;  %v675_v5 = vsel %vm114_vm1, %v2387_v48, %v2028_v17 }
 0x190   :  { %v645_v6 = vsel %vm114_vm1, %v637_v37, %v644_v57  ;;  %v649_v7 = vperm.slane %v643_v4, %v2256_v38  ;;  %v656_v32 = vrot.slane %v629_v56, 4  ;;  %v689_v11 = vsel %vm114_vm1, %v2034_v33, %v688_v60 }
 0x191   :  { %v653_v47 = vperm.slane %v645_v6, %v2256_v38  ;;  %v655_v12 = vsel %vm114_vm1, %v654_v1, %v629_v56  ;;  %v697_v13 = vperm.slane %v689_v11, %v2241_v20  ;;  %v698_v16 = vrot.slane %v693_v31, 4 }
 0x192   :  { %v657_v19 = vsel %vm114_vm1, %v641_v51, %v656_v32  ;;  %v661_v48 = vperm.slane %v655_v12, %v2256_v38  ;;  %v666_v3 = vrot.slane %v649_v7, 4  ;;  %v676_v24 = vrot.slane %v2028_v17, 4 }
 0x193   :  { %v665_v26 = vperm.slane %v657_v19, %v2256_v38  ;;  %v668_v37 = vrot.slane %v653_v47, 4  ;;  %v710_v39 = vrot.slane %v697_v13, 4  ;;  %v681_v44 = vperm.slane %v675_v5, %v2241_v20 }
 0x194   :  { %v2496_v33 = vsel %vm114_vm1, 0.0, %v666_v3  ;;  %v670_v46 = vrot.slane %v661_v48, 4  ;;  %v677_v53 = vsel %vm114_vm1, %v2033_v34, %v676_v24  ;;  %v415_v51 = vsel %vm114_vm1, 0.0, %v414_v61 }
 0x195   :  { %v2503_v54 = vsel %vm114_vm1, 0.0, %v668_v37  ;;  %v672_v17 = vrot.slane %v665_v26, 4  ;;  %v2506_v56 = vsel %vm114_vm1, %v668_v37, %v649_v7  ;;  %v685_v57 = vperm.slane %v677_v53, %v2241_v20 }
 0x196   :  { %v2510_v58 = vsel %vm114_vm1, 0.0, %v670_v46  ;;  %v735_v60 = vrot.slane %v2503_v54, 4  ;;  %v699_v18 = vsel %vm114_vm1, %v698_v16, %v681_v44  ;;  %v700_v1 = vrot.slane %v681_v44, 4 }
 0x197   :  { %v2515_v34 = vsel %vm114_vm1, 0.0, %v672_v17  ;;  %v2518_v61 = vsel %vm114_vm1, %v672_v17, %v661_v48  ;;  %v705_v4 = vperm.slane %v699_v18, %v2256_v38  ;;  %v711_v5 = vsel %vm114_vm1, %v710_v39, %v685_v57 }
 0x198   :  { %v746_v6 = vrot.slane %v2515_v34, 4  ;;  %v701_v7 = vsel %vm114_vm1, %v693_v31, %v700_v1  ;;  %v712_v32 = vrot.slane %v685_v57, 4  ;;  %v717_v11 = vperm.slane %v711_v5, %v2256_v38 }
 0x199   :  { %v709_v47 = vperm.slane %v701_v7, %v2256_v38  ;;  %v722_v12 = vrot.slane %v705_v4, 4  ;;  %v478_v16 = vsel %vm114_vm1, %v2429_v62, %v2419_v52  ;;  %v483_v19 = vrot.slane %v2443_v8, 4 }
 0x19a   :  { %v713_v48 = vsel %vm114_vm1, %v697_v13, %v712_v32  ;;  %v726_v3 = vrot.slane %v717_v11, 4  ;;  %v482_v24 = vperm.slane %v478_v16, %v2241_v20  ;;  %v489_v31 = vsel %vm114_vm1, %v2423_v55, %v2408_v30 }
 0x19b   :  { %v721_v26 = vperm.slane %v713_v48, %v2256_v38  ;;  %v2537_v37 = vsel %vm114_vm1, 0.0, %v722_v12  ;;  %v724_v39 = vrot.slane %v709_v47, 4  ;;  %v484_v44 = vsel %vm114_vm1, %v483_v19, %v415_v51 }
 0x19c   :  { %v2541_v52 = vsel %vm114_vm1, 0.0, %v726_v3  ;;  %v488_v62 = vperm.slane %v484_v44, %v2241_v20  ;;  %v493_v8 = vperm.slane %v489_v31, %v2241_v20  ;;  %v495_v30 = vsel %vm114_vm1, %v494_v2, %v2432_v63 }
 0x19d   :  { %v2550_v55 = vsel %vm114_vm1, 0.0, %v724_v39  ;;  %v728_v13 = vrot.slane %v721_v26, 4  ;;  %v2553_v46 = vsel %vm114_vm1, %v724_v39, %v705_v4  ;;  %v499_v53 = vperm.slane %v495_v30, %v2241_v20 }
 0x19e   :  { %v789_v51 = vrot.slane %v2550_v55, 4  ;;  %v502_v17 = vrot.slane %v482_v24, 4  ;;  %v514_v57 = vrot.slane %v493_v8, 4  ;;  %v471_v63 = vsel %vm114_vm1, 0.0, %v470_v59 }
 0x19f   :  { %v2558_v18 = vsel %vm114_vm1, 0.0, %v728_v13  ;;  %v2561_v0 = vsel %vm114_vm1, %v728_v13, %v717_v11  ;;  %v532_v2 = vsel %vm114_vm1, %v2446_v14, %v2415_v50  ;;  %v538_v59 = vsel %vm114_vm1, %v537_v23, %v471_v63 }
 0x1a0   :  { %v800_v1 = vrot.slane %v2558_v18, 4  ;;  %v503_v4 = vsel %vm114_vm1, %v488_v62, %v502_v17  ;;  %v515_v5 = vsel %vm114_vm1, %v499_v53, %v514_v57  ;;  %v536_v7 = vperm.slane %v532_v2, %v2241_v20 }
 0x1a1   :  { %v511_v32 = vperm.slane %v503_v4, %v2256_v38  ;;  %v523_v11 = vperm.slane %v515_v5, %v2256_v38  ;;  %v547_v47 = vperm.slane %v2466_v21, %v2241_v20  ;;  %v542_v50 = vperm.slane %v538_v59, %v2241_v20 }
 0x1a2   :  { %v549_v14 = vsel %vm114_vm1, %v548_v49, %v2449_v15  ;;  %v556_v12 = vrot.slane %v536_v7, 4  ;;  %v500_v16 = vrot.slane %v488_v62, 4  ;;  %v512_v31 = vrot.slane %v499_v53, 4 }
 0x1a3   :  { %v528_v19 = vrot.slane %v523_v11, 4  ;;  %v553_v48 = vperm.slane %v549_v14, %v2241_v20  ;;  %v568_v3 = vrot.slane %v547_v47, 4  ;;  %v530_v26 = vrot.slane %v511_v32, 4 }
 0x1a4   :  { %v557_v29 = vsel %vm114_vm1, %v542_v50, %v556_v12  ;;  %v501_v23 = vsel %vm114_vm1, %v500_v16, %v482_v24  ;;  %v554_v21 = vrot.slane %v542_v50, 4  ;;  %v513_v30 = vsel %vm114_vm1, %v512_v31, %v493_v8 }
 0x1a5   :  { %v529_v39 = vsel %vm114_vm1, %v528_v19, %v511_v32  ;;  %v565_v44 = vperm.slane %v557_v29, %v2256_v38  ;;  %v569_v45 = vsel %vm114_vm1, %v553_v48, %v568_v3  ;;  %v507_v15 = vperm.slane %v501_v23, %v2256_v38 }
 0x1a6   :  { %v588_v49 = vpack.c.bf16 %v529_v39, %v529_v39  ;;  %v577_v62 = vperm.slane %v569_v45, %v2256_v38  ;;  %v531_v13 = vsel %vm114_vm1, %v523_v11, %v530_v26  ;;  %v519_v24 = vperm.slane %v513_v30, %v2256_v38 }
 0x1a7   :  { %v584_v53 = vrot.slane %v565_v44, 4  ;;  %v589_v17 = vpack.c.bf16 %v531_v13, %v531_v13  ;;  %v555_v57 = vsel %vm114_vm1, %v554_v21, %v536_v7  ;;  %v566_v5 = vrot.slane %v553_v48, 4 }
 0x1a8   :  { %v889_v63 = vsel %vm846_vm2, %v588_v49, 0  ;;  %v582_v2 = vrot.slane %v577_v62, 4  ;;  %v561_v4 = vperm.slane %v555_v57, %v2256_v38  ;;  %v524_v32 = vrot.slane %v519_v24, 4 }
 0x1a9   :  { %898 = vmatpush.bf16.xpose.msra.mxu3 %v889_v63  ;;  %v908_v59 = vsel %vm846_vm2, %v589_v17, 0  ;;  %v585_v8 = vsel %vm114_vm1, %v577_v62, %v584_v53  ;;  %v526_v50 = vrot.slane %v507_v15, 4  ;;  %v567_v14 = vsel %vm114_vm1, %v566_v5, %v547_v47 }
 0x1aa   :  { %v583_v11 = vsel %vm114_vm1, %v582_v2, %v565_v44  ;;  %917 = vmatpush.bf16.xpose.msrb.mxu0 %v908_v59  ;;  %v593_v12 = vpack.c.bf16 %v585_v8, %v585_v8  ;;  %v580_v7 = vrot.slane %v561_v4, 4  ;;  %v525_v19 = vsel %vm114_vm1, %v524_v32, %v507_v15 }
 0x1ab   :  { %v592_v16 = vpack.c.bf16 %v583_v11, %v583_v11  ;;  %v573_v3 = vperm.slane %v567_v14, %v2256_v38  ;;  %v527_v48 = vsel %vm114_vm1, %v519_v24, %v526_v50  ;;  %v586_v31 = vpack.c.bf16 %v525_v19, %v525_v19 }
 0x1ac   :  { %v984_v29 = vsel %vm846_vm2, %v593_v12, 0  ;;  %v587_v23 = vpack.c.bf16 %v527_v48, %v527_v48  ;;  %v734_v26 = vperm.slane %v2506_v56, %v2241_v20  ;;  %v736_v44 = vsel %vm114_vm1, %v735_v60, %v2496_v33 }
 0x1ad   :  { %v965_v21 = vsel %vm846_vm2, %v592_v16, 0  ;;  %v578_v39 = vrot.slane %v573_v3, 4  ;;  %v581_v47 = vsel %vm114_vm1, %v573_v3, %v580_v7  ;;  %v851_v45 = vsel %vm846_vm2, %v586_v31, 0 }
 0x1ae   :  { %v870_v15 = vsel %vm846_vm2, %v587_v23, 0  ;;  %v591_v49 = vpack.c.bf16 %v581_v47, %v581_v47  ;;  %v740_v62 = vperm.slane %v736_v44, %v2241_v20  ;;  %860 = vmatpush.bf16.xpose.msra.mxu1 %v851_v45  ;;  %v745_v30 = vperm.slane %v2518_v61, %v2241_v20 }
 0x1af   :  { %v579_v56 = vsel %vm114_vm1, %v578_v39, %v561_v4  ;;  %879 = vmatpush.bf16.xpose.msra.mxu2 %v870_v15  ;;  %v747_v33 = vsel %vm114_vm1, %v746_v6, %v2510_v58  ;;  %v754_v54 = vrot.slane %v734_v26, 4  ;;  %v788_v6 = vperm.slane %v2553_v46, %v2241_v20 }
 0x1b0   :  { %v590_v60 = vpack.c.bf16 %v579_v56, %v579_v56  ;;  %v946_v13 = vsel %vm846_vm2, %v591_v49, 0  ;;  %1901 = vmatmul.msk.bf16.vlgmr.msra.gmra.mxu3 %vm846_vm2, %v336_v40  ;;  %v751_v53 = vperm.slane %v747_v33, %v2241_v20  ;;  %v766_v34 = vrot.slane %v745_v30, 4 }
 0x1b1   :  { %974 = vmatpush.bf16.xpose.msrb.mxu3 %v965_v21  ;;  %1902 = vmatmul.msk.bf16.vlgmr.msrb.gmra.mxu0 %vm846_vm2, %v337_v42  ;;  %v755_v58 = vsel %vm114_vm1, %v740_v62, %v754_v54  ;;  %v752_v61 = vrot.slane %v740_v62, 4  ;;  %v790_v17 = vsel %vm114_vm1, %v789_v51, %v2537_v37  ;;  %v799_v46 = vperm.slane %v2561_v0, %v2241_v20 }
 0x1b2   :  { %993 = vmatpush.bf16.xpose.msra.mxu0 %v984_v29  ;;  %v927_v22 = vsel %vm846_vm2, %v590_v60, 0  ;;  %v763_v40 = vperm.slane %v755_v58, %v2256_v38  ;;  %v764_v24 = vrot.slane %v751_v53, 4  ;;  %v767_v25 = vsel %vm114_vm1, %v751_v53, %v766_v34 }
 0x1b3   :  { %v753_v42 = vsel %vm114_vm1, %v752_v61, %v734_v26  ;;  %v794_v57 = vperm.slane %v790_v17, %v2241_v20  ;;  %v775_v63 = vperm.slane %v767_v25, %v2256_v38  ;;  %v801_v37 = vsel %vm114_vm1, %v800_v1, %v2541_v52 }
 0x1b4   :  { %v782_v2 = vrot.slane %v763_v40, 4  ;;  %v759_v4 = vperm.slane %v753_v42, %v2256_v38  ;;  %v765_v5 = vsel %vm114_vm1, %v764_v24, %v745_v30  ;;  %v808_v51 = vrot.slane %v788_v6, 4 }
 0x1b5   :  { %v771_v55 = vperm.slane %v765_v5, %v2256_v38  ;;  %v820_v32 = vrot.slane %v799_v46, 4  ;;  %1899 = vmatmul.msk.bf16.vlgmr.msra.gmra.mxu1 %vm846_vm2, %v334_v10  ;;  %v780_v0 = vrot.slane %v775_v63, 4  ;;  %v805_v18 = vperm.slane %v801_v37, %v2241_v20 }
 0x1b6   :  { %936 = vmatpush.bf16.xpose.msrb.mxu1 %v927_v22  ;;  %v783_v59 = vsel %vm114_vm1, %v775_v63, %v782_v2  ;;  %1900 = vmatmul.msk.bf16.vlgmr.msra.gmra.mxu2 %vm846_vm2, %v335_v43  ;;  %v778_v8 = vrot.slane %v759_v4, 4  ;;  %v809_v1 = vsel %vm114_vm1, %v794_v57, %v808_v51  ;;  %v806_v11 = vrot.slane %v794_v57, 4 }
 0x1b7   :  { %955 = vmatpush.bf16.xpose.msrb.mxu2 %v946_v13  ;;  %v841_v50 = vpack.c.bf16 %v783_v59, %v783_v59  ;;  %v776_v52 = vrot.slane %v771_v55, 4  ;;  %v781_v27 = vsel %vm114_vm1, %v780_v0, %v763_v40  ;;  %v817_v14 = vperm.slane %v809_v1, %v2256_v38 }
 0x1b8   :  { %v779_v10 = vsel %vm114_vm1, %v771_v55, %v778_v8  ;;  %v821_v12 = vsel %vm114_vm1, %v805_v18, %v820_v32  ;;  %v840_v7 = vpack.c.bf16 %v781_v27, %v781_v27  ;;  %v807_v48 = vsel %vm114_vm1, %v806_v11, %v788_v6 }
 0x1b9   :  { %v1141_v28 = vsel %vm1082_vm3, %v841_v50, 0  ;;  %v777_v43 = vsel %vm114_vm1, %v776_v52, %v759_v4  ;;  %v839_v16 = vpack.c.bf16 %v779_v10, %v779_v10  ;;  %v829_v3 = vperm.slane %v821_v12, %v2256_v38 }
 0x1ba   :  { %1150 = vmatpush.bf16.msrb.mxu0 %v1141_v28  ;;  %v838_v19 = vpack.c.bf16 %v777_v43, %v777_v43  ;;  %v818_v31 = vrot.slane %v805_v18, 4  ;;  %v1122_v29 = vsel %vm1082_vm3, %v840_v7, 0  ;;  %v813_v26 = vperm.slane %v807_v48, %v2256_v38 }
 0x1bb   :  { %v1103_v23 = vsel %vm1082_vm3, %v839_v16, 0  ;;  %v836_v21 = vrot.slane %v817_v14, 4  ;;  %1131 = vmatpush.bf16.msra.mxu3 %v1122_v29  ;;  %v834_v47 = vrot.slane %v829_v3, 4  ;;  %v328_v45 = vrot.slane %v2357_v36, 4 }
 0x1bc   :  { %v1084_v39 = vsel %vm1082_vm3, %v838_v19, 0  ;;  %v819_v44 = vsel %vm114_vm1, %v818_v31, %v799_v46  ;;  %v326_v15 = vrot.slane %v2371_v9, 4  ;;  %v832_v56 = vrot.slane %v813_v26, 4 }
 0x1bd   :  { %v825_v49 = vperm.slane %v819_v44, %v2256_v38  ;;  %v837_v62 = vsel %vm114_vm1, %v829_v3, %v836_v21  ;;  %v340_v30 = vpack.c.bf16 %v2354_v35, %v2354_v35  ;;  %v835_v33 = vsel %vm114_vm1, %v834_v47, %v817_v14 }
 0x1be   :  { %1093 = vmatpush.bf16.msra.mxu1 %v1084_v39  ;;  %v845_v54 = vpack.c.bf16 %v837_v62, %v837_v62  ;;  %v844_v60 = vpack.c.bf16 %v835_v33, %v835_v33  ;;  %v341_v13 = vpack.c.bf16 %v2362_v41, %v2362_v41  ;;  %v329_v34 = vsel %vm114_vm1, %v2371_v9, %v328_v45 }
 0x1bf   :  { %1112 = vmatpush.bf16.msra.mxu2 %v1103_v23  ;;  %v830_v53 = vrot.slane %v825_v49, 4  ;;  %v833_v58 = vsel %vm114_vm1, %v825_v49, %v832_v56  ;;  %v327_v35 = vsel %vm114_vm1, %v326_v15, %v2357_v36  ;;  %v339_v17 = vpack.c.bf16 %v329_v34, %v329_v34 }
 0x1c0   :  { %1905 = vmatmul.msk.bf16.vlgmr.msrb.gmra.mxu3 %vm846_vm2, %v340_v30  ;;  %v1198_v61 = vsel %vm1082_vm3, %v844_v60, 0  ;;  %v1217_v22 = vsel %vm1082_vm3, %v845_v54, 0  ;;  %v843_v40 = vpack.c.bf16 %v833_v58, %v833_v58  ;;  %v338_v24 = vpack.c.bf16 %v327_v35, %v327_v35 }
 0x1c1   :  { %1906 = vmatmul.msk.bf16.vlgmr.msra.gmra.mxu0 %vm846_vm2, %v341_v13  ;;  %v831_v6 = vsel %vm114_vm1, %v830_v53, %v813_v26  ;;  %1207 = vmatpush.bf16.msrb.mxu3 %v1198_v61  ;;  %v87_v25 = vlaneseq  ;;  %v2139_v63 = vmov -1e+30  }
 0x1c2   :  { %v842_v41 = vpack.c.bf16 %v831_v6, %v831_v6  ;;  %1226 = vmatpush.bf16.msra.mxu0 %v1217_v22  ;;  %v1179_v36 = vsel %vm1082_vm3, %v843_v40, 0 }
 0x1c3   :  { %v88_v42 = vshrl.u32 %v87_v25, 7  ;;  %v90_v57 = vand.u32 127, %v87_v25 }
 0x1c4   :  { %v1160_v9 = vsel %vm1082_vm3, %v842_v41, 0 }
 0x1c5   :  { %1903 = vmatmul.msk.bf16.vlgmr.msrb.gmra.mxu1 %vm846_vm2, %v338_v24  ;;  %vm91_vm4 = vcmp.le.s32.totalorder %v90_v57, %v88_v42 }
 0x1c6   :  { %1904 = vmatmul.msk.bf16.vlgmr.msrb.gmra.mxu2 %vm846_vm2, %v339_v17  ;;  %1169 = vmatpush.bf16.msrb.mxu1 %v1160_v9  ;;  %v92_v2 = vsel %vm91_vm4, 0.0, %v2139_v63 }
 0x1c7   :  { %1188 = vmatpush.bf16.msrb.mxu2 %v1179_v36 }
 0x22e   :  { %v919_v46 = vpop.f32.mrf.mxu0 }
 0x22f   :  { %v920_v8 = vadd.f32 %v919_v46, %v92_v2 }
 0x231   :  { %v1008_v27 = vsel %vm846_vm2, %v920_v8, -inf }
 0x232   :  { %v862_v4 = vpop.f32.mrf.mxu1 }
 0x233   :  { %v900_v5 = vpop.f32.mrf.mxu3  ;;  %v863_v55 = vadd.f32 %v862_v4, %v92_v2 }
 0x234   :  { %v901_v37 = vadd.f32 %v900_v5, %v92_v2 }
 0x235   :  { %v999_v51 = vsel %vm846_vm2, %v863_v55, -inf }
 0x236   :  { %v921_v32 = vpop.f32.mrf.mxu0  ;;  %v1005_v0 = vsel %vm846_vm2, %v901_v37, -inf  ;;  %1000 = vmax.xlane.f32.xlu2 %v999_v51 }
 0x237   :  { %1006 = vmax.xlane.f32.xlu1 %v1005_v0 }
 0x239   :  { %v881_v59 = vpop.f32.mrf.mxu2 }
 0x23a   :  { %v882_v18 = vadd.f32 %v881_v59, %v92_v2  ;;  %v864_v50 = vpop.f32.mrf.mxu1 }
 0x23b   :  { %v902_v52 = vpop.f32.mrf.mxu3 }
 0x23c   :  { %v1002_v1 = vsel %vm846_vm2, %v882_v18, -inf }
 0x23d   :  { %1003 = vmax.xlane.f32.xlu0 %v1002_v1 }
 0x23e   :  { %v995_v11 = vpop.f32.mrf.mxu0 }
 0x23f   :  { %1009 = vmax.xlane.f32.xlu1 %v1008_v27  ;;  %v996_v48 = vadd.f32 %v995_v11, %v92_v2 }
 0x241   :  { %v883_v10 = vpop.f32.mrf.mxu2  ;;  %v1020_v21 = vsel %vm846_vm2, %v996_v48, -inf }
 0x242   :  { %v938_v14 = vpop.f32.mrf.mxu1 }
 0x243   :  { %v976_v12 = vpop.f32.mrf.mxu3  ;;  %v939_v7 = vadd.f32 %v938_v14, %v92_v2 }
 0x244   :  { %v977_v28 = vadd.f32 %v976_v12, %v92_v2 }
 0x245   :  { %v1011_v16 = vsel %vm846_vm2, %v939_v7, -inf }
 0x246   :  { %v997_v43 = vpop.f32.mrf.mxu0  ;;  %v1017_v19 = vsel %vm846_vm2, %v977_v28, -inf }
 0x247   :  { %1012 = vmax.xlane.f32.xlu1 %v1011_v16  ;;  %1018 = vmax.xlane.f32.xlu2 %v1017_v19 }
 0x249   :  { %v957_v3 = vpop.f32.mrf.mxu2 }
 0x24a   :  { %v958_v31 = vadd.f32 %v957_v3, %v92_v2  ;;  %v940_v29 = vpop.f32.mrf.mxu1 }
 0x24b   :  { %v978_v23 = vpop.f32.mrf.mxu3 }
 0x24c   :  { %v1014_v26 = vsel %vm846_vm2, %v958_v31, -inf }
 0x24d   :  { %1015 = vmax.xlane.f32.xlu0 %v1014_v26 }
 0x24f   :  { %1021 = vmax.xlane.f32.xlu2 %v1020_v21 }
 0x251   :  { %v959_v39 = vpop.f32.mrf.mxu2 }
 0x2a9   :  { %v1001_v47 = vpop.xlane.xlu2 %1000 }
 0x2aa   :  { %v1007_v44 = vpop.xlane.xlu1 %1006  ;;  %v1023_v45 = vsub.f32 %v863_v55, %v1001_v47 }
 0x2ab   :  { %v1025_v15 = vsub.f32 %v901_v37, %v1007_v44 }
 0x2ac   :  { %v1031_v49 = vmul.f32 1.442695, %v1023_v45 }
 0x2ad   :  { %v1035_v62 = vmul.f32 1.442695, %v1025_v15 }
 0x2ae   :  { %2058 = vpow2.f32 %v1031_v49 }
 0x2af   :  { %2060 = vpow2.f32 %v1035_v62 }
 0x2b0   :  { %v1004_v56 = vpop.xlane.xlu0 %1003 }
 0x2b1   :  { %v1024_v30 = vsub.f32 %v882_v18, %v1004_v56 }
 0x2b2   :  { %v1010_v33 = vpop.xlane.xlu1 %1009 }
 0x2b3   :  { %v1033_v54 = vmul.f32 1.442695, %v1024_v30  ;;  %v1026_v60 = vsub.f32 %v920_v8, %v1010_v33 }
 0x2b4   :  { %v2059_v13 = vpop.eup %2058 }
 0x2b5   :  { %2062 = vpow2.f32 %v1033_v54  ;;  %v1037_v53 = vmul.f32 1.442695, %v1026_v60  ;;  %v2061_v58 = vpop.eup %2060  ;;  %v1071_v34 = vpack.c.bf16 %v2059_v13, %v2059_v13  ;;  %v1047_v61 = vsel %vm846_vm2, %v2059_v13, 0.0 }
 0x2b6   :  { %v1073_v35 = vpack.c.bf16 %v2061_v58, %v2061_v58  ;;  %1048 = vadd.xlane.f32.xlu2 %v1047_v61  ;;  %v1053_v0 = vsel %vm846_vm2, %v2061_v58, 0.0 }
 0x2b7   :  { %2064 = vpow2.f32 %v1037_v53  ;;  %1907 = vmatmul.msk.bf16.vlgmr.msra.gmra.mxu1 %vm846_vm2, %v1071_v34 }
 0x2b8   :  { %1909 = vmatmul.msk.bf16.vlgmr.msra.gmra.mxu3 %vm846_vm2, %v1073_v35 }
 0x2ba   :  { %v1013_v6 = vpop.xlane.xlu1 %1012  ;;  %v1019_v22 = vpop.xlane.xlu2 %1018 }
 0x2bb   :  { %v2063_v41 = vpop.eup %2062  ;;  %v1027_v40 = vsub.f32 %v939_v7, %v1013_v6  ;;  %v1029_v24 = vsub.f32 %v977_v28, %v1019_v22 }
 0x2bc   :  { %v1072_v17 = vpack.c.bf16 %v2063_v41, %v2063_v41  ;;  %v1050_v11 = vsel %vm846_vm2, %v2063_v41, 0.0 }
 0x2bd   :  { %v2065_v9 = vpop.eup %2064  ;;  %v1039_v36 = vmul.f32 1.442695, %v1027_v40  ;;  %v1043_v25 = vmul.f32 1.442695, %v1029_v24 }
 0x2be   :  { %v1074_v42 = vpack.c.bf16 %v2065_v9, %v2065_v9  ;;  %1908 = vmatmul.msk.bf16.vlgmr.msra.gmra.mxu2 %vm846_vm2, %v1072_v17  ;;  %v1056_v57 = vsel %vm846_vm2, %v2065_v9, 0.0 }
 0x2bf   :  { %2066 = vpow2.f32 %v1039_v36  ;;  %1057 = vadd.xlane.f32.xlu0 %v1056_v57 }
 0x2c0   :  { %2068 = vpow2.f32 %v1043_v25  ;;  %v1016_v46 = vpop.xlane.xlu0 %1015  ;;  %1910 = vmatmul.msk.bf16.vlgmr.msrb.gmra.mxu0 %vm846_vm2, %v1074_v42 }
 0x2c1   :  { %v1028_v63 = vsub.f32 %v958_v31, %v1016_v46 }
 0x2c2   :  { %v1022_v2 = vpop.xlane.xlu2 %1021 }
 0x2c3   :  { %v1041_v4 = vmul.f32 1.442695, %v1028_v63  ;;  %v1030_v5 = vsub.f32 %v996_v48, %v1022_v2 }
 0x2c5   :  { %v2067_v55 = vpop.eup %2066  ;;  %2070 = vpow2.f32 %v1041_v4  ;;  %v1045_v37 = vmul.f32 1.442695, %v1030_v5 }
 0x2c6   :  { %v2069_v51 = vpop.eup %2068  ;;  %v1075_v32 = vpack.c.bf16 %v2067_v55, %v2067_v55  ;;  %v1059_v59 = vsel %vm846_vm2, %v2067_v55, 0.0 }
 0x2c7   :  { %v1077_v8 = vpack.c.bf16 %v2069_v51, %v2069_v51  ;;  %2072 = vpow2.f32 %v1045_v37  ;;  %1054 = vadd.xlane.f32.xlu0 %v1053_v0  ;;  %1060 = vadd.xlane.f32.xlu1 %v1059_v59  ;;  %v1065_v27 = vsel %vm846_vm2, %v2069_v51, 0.0 }
 0x2c8   :  { %1911 = vmatmul.msk.bf16.vlgmr.msrb.gmra.mxu1 %vm846_vm2, %v1075_v32 }
 0x2c9   :  { %1913 = vmatmul.msk.bf16.vlgmr.msrb.gmra.mxu3 %vm846_vm2, %v1077_v8 }
 0x2cb   :  { %v2071_v18 = vpop.eup %2070 }
 0x2cc   :  { %v1076_v50 = vpack.c.bf16 %v2071_v18, %v2071_v18  ;;  %v1062_v14 = vsel %vm846_vm2, %v2071_v18, 0.0 }
 0x2cd   :  { %v2073_v52 = vpop.eup %2072 }
 0x2ce   :  { %v1078_v1 = vpack.c.bf16 %v2073_v52, %v2073_v52  ;;  %1912 = vmatmul.msk.bf16.vlgmr.msrb.gmra.mxu2 %vm846_vm2, %v1076_v50  ;;  %v1068_v10 = vsel %vm846_vm2, %v2073_v52, 0.0 }
 0x2cf   :  { %1051 = vadd.xlane.f32.xlu0 %v1050_v11  ;;  %1066 = vadd.xlane.f32.xlu1 %v1065_v27 }
 0x2d0   :  { %1069 = vadd.xlane.f32.xlu2 %v1068_v10  ;;  %1914 = vmatmul.msk.bf16.vlgmr.msra.gmra.mxu0 %vm846_vm2, %v1078_v1 }
 0x2d7   :  { %1063 = vadd.xlane.f32.xlu1 %v1062_v14 }
 0x329   :  { %v1049_v28 = vpop.xlane.xlu2 %1048 }
 0x32a   :  { %2074 = vrcp.f32 %v1049_v28 }
 0x330   :  { %v2075_v31 = vpop.eup %2074 }
 0x332   :  { %v1058_v12 = vpop.xlane.xlu0 %1057 }
 0x334   :  { %v1095_v7 = vpop.f32.mrf.mxu1 }
 0x335   :  { %v1240_v23 = vmul.f32 %v2075_v31, %v1095_v7 }
 0x337   :  { %v1250_v62 = vrot.slane %v1240_v23, 4 }
 0x33a   :  { %v1055_v43 = vpop.xlane.xlu0 %1054  ;;  %v1061_v16 = vpop.xlane.xlu1 %1060 }
 0x33b   :  { %2076 = vrcp.f32 %v1055_v43  ;;  %v1133_v19 = vpop.f32.mrf.mxu3 }
 0x33c   :  { %v1097_v3 = vpop.f32.mrf.mxu1  ;;  %2078 = vrcp.f32 %v1058_v12 }
 0x33d   :  { %v1152_v48 = vpop.f32.mrf.mxu0  ;;  %2080 = vrcp.f32 %v1061_v16 }
 0x341   :  { %v2077_v29 = vpop.eup %2076  ;;  %v1114_v26 = vpop.f32.mrf.mxu2 }
 0x342   :  { %v1242_v21 = vmul.f32 %v2077_v29, %v1133_v19  ;;  %v1052_v39 = vpop.xlane.xlu0 %1051  ;;  %v1067_v47 = vpop.xlane.xlu1 %1066 }
 0x343   :  { %2082 = vrcp.f32 %v1052_v39  ;;  %v1070_v45 = vpop.xlane.xlu2 %1069  ;;  %v1135_v15 = vpop.f32.mrf.mxu3 }
 0x344   :  { %v1248_v44 = vrot.slane %v1242_v21, 4  ;;  %v2079_v49 = vpop.eup %2078  ;;  %2084 = vrcp.f32 %v1067_v47  ;;  %v1251_v60 = vsel %vm114_vm1, %v1242_v21, %v1250_v62 }
 0x345   :  { %v1154_v56 = vpop.f32.mrf.mxu0  ;;  %v1171_v30 = vpop.f32.mrf.mxu1  ;;  %v1243_v54 = vmul.f32 %v2079_v49, %v1152_v48  ;;  %2086 = vrcp.f32 %v1070_v45  ;;  %v1259_v61 = vperm.slane %v1251_v60, %v2241_v20 }
 0x346   :  { %v1249_v33 = vsel %vm114_vm1, %v1248_v44, %v1240_v23  ;;  %v2081_v13 = vpop.eup %2080 }
 0x347   :  { %v1255_v58 = vperm.slane %v1249_v33, %v2241_v20  ;;  %v1260_v35 = vrot.slane %v1243_v54, 4  ;;  %v1244_v22 = vmul.f32 %v2081_v13, %v1171_v30  ;;  %v1286_v2 = vrot.slane %v1259_v61, 4 }
 0x349   :  { %v2083_v53 = vpop.eup %2082  ;;  %v1116_v34 = vpop.f32.mrf.mxu2  ;;  %v1274_v25 = vrot.slane %v1255_v58, 4  ;;  %v1306_v5 = vrot.slane %v1244_v22, 4 }
 0x34a   :  { %v1241_v6 = vmul.f32 %v2083_v53, %v1114_v26  ;;  %v1064_v41 = vpop.xlane.xlu1 %1063  ;;  %v2085_v40 = vpop.eup %2084 }
 0x34b   :  { %2088 = vrcp.f32 %v1064_v41  ;;  %v2087_v36 = vpop.eup %2086 }
 0x34c   :  { %v1261_v24 = vsel %vm114_vm1, %v1260_v35, %v1241_v6  ;;  %v1262_v17 = vrot.slane %v1241_v6, 4  ;;  %v1209_v9 = vpop.f32.mrf.mxu3 }
 0x34d   :  { %v1267_v42 = vperm.slane %v1261_v24, %v2241_v20  ;;  %v1246_v57 = vmul.f32 %v2085_v40, %v1209_v9  ;;  %v1173_v46 = vpop.f32.mrf.mxu1  ;;  %v1228_v63 = vpop.f32.mrf.mxu0 }
 0x34e   :  { %v1263_v4 = vsel %vm114_vm1, %v1243_v54, %v1262_v17  ;;  %v1247_v55 = vmul.f32 %v2087_v36, %v1228_v63 }
 0x34f   :  { %v1271_v37 = vperm.slane %v1263_v4, %v2241_v20  ;;  %v1272_v51 = vrot.slane %v1267_v42, 4  ;;  %v1275_v32 = vsel %vm114_vm1, %v1267_v42, %v1274_v25  ;;  %v1304_v0 = vrot.slane %v1246_v57, 4 }
 0x350   :  { %v1283_v59 = vperm.slane %v1275_v32, %v2256_v38  ;;  %v1307_v8 = vsel %vm114_vm1, %v1246_v57, %v1306_v5  ;;  %v1316_v16 = vrot.slane %v1247_v55, 4 }
 0x351   :  { %v2089_v18 = vpop.eup %2088  ;;  %v1273_v50 = vsel %vm114_vm1, %v1272_v51, %v1255_v58  ;;  %v1284_v52 = vrot.slane %v1271_v37, 4  ;;  %v1287_v1 = vsel %vm114_vm1, %v1271_v37, %v1286_v2  ;;  %v1305_v11 = vsel %vm114_vm1, %v1304_v0, %v1244_v22  ;;  %v1190_v27 = vpop.f32.mrf.mxu2 }
 0x352   :  { %v1279_v10 = vperm.slane %v1273_v50, %v2256_v38  ;;  %v1295_v14 = vperm.slane %v1287_v1, %v2256_v38  ;;  %v1298_v12 = vrot.slane %v1283_v59, 4  ;;  %v1311_v7 = vperm.slane %v1305_v11, %v2241_v20 }
 0x353   :  { %v1285_v28 = vsel %vm114_vm1, %v1284_v52, %v1259_v61  ;;  %v1315_v43 = vperm.slane %v1307_v8, %v2241_v20  ;;  %v1245_v19 = vmul.f32 %v2089_v18, %v1190_v27 }
 0x354   :  { %v1299_v3 = vsel %vm114_vm1, 0.0, %v1298_v12  ;;  %v1302_v48 = vrot.slane %v1295_v14, 4  ;;  %v1330_v31 = vrot.slane %v1311_v7, 4  ;;  %v1211_v29 = vpop.f32.mrf.mxu3  ;;  %v1291_v23 = vperm.slane %v1285_v28, %v2256_v38 }
 0x355   :  { %v1365_v26 = vrot.slane %v1299_v3, 4  ;;  %v1342_v21 = vrot.slane %v1315_v43, 4  ;;  %v1317_v39 = vsel %vm114_vm1, %v1316_v16, %v1245_v19  ;;  %v1318_v47 = vrot.slane %v1245_v19, 4  ;;  %v1230_v44 = vpop.f32.mrf.mxu0 }
 0x356   :  { %v1323_v45 = vperm.slane %v1317_v39, %v2241_v20  ;;  %v1296_v15 = vrot.slane %v1279_v10, 4  ;;  %v1300_v49 = vrot.slane %v1291_v23, 4  ;;  %v1303_v62 = vsel %vm114_vm1, 0.0, %v1302_v48 }
 0x357   :  { %v1319_v56 = vsel %vm114_vm1, %v1247_v55, %v1318_v47  ;;  %v1360_v30 = vsel %vm114_vm1, %v1298_v12, %v1279_v10  ;;  %v1371_v33 = vsel %vm114_vm1, %v1302_v48, %v1291_v23  ;;  %v1376_v54 = vrot.slane %v1303_v62, 4 }
 0x358   :  { %v1327_v60 = vperm.slane %v1319_v56, %v2241_v20  ;;  %v1328_v13 = vrot.slane %v1323_v45, 4  ;;  %v1331_v53 = vsel %vm114_vm1, %v1323_v45, %v1330_v31  ;;  %v1297_v58 = vsel %vm114_vm1, 0.0, %v1296_v15 }
 0x359   :  { %v1339_v34 = vperm.slane %v1331_v53, %v2256_v38  ;;  %v1192_v61 = vpop.f32.mrf.mxu2  ;;  %v1301_v35 = vsel %vm114_vm1, 0.0, %v1300_v49  ;;  %v1364_v6 = vperm.slane %v1360_v30, %v2241_v20  ;;  %v1366_v22 = vsel %vm114_vm1, %v1365_v26, %v1297_v58 }
 0x35a   :  { %v1329_v41 = vsel %vm114_vm1, %v1328_v13, %v1311_v7  ;;  %v1340_v40 = vrot.slane %v1327_v60, 4  ;;  %v1343_v24 = vsel %vm114_vm1, %v1327_v60, %v1342_v21  ;;  %v1370_v17 = vperm.slane %v1366_v22, %v2241_v20 }
 0x35b   :  { %v1335_v9 = vperm.slane %v1329_v41, %v2256_v38  ;;  %v1351_v36 = vperm.slane %v1343_v24, %v2256_v38  ;;  %v1354_v25 = vrot.slane %v1339_v34, 4  ;;  %v1375_v42 = vperm.slane %v1371_v33, %v2241_v20 }
 0x35c   :  { %v1341_v57 = vsel %vm114_vm1, %v1340_v40, %v1315_v43  ;;  %v1377_v46 = vsel %vm114_vm1, %v1376_v54, %v1301_v35  ;;  %v1384_v63 = vrot.slane %v1364_v6, 4  ;;  %v1382_v2 = vrot.slane %v1370_v17, 4 }
 0x35d   :  { %v1347_v4 = vperm.slane %v1341_v57, %v2256_v38  ;;  %v1352_v5 = vrot.slane %v1335_v9, 4  ;;  %v1355_v55 = vsel %vm114_vm1, 0.0, %v1354_v25  ;;  %v1358_v37 = vrot.slane %v1351_v36, 4  ;;  %v1970_v57 = vld [vmem:[%s2929_s3 + $0x8] sm:$0xff] }
 0x35e   :  { %v1414_v51 = vsel %vm114_vm1, %v1354_v25, %v1335_v9  ;;  %v1419_v32 = vrot.slane %v1355_v55, 4  ;;  %v1381_v0 = vperm.slane %v1377_v46, %v2241_v20  ;;  %v1385_v59 = vsel %vm114_vm1, %v1370_v17, %v1384_v63  ;;  %1530 = vmatpush.bf16.msra.mxu1 %v1970_v57  ;;  %v1969_v46 = vld [vmem:[%s2929_s3] sm:$0xff] }
 0x35f   :  { %v1353_v8 = vsel %vm114_vm1, 0.0, %v1352_v5  ;;  %v1356_v18 = vrot.slane %v1347_v4, 4  ;;  %v1359_v50 = vsel %vm114_vm1, 0.0, %v1358_v37  ;;  %v1418_v52 = vperm.slane %v1414_v51, %v2241_v20 }
 0x360   :  { %v1430_v1 = vrot.slane %v1359_v50, 4  ;;  %v1393_v11 = vperm.slane %v1385_v59, %v2256_v38  ;;  %v1396_v27 = vrot.slane %v1375_v42, 4  ;;  %v1420_v10 = vsel %vm114_vm1, %v1419_v32, %v1353_v8 }
 0x361   :  { %v1357_v14 = vsel %vm114_vm1, 0.0, %v1356_v18  ;;  %v1424_v12 = vperm.slane %v1420_v10, %v2241_v20  ;;  %v1425_v7 = vsel %vm114_vm1, %v1358_v37, %v1347_v4  ;;  %v1438_v28 = vrot.slane %v1418_v52, 4 }
 0x362   :  { %v1397_v43 = vsel %vm114_vm1, %v1381_v0, %v1396_v27  ;;  %v1429_v16 = vperm.slane %v1425_v7, %v2241_v20  ;;  %v1431_v19 = vsel %vm114_vm1, %v1430_v1, %v1357_v14  ;;  %v1383_v29 = vsel %vm114_vm1, %v1382_v2, %v1364_v6  ;;  %1531 = vmatpush.bf16.msra.mxu1 %v1969_v46  ;;  %v2051_v27 = vld [vmem:[%s2930_s4] ss:$0 sm:$0xff] }
 0x363   :  { %v1405_v3 = vperm.slane %v1397_v43, %v2256_v38  ;;  %v1435_v48 = vperm.slane %v1431_v19, %v2241_v20  ;;  %v1439_v31 = vsel %vm114_vm1, %v1424_v12, %v1438_v28  ;;  %v1389_v21 = vperm.slane %v1383_v29, %v2256_v38  ;;  %v2105_v19 = vld [vmem:[%s2926_s0 + $0x8] sm:$0xff] }
 0x364   :  { %v1447_v23 = vperm.slane %v1439_v31, %v2256_v38  ;;  %v1450_v26 = vrot.slane %v1429_v16, 4  ;;  %v1394_v39 = vrot.slane %v1381_v0, 4  ;;  %v1412_v47 = vrot.slane %v1393_v11, 4 }
 0x365   :  { %v1436_v44 = vrot.slane %v1424_v12, 4  ;;  %v1448_v45 = vrot.slane %v1435_v48, 4  ;;  %v1410_v56 = vrot.slane %v1405_v3, 4  ;;  %v1408_v54 = vrot.slane %v1389_v21, 4  ;;  %v2104_v12 = vld [vmem:[%s2926_s0] sm:$0xff] }
 0x366   :  { %v1451_v15 = vsel %vm114_vm1, %v1435_v48, %v1450_v26  ;;  %v1466_v49 = vrot.slane %v1447_v23, 4  ;;  %v1395_v62 = vsel %vm114_vm1, %v1394_v39, %v1375_v42  ;;  %v1413_v53 = vsel %vm114_vm1, %v1405_v3, %v1412_v47 }
 0x367   :  { %v1459_v20 = vperm.slane %v1451_v15, %v2256_v38  ;;  %v1401_v30 = vperm.slane %v1395_v62, %v2256_v38  ;;  %v1437_v33 = vsel %vm114_vm1, %v1436_v44, %v1418_v52  ;;  %v1449_v13 = vsel %vm114_vm1, %v1448_v45, %v1429_v16 }
 0x368   :  { %v1443_v60 = vperm.slane %v1437_v33, %v2256_v38  ;;  %v1455_v6 = vperm.slane %v1449_v13, %v2256_v38  ;;  %v1411_v41 = vsel %vm114_vm1, %v1410_v56, %v1393_v11  ;;  %v2143_v31 = vmov 32.0  }
 0x369   :  { %v1467_v58 = vsel %vm114_vm1, %v1459_v20, %v1466_v49  ;;  %v1464_v34 = vrot.slane %v1459_v20, 4  ;;  %v1406_v61 = vrot.slane %v1401_v30, 4  ;;  %v1409_v9 = vsel %vm114_vm1, %v1401_v30, %v1408_v54 }
 0x36a   :  { %v2045_v35 = vpack.i.bf16 %v1467_v58, %v1413_v53  ;;  %v1462_v22 = vrot.slane %v1443_v60, 4  ;;  %v1460_v36 = vrot.slane %v1455_v6, 4  ;;  %2090 = vrcp.f32 %v2143_v31  ;;  %v1972_v58 = vld [vmem:[%s2935_s9 + $0x8] sm:$0xff] }
 0x36b   :  { %v1465_v40 = vsel %vm114_vm1, %v1464_v34, %v1447_v23  ;;  %v1407_v24 = vsel %vm114_vm1, %v1406_v61, %v1389_v21  ;;  %1633 = vmatpush.bf16.msra.mxu2 %v1972_v58  ;;  %v1971_v34 = vld [vmem:[%s2935_s9] sm:$0xff] }
 0x36c   :  { %2046 = vrot.lane.b32.xlu1 %v2045_v35, %s2140_s21  ;;  %v2040_v17 = vpack.i.bf16 %v1465_v40, %v1411_v41  ;;  %v1463_v25 = vsel %vm114_vm1, %v1455_v6, %v1462_v22  ;;  %v1461_v38 = vsel %vm114_vm1, %v1460_v36, %v1443_v60 }
 0x36d   :  { %v2035_v42 = vpack.i.bf16 %v1463_v25, %v1409_v9 }
 0x36e   :  { %2041 = vrot.lane.b32.xlu0 %v2040_v17, %s2141_s22 }
 0x36f   :  { %2036 = vrot.lane.b32.xlu2 %v2035_v42, %s2142_s23  ;;  %1634 = vmatpush.bf16.msra.mxu2 %v1971_v34  ;;  %v1977_v34 = vld [vmem:[%s2937_s11 + $0x20] sm:$0xff] }
 0x370   :  { %v2091_v29 = vpop.eup %2090 }
 0x371   :  { %v1549_v23 = vmul.f32 32.0, %v2091_v29  ;;  %vm1553_vm7 = vweird.f32 %v2091_v29 }
 0x373   :  { %v1550_v26 = vsub.f32 1.0, %v1549_v23 }
 0x375   :  { %v1551_v21 = vmul.f32 %v2091_v29, %v1550_v26 }
 0x377   :  { %v1552_v39 = vadd.f32 %v2091_v29, %v1551_v21  ;;  %v1979_v21 = vld [vmem:[%s2937_s11 + $0x30] sm:$0xff] }
 0x379   :  { %v2829_v47 = vsel %vm1553_vm7, %v2091_v29, %v1552_v39 }
 0x3c9   :  { %v2037_v63 = vpop.permute.xlu2 %2036 }
 0x3ca   :  { %v2039_v2 = vunpack.i.h.bf16 %v2037_v63  ;;  %v2038_v4 = vunpack.i.l.bf16 %v2037_v63  ;;  %v2052_v63 = vld [vmem:[%s2931_s5] ss:$0 sm:$0xff]  ;;  %s1876_s5 = sshll.u32 %s2144_s19, 4  ;;  %s1877_s5 = int_to_ptr.vmem [resolvable:$true] %s1876_s5 }
 0x3cc   :  { %v1492_v32 = vsel %vm846_vm2, %v1407_v24, %v2038_v4  ;;  %v1493_v0 = vsel %vm846_vm2, %v1461_v38, %v2039_v2 }
 0x3de   :  { %v2047_v5 = vpop.permute.xlu1 %2046 }
 0x3df   :  { %v2049_v59 = vunpack.i.h.bf16 %v2047_v5  ;;  %v2048_v8 = vunpack.i.l.bf16 %v2047_v5 }
 0x3e0   :  { %v2042_v55 = vpop.permute.xlu0 %2041 }
 0x3e1   :  { %v2044_v37 = vunpack.i.h.bf16 %v2042_v55  ;;  %v2043_v51 = vunpack.i.l.bf16 %v2042_v55  ;;  %v2053_v55 = vld [vmem:[%s2932_s6] ss:$0 sm:$0xff] }
 0x3e3   :  { %v1495_v18 = vsel %vm1494_vm5, %v1492_v32, %v2043_v51  ;;  %v1496_v50 = vsel %vm1494_vm5, %v1493_v0, %v2044_v37 }
 0x3e4   :  { %v1498_v52 = vsel %vm1497_vm6, %v1495_v18, %v2048_v8  ;;  %v1499_v1 = vsel %vm1497_vm6, %v1496_v50, %v2049_v59  ;;  %v2054_v18 = vld [vmem:[%s2936_s10] ss:$0 sm:$0xff] }
 0x3e5   :  { %v1500_v11 = vpack.c.bf16 %v1499_v1, %v1498_v52 }
 0x3e7   :  { %1923 = vmatmul.msk.bf16.vlgmr.msra.gmra.mxu1 %vm69_vm0, %v1500_v11 }
 0x464   :  { %v1533_v10 = vpop.f32.mrf.mxu1 }
 0x465   :  { %v1534_v14 = vadd.f32 %v2051_v27, %v1533_v10 }
 0x467   :  { %v1538_v7 = vadd.f32 %v2104_v12, %v1534_v14 }
 0x469   :  { %v1542_v28 = vsel %vm69_vm0, %v1538_v7, 0.0 }
 0x46a   :  { %1543 = vadd.xlane.f32.xlu0 %v1542_v28 }
 0x46c   :  { %v1535_v43 = vpop.f32.mrf.mxu1 }
 0x46d   :  { %v1536_v16 = vadd.f32 %v2051_v27, %v1535_v43 }
 0x46f   :  { %v1539_v3 = vadd.f32 %v2105_v19, %v1536_v16 }
 0x471   :  { %v1545_v48 = vsel %vm69_vm0, %v1539_v3, 0.0 }
 0x472   :  { %1546 = vadd.xlane.f32.xlu2 %v1545_v48 }
 0x4dd   :  { %v1544_v44 = vpop.xlane.xlu0 %1543 }
 0x4de   :  { %v1555_v45 = vmul.f32 %v2829_v47, %v1544_v44 }
 0x4e0   :  { %v1557_v15 = vsub.f32 %v1538_v7, %v1555_v45 }
 0x4e2   :  { %v1559_v49 = vmul.f32 %v1557_v15, %v1557_v15 }
 0x4e4   :  { %v1561_v62 = vsel %vm69_vm0, %v1559_v49, 0.0 }
 0x4e5   :  { %v1547_v20 = vpop.xlane.xlu2 %1546  ;;  %1562 = vadd.xlane.f32.xlu1 %v1561_v62 }
 0x4e6   :  { %v1556_v56 = vmul.f32 %v2829_v47, %v1547_v20 }
 0x4e8   :  { %v1558_v30 = vsub.f32 %v1539_v3, %v1556_v56  ;;  %v1980_v3 = vld [vmem:[%s2937_s11 + $0x38] sm:$0xff]  ;;  %v1978_v56 = vld [vmem:[%s2937_s11 + $0x28] sm:$0xff] }
 0x4e9   :  { %1798 = vmatpush.bf16.msra.mxu3 %v1980_v3 }
 0x4ea   :  { %v1560_v33 = vmul.f32 %v1558_v30, %v1558_v30 }
 0x4ec   :  { %v1564_v54 = vsel %vm69_vm0, %v1560_v33, 0.0 }
 0x4ed   :  { %1565 = vadd.xlane.f32.xlu0 %v1564_v54  ;;  %1799 = vmatpush.bf16.msra.mxu3 %v1979_v21 }
 0x4f1   :  { %1800 = vmatpush.bf16.msra.mxu3 %v1978_v56 }
 0x4f5   :  { %1801 = vmatpush.bf16.msra.mxu3 %v1977_v34 }
 0x558   :  { %v1563_v60 = vpop.xlane.xlu1 %1562 }
 0x559   :  { %v1567_v13 = vmul.f32 %v1563_v60, %v2829_v47 }
 0x55b   :  { %v1569_v53 = vadd.f32 1e-05, %v1567_v13 }
 0x55d   :  { %2092 = vrsqrt.f32 %v1569_v53  ;;  %vm1577_vm9 = vweird.f32 %v1569_v53 }
 0x560   :  { %v1566_v61 = vpop.xlane.xlu0 %1565 }
 0x561   :  { %v1568_v35 = vmul.f32 %v1566_v61, %v2829_v47 }
 0x563   :  { %v2093_v6 = vpop.eup %2092  ;;  %v1570_v22 = vadd.f32 1e-05, %v1568_v35 }
 0x564   :  { %v1572_v41 = vmul.f32 %v2093_v6, %v1569_v53  ;;  %vm1578_vm8 = vweird.f32 %v2093_v6 }
 0x565   :  { %2094 = vrsqrt.f32 %v1570_v22  ;;  %vm1579_vm10 = vmor %vm1577_vm9, %vm1578_vm8  ;;  %vm1587_vm12 = vweird.f32 %v1570_v22 }
 0x566   :  { %v1573_v40 = vmul.f32 %v2093_v6, %v1572_v41 }
 0x568   :  { %v1574_v24 = vmul.f32 0.5, %v1573_v40  ;;  %v1976_v40 = vld [vmem:[%s2937_s11 + $0x18] sm:$0xff] }
 0x569   :  { %1802 = vmatpush.bf16.msra.mxu3 %v1976_v40 }
 0x56a   :  { %v1575_v17 = vsub.f32 1.5, %v1574_v24 }
 0x56b   :  { %v2095_v9 = vpop.eup %2094 }
 0x56c   :  { %v1576_v36 = vmul.f32 %v2093_v6, %v1575_v17  ;;  %v1582_v25 = vmul.f32 %v2095_v9, %v1570_v22  ;;  %vm1588_vm11 = vweird.f32 %v2095_v9 }
 0x56d   :  { %vm1589_vm13 = vmor %vm1587_vm12, %vm1588_vm11 }
 0x56e   :  { %v1583_v42 = vmul.f32 %v2095_v9, %v1582_v25  ;;  %v1580_v38 = vsel %vm1579_vm10, %v2093_v6, %v1576_v36 }
 0x56f   :  { %v1591_v2 = vmul.f32 %v1580_v38, %v1557_v15 }
 0x570   :  { %v1584_v57 = vmul.f32 0.5, %v1583_v42 }
 0x571   :  { %v1596_v37 = vmul.f32 %v2052_v63, %v1591_v2 }
 0x572   :  { %v1585_v46 = vsub.f32 1.5, %v1584_v57 }
 0x573   :  { %v2849_v0 = vadd.f32 %v2053_v55, %v1596_v37  ;;  %v1973_v37 = vld [vmem:[%s2937_s11] sm:$0xff] }
 0x574   :  { %v1586_v4 = vmul.f32 %v2095_v9, %v1585_v46  ;;  %v1974_v46 = vld [vmem:[%s2937_s11 + $0x8] sm:$0xff] }
 0x576   :  { %v1590_v5 = vsel %vm1589_vm13, %v2095_v9, %v1586_v4  ;;  %v1975_v9 = vld [vmem:[%s2937_s11 + $0x10] sm:$0xff] }
 0x577   :  { %v1592_v51 = vmul.f32 %v1590_v5, %v1558_v30  ;;  %1803 = vmatpush.bf16.msra.mxu3 %v1975_v9 }
 0x579   :  { %v1597_v32 = vmul.f32 %v2052_v63, %v1592_v51 }
 0x57b   :  { %v2851_v59 = vadd.f32 %v2053_v55, %v1597_v32  ;;  %1804 = vmatpush.bf16.msra.mxu3 %v1974_v46 }
 0x57d   :  { %v1603_v8 = vpack.c.bf16 %v2851_v59, %v2849_v0 }
 0x57f   :  { %1932 = vmatmul.msk.bf16.vlgmr.msra.gmra.mxu2 %vm69_vm0, %v1603_v8  ;;  %1805 = vmatpush.bf16.msra.mxu3 %v1973_v37 }
 0x602   :  { %v1636_v50 = vpop.f32.mrf.mxu2 }
 0x603   :  { %v2859_v52 = vadd.f32 %v2054_v18, %v1636_v50 }
 0x605   :  { %v2862_v1 = vmul.f32 0.70710677, %v2859_v52  ;;  %v1641_v56 = vmul.f32 0.5, %v2859_v52 }
 0x607   :  { %v1645_v11 = vmul.f32 %v2862_v1, %v2862_v1 }
 0x609   :  { %v1646_v27 = vmin.f32 %v1645_v11, 16.0 }
 0x60a   :  { %v1638_v10 = vpop.f32.mrf.mxu2 }
 0x60b   :  { %v1647_v14 = vmul.f32 2.1237322e-06, %v1646_v27  ;;  %v1658_v12 = vmul.f32 3.8918573e-05, %v1646_v27  ;;  %v2866_v7 = vadd.f32 %v2054_v18, %v1638_v10 }
 0x60d   :  { %v1648_v28 = vadd.f32 0.00028619796, %v1647_v14  ;;  %v1659_v43 = vadd.f32 0.001143296, %v1658_v12  ;;  %v2869_v16 = vmul.f32 0.70710677, %v2866_v7 }
 0x60f   :  { %v1660_v19 = vmul.f32 %v1659_v43, %v1646_v27  ;;  %v1685_v48 = vmul.f32 %v2869_v16, %v2869_v16  ;;  %v1649_v31 = vmul.f32 %v1648_v28, %v1646_v27 }
 0x611   :  { %v1661_v29 = vadd.f32 0.014752088, %v1660_v19  ;;  %v1686_v23 = vmin.f32 %v1685_v48, 16.0  ;;  %v1650_v45 = vadd.f32 0.0036580483, %v1649_v31 }
 0x613   :  { %v1662_v26 = vmul.f32 %v1661_v29, %v1646_v27  ;;  %v1687_v39 = vmul.f32 2.1237322e-06, %v1686_v23  ;;  %v1698_v44 = vmul.f32 3.8918573e-05, %v1686_v23  ;;  %v1651_v54 = vmul.f32 %v1650_v45, %v1646_v27 }
 0x615   :  { %v1663_v15 = vadd.f32 0.112945676, %v1662_v26  ;;  %v1688_v49 = vadd.f32 0.00028619796, %v1687_v39  ;;  %v1699_v62 = vadd.f32 0.001143296, %v1698_v44 }
 0x616   :  { %v1652_v35 = vadd.f32 0.05243302, %v1651_v54 }
 0x617   :  { %v1664_v20 = vmul.f32 %v1663_v15, %v1646_v27  ;;  %v1689_v30 = vmul.f32 %v1688_v49, %v1686_v23  ;;  %v1700_v33 = vmul.f32 %v1699_v62, %v1686_v23 }
 0x618   :  { %v1653_v17 = vmul.f32 %v1652_v35, %v1646_v27 }
 0x619   :  { %v1665_v60 = vadd.f32 0.4994258, %v1664_v20  ;;  %v1690_v13 = vadd.f32 0.0036580483, %v1689_v30  ;;  %v1701_v53 = vadd.f32 0.014752088, %v1700_v33 }
 0x61a   :  { %v1654_v57 = vadd.f32 0.18741608, %v1653_v17  ;;  %v1642_v30 = vmul.f32 0.5, %v2866_v7 }
 0x61b   :  { %v1666_v58 = vmul.f32 %v1665_v60, %v1646_v27  ;;  %v1702_v61 = vmul.f32 %v1701_v53, %v1686_v23  ;;  %v1691_v22 = vmul.f32 %v1690_v13, %v1686_v23  ;;  %v2055_v53 = vld [vmem:[%s2938_s12] ss:$0 sm:$0xff] }
 0x61c   :  { %v1655_v55 = vmul.f32 %v1654_v57, %v1646_v27 }
 0x61d   :  { %v1667_v6 = vadd.f32 1.0, %v1666_v58  ;;  %v1703_v41 = vadd.f32 0.112945676, %v1702_v61  ;;  %v1692_v36 = vadd.f32 0.05243302, %v1691_v22 }
 0x61e   :  { %v1656_v11 = vadd.f32 1.1283791, %v1655_v55 }
 0x61f   :  { %2096 = vrcp.f32 %v1667_v6  ;;  %v1704_v24 = vmul.f32 %v1703_v41, %v1686_v23  ;;  %v1693_v2 = vmul.f32 %v1692_v36, %v1686_v23  ;;  %v1679_v32 = vand.u32 2147483648, %v1667_v6 }
 0x620   :  { %v1677_v18 = vand.u32 2147483647, %v1667_v6  ;;  %vm1673_vm15 = vweird.f32 %v1667_v6  ;;  %v1657_v19 = vmul.f32 %v1656_v11, %v2862_v1 }
 0x621   :  { %v1705_v25 = vadd.f32 0.4994258, %v1704_v24  ;;  %v1694_v8 = vadd.f32 0.18741608, %v1693_v2  ;;  %v1680_v12 = vor.u32 1.1754944e-38, %v1679_v32 }
 0x622   :  { %vm1678_vm2 = vcmp.eq.f32.partialorder %v1677_v18, 8.507059e+37 }
 0x623   :  { %v1706_v42 = vmul.f32 %v1705_v25, %v1686_v23  ;;  %v1695_v28 = vmul.f32 %v1694_v8, %v1686_v23 }
 0x625   :  { %v2097_v38 = vpop.eup %2096  ;;  %v1707_v4 = vadd.f32 1.0, %v1706_v42  ;;  %v1696_v48 = vadd.f32 1.1283791, %v1695_v28 }
 0x626   :  { %v1669_v63 = vmul.f32 %v2097_v38, %v1667_v6  ;;  %vm1674_vm14 = vweird.f32 %v2097_v38 }
 0x627   :  { %2098 = vrcp.f32 %v1707_v4  ;;  %vm1675_vm1 = vmor %vm1673_vm15, %vm1674_vm14  ;;  %v1719_v31 = vand.u32 2147483648, %v1707_v4  ;;  %v1717_v21 = vand.u32 2147483647, %v1707_v4  ;;  %vm1713_vm4 = vweird.f32 %v1707_v4 }
 0x628   :  { %v1670_v5 = vsub.f32 1.0, %v1669_v63  ;;  %v1697_v15 = vmul.f32 %v1696_v48, %v2869_v16 }
 0x629   :  { %v1720_v44 = vor.u32 1.1754944e-38, %v1719_v31  ;;  %vm1718_vm6 = vcmp.eq.f32.partialorder %v1717_v21, 8.507059e+37 }
 0x62a   :  { %v1671_v51 = vmul.f32 %v2097_v38, %v1670_v5 }
 0x62c   :  { %v1672_v50 = vadd.f32 %v2097_v38, %v1671_v51 }
 0x62d   :  { %v2099_v10 = vpop.eup %2098 }
 0x62e   :  { %v1676_v14 = vsel %vm1675_vm1, %v2097_v38, %v1672_v50  ;;  %v1709_v27 = vmul.f32 %v2099_v10, %v1707_v4  ;;  %vm1714_vm3 = vweird.f32 %v2099_v10  ;;  %v2056_v50 = vld [vmem:[%s2933_s7] ss:$0 sm:$0xff] }
 0x62f   :  { %v1681_v43 = vsel %vm1678_vm2, %v1680_v12, %v1676_v14  ;;  %vm1715_vm5 = vmor %vm1713_vm4, %vm1714_vm3  ;;  %v2057_v14 = vld [vmem:[%s2934_s8] ss:$0 sm:$0xff]  ;;  %s2145_s8 = smov 128  }
 0x630   :  { %v1710_v3 = vsub.f32 1.0, %v1709_v27  ;;  %v1682_v29 = vmul.f32 %v1681_v43, %v1657_v19 }
 0x632   :  { %v1711_v26 = vmul.f32 %v2099_v10, %v1710_v3  ;;  %v1933_v45 = vclamps-f32 %v1682_v29, 1.0 }
 0x634   :  { %v1712_v39 = vadd.f32 %v2099_v10, %v1711_v26  ;;  %v1725_v20 = vadd.f32 1.0, %v1933_v45 }
 0x636   :  { %v1716_v23 = vsel %vm1715_vm5, %v2099_v10, %v1712_v39  ;;  %v1727_v54 = vmul.f32 %v1725_v20, %v1641_v56 }
 0x637   :  { %v1721_v49 = vsel %vm1718_vm6, %v1720_v44, %v1716_v23 }
 0x638   :  { %v1722_v62 = vmul.f32 %v1721_v49, %v1697_v15 }
 0x63a   :  { %v1934_v1 = vclamps-f32 %v1722_v62, 1.0 }
 0x63c   :  { %v1726_v33 = vadd.f32 1.0, %v1934_v1 }
 0x63e   :  { %v1728_v60 = vmul.f32 %v1726_v33, %v1642_v30 }
 0x640   :  { %v1729_v13 = vpack.c.bf16 %v1728_v60, %v1727_v54 }
 0x642   :  { %1806 = vmatmul.bf16.vlgmr.msra.gmra.mxu3 %v1729_v13 }
 0x6c5   :  { %v1807_v16 = vpop.f32.mrf.mxu3 }
 0x6c6   :  { %v1808_v58 = vadd.f32 %v2055_v53, %v1807_v16 }
 0x6c8   :  { %v1812_v34 = vadd.f32 %v1808_v58, %v2849_v0 }
 0x6ca   :  { %v1816_v61 = vsel %vm69_vm0, %v1812_v34, 0.0 }
 0x6cb   :  { %1817 = vadd.xlane.f32.xlu2 %v1816_v61 }
 0x6cd   :  { %v1809_v35 = vpop.f32.mrf.mxu3 }
 0x6ce   :  { %v1810_v52 = vadd.f32 %v2055_v53, %v1809_v35 }
 0x6d0   :  { %v1813_v7 = vadd.f32 %v1810_v52, %v2851_v59 }
 0x6d2   :  { %v1819_v6 = vsel %vm69_vm0, %v1813_v7, 0.0 }
 0x6d3   :  { %1820 = vadd.xlane.f32.xlu1 %v1819_v6 }
 0x73e   :  { %v1818_v22 = vpop.xlane.xlu2 %1817 }
 0x73f   :  { %v1822_v41 = vmul.f32 %v1818_v22, %v2829_v47 }
 0x741   :  { %v1824_v40 = vsub.f32 %v1812_v34, %v1822_v41 }
 0x743   :  { %v1826_v24 = vmul.f32 %v1824_v40, %v1824_v40 }
 0x745   :  { %v1828_v17 = vsel %vm69_vm0, %v1826_v24, 0.0 }
 0x746   :  { %v1821_v9 = vpop.xlane.xlu1 %1820  ;;  %1829 = vadd.xlane.f32.xlu0 %v1828_v17 }
 0x747   :  { %v1823_v0 = vmul.f32 %v1821_v9, %v2829_v47 }
 0x749   :  { %v1825_v36 = vsub.f32 %v1813_v7, %v1823_v0 }
 0x74b   :  { %v1827_v25 = vmul.f32 %v1825_v36, %v1825_v36 }
 0x74d   :  { %v1831_v42 = vsel %vm69_vm0, %v1827_v25, 0.0 }
 0x74e   :  { %1832 = vadd.xlane.f32.xlu2 %v1831_v42 }
 0x7b9   :  { %v1830_v59 = vpop.xlane.xlu0 %1829 }
 0x7ba   :  { %v1834_v38 = vmul.f32 %v1830_v59, %v2829_v47 }
 0x7bc   :  { %v1836_v57 = vadd.f32 1e-05, %v1834_v38 }
 0x7be   :  { %2100 = vrsqrt.f32 %v1836_v57  ;;  %vm1844_vm8 = vweird.f32 %v1836_v57 }
 0x7c1   :  { %v1833_v46 = vpop.xlane.xlu2 %1832 }
 0x7c2   :  { %v1835_v63 = vmul.f32 %v1833_v46, %v2829_v47 }
 0x7c4   :  { %v2101_v2 = vpop.eup %2100  ;;  %v1837_v4 = vadd.f32 1e-05, %v1835_v63 }
 0x7c5   :  { %v1839_v5 = vmul.f32 %v2101_v2, %v1836_v57  ;;  %vm1845_vm7 = vweird.f32 %v2101_v2 }
 0x7c6   :  { %2102 = vrsqrt.f32 %v1837_v4  ;;  %vm1846_vm9 = vmor %vm1844_vm8, %vm1845_vm7  ;;  %vm1854_vm11 = vweird.f32 %v1837_v4 }
 0x7c7   :  { %v1840_v55 = vmul.f32 %v2101_v2, %v1839_v5 }
 0x7c9   :  { %v1841_v37 = vmul.f32 0.5, %v1840_v55 }
 0x7cb   :  { %v1842_v51 = vsub.f32 1.5, %v1841_v37 }
 0x7cc   :  { %v2103_v32 = vpop.eup %2102 }
 0x7cd   :  { %v1843_v8 = vmul.f32 %v2101_v2, %v1842_v51  ;;  %v1849_v18 = vmul.f32 %v2103_v32, %v1837_v4  ;;  %vm1855_vm10 = vweird.f32 %v2103_v32 }
 0x7ce   :  { %vm1856_vm12 = vmor %vm1854_vm11, %vm1855_vm10 }
 0x7cf   :  { %v1847_v11 = vsel %vm1846_vm9, %v2101_v2, %v1843_v8  ;;  %v1850_v10 = vmul.f32 %v2103_v32, %v1849_v18 }
 0x7d0   :  { %v1858_v47 = vmul.f32 %v1847_v11, %v1824_v40 }
 0x7d1   :  { %v1851_v12 = vmul.f32 0.5, %v1850_v10 }
 0x7d2   :  { %v1863_v28 = vmul.f32 %v2056_v50, %v1858_v47 }
 0x7d3   :  { %v1852_v27 = vsub.f32 1.5, %v1851_v12 }
 0x7d4   :  { %v1868_v43 = vadd.f32 %v2057_v14, %v1863_v28 }
 0x7d5   :  { %v1853_v19 = vmul.f32 %v2103_v32, %v1852_v27 }
 0x7d6   :  { %1870 = vst.msk [vmem:[#allocation2] sm:$0xff] %vm69_vm0, %v1868_v43 }
 0x7d7   :  { %v1857_v3 = vsel %vm1856_vm12, %v2103_v32, %v1853_v19 }
 0x7d8   :  { %v1859_v48 = vmul.f32 %v1857_v3, %v1825_v36 }
 0x7da   :  { %v1864_v31 = vmul.f32 %v2056_v50, %v1859_v48 }
 0x7dc   :  { %v1869_v29 = vadd.f32 %v2057_v14, %v1864_v31 }
 0x7de   :  { %1871 = vst.msk [vmem:[#allocation2 + $0x8] sm:$0xff] %vm69_vm0, %v1869_v29 }
 0x7df   :  { %1884 = dma.vmem_to_hbm [thread:$0]  %s1877_s5, 256, %s1879_s18, [#allocation3], %s2145_s8, %s2145_s8, %s2142_s23  }
 0x7e0   :  { %2130 = dma.done.wait [#allocation3], 256  }
 0x7e1   :  { %2131 = vsyncadd [#allocation3], 4294967040 }
 0x7e2   :  { %1889 = vsyncpa [#allocation3], 1 }

// kernel: tpu_custom_call.1
= control target key start
LH: loop header
LB: loop body
LE: loop exit
PB: predicated region body
PF: predicated region fallthrough
CT: control target
= control target key end

     0   :  { %s2926_s0 = inlined_call_operand.vmem [shape: f32[2,8,32], index: 0, kind: input, shape index: {}]   ;;  %s2927_s1 = inlined_call_operand.vmem [shape: bf16[32,96], index: 1, kind: input, shape index: {}]   ;;  %s2928_s2 = inlined_call_operand.vmem [shape: f32[1,96], index: 2, kind: input, shape index: {}]   ;;  %s2929_s3 = inlined_call_operand.vmem [shape: bf16[32,32], index: 3, kind: input, shape index: {}]   ;;  %s2930_s4 = inlined_call_operand.vmem [shape: f32[1,32], index: 4, kind: input, shape index: {}]   ;;  %s2931_s5 = inlined_call_operand.vmem [shape: f32[1,32], index: 5, kind: input, shape index: {}]   ;;  %s2932_s6 = inlined_call_operand.vmem [shape: f32[1,32], index: 6, kind: input, shape index: {}]   ;;  %s2933_s7 = inlined_call_operand.vmem [shape: f32[1,32], index: 7, kind: input, shape index: {}]   ;;  %s2934_s8 = inlined_call_operand.vmem [shape: f32[1,32], index: 8, kind: input, shape index: {}]   ;;  %s2935_s9 = inlined_call_operand.vmem [shape: bf16[32,128], index: 9, kind: input, shape index: {}]   ;;  %s2936_s10 = inlined_call_operand.vmem [shape: f32[1,128], index: 10, kind: input, shape index: {}]   ;;  %s2937_s11 = inlined_call_operand.vmem [shape: bf16[128,32], index: 11, kind: input, shape index: {}]   ;;  %s2938_s12 = inlined_call_operand.vmem [shape: f32[1,32], index: 12, kind: input, shape index: {}]   ;;  %s2939_s13 = inlined_call_operand.hbm [shape: f32[2,8,32], index: 13, kind: output, shape index: {}]  }
   0x1   :  { %v1968_v0 = vld [vmem:[%s2927_s1 + $0x8] sm:$0xff]  ;;  %v1967_v1 = vld [vmem:[%s2927_s1] sm:$0xff] }
   0x2   :  { %v46_v2 = vld [vmem:[%s2926_s0] sm:$0xff]  ;;  %v47_v3 = vld [vmem:[%s2926_s0 + $0x8] sm:$0xff]  ;;  %79 = vmatpush.bf16.msra.mxu0 %v1968_v0 }
   0x3   :  { %18 = vsyncpa [#allocation3], 0  ;;  %v48_v4 = vpack.c.bf16 %v47_v3, %v46_v2  ;;  %vm69_vm0 = vcmask 261120   ;;  %v2050_v5 = vld [vmem:[%s2928_s2] ss:$0 sm:$0xff]  ;;  %s2132_s1 = smov 104  }
   0x4   :  { %s2133_s18 = smov 120   ;;  %s2134_s19 = smov 112   ;;  %vm114_vm1 = vcmask 1047556   ;;  %v2135_v16 = vmov 1983009808   ;;  %vm846_vm2 = vcmask 64512  }
   0x5   :  { %v119_v17 = vunpack.c.l.s4 %v2135_v16  ;;  %s2136_s2 = smov 96   ;;  %v2137_v26 = vmov 1934713408   ;;  %s2138_s20 = smov 64   ;;  %vm1082_vm3 = vcmask 1043456   ;;  %vm1494_vm5 = vcmask 130048  }
   0x6   :  { %80 = vmatpush.bf16.msra.mxu0 %v1967_v1  ;;  %v143_v27 = vunpack.c.l.s4 %v2137_v26  ;;  %s2140_s21 = smov 24   ;;  %s2141_s22 = smov 16   ;;  %vm1497_vm6 = vcmask 195584  }
   0x7   :  { %v2241_v20 = vunpack.c.0.s8 %v119_v17  ;;  %s2142_s23 = smov 8  }
   0x8   :  { %v2256_v38 = vunpack.c.0.s8 %v143_v27 }
   0x9   :  { %1898 = vmatmul.msk.bf16.vlgmr.msra.gmra.mxu0 %vm69_vm0, %v48_v4 }
  0x86   :  { %v82_v6 = vpop.f32.mrf.mxu0 }
  0x87   :  { %v83_v7 = vadd.f32 %v2050_v5, %v82_v6 }
  0x89   :  { %107 = vrot.lane.b32.xlu1 %v83_v7, %s2132_s1  ;;  %95 = vrot.lane.b32.xlu0 %v83_v7, %s2133_s18  ;;  %v116_v24 = vrot.slane %v83_v7, 4 }
  0x8e   :  { %v84_v8 = vpop.f32.mrf.mxu0 }
  0x8f   :  { %v2232_v9 = vadd.f32 %v2050_v5, %v84_v8 }
  0x91   :  { %103 = vrot.lane.b32.xlu2 %v2232_v9, %s2134_s19  ;;  %97 = vrot.lane.b32.xlu1 %v2232_v9, %s2133_s18  ;;  %s1878_s18 = sshll.u32 %s2939_s13, 4  ;;  %s1879_s18 = int_to_ptr.hbm [resolvable:$true] %s1878_s18 }
  0x92   :  { %101 = vrot.lane.b32.xlu0 %v83_v7, %s2134_s19  ;;  %s2144_s19 = smov [#allocation2]  }
  0x99   :  { %109 = vrot.lane.b32.xlu2 %v2232_v9, %s2132_s1 }
  0xeb   :  { %v2237_v10 = vpop.permute.xlu2 %103 }
  0xf3   :  { %v2243_v21 = vpop.permute.xlu2 %109 }
  0xf4   :  { %v2010_v30 = vpack.i.bf16 %v2243_v21, %v2237_v10 }
  0xfb   :  { %v108_v11 = vpop.permute.xlu1 %107  ;;  %v96_v12 = vpop.permute.xlu0 %95 }
  0xfc   :  { %v126_v13 = vrot.slane %v108_v11, 4  ;;  %v128_v14 = vrot.slane %v96_v12, 4  ;;  %v1995_v15 = vpack.i.bf16 %v96_v12, %v83_v7 }
  0xfe   :  { %v127_v18 = vsel %vm114_vm1, %v126_v13, %v96_v12  ;;  %v129_v19 = vsel %vm114_vm1, %v108_v11, %v128_v14  ;;  %1996 = vrot.lane.b32.xlu0 %v1995_v15, %s2136_s2 }
  0xff   :  { %v137_v22 = vperm.slane %v129_v19, %v2241_v20  ;;  %v133_v25 = vperm.slane %v127_v18, %v2241_v20 }
 0x101   :  { %v150_v35 = vrot.slane %v137_v22, 4  ;;  %v138_v37 = vrot.slane %v133_v25, 4 }
 0x103   :  { %v2246_v23 = vpop.permute.xlu1 %97 }
 0x104   :  { %v102_v28 = vpop.permute.xlu0 %101  ;;  %v2005_v29 = vpack.i.bf16 %v2246_v23, %v2232_v9 }
 0x105   :  { %v113_v31 = vrot.slane %v102_v28, 4  ;;  %v117_v32 = vsel %vm114_vm1, %v102_v28, %v116_v24  ;;  %v2000_v33 = vpack.i.bf16 %v108_v11, %v102_v28 }
 0x106   :  { %v125_v34 = vperm.slane %v117_v32, %v2241_v20  ;;  %2006 = vrot.lane.b32.xlu2 %v2005_v29, %s2136_s2  ;;  %2011 = vrot.lane.b32.xlu0 %v2010_v30, %s2136_s2 }
 0x107   :  { %v115_v36 = vsel %vm114_vm1, %v113_v31, %v83_v7  ;;  %2001 = vrot.lane.b32.xlu1 %v2000_v33, %s2136_s2  ;;  %v184_v31 = vrot.slane %v2246_v23, 4 }
 0x108   :  { %v121_v39 = vperm.slane %v115_v36, %v2241_v20  ;;  %v152_v40 = vrot.slane %v125_v34, 4  ;;  %v151_v41 = vsel %vm114_vm1, %v150_v35, %v125_v34  ;;  %v182_v34 = vrot.slane %v2243_v21, 4 }
 0x109   :  { %v157_v45 = vperm.slane %v151_v41, %v2256_v38  ;;  %v185_v35 = vsel %vm114_vm1, %v2243_v21, %v184_v31 }
 0x10a   :  { %v139_v42 = vsel %vm114_vm1, %v138_v37, %v121_v39  ;;  %v140_v43 = vrot.slane %v121_v39, 4  ;;  %v153_v44 = vsel %vm114_vm1, %v137_v22, %v152_v40  ;;  %v183_v37 = vsel %vm114_vm1, %v182_v34, %v2246_v23 }
 0x10b   :  { %v145_v47 = vperm.slane %v139_v42, %v2256_v38  ;;  %v161_v48 = vperm.slane %v153_v44, %v2256_v38  ;;  %v166_v50 = vrot.slane %v157_v45, 4  ;;  %v193_v40 = vperm.slane %v185_v35, %v2241_v20 }
 0x10c   :  { %v141_v46 = vsel %vm114_vm1, %v133_v25, %v140_v43  ;;  %v189_v41 = vperm.slane %v183_v37, %v2241_v20 }
 0x10d   :  { %v149_v49 = vperm.slane %v141_v46, %v2256_v38  ;;  %v168_v51 = vrot.slane %v161_v48, 4  ;;  %v162_v52 = vrot.slane %v145_v47, 4  ;;  %v167_v60 = vsel %vm114_vm1, 0.0, %v166_v50 }
 0x10e   :  { %2026 = vrot.lane.b32.xlu0 %v2005_v29, %s2138_s20  ;;  %2021 = vrot.lane.b32.xlu2 %v2000_v33, %s2138_s20  ;;  %v170_v29 = vrot.slane %v2237_v10, 4  ;;  %v206_v43 = vrot.slane %v193_v40, 4  ;;  %v194_v44 = vrot.slane %v189_v41, 4 }
 0x10f   :  { %2016 = vrot.lane.b32.xlu1 %v1995_v15, %s2138_s20  ;;  %v164_v53 = vrot.slane %v149_v49, 4  ;;  %v169_v54 = vsel %vm114_vm1, 0.0, %v168_v51  ;;  %v237_v55 = vsel %vm114_vm1, %v168_v51, %v157_v45  ;;  %v163_v63 = vsel %vm114_vm1, 0.0, %v162_v52 }
 0x110   :  { %v241_v56 = vperm.slane %v237_v55, %v2241_v20  ;;  %v242_v57 = vrot.slane %v169_v54, 4  ;;  %v171_v33 = vsel %vm114_vm1, %v170_v29, %v2232_v9 }
 0x111   :  { %v165_v58 = vsel %vm114_vm1, 0.0, %v164_v53  ;;  %v226_v59 = vsel %vm114_vm1, %v164_v53, %v145_v47  ;;  %v177_v39 = vperm.slane %v171_v33, %v2241_v20 }
 0x112   :  { %v230_v61 = vperm.slane %v226_v59, %v2241_v20  ;;  %v231_v62 = vrot.slane %v165_v58, 4  ;;  %v243_v0 = vsel %vm114_vm1, %v242_v57, %v167_v60  ;;  %v262_v1 = vrot.slane %v241_v56, 4 }
 0x113   :  { %v247_v3 = vperm.slane %v243_v0, %v2241_v20  ;;  %v196_v42 = vrot.slane %v177_v39, 4  ;;  %v195_v47 = vsel %vm114_vm1, %v194_v44, %v177_v39 }
 0x114   :  { %v232_v2 = vsel %vm114_vm1, %v231_v62, %v163_v63  ;;  %v250_v4 = vrot.slane %v230_v61, 4  ;;  %v201_v50 = vperm.slane %v195_v47, %v2256_v38 }
 0x115   :  { %v236_v5 = vperm.slane %v232_v2, %v2241_v20  ;;  %v263_v6 = vsel %vm114_vm1, %v247_v3, %v262_v1  ;;  %v260_v7 = vrot.slane %v247_v3, 4  ;;  %v197_v45 = vsel %vm114_vm1, %v189_v41, %v196_v42 }
 0x116   :  { %2031 = vrot.lane.b32.xlu2 %v2010_v30, %s2138_s20  ;;  %v271_v11 = vperm.slane %v263_v6, %v2256_v38  ;;  %v172_v30 = vrot.slane %v2232_v9, 4  ;;  %v205_v46 = vperm.slane %v197_v45, %v2256_v38  ;;  %v218_v54 = vrot.slane %v201_v50, 4 }
 0x117   :  { %v251_v8 = vsel %vm114_vm1, %v236_v5, %v250_v4  ;;  %v248_v12 = vrot.slane %v236_v5, 4  ;;  %v261_v14 = vsel %vm114_vm1, %v260_v7, %v241_v56 }
 0x118   :  { %v259_v13 = vperm.slane %v251_v8, %v2256_v38  ;;  %v276_v15 = vrot.slane %v271_v11, 4  ;;  %v267_v17 = vperm.slane %v261_v14, %v2256_v38  ;;  %v173_v32 = vsel %vm114_vm1, %v2237_v10, %v172_v30 }
 0x119   :  { %v249_v16 = vsel %vm114_vm1, %v248_v12, %v230_v61  ;;  %v181_v36 = vperm.slane %v173_v32, %v2241_v20  ;;  %v220_v51 = vrot.slane %v205_v46, 4  ;;  %v219_v62 = vsel %vm114_vm1, 0.0, %v218_v54 }
 0x11a   :  { %v278_v18 = vrot.slane %v259_v13, 4  ;;  %v255_v19 = vperm.slane %v249_v16, %v2256_v38  ;;  %v2288_v22 = vsel %vm114_vm1, %v276_v15, %v259_v13  ;;  %v272_v24 = vrot.slane %v267_v17, 4 }
 0x11b   :  { %v208_v10 = vrot.slane %v181_v36, 4  ;;  %v207_v23 = vsel %vm114_vm1, %v206_v43, %v181_v36  ;;  %v221_v55 = vsel %vm114_vm1, 0.0, %v220_v51  ;;  %v280_v59 = vsel %vm114_vm1, %v220_v51, %v201_v50 }
 0x11c   :  { %v2291_v25 = vsel %vm114_vm1, %v271_v11, %v278_v18  ;;  %v274_v26 = vrot.slane %v255_v19, 4  ;;  %v2294_v27 = vsel %vm114_vm1, %v272_v24, %v255_v19  ;;  %v213_v48 = vperm.slane %v207_v23, %v2256_v38 }
 0x11d   :  { %v209_v9 = vsel %vm114_vm1, %v193_v40, %v208_v10  ;;  %v285_v60 = vrot.slane %v221_v55, 4  ;;  %v284_v0 = vperm.slane %v280_v59, %v2241_v20  ;;  %v336_v40 = vpack.c.bf16 %v2288_v22, %v2288_v22 }
 0x11e   :  { %v2297_v28 = vsel %vm114_vm1, %v267_v17, %v274_v26  ;;  %v217_v21 = vperm.slane %v209_v9, %v2256_v38  ;;  %v222_v52 = vrot.slane %v213_v48, 4  ;;  %v334_v10 = vpack.c.bf16 %v2294_v27, %v2294_v27 }
 0x11f   :  { %v286_v2 = vsel %vm114_vm1, %v285_v60, %v219_v62  ;;  %v304_v6 = vrot.slane %v284_v0, 4  ;;  %v337_v42 = vpack.c.bf16 %v2291_v25, %v2291_v25  ;;  %v335_v43 = vpack.c.bf16 %v2297_v28, %v2297_v28 }
 0x120   :  { %v224_v49 = vrot.slane %v217_v21, 4  ;;  %v223_v58 = vsel %vm114_vm1, 0.0, %v222_v52  ;;  %v290_v5 = vperm.slane %v286_v2, %v2241_v20 }
 0x122   :  { %v225_v53 = vsel %vm114_vm1, 0.0, %v224_v49  ;;  %v291_v56 = vsel %vm114_vm1, %v224_v49, %v213_v48  ;;  %v305_v11 = vsel %vm114_vm1, %v290_v5, %v304_v6  ;;  %v302_v14 = vrot.slane %v290_v5, 4 }
 0x123   :  { %v296_v57 = vrot.slane %v225_v53, 4  ;;  %v295_v63 = vperm.slane %v291_v56, %v2241_v20  ;;  %v313_v13 = vperm.slane %v305_v11, %v2256_v38 }
 0x124   :  { %v303_v24 = vsel %vm114_vm1, %v302_v14, %v284_v0 }
 0x125   :  { %v297_v1 = vsel %vm114_vm1, %v296_v57, %v223_v58  ;;  %v316_v4 = vrot.slane %v295_v63, 4  ;;  %v332_v19 = vrot.slane %v313_v13, 4  ;;  %v2357_v36 = vperm.slane %v303_v24, %v2256_v38 }
 0x126   :  { %v301_v3 = vperm.slane %v297_v1, %v2241_v20 }
 0x128   :  { %v317_v8 = vsel %vm114_vm1, %v301_v3, %v316_v4  ;;  %v314_v15 = vrot.slane %v301_v3, 4 }
 0x129   :  { %v325_v12 = vperm.slane %v317_v8, %v2256_v38 }
 0x12a   :  { %v315_v26 = vsel %vm114_vm1, %v314_v15, %v295_v63 }
 0x12b   :  { %v330_v17 = vrot.slane %v325_v12, 4  ;;  %v2362_v41 = vsel %vm114_vm1, %v325_v12, %v332_v19  ;;  %v2371_v9 = vperm.slane %v315_v26, %v2256_v38 }
 0x12d   :  { %v2354_v35 = vsel %vm114_vm1, %v330_v17, %v313_v13 }
 0x160   :  { %v2328_v61 = vpop.permute.xlu2 %2006 }
 0x161   :  { %v2009_v29 = vunpack.i.h.bf16 %v2328_v61  ;;  %v2008_v30 = vunpack.i.l.bf16 %v2328_v61 }
 0x163   :  { %v436_v44 = vrot.slane %v2009_v29, 4  ;;  %v424_v45 = vrot.slane %v2008_v30, 4 }
 0x168   :  { %v2337_v7 = vpop.permute.xlu2 %2021 }
 0x169   :  { %v2024_v31 = vunpack.i.h.bf16 %v2337_v7  ;;  %v2023_v32 = vunpack.i.l.bf16 %v2337_v7 }
 0x16b   :  { %v2375_v21 = vrot.slane %v2024_v31, 4  ;;  %v2379_v46 = vrot.slane %v2023_v32, 4 }
 0x170   :  { %v1997_v16 = vpop.permute.xlu0 %1996  ;;  %v2343_v18 = vpop.permute.xlu2 %2031 }
 0x171   :  { %v2034_v33 = vunpack.i.h.bf16 %v2343_v18  ;;  %v2033_v34 = vunpack.i.l.bf16 %v2343_v18  ;;  %v1999_v37 = vunpack.i.h.bf16 %v1997_v16  ;;  %v1998_v39 = vunpack.i.l.bf16 %v1997_v16 }
 0x173   :  { %v2383_v47 = vrot.slane %v2034_v33, 4  ;;  %v2387_v48 = vrot.slane %v2033_v34, 4  ;;  %v380_v52 = vrot.slane %v1999_v37, 4  ;;  %v368_v53 = vrot.slane %v1998_v39, 4 }
 0x178   :  { %v2012_v23 = vpop.permute.xlu0 %2011 }
 0x179   :  { %v2002_v49 = vpop.permute.xlu1 %2001  ;;  %v2014_v50 = vunpack.i.h.bf16 %v2012_v23  ;;  %v2013_v51 = vunpack.i.l.bf16 %v2012_v23 }
 0x17a   :  { %v2004_v54 = vunpack.i.h.bf16 %v2002_v49  ;;  %v2003_v55 = vunpack.i.l.bf16 %v2002_v49 }
 0x17b   :  { %v434_v56 = vrot.slane %v2014_v50, 4  ;;  %v437_v57 = vsel %vm114_vm1, %v2014_v50, %v436_v44  ;;  %v422_v58 = vrot.slane %v2013_v51, 4  ;;  %v425_v59 = vsel %vm114_vm1, %v2013_v51, %v424_v45 }
 0x17c   :  { %v378_v60 = vrot.slane %v2004_v54, 4  ;;  %v366_v61 = vrot.slane %v2003_v55, 4  ;;  %v369_v62 = vsel %vm114_vm1, %v2003_v55, %v368_v53  ;;  %v381_v63 = vsel %vm114_vm1, %v2004_v54, %v380_v52 }
 0x17d   :  { %v377_v0 = vperm.slane %v369_v62, %v2241_v20  ;;  %v389_v1 = vperm.slane %v381_v63, %v2241_v20  ;;  %v435_v2 = vsel %vm114_vm1, %v434_v56, %v2009_v29  ;;  %v445_v3 = vperm.slane %v437_v57, %v2241_v20 }
 0x17e   :  { %v367_v4 = vsel %vm114_vm1, %v366_v61, %v1998_v39  ;;  %v379_v5 = vsel %vm114_vm1, %v378_v60, %v1999_v37  ;;  %v441_v6 = vperm.slane %v435_v2, %v2241_v20  ;;  %v423_v8 = vsel %vm114_vm1, %v422_v58, %v2008_v30 }
 0x17f   :  { %v373_v11 = vperm.slane %v367_v4, %v2241_v20  ;;  %v385_v12 = vperm.slane %v379_v5, %v2241_v20  ;;  %v402_v13 = vrot.slane %v389_v1, 4  ;;  %v404_v14 = vrot.slane %v377_v0, 4 }
 0x180   :  { %v446_v15 = vrot.slane %v441_v6, 4  ;;  %v458_v16 = vrot.slane %v445_v3, 4  ;;  %v429_v17 = vperm.slane %v423_v8, %v2241_v20  ;;  %v433_v19 = vperm.slane %v425_v59, %v2241_v20 }
 0x181   :  { %v390_v24 = vrot.slane %v385_v12, 4  ;;  %v392_v26 = vrot.slane %v373_v11, 4  ;;  %v403_v29 = vsel %vm114_vm1, %v402_v13, %v377_v0  ;;  %v405_v37 = vsel %vm114_vm1, %v389_v1, %v404_v14  ;;  %v2017_v60 = vpop.permute.xlu1 %2016  ;;  %v2027_v1 = vpop.permute.xlu0 %2026 }
 0x182   :  { %v2408_v30 = vperm.slane %v403_v29, %v2256_v38  ;;  %v413_v39 = vperm.slane %v405_v37, %v2256_v38  ;;  %v447_v44 = vsel %vm114_vm1, %v446_v15, %v429_v17  ;;  %v448_v45 = vrot.slane %v429_v17, 4 }
 0x183   :  { %v391_v23 = vsel %vm114_vm1, %v390_v24, %v373_v11  ;;  %v393_v49 = vsel %vm114_vm1, %v385_v12, %v392_v26  ;;  %v2415_v50 = vperm.slane %v447_v44, %v2256_v38  ;;  %v459_v51 = vsel %vm114_vm1, %v458_v16, %v433_v19 }
 0x184   :  { %v2419_v52 = vperm.slane %v391_v23, %v2256_v38  ;;  %v401_v53 = vperm.slane %v393_v49, %v2256_v38  ;;  %v418_v54 = vrot.slane %v2408_v30, 4  ;;  %v2423_v55 = vrot.slane %v413_v39, 4 }
 0x185   :  { %v449_v56 = vsel %vm114_vm1, %v441_v6, %v448_v45  ;;  %v460_v57 = vrot.slane %v433_v19, 4  ;;  %v465_v58 = vperm.slane %v459_v51, %v2256_v38  ;;  %v470_v59 = vrot.slane %v2415_v50, 4 }
 0x186   :  { %v414_v61 = vrot.slane %v2419_v52, 4  ;;  %v2429_v62 = vrot.slane %v401_v53, 4  ;;  %v2432_v63 = vsel %vm114_vm1, 0.0, %v418_v54  ;;  %v2436_v0 = vsel %vm114_vm1, 0.0, %v2423_v55 }
 0x187   :  { %v494_v2 = vrot.slane %v2436_v0, 4  ;;  %v457_v4 = vperm.slane %v449_v56, %v2256_v38  ;;  %v461_v5 = vsel %vm114_vm1, %v445_v3, %v460_v57  ;;  %v474_v6 = vrot.slane %v465_v58, 4 }
 0x188   :  { %v2443_v8 = vsel %vm114_vm1, 0.0, %v2429_v62  ;;  %v469_v11 = vperm.slane %v461_v5, %v2256_v38  ;;  %v2019_v12 = vunpack.i.h.bf16 %v2017_v60  ;;  %v2018_v13 = vunpack.i.l.bf16 %v2017_v60 }
 0x189   :  { %v2446_v14 = vrot.slane %v457_v4, 4  ;;  %v2449_v15 = vsel %vm114_vm1, 0.0, %v474_v6  ;;  %v2029_v16 = vunpack.i.h.bf16 %v2027_v1  ;;  %v2028_v17 = vunpack.i.l.bf16 %v2027_v1 }
 0x18a   :  { %v476_v19 = vrot.slane %v469_v11, 4  ;;  %v631_v3 = vsel %vm114_vm1, %v2375_v21, %v2019_v12  ;;  %v632_v24 = vrot.slane %v2019_v12, 4  ;;  %v619_v26 = vsel %vm114_vm1, %v2379_v46, %v2018_v13 }
 0x18b   :  { %v2457_v29 = vsel %vm114_vm1, 0.0, %v2446_v14  ;;  %v637_v37 = vperm.slane %v631_v3, %v2241_v20  ;;  %v620_v39 = vrot.slane %v2018_v13, 4  ;;  %v625_v44 = vperm.slane %v619_v26, %v2241_v20 }
 0x18c   :  { %v2462_v45 = vsel %vm114_vm1, 0.0, %v476_v19  ;;  %v537_v23 = vrot.slane %v2457_v29, 4  ;;  %v2466_v21 = vsel %vm114_vm1, %v476_v19, %v465_v58  ;;  %v633_v46 = vsel %vm114_vm1, %v2024_v31, %v632_v24 }
 0x18d   :  { %v548_v49 = vrot.slane %v2462_v45, 4  ;;  %v641_v51 = vperm.slane %v633_v46, %v2241_v20  ;;  %v642_v53 = vrot.slane %v637_v37, 4  ;;  %v621_v54 = vsel %vm114_vm1, %v2023_v32, %v620_v39 }
 0x18e   :  { %v629_v56 = vperm.slane %v621_v54, %v2241_v20  ;;  %v644_v57 = vrot.slane %v625_v44, 4  ;;  %v687_v58 = vsel %vm114_vm1, %v2383_v47, %v2029_v16  ;;  %v688_v60 = vrot.slane %v2029_v16, 4 }
 0x18f   :  { %v654_v1 = vrot.slane %v641_v51, 4  ;;  %v643_v4 = vsel %vm114_vm1, %v642_v53, %v625_v44  ;;  %v693_v31 = vperm.slane %v687_v58, %v2241_v20  ;;  %v675_v5 = vsel %vm114_vm1, %v2387_v48, %v2028_v17 }
 0x190   :  { %v645_v6 = vsel %vm114_vm1, %v637_v37, %v644_v57  ;;  %v649_v7 = vperm.slane %v643_v4, %v2256_v38  ;;  %v656_v32 = vrot.slane %v629_v56, 4  ;;  %v689_v11 = vsel %vm114_vm1, %v2034_v33, %v688_v60 }
 0x191   :  { %v653_v47 = vperm.slane %v645_v6, %v2256_v38  ;;  %v655_v12 = vsel %vm114_vm1, %v654_v1, %v629_v56  ;;  %v697_v13 = vperm.slane %v689_v11, %v2241_v20  ;;  %v698_v16 = vrot.slane %v693_v31, 4 }
 0x192   :  { %v657_v19 = vsel %vm114_vm1, %v641_v51, %v656_v32  ;;  %v661_v48 = vperm.slane %v655_v12, %v2256_v38  ;;  %v666_v3 = vrot.slane %v649_v7, 4  ;;  %v676_v24 = vrot.slane %v2028_v17, 4 }
 0x193   :  { %v665_v26 = vperm.slane %v657_v19, %v2256_v38  ;;  %v668_v37 = vrot.slane %v653_v47, 4  ;;  %v710_v39 = vrot.slane %v697_v13, 4  ;;  %v681_v44 = vperm.slane %v675_v5, %v2241_v20 }
 0x194   :  { %v2496_v33 = vsel %vm114_vm1, 0.0, %v666_v3  ;;  %v670_v46 = vrot.slane %v661_v48, 4  ;;  %v677_v53 = vsel %vm114_vm1, %v2033_v34, %v676_v24  ;;  %v415_v51 = vsel %vm114_vm1, 0.0, %v414_v61 }
 0x195   :  { %v2503_v54 = vsel %vm114_vm1, 0.0, %v668_v37  ;;  %v672_v17 = vrot.slane %v665_v26, 4  ;;  %v2506_v56 = vsel %vm114_vm1, %v668_v37, %v649_v7  ;;  %v685_v57 = vperm.slane %v677_v53, %v2241_v20 }
 0x196   :  { %v2510_v58 = vsel %vm114_vm1, 0.0, %v670_v46  ;;  %v735_v60 = vrot.slane %v2503_v54, 4  ;;  %v699_v18 = vsel %vm114_vm1, %v698_v16, %v681_v44  ;;  %v700_v1 = vrot.slane %v681_v44, 4 }
 0x197   :  { %v2515_v34 = vsel %vm114_vm1, 0.0, %v672_v17  ;;  %v2518_v61 = vsel %vm114_vm1, %v672_v17, %v661_v48  ;;  %v705_v4 = vperm.slane %v699_v18, %v2256_v38  ;;  %v711_v5 = vsel %vm114_vm1, %v710_v39, %v685_v57 }
 0x198   :  { %v746_v6 = vrot.slane %v2515_v34, 4  ;;  %v701_v7 = vsel %vm114_vm1, %v693_v31, %v700_v1  ;;  %v712_v32 = vrot.slane %v685_v57, 4  ;;  %v717_v11 = vperm.slane %v711_v5, %v2256_v38 }
 0x199   :  { %v709_v47 = vperm.slane %v701_v7, %v2256_v38  ;;  %v722_v12 = vrot.slane %v705_v4, 4  ;;  %v478_v16 = vsel %vm114_vm1, %v2429_v62, %v2419_v52  ;;  %v483_v19 = vrot.slane %v2443_v8, 4 }
 0x19a   :  { %v713_v48 = vsel %vm114_vm1, %v697_v13, %v712_v32  ;;  %v726_v3 = vrot.slane %v717_v11, 4  ;;  %v482_v24 = vperm.slane %v478_v16, %v2241_v20  ;;  %v489_v31 = vsel %vm114_vm1, %v2423_v55, %v2408_v30 }
 0x19b   :  { %v721_v26 = vperm.slane %v713_v48, %v2256_v38  ;;  %v2537_v37 = vsel %vm114_vm1, 0.0, %v722_v12  ;;  %v724_v39 = vrot.slane %v709_v47, 4  ;;  %v484_v44 = vsel %vm114_vm1, %v483_v19, %v415_v51 }
 0x19c   :  { %v2541_v52 = vsel %vm114_vm1, 0.0, %v726_v3  ;;  %v488_v62 = vperm.slane %v484_v44, %v2241_v20  ;;  %v493_v8 = vperm.slane %v489_v31, %v2241_v20  ;;  %v495_v30 = vsel %vm114_vm1, %v494_v2, %v2432_v63 }
 0x19d   :  { %v2550_v55 = vsel %vm114_vm1, 0.0, %v724_v39  ;;  %v728_v13 = vrot.slane %v721_v26, 4  ;;  %v2553_v46 = vsel %vm114_vm1, %v724_v39, %v705_v4  ;;  %v499_v53 = vperm.slane %v495_v30, %v2241_v20 }
 0x19e   :  { %v789_v51 = vrot.slane %v2550_v55, 4  ;;  %v502_v17 = vrot.slane %v482_v24, 4  ;;  %v514_v57 = vrot.slane %v493_v8, 4  ;;  %v471_v63 = vsel %vm114_vm1, 0.0, %v470_v59 }
 0x19f   :  { %v2558_v18 = vsel %vm114_vm1, 0.0, %v728_v13  ;;  %v2561_v0 = vsel %vm114_vm1, %v728_v13, %v717_v11  ;;  %v532_v2 = vsel %vm114_vm1, %v2446_v14, %v2415_v50  ;;  %v538_v59 = vsel %vm114_vm1, %v537_v23, %v471_v63 }
 0x1a0   :  { %v800_v1 = vrot.slane %v2558_v18, 4  ;;  %v503_v4 = vsel %vm114_vm1, %v488_v62, %v502_v17  ;;  %v515_v5 = vsel %vm114_vm1, %v499_v53, %v514_v57  ;;  %v536_v7 = vperm.slane %v532_v2, %v2241_v20 }
 0x1a1   :  { %v511_v32 = vperm.slane %v503_v4, %v2256_v38  ;;  %v523_v11 = vperm.slane %v515_v5, %v2256_v38  ;;  %v547_v47 = vperm.slane %v2466_v21, %v2241_v20  ;;  %v542_v50 = vperm.slane %v538_v59, %v2241_v20 }
 0x1a2   :  { %v549_v14 = vsel %vm114_vm1, %v548_v49, %v2449_v15  ;;  %v556_v12 = vrot.slane %v536_v7, 4  ;;  %v500_v16 = vrot.slane %v488_v62, 4  ;;  %v512_v31 = vrot.slane %v499_v53, 4 }
 0x1a3   :  { %v528_v19 = vrot.slane %v523_v11, 4  ;;  %v553_v48 = vperm.slane %v549_v14, %v2241_v20  ;;  %v568_v3 = vrot.slane %v547_v47, 4  ;;  %v530_v26 = vrot.slane %v511_v32, 4 }
 0x1a4   :  { %v557_v29 = vsel %vm114_vm1, %v542_v50, %v556_v12  ;;  %v501_v23 = vsel %vm114_vm1, %v500_v16, %v482_v24  ;;  %v554_v21 = vrot.slane %v542_v50, 4  ;;  %v513_v30 = vsel %vm114_vm1, %v512_v31, %v493_v8 }
 0x1a5   :  { %v529_v39 = vsel %vm114_vm1, %v528_v19, %v511_v32  ;;  %v565_v44 = vperm.slane %v557_v29, %v2256_v38  ;;  %v569_v45 = vsel %vm114_vm1, %v553_v48, %v568_v3  ;;  %v507_v15 = vperm.slane %v501_v23, %v2256_v38 }
 0x1a6   :  { %v588_v49 = vpack.c.bf16 %v529_v39, %v529_v39  ;;  %v577_v62 = vperm.slane %v569_v45, %v2256_v38  ;;  %v531_v13 = vsel %vm114_vm1, %v523_v11, %v530_v26  ;;  %v519_v24 = vperm.slane %v513_v30, %v2256_v38 }
 0x1a7   :  { %v584_v53 = vrot.slane %v565_v44, 4  ;;  %v589_v17 = vpack.c.bf16 %v531_v13, %v531_v13  ;;  %v555_v57 = vsel %vm114_vm1, %v554_v21, %v536_v7  ;;  %v566_v5 = vrot.slane %v553_v48, 4 }
 0x1a8   :  { %v889_v63 = vsel %vm846_vm2, %v588_v49, 0  ;;  %v582_v2 = vrot.slane %v577_v62, 4  ;;  %v561_v4 = vperm.slane %v555_v57, %v2256_v38  ;;  %v524_v32 = vrot.slane %v519_v24, 4 }
 0x1a9   :  { %898 = vmatpush.bf16.xpose.msra.mxu3 %v889_v63  ;;  %v908_v59 = vsel %vm846_vm2, %v589_v17, 0  ;;  %v585_v8 = vsel %vm114_vm1, %v577_v62, %v584_v53  ;;  %v526_v50 = vrot.slane %v507_v15, 4  ;;  %v567_v14 = vsel %vm114_vm1, %v566_v5, %v547_v47 }
 0x1aa   :  { %v583_v11 = vsel %vm114_vm1, %v582_v2, %v565_v44  ;;  %917 = vmatpush.bf16.xpose.msrb.mxu0 %v908_v59  ;;  %v593_v12 = vpack.c.bf16 %v585_v8, %v585_v8  ;;  %v580_v7 = vrot.slane %v561_v4, 4  ;;  %v525_v19 = vsel %vm114_vm1, %v524_v32, %v507_v15 }
 0x1ab   :  { %v592_v16 = vpack.c.bf16 %v583_v11, %v583_v11  ;;  %v573_v3 = vperm.slane %v567_v14, %v2256_v38  ;;  %v527_v48 = vsel %vm114_vm1, %v519_v24, %v526_v50  ;;  %v586_v31 = vpack.c.bf16 %v525_v19, %v525_v19 }
 0x1ac   :  { %v984_v29 = vsel %vm846_vm2, %v593_v12, 0  ;;  %v587_v23 = vpack.c.bf16 %v527_v48, %v527_v48  ;;  %v734_v26 = vperm.slane %v2506_v56, %v2241_v20  ;;  %v736_v44 = vsel %vm114_vm1, %v735_v60, %v2496_v33 }
 0x1ad   :  { %v965_v21 = vsel %vm846_vm2, %v592_v16, 0  ;;  %v578_v39 = vrot.slane %v573_v3, 4  ;;  %v581_v47 = vsel %vm114_vm1, %v573_v3, %v580_v7  ;;  %v851_v45 = vsel %vm846_vm2, %v586_v31, 0 }
 0x1ae   :  { %v870_v15 = vsel %vm846_vm2, %v587_v23, 0  ;;  %v591_v49 = vpack.c.bf16 %v581_v47, %v581_v47  ;;  %v740_v62 = vperm.slane %v736_v44, %v2241_v20  ;;  %860 = vmatpush.bf16.xpose.msra.mxu1 %v851_v45  ;;  %v745_v30 = vperm.slane %v2518_v61, %v2241_v20 }
 0x1af   :  { %v579_v56 = vsel %vm114_vm1, %v578_v39, %v561_v4  ;;  %879 = vmatpush.bf16.xpose.msra.mxu2 %v870_v15  ;;  %v747_v33 = vsel %vm114_vm1, %v746_v6, %v2510_v58  ;;  %v754_v54 = vrot.slane %v734_v26, 4  ;;  %v788_v6 = vperm.slane %v2553_v46, %v2241_v20 }
 0x1b0   :  { %v590_v60 = vpack.c.bf16 %v579_v56, %v579_v56  ;;  %v946_v13 = vsel %vm846_vm2, %v591_v49, 0  ;;  %1901 = vmatmul.msk.bf16.vlgmr.msra.gmra.mxu3 %vm846_vm2, %v336_v40  ;;  %v751_v53 = vperm.slane %v747_v33, %v2241_v20  ;;  %v766_v34 = vrot.slane %v745_v30, 4 }
 0x1b1   :  { %974 = vmatpush.bf16.xpose.msrb.mxu3 %v965_v21  ;;  %1902 = vmatmul.msk.bf16.vlgmr.msrb.gmra.mxu0 %vm846_vm2, %v337_v42  ;;  %v755_v58 = vsel %vm114_vm1, %v740_v62, %v754_v54  ;;  %v752_v61 = vrot.slane %v740_v62, 4  ;;  %v790_v17 = vsel %vm114_vm1, %v789_v51, %v2537_v37  ;;  %v799_v46 = vperm.slane %v2561_v0, %v2241_v20 }
 0x1b2   :  { %993 = vmatpush.bf16.xpose.msra.mxu0 %v984_v29  ;;  %v927_v22 = vsel %vm846_vm2, %v590_v60, 0  ;;  %v763_v40 = vperm.slane %v755_v58, %v2256_v38  ;;  %v764_v24 = vrot.slane %v751_v53, 4  ;;  %v767_v25 = vsel %vm114_vm1, %v751_v53, %v766_v34 }
 0x1b3   :  { %v753_v42 = vsel %vm114_vm1, %v752_v61, %v734_v26  ;;  %v794_v57 = vperm.slane %v790_v17, %v2241_v20  ;;  %v775_v63 = vperm.slane %v767_v25, %v2256_v38  ;;  %v801_v37 = vsel %vm114_vm1, %v800_v1, %v2541_v52 }
 0x1b4   :  { %v782_v2 = vrot.slane %v763_v40, 4  ;;  %v759_v4 = vperm.slane %v753_v42, %v2256_v38  ;;  %v765_v5 = vsel %vm114_vm1, %v764_v24, %v745_v30  ;;  %v808_v51 = vrot.slane %v788_v6, 4 }
 0x1b5   :  { %v771_v55 = vperm.slane %v765_v5, %v2256_v38  ;;  %v820_v32 = vrot.slane %v799_v46, 4  ;;  %1899 = vmatmul.msk.bf16.vlgmr.msra.gmra.mxu1 %vm846_vm2, %v334_v10  ;;  %v780_v0 = vrot.slane %v775_v63, 4  ;;  %v805_v18 = vperm.slane %v801_v37, %v2241_v20 }
 0x1b6   :  { %936 = vmatpush.bf16.xpose.msrb.mxu1 %v927_v22  ;;  %v783_v59 = vsel %vm114_vm1, %v775_v63, %v782_v2  ;;  %1900 = vmatmul.msk.bf16.vlgmr.msra.gmra.mxu2 %vm846_vm2, %v335_v43  ;;  %v778_v8 = vrot.slane %v759_v4, 4  ;;  %v809_v1 = vsel %vm114_vm1, %v794_v57, %v808_v51  ;;  %v806_v11 = vrot.slane %v794_v57, 4 }
 0x1b7   :  { %955 = vmatpush.bf16.xpose.msrb.mxu2 %v946_v13  ;;  %v841_v50 = vpack.c.bf16 %v783_v59, %v783_v59  ;;  %v776_v52 = vrot.slane %v771_v55, 4  ;;  %v781_v27 = vsel %vm114_vm1, %v780_v0, %v763_v40  ;;  %v817_v14 = vperm.slane %v809_v1, %v2256_v38 }
 0x1b8   :  { %v779_v10 = vsel %vm114_vm1, %v771_v55, %v778_v8  ;;  %v821_v12 = vsel %vm114_vm1, %v805_v18, %v820_v32  ;;  %v840_v7 = vpack.c.bf16 %v781_v27, %v781_v27  ;;  %v807_v48 = vsel %vm114_vm1, %v806_v11, %v788_v6 }
 0x1b9   :  { %v1141_v28 = vsel %vm1082_vm3, %v841_v50, 0  ;;  %v777_v43 = vsel %vm114_vm1, %v776_v52, %v759_v4  ;;  %v839_v16 = vpack.c.bf16 %v779_v10, %v779_v10  ;;  %v829_v3 = vperm.slane %v821_v12, %v2256_v38 }
 0x1ba   :  { %1150 = vmatpush.bf16.msrb.mxu0 %v1141_v28  ;;  %v838_v19 = vpack.c.bf16 %v777_v43, %v777_v43  ;;  %v818_v31 = vrot.slane %v805_v18, 4  ;;  %v1122_v29 = vsel %vm1082_vm3, %v840_v7, 0  ;;  %v813_v26 = vperm.slane %v807_v48, %v2256_v38 }
 0x1bb   :  { %v1103_v23 = vsel %vm1082_vm3, %v839_v16, 0  ;;  %v836_v21 = vrot.slane %v817_v14, 4  ;;  %1131 = vmatpush.bf16.msra.mxu3 %v1122_v29  ;;  %v834_v47 = vrot.slane %v829_v3, 4  ;;  %v328_v45 = vrot.slane %v2357_v36, 4 }
 0x1bc   :  { %v1084_v39 = vsel %vm1082_vm3, %v838_v19, 0  ;;  %v819_v44 = vsel %vm114_vm1, %v818_v31, %v799_v46  ;;  %v326_v15 = vrot.slane %v2371_v9, 4  ;;  %v832_v56 = vrot.slane %v813_v26, 4 }
 0x1bd   :  { %v825_v49 = vperm.slane %v819_v44, %v2256_v38  ;;  %v837_v62 = vsel %vm114_vm1, %v829_v3, %v836_v21  ;;  %v340_v30 = vpack.c.bf16 %v2354_v35, %v2354_v35  ;;  %v835_v33 = vsel %vm114_vm1, %v834_v47, %v817_v14 }
 0x1be   :  { %1093 = vmatpush.bf16.msra.mxu1 %v1084_v39  ;;  %v845_v54 = vpack.c.bf16 %v837_v62, %v837_v62  ;;  %v844_v60 = vpack.c.bf16 %v835_v33, %v835_v33  ;;  %v341_v13 = vpack.c.bf16 %v2362_v41, %v2362_v41  ;;  %v329_v34 = vsel %vm114_vm1, %v2371_v9, %v328_v45 }
 0x1bf   :  { %1112 = vmatpush.bf16.msra.mxu2 %v1103_v23  ;;  %v830_v53 = vrot.slane %v825_v49, 4  ;;  %v833_v58 = vsel %vm114_vm1, %v825_v49, %v832_v56  ;;  %v327_v35 = vsel %vm114_vm1, %v326_v15, %v2357_v36  ;;  %v339_v17 = vpack.c.bf16 %v329_v34, %v329_v34 }
 0x1c0   :  { %1905 = vmatmul.msk.bf16.vlgmr.msrb.gmra.mxu3 %vm846_vm2, %v340_v30  ;;  %v1198_v61 = vsel %vm1082_vm3, %v844_v60, 0  ;;  %v1217_v22 = vsel %vm1082_vm3, %v845_v54, 0  ;;  %v843_v40 = vpack.c.bf16 %v833_v58, %v833_v58  ;;  %v338_v24 = vpack.c.bf16 %v327_v35, %v327_v35 }
 0x1c1   :  { %1906 = vmatmul.msk.bf16.vlgmr.msra.gmra.mxu0 %vm846_vm2, %v341_v13  ;;  %v831_v6 = vsel %vm114_vm1, %v830_v53, %v813_v26  ;;  %1207 = vmatpush.bf16.msrb.mxu3 %v1198_v61  ;;  %v87_v25 = vlaneseq  ;;  %v2139_v63 = vmov -1e+30  }
 0x1c2   :  { %v842_v41 = vpack.c.bf16 %v831_v6, %v831_v6  ;;  %1226 = vmatpush.bf16.msra.mxu0 %v1217_v22  ;;  %v1179_v36 = vsel %vm1082_vm3, %v843_v40, 0 }
 0x1c3   :  { %v88_v42 = vshrl.u32 %v87_v25, 7  ;;  %v90_v57 = vand.u32 127, %v87_v25 }
 0x1c4   :  { %v1160_v9 = vsel %vm1082_vm3, %v842_v41, 0 }
 0x1c5   :  { %1903 = vmatmul.msk.bf16.vlgmr.msrb.gmra.mxu1 %vm846_vm2, %v338_v24  ;;  %vm91_vm4 = vcmp.le.s32.totalorder %v90_v57, %v88_v42 }
 0x1c6   :  { %1904 = vmatmul.msk.bf16.vlgmr.msrb.gmra.mxu2 %vm846_vm2, %v339_v17  ;;  %1169 = vmatpush.bf16.msrb.mxu1 %v1160_v9  ;;  %v92_v2 = vsel %vm91_vm4, 0.0, %v2139_v63 }
 0x1c7   :  { %1188 = vmatpush.bf16.msrb.mxu2 %v1179_v36 }
 0x22e   :  { %v919_v46 = vpop.f32.mrf.mxu0 }
 0x22f   :  { %v920_v8 = vadd.f32 %v919_v46, %v92_v2 }
 0x231   :  { %v1008_v27 = vsel %vm846_vm2, %v920_v8, -inf }
 0x232   :  { %v862_v4 = vpop.f32.mrf.mxu1 }
 0x233   :  { %v900_v5 = vpop.f32.mrf.mxu3  ;;  %v863_v55 = vadd.f32 %v862_v4, %v92_v2 }
 0x234   :  { %v901_v37 = vadd.f32 %v900_v5, %v92_v2 }
 0x235   :  { %v999_v51 = vsel %vm846_vm2, %v863_v55, -inf }
 0x236   :  { %v921_v32 = vpop.f32.mrf.mxu0  ;;  %v1005_v0 = vsel %vm846_vm2, %v901_v37, -inf  ;;  %1000 = vmax.xlane.f32.xlu2 %v999_v51 }
 0x237   :  { %1006 = vmax.xlane.f32.xlu1 %v1005_v0 }
 0x239   :  { %v881_v59 = vpop.f32.mrf.mxu2 }
 0x23a   :  { %v882_v18 = vadd.f32 %v881_v59, %v92_v2  ;;  %v864_v50 = vpop.f32.mrf.mxu1 }
 0x23b   :  { %v902_v52 = vpop.f32.mrf.mxu3 }
 0x23c   :  { %v1002_v1 = vsel %vm846_vm2, %v882_v18, -inf }
 0x23d   :  { %1003 = vmax.xlane.f32.xlu0 %v1002_v1 }
 0x23e   :  { %v995_v11 = vpop.f32.mrf.mxu0 }
 0x23f   :  { %1009 = vmax.xlane.f32.xlu1 %v1008_v27  ;;  %v996_v48 = vadd.f32 %v995_v11, %v92_v2 }
 0x241   :  { %v883_v10 = vpop.f32.mrf.mxu2  ;;  %v1020_v21 = vsel %vm846_vm2, %v996_v48, -inf }
 0x242   :  { %v938_v14 = vpop.f32.mrf.mxu1 }
 0x243   :  { %v976_v12 = vpop.f32.mrf.mxu3  ;;  %v939_v7 = vadd.f32 %v938_v14, %v92_v2 }
 0x244   :  { %v977_v28 = vadd.f32 %v976_v12, %v92_v2 }
 0x245   :  { %v1011_v16 = vsel %vm846_vm2, %v939_v7, -inf }
 0x246   :  { %v997_v43 = vpop.f32.mrf.mxu0  ;;  %v1017_v19 = vsel %vm846_vm2, %v977_v28, -inf }
 0x247   :  { %1012 = vmax.xlane.f32.xlu1 %v1011_v16  ;;  %1018 = vmax.xlane.f32.xlu2 %v1017_v19 }
 0x249   :  { %v957_v3 = vpop.f32.mrf.mxu2 }
 0x24a   :  { %v958_v31 = vadd.f32 %v957_v3, %v92_v2  ;;  %v940_v29 = vpop.f32.mrf.mxu1 }
 0x24b   :  { %v978_v23 = vpop.f32.mrf.mxu3 }
 0x24c   :  { %v1014_v26 = vsel %vm846_vm2, %v958_v31, -inf }
 0x24d   :  { %1015 = vmax.xlane.f32.xlu0 %v1014_v26 }
 0x24f   :  { %1021 = vmax.xlane.f32.xlu2 %v1020_v21 }
 0x251   :  { %v959_v39 = vpop.f32.mrf.mxu2 }
 0x2a9   :  { %v1001_v47 = vpop.xlane.xlu2 %1000 }
 0x2aa   :  { %v1007_v44 = vpop.xlane.xlu1 %1006  ;;  %v1023_v45 = vsub.f32 %v863_v55, %v1001_v47 }
 0x2ab   :  { %v1025_v15 = vsub.f32 %v901_v37, %v1007_v44 }
 0x2ac   :  { %v1031_v49 = vmul.f32 1.442695, %v1023_v45 }
 0x2ad   :  { %v1035_v62 = vmul.f32 1.442695, %v1025_v15 }
 0x2ae   :  { %2058 = vpow2.f32 %v1031_v49 }
 0x2af   :  { %2060 = vpow2.f32 %v1035_v62 }
 0x2b0   :  { %v1004_v56 = vpop.xlane.xlu0 %1003 }
 0x2b1   :  { %v1024_v30 = vsub.f32 %v882_v18, %v1004_v56 }
 0x2b2   :  { %v1010_v33 = vpop.xlane.xlu1 %1009 }
 0x2b3   :  { %v1033_v54 = vmul.f32 1.442695, %v1024_v30  ;;  %v1026_v60 = vsub.f32 %v920_v8, %v1010_v33 }
 0x2b4   :  { %v2059_v13 = vpop.eup %2058 }
 0x2b5   :  { %2062 = vpow2.f32 %v1033_v54  ;;  %v1037_v53 = vmul.f32 1.442695, %v1026_v60  ;;  %v2061_v58 = vpop.eup %2060  ;;  %v1071_v34 = vpack.c.bf16 %v2059_v13, %v2059_v13  ;;  %v1047_v61 = vsel %vm846_vm2, %v2059_v13, 0.0 }
 0x2b6   :  { %v1073_v35 = vpack.c.bf16 %v2061_v58, %v2061_v58  ;;  %1048 = vadd.xlane.f32.xlu2 %v1047_v61  ;;  %v1053_v0 = vsel %vm846_vm2, %v2061_v58, 0.0 }
 0x2b7   :  { %2064 = vpow2.f32 %v1037_v53  ;;  %1907 = vmatmul.msk.bf16.vlgmr.msra.gmra.mxu1 %vm846_vm2, %v1071_v34 }
 0x2b8   :  { %1909 = vmatmul.msk.bf16.vlgmr.msra.gmra.mxu3 %vm846_vm2, %v1073_v35 }
 0x2ba   :  { %v1013_v6 = vpop.xlane.xlu1 %1012  ;;  %v1019_v22 = vpop.xlane.xlu2 %1018 }
 0x2bb   :  { %v2063_v41 = vpop.eup %2062  ;;  %v1027_v40 = vsub.f32 %v939_v7, %v1013_v6  ;;  %v1029_v24 = vsub.f32 %v977_v28, %v1019_v22 }
 0x2bc   :  { %v1072_v17 = vpack.c.bf16 %v2063_v41, %v2063_v41  ;;  %v1050_v11 = vsel %vm846_vm2, %v2063_v41, 0.0 }
 0x2bd   :  { %v2065_v9 = vpop.eup %2064  ;;  %v1039_v36 = vmul.f32 1.442695, %v1027_v40  ;;  %v1043_v25 = vmul.f32 1.442695, %v1029_v24 }
 0x2be   :  { %v1074_v42 = vpack.c.bf16 %v2065_v9, %v2065_v9  ;;  %1908 = vmatmul.msk.bf16.vlgmr.msra.gmra.mxu2 %vm846_vm2, %v1072_v17  ;;  %v1056_v57 = vsel %vm846_vm2, %v2065_v9, 0.0 }
 0x2bf   :  { %2066 = vpow2.f32 %v1039_v36  ;;  %1057 = vadd.xlane.f32.xlu0 %v1056_v57 }
 0x2c0   :  { %2068 = vpow2.f32 %v1043_v25  ;;  %v1016_v46 = vpop.xlane.xlu0 %1015  ;;  %1910 = vmatmul.msk.bf16.vlgmr.msrb.gmra.mxu0 %vm846_vm2, %v1074_v42 }
 0x2c1   :  { %v1028_v63 = vsub.f32 %v958_v31, %v1016_v46 }
 0x2c2   :  { %v1022_v2 = vpop.xlane.xlu2 %1021 }
 0x2c3   :  { %v1041_v4 = vmul.f32 1.442695, %v1028_v63  ;;  %v1030_v5 = vsub.f32 %v996_v48, %v1022_v2 }
 0x2c5   :  { %v2067_v55 = vpop.eup %2066  ;;  %2070 = vpow2.f32 %v1041_v4  ;;  %v1045_v37 = vmul.f32 1.442695, %v1030_v5 }
 0x2c6   :  { %v2069_v51 = vpop.eup %2068  ;;  %v1075_v32 = vpack.c.bf16 %v2067_v55, %v2067_v55  ;;  %v1059_v59 = vsel %vm846_vm2, %v2067_v55, 0.0 }
 0x2c7   :  { %v1077_v8 = vpack.c.bf16 %v2069_v51, %v2069_v51  ;;  %2072 = vpow2.f32 %v1045_v37  ;;  %1054 = vadd.xlane.f32.xlu0 %v1053_v0  ;;  %1060 = vadd.xlane.f32.xlu1 %v1059_v59  ;;  %v1065_v27 = vsel %vm846_vm2, %v2069_v51, 0.0 }
 0x2c8   :  { %1911 = vmatmul.msk.bf16.vlgmr.msrb.gmra.mxu1 %vm846_vm2, %v1075_v32 }
 0x2c9   :  { %1913 = vmatmul.msk.bf16.vlgmr.msrb.gmra.mxu3 %vm846_vm2, %v1077_v8 }
 0x2cb   :  { %v2071_v18 = vpop.eup %2070 }
 0x2cc   :  { %v1076_v50 = vpack.c.bf16 %v2071_v18, %v2071_v18  ;;  %v1062_v14 = vsel %vm846_vm2, %v2071_v18, 0.0 }
 0x2cd   :  { %v2073_v52 = vpop.eup %2072 }
 0x2ce   :  { %v1078_v1 = vpack.c.bf16 %v2073_v52, %v2073_v52  ;;  %1912 = vmatmul.msk.bf16.vlgmr.msrb.gmra.mxu2 %vm846_vm2, %v1076_v50  ;;  %v1068_v10 = vsel %vm846_vm2, %v2073_v52, 0.0 }
 0x2cf   :  { %1051 = vadd.xlane.f32.xlu0 %v1050_v11  ;;  %1066 = vadd.xlane.f32.xlu1 %v1065_v27 }
 0x2d0   :  { %1069 = vadd.xlane.f32.xlu2 %v1068_v10  ;;  %1914 = vmatmul.msk.bf16.vlgmr.msra.gmra.mxu0 %vm846_vm2, %v1078_v1 }
 0x2d7   :  { %1063 = vadd.xlane.f32.xlu1 %v1062_v14 }
 0x329   :  { %v1049_v28 = vpop.xlane.xlu2 %1048 }
 0x32a   :  { %2074 = vrcp.f32 %v1049_v28 }
 0x330   :  { %v2075_v31 = vpop.eup %2074 }
 0x332   :  { %v1058_v12 = vpop.xlane.xlu0 %1057 }
 0x334   :  { %v1095_v7 = vpop.f32.mrf.mxu1 }
 0x335   :  { %v1240_v23 = vmul.f32 %v2075_v31, %v1095_v7 }
 0x337   :  { %v1250_v62 = vrot.slane %v1240_v23, 4 }
 0x33a   :  { %v1055_v43 = vpop.xlane.xlu0 %1054  ;;  %v1061_v16 = vpop.xlane.xlu1 %1060 }
 0x33b   :  { %2076 = vrcp.f32 %v1055_v43  ;;  %v1133_v19 = vpop.f32.mrf.mxu3 }
 0x33c   :  { %v1097_v3 = vpop.f32.mrf.mxu1  ;;  %2078 = vrcp.f32 %v1058_v12 }
 0x33d   :  { %v1152_v48 = vpop.f32.mrf.mxu0  ;;  %2080 = vrcp.f32 %v1061_v16 }
 0x341   :  { %v2077_v29 = vpop.eup %2076  ;;  %v1114_v26 = vpop.f32.mrf.mxu2 }
 0x342   :  { %v1242_v21 = vmul.f32 %v2077_v29, %v1133_v19  ;;  %v1052_v39 = vpop.xlane.xlu0 %1051  ;;  %v1067_v47 = vpop.xlane.xlu1 %1066 }
 0x343   :  { %2082 = vrcp.f32 %v1052_v39  ;;  %v1070_v45 = vpop.xlane.xlu2 %1069  ;;  %v1135_v15 = vpop.f32.mrf.mxu3 }
 0x344   :  { %v1248_v44 = vrot.slane %v1242_v21, 4  ;;  %v2079_v49 = vpop.eup %2078  ;;  %2084 = vrcp.f32 %v1067_v47  ;;  %v1251_v60 = vsel %vm114_vm1, %v1242_v21, %v1250_v62 }
 0x345   :  { %v1154_v56 = vpop.f32.mrf.mxu0  ;;  %v1171_v30 = vpop.f32.mrf.mxu1  ;;  %v1243_v54 = vmul.f32 %v2079_v49, %v1152_v48  ;;  %2086 = vrcp.f32 %v1070_v45  ;;  %v1259_v61 = vperm.slane %v1251_v60, %v2241_v20 }
 0x346   :  { %v1249_v33 = vsel %vm114_vm1, %v1248_v44, %v1240_v23  ;;  %v2081_v13 = vpop.eup %2080 }
 0x347   :  { %v1255_v58 = vperm.slane %v1249_v33, %v2241_v20  ;;  %v1260_v35 = vrot.slane %v1243_v54, 4  ;;  %v1244_v22 = vmul.f32 %v2081_v13, %v1171_v30  ;;  %v1286_v2 = vrot.slane %v1259_v61, 4 }
 0x349   :  { %v2083_v53 = vpop.eup %2082  ;;  %v1116_v34 = vpop.f32.mrf.mxu2  ;;  %v1274_v25 = vrot.slane %v1255_v58, 4  ;;  %v1306_v5 = vrot.slane %v1244_v22, 4 }
 0x34a   :  { %v1241_v6 = vmul.f32 %v2083_v53, %v1114_v26  ;;  %v1064_v41 = vpop.xlane.xlu1 %1063  ;;  %v2085_v40 = vpop.eup %2084 }
 0x34b   :  { %2088 = vrcp.f32 %v1064_v41  ;;  %v2087_v36 = vpop.eup %2086 }
 0x34c   :  { %v1261_v24 = vsel %vm114_vm1, %v1260_v35, %v1241_v6  ;;  %v1262_v17 = vrot.slane %v1241_v6, 4  ;;  %v1209_v9 = vpop.f32.mrf.mxu3 }
 0x34d   :  { %v1267_v42 = vperm.slane %v1261_v24, %v2241_v20  ;;  %v1246_v57 = vmul.f32 %v2085_v40, %v1209_v9  ;;  %v1173_v46 = vpop.f32.mrf.mxu1  ;;  %v1228_v63 = vpop.f32.mrf.mxu0 }
 0x34e   :  { %v1263_v4 = vsel %vm114_vm1, %v1243_v54, %v1262_v17  ;;  %v1247_v55 = vmul.f32 %v2087_v36, %v1228_v63 }
 0x34f   :  { %v1271_v37 = vperm.slane %v1263_v4, %v2241_v20  ;;  %v1272_v51 = vrot.slane %v1267_v42, 4  ;;  %v1275_v32 = vsel %vm114_vm1, %v1267_v42, %v1274_v25  ;;  %v1304_v0 = vrot.slane %v1246_v57, 4 }
 0x350   :  { %v1283_v59 = vperm.slane %v1275_v32, %v2256_v38  ;;  %v1307_v8 = vsel %vm114_vm1, %v1246_v57, %v1306_v5  ;;  %v1316_v16 = vrot.slane %v1247_v55, 4 }
 0x351   :  { %v2089_v18 = vpop.eup %2088  ;;  %v1273_v50 = vsel %vm114_vm1, %v1272_v51, %v1255_v58  ;;  %v1284_v52 = vrot.slane %v1271_v37, 4  ;;  %v1287_v1 = vsel %vm114_vm1, %v1271_v37, %v1286_v2  ;;  %v1305_v11 = vsel %vm114_vm1, %v1304_v0, %v1244_v22  ;;  %v1190_v27 = vpop.f32.mrf.mxu2 }
 0x352   :  { %v1279_v10 = vperm.slane %v1273_v50, %v2256_v38  ;;  %v1295_v14 = vperm.slane %v1287_v1, %v2256_v38  ;;  %v1298_v12 = vrot.slane %v1283_v59, 4  ;;  %v1311_v7 = vperm.slane %v1305_v11, %v2241_v20 }
 0x353   :  { %v1285_v28 = vsel %vm114_vm1, %v1284_v52, %v1259_v61  ;;  %v1315_v43 = vperm.slane %v1307_v8, %v2241_v20  ;;  %v1245_v19 = vmul.f32 %v2089_v18, %v1190_v27 }
 0x354   :  { %v1299_v3 = vsel %vm114_vm1, 0.0, %v1298_v12  ;;  %v1302_v48 = vrot.slane %v1295_v14, 4  ;;  %v1330_v31 = vrot.slane %v1311_v7, 4  ;;  %v1211_v29 = vpop.f32.mrf.mxu3  ;;  %v1291_v23 = vperm.slane %v1285_v28, %v2256_v38 }
 0x355   :  { %v1365_v26 = vrot.slane %v1299_v3, 4  ;;  %v1342_v21 = vrot.slane %v1315_v43, 4  ;;  %v1317_v39 = vsel %vm114_vm1, %v1316_v16, %v1245_v19  ;;  %v1318_v47 = vrot.slane %v1245_v19, 4  ;;  %v1230_v44 = vpop.f32.mrf.mxu0 }
 0x356   :  { %v1323_v45 = vperm.slane %v1317_v39, %v2241_v20  ;;  %v1296_v15 = vrot.slane %v1279_v10, 4  ;;  %v1300_v49 = vrot.slane %v1291_v23, 4  ;;  %v1303_v62 = vsel %vm114_vm1, 0.0, %v1302_v48 }
 0x357   :  { %v1319_v56 = vsel %vm114_vm1, %v1247_v55, %v1318_v47  ;;  %v1360_v30 = vsel %vm114_vm1, %v1298_v12, %v1279_v10  ;;  %v1371_v33 = vsel %vm114_vm1, %v1302_v48, %v1291_v23  ;;  %v1376_v54 = vrot.slane %v1303_v62, 4 }
 0x358   :  { %v1327_v60 = vperm.slane %v1319_v56, %v2241_v20  ;;  %v1328_v13 = vrot.slane %v1323_v45, 4  ;;  %v1331_v53 = vsel %vm114_vm1, %v1323_v45, %v1330_v31  ;;  %v1297_v58 = vsel %vm114_vm1, 0.0, %v1296_v15 }
 0x359   :  { %v1339_v34 = vperm.slane %v1331_v53, %v2256_v38  ;;  %v1192_v61 = vpop.f32.mrf.mxu2  ;;  %v1301_v35 = vsel %vm114_vm1, 0.0, %v1300_v49  ;;  %v1364_v6 = vperm.slane %v1360_v30, %v2241_v20  ;;  %v1366_v22 = vsel %vm114_vm1, %v1365_v26, %v1297_v58 }
 0x35a   :  { %v1329_v41 = vsel %vm114_vm1, %v1328_v13, %v1311_v7  ;;  %v1340_v40 = vrot.slane %v1327_v60, 4  ;;  %v1343_v24 = vsel %vm114_vm1, %v1327_v60, %v1342_v21  ;;  %v1370_v17 = vperm.slane %v1366_v22, %v2241_v20 }
 0x35b   :  { %v1335_v9 = vperm.slane %v1329_v41, %v2256_v38  ;;  %v1351_v36 = vperm.slane %v1343_v24, %v2256_v38  ;;  %v1354_v25 = vrot.slane %v1339_v34, 4  ;;  %v1375_v42 = vperm.slane %v1371_v33, %v2241_v20 }
 0x35c   :  { %v1341_v57 = vsel %vm114_vm1, %v1340_v40, %v1315_v43  ;;  %v1377_v46 = vsel %vm114_vm1, %v1376_v54, %v1301_v35  ;;  %v1384_v63 = vrot.slane %v1364_v6, 4  ;;  %v1382_v2 = vrot.slane %v1370_v17, 4 }
 0x35d   :  { %v1347_v4 = vperm.slane %v1341_v57, %v2256_v38  ;;  %v1352_v5 = vrot.slane %v1335_v9, 4  ;;  %v1355_v55 = vsel %vm114_vm1, 0.0, %v1354_v25  ;;  %v1358_v37 = vrot.slane %v1351_v36, 4  ;;  %v1970_v57 = vld [vmem:[%s2929_s3 + $0x8] sm:$0xff] }
 0x35e   :  { %v1414_v51 = vsel %vm114_vm1, %v1354_v25, %v1335_v9  ;;  %v1419_v32 = vrot.slane %v1355_v55, 4  ;;  %v1381_v0 = vperm.slane %v1377_v46, %v2241_v20  ;;  %v1385_v59 = vsel %vm114_vm1, %v1370_v17, %v1384_v63  ;;  %1530 = vmatpush.bf16.msra.mxu1 %v1970_v57  ;;  %v1969_v46 = vld [vmem:[%s2929_s3] sm:$0xff] }
 0x35f   :  { %v1353_v8 = vsel %vm114_vm1, 0.0, %v1352_v5  ;;  %v1356_v18 = vrot.slane %v1347_v4, 4  ;;  %v1359_v50 = vsel %vm114_vm1, 0.0, %v1358_v37  ;;  %v1418_v52 = vperm.slane %v1414_v51, %v2241_v20 }
 0x360   :  { %v1430_v1 = vrot.slane %v1359_v50, 4  ;;  %v1393_v11 = vperm.slane %v1385_v59, %v2256_v38  ;;  %v1396_v27 = vrot.slane %v1375_v42, 4  ;;  %v1420_v10 = vsel %vm114_vm1, %v1419_v32, %v1353_v8 }
 0x361   :  { %v1357_v14 = vsel %vm114_vm1, 0.0, %v1356_v18  ;;  %v1424_v12 = vperm.slane %v1420_v10, %v2241_v20  ;;  %v1425_v7 = vsel %vm114_vm1, %v1358_v37, %v1347_v4  ;;  %v1438_v28 = vrot.slane %v1418_v52, 4 }
 0x362   :  { %v1397_v43 = vsel %vm114_vm1, %v1381_v0, %v1396_v27  ;;  %v1429_v16 = vperm.slane %v1425_v7, %v2241_v20  ;;  %v1431_v19 = vsel %vm114_vm1, %v1430_v1, %v1357_v14  ;;  %v1383_v29 = vsel %vm114_vm1, %v1382_v2, %v1364_v6  ;;  %1531 = vmatpush.bf16.msra.mxu1 %v1969_v46  ;;  %v2051_v27 = vld [vmem:[%s2930_s4] ss:$0 sm:$0xff] }
 0x363   :  { %v1405_v3 = vperm.slane %v1397_v43, %v2256_v38  ;;  %v1435_v48 = vperm.slane %v1431_v19, %v2241_v20  ;;  %v1439_v31 = vsel %vm114_vm1, %v1424_v12, %v1438_v28  ;;  %v1389_v21 = vperm.slane %v1383_v29, %v2256_v38  ;;  %v2105_v19 = vld [vmem:[%s2926_s0 + $0x8] sm:$0xff] }
 0x364   :  { %v1447_v23 = vperm.slane %v1439_v31, %v2256_v38  ;;  %v1450_v26 = vrot.slane %v1429_v16, 4  ;;  %v1394_v39 = vrot.slane %v1381_v0, 4  ;;  %v1412_v47 = vrot.slane %v1393_v11, 4 }
 0x365   :  { %v1436_v44 = vrot.slane %v1424_v12, 4  ;;  %v1448_v45 = vrot.slane %v1435_v48, 4  ;;  %v1410_v56 = vrot.slane %v1405_v3, 4  ;;  %v1408_v54 = vrot.slane %v1389_v21, 4  ;;  %v2104_v12 = vld [vmem:[%s2926_s0] sm:$0xff] }
 0x366   :  { %v1451_v15 = vsel %vm114_vm1, %v1435_v48, %v1450_v26  ;;  %v1466_v49 = vrot.slane %v1447_v23, 4  ;;  %v1395_v62 = vsel %vm114_vm1, %v1394_v39, %v1375_v42  ;;  %v1413_v53 = vsel %vm114_vm1, %v1405_v3, %v1412_v47 }
 0x367   :  { %v1459_v20 = vperm.slane %v1451_v15, %v2256_v38  ;;  %v1401_v30 = vperm.slane %v1395_v62, %v2256_v38  ;;  %v1437_v33 = vsel %vm114_vm1, %v1436_v44, %v1418_v52  ;;  %v1449_v13 = vsel %vm114_vm1, %v1448_v45, %v1429_v16 }
 0x368   :  { %v1443_v60 = vperm.slane %v1437_v33, %v2256_v38  ;;  %v1455_v6 = vperm.slane %v1449_v13, %v2256_v38  ;;  %v1411_v41 = vsel %vm114_vm1, %v1410_v56, %v1393_v11  ;;  %v2143_v31 = vmov 32.0  }
 0x369   :  { %v1467_v58 = vsel %vm114_vm1, %v1459_v20, %v1466_v49  ;;  %v1464_v34 = vrot.slane %v1459_v20, 4  ;;  %v1406_v61 = vrot.slane %v1401_v30, 4  ;;  %v1409_v9 = vsel %vm114_vm1, %v1401_v30, %v1408_v54 }
 0x36a   :  { %v2045_v35 = vpack.i.bf16 %v1467_v58, %v1413_v53  ;;  %v1462_v22 = vrot.slane %v1443_v60, 4  ;;  %v1460_v36 = vrot.slane %v1455_v6, 4  ;;  %2090 = vrcp.f32 %v2143_v31  ;;  %v1972_v58 = vld [vmem:[%s2935_s9 + $0x8] sm:$0xff] }
 0x36b   :  { %v1465_v40 = vsel %vm114_vm1, %v1464_v34, %v1447_v23  ;;  %v1407_v24 = vsel %vm114_vm1, %v1406_v61, %v1389_v21  ;;  %1633 = vmatpush.bf16.msra.mxu2 %v1972_v58  ;;  %v1971_v34 = vld [vmem:[%s2935_s9] sm:$0xff] }
 0x36c   :  { %2046 = vrot.lane.b32.xlu1 %v2045_v35, %s2140_s21  ;;  %v2040_v17 = vpack.i.bf16 %v1465_v40, %v1411_v41  ;;  %v1463_v25 = vsel %vm114_vm1, %v1455_v6, %v1462_v22  ;;  %v1461_v38 = vsel %vm114_vm1, %v1460_v36, %v1443_v60 }
 0x36d   :  { %v2035_v42 = vpack.i.bf16 %v1463_v25, %v1409_v9 }
 0x36e   :  { %2041 = vrot.lane.b32.xlu0 %v2040_v17, %s2141_s22 }
 0x36f   :  { %2036 = vrot.lane.b32.xlu2 %v2035_v42, %s2142_s23  ;;  %1634 = vmatpush.bf16.msra.mxu2 %v1971_v34  ;;  %v1977_v34 = vld [vmem:[%s2937_s11 + $0x20] sm:$0xff] }
 0x370   :  { %v2091_v29 = vpop.eup %2090 }
 0x371   :  { %v1549_v23 = vmul.f32 32.0, %v2091_v29  ;;  %vm1553_vm7 = vweird.f32 %v2091_v29 }
 0x373   :  { %v1550_v26 = vsub.f32 1.0, %v1549_v23 }
 0x375   :  { %v1551_v21 = vmul.f32 %v2091_v29, %v1550_v26 }
 0x377   :  { %v1552_v39 = vadd.f32 %v2091_v29, %v1551_v21  ;;  %v1979_v21 = vld [vmem:[%s2937_s11 + $0x30] sm:$0xff] }
 0x379   :  { %v2829_v47 = vsel %vm1553_vm7, %v2091_v29, %v1552_v39 }
 0x3c9   :  { %v2037_v63 = vpop.permute.xlu2 %2036 }
 0x3ca   :  { %v2039_v2 = vunpack.i.h.bf16 %v2037_v63  ;;  %v2038_v4 = vunpack.i.l.bf16 %v2037_v63  ;;  %v2052_v63 = vld [vmem:[%s2931_s5] ss:$0 sm:$0xff]  ;;  %s1876_s5 = sshll.u32 %s2144_s19, 4  ;;  %s1877_s5 = int_to_ptr.vmem [resolvable:$true] %s1876_s5 }
 0x3cc   :  { %v1492_v32 = vsel %vm846_vm2, %v1407_v24, %v2038_v4  ;;  %v1493_v0 = vsel %vm846_vm2, %v1461_v38, %v2039_v2 }
 0x3de   :  { %v2047_v5 = vpop.permute.xlu1 %2046 }
 0x3df   :  { %v2049_v59 = vunpack.i.h.bf16 %v2047_v5  ;;  %v2048_v8 = vunpack.i.l.bf16 %v2047_v5 }
 0x3e0   :  { %v2042_v55 = vpop.permute.xlu0 %2041 }
 0x3e1   :  { %v2044_v37 = vunpack.i.h.bf16 %v2042_v55  ;;  %v2043_v51 = vunpack.i.l.bf16 %v2042_v55  ;;  %v2053_v55 = vld [vmem:[%s2932_s6] ss:$0 sm:$0xff] }
 0x3e3   :  { %v1495_v18 = vsel %vm1494_vm5, %v1492_v32, %v2043_v51  ;;  %v1496_v50 = vsel %vm1494_vm5, %v1493_v0, %v2044_v37 }
 0x3e4   :  { %v1498_v52 = vsel %vm1497_vm6, %v1495_v18, %v2048_v8  ;;  %v1499_v1 = vsel %vm1497_vm6, %v1496_v50, %v2049_v59  ;;  %v2054_v18 = vld [vmem:[%s2936_s10] ss:$0 sm:$0xff] }
 0x3e5   :  { %v1500_v11 = vpack.c.bf16 %v1499_v1, %v1498_v52 }
 0x3e7   :  { %1923 = vmatmul.msk.bf16.vlgmr.msra.gmra.mxu1 %vm69_vm0, %v1500_v11 }
 0x464   :  { %v1533_v10 = vpop.f32.mrf.mxu1 }
 0x465   :  { %v1534_v14 = vadd.f32 %v2051_v27, %v1533_v10 }
 0x467   :  { %v1538_v7 = vadd.f32 %v2104_v12, %v1534_v14 }
 0x469   :  { %v1542_v28 = vsel %vm69_vm0, %v1538_v7, 0.0 }
 0x46a   :  { %1543 = vadd.xlane.f32.xlu0 %v1542_v28 }
 0x46c   :  { %v1535_v43 = vpop.f32.mrf.mxu1 }
 0x46d   :  { %v1536_v16 = vadd.f32 %v2051_v27, %v1535_v43 }
 0x46f   :  { %v1539_v3 = vadd.f32 %v2105_v19, %v1536_v16 }
 0x471   :  { %v1545_v48 = vsel %vm69_vm0, %v1539_v3, 0.0 }
 0x472   :  { %1546 = vadd.xlane.f32.xlu2 %v1545_v48 }
 0x4dd   :  { %v1544_v44 = vpop.xlane.xlu0 %1543 }
 0x4de   :  { %v1555_v45 = vmul.f32 %v2829_v47, %v1544_v44 }
 0x4e0   :  { %v1557_v15 = vsub.f32 %v1538_v7, %v1555_v45 }
 0x4e2   :  { %v1559_v49 = vmul.f32 %v1557_v15, %v1557_v15 }
 0x4e4   :  { %v1561_v62 = vsel %vm69_vm0, %v1559_v49, 0.0 }
 0x4e5   :  { %v1547_v20 = vpop.xlane.xlu2 %1546  ;;  %1562 = vadd.xlane.f32.xlu1 %v1561_v62 }
 0x4e6   :  { %v1556_v56 = vmul.f32 %v2829_v47, %v1547_v20 }
 0x4e8   :  { %v1558_v30 = vsub.f32 %v1539_v3, %v1556_v56  ;;  %v1980_v3 = vld [vmem:[%s2937_s11 + $0x38] sm:$0xff]  ;;  %v1978_v56 = vld [vmem:[%s2937_s11 + $0x28] sm:$0xff] }
 0x4e9   :  { %1798 = vmatpush.bf16.msra.mxu3 %v1980_v3 }
 0x4ea   :  { %v1560_v33 = vmul.f32 %v1558_v30, %v1558_v30 }
 0x4ec   :  { %v1564_v54 = vsel %vm69_vm0, %v1560_v33, 0.0 }
 0x4ed   :  { %1565 = vadd.xlane.f32.xlu0 %v1564_v54  ;;  %1799 = vmatpush.bf16.msra.mxu3 %v1979_v21 }
 0x4f1   :  { %1800 = vmatpush.bf16.msra.mxu3 %v1978_v56 }
 0x4f5   :  { %1801 = vmatpush.bf16.msra.mxu3 %v1977_v34 }
 0x558   :  { %v1563_v60 = vpop.xlane.xlu1 %1562 }
 0x559   :  { %v1567_v13 = vmul.f32 %v1563_v60, %v2829_v47 }
 0x55b   :  { %v1569_v53 = vadd.f32 1e-05, %v1567_v13 }
 0x55d   :  { %2092 = vrsqrt.f32 %v1569_v53  ;;  %vm1577_vm9 = vweird.f32 %v1569_v53 }
 0x560   :  { %v1566_v61 = vpop.xlane.xlu0 %1565 }
 0x561   :  { %v1568_v35 = vmul.f32 %v1566_v61, %v2829_v47 }
 0x563   :  { %v2093_v6 = vpop.eup %2092  ;;  %v1570_v22 = vadd.f32 1e-05, %v1568_v35 }
 0x564   :  { %v1572_v41 = vmul.f32 %v2093_v6, %v1569_v53  ;;  %vm1578_vm8 = vweird.f32 %v2093_v6 }
 0x565   :  { %2094 = vrsqrt.f32 %v1570_v22  ;;  %vm1579_vm10 = vmor %vm1577_vm9, %vm1578_vm8  ;;  %vm1587_vm12 = vweird.f32 %v1570_v22 }
 0x566   :  { %v1573_v40 = vmul.f32 %v2093_v6, %v1572_v41 }
 0x568   :  { %v1574_v24 = vmul.f32 0.5, %v1573_v40  ;;  %v1976_v40 = vld [vmem:[%s2937_s11 + $0x18] sm:$0xff] }
 0x569   :  { %1802 = vmatpush.bf16.msra.mxu3 %v1976_v40 }
 0x56a   :  { %v1575_v17 = vsub.f32 1.5, %v1574_v24 }
 0x56b   :  { %v2095_v9 = vpop.eup %2094 }
 0x56c   :  { %v1576_v36 = vmul.f32 %v2093_v6, %v1575_v17  ;;  %v1582_v25 = vmul.f32 %v2095_v9, %v1570_v22  ;;  %vm1588_vm11 = vweird.f32 %v2095_v9 }
 0x56d   :  { %vm1589_vm13 = vmor %vm1587_vm12, %vm1588_vm11 }
 0x56e   :  { %v1583_v42 = vmul.f32 %v2095_v9, %v1582_v25  ;;  %v1580_v38 = vsel %vm1579_vm10, %v2093_v6, %v1576_v36 }
 0x56f   :  { %v1591_v2 = vmul.f32 %v1580_v38, %v1557_v15 }
 0x570   :  { %v1584_v57 = vmul.f32 0.5, %v1583_v42 }
 0x571   :  { %v1596_v37 = vmul.f32 %v2052_v63, %v1591_v2 }
 0x572   :  { %v1585_v46 = vsub.f32 1.5, %v1584_v57 }
 0x573   :  { %v2849_v0 = vadd.f32 %v2053_v55, %v1596_v37  ;;  %v1973_v37 = vld [vmem:[%s2937_s11] sm:$0xff] }
 0x574   :  { %v1586_v4 = vmul.f32 %v2095_v9, %v1585_v46  ;;  %v1974_v46 = vld [vmem:[%s2937_s11 + $0x8] sm:$0xff] }
 0x576   :  { %v1590_v5 = vsel %vm1589_vm13, %v2095_v9, %v1586_v4  ;;  %v1975_v9 = vld [vmem:[%s2937_s11 + $0x10] sm:$0xff] }
 0x577   :  { %v1592_v51 = vmul.f32 %v1590_v5, %v1558_v30  ;;  %1803 = vmatpush.bf16.msra.mxu3 %v1975_v9 }
 0x579   :  { %v1597_v32 = vmul.f32 %v2052_v63, %v1592_v51 }
 0x57b   :  { %v2851_v59 = vadd.f32 %v2053_v55, %v1597_v32  ;;  %1804 = vmatpush.bf16.msra.mxu3 %v1974_v46 }
 0x57d   :  { %v1603_v8 = vpack.c.bf16 %v2851_v59, %v2849_v0 }
 0x57f   :  { %1932 = vmatmul.msk.bf16.vlgmr.msra.gmra.mxu2 %vm69_vm0, %v1603_v8  ;;  %1805 = vmatpush.bf16.msra.mxu3 %v1973_v37 }
 0x602   :  { %v1636_v50 = vpop.f32.mrf.mxu2 }
 0x603   :  { %v2859_v52 = vadd.f32 %v2054_v18, %v1636_v50 }
 0x605   :  { %v2862_v1 = vmul.f32 0.70710677, %v2859_v52  ;;  %v1641_v56 = vmul.f32 0.5, %v2859_v52 }
 0x607   :  { %v1645_v11 = vmul.f32 %v2862_v1, %v2862_v1 }
 0x609   :  { %v1646_v27 = vmin.f32 %v1645_v11, 16.0 }
 0x60a   :  { %v1638_v10 = vpop.f32.mrf.mxu2 }
 0x60b   :  { %v1647_v14 = vmul.f32 2.1237322e-06, %v1646_v27  ;;  %v1658_v12 = vmul.f32 3.8918573e-05, %v1646_v27  ;;  %v2866_v7 = vadd.f32 %v2054_v18, %v1638_v10 }
 0x60d   :  { %v1648_v28 = vadd.f32 0.00028619796, %v1647_v14  ;;  %v1659_v43 = vadd.f32 0.001143296, %v1658_v12  ;;  %v2869_v16 = vmul.f32 0.70710677, %v2866_v7 }
 0x60f   :  { %v1660_v19 = vmul.f32 %v1659_v43, %v1646_v27  ;;  %v1685_v48 = vmul.f32 %v2869_v16, %v2869_v16  ;;  %v1649_v31 = vmul.f32 %v1648_v28, %v1646_v27 }
 0x611   :  { %v1661_v29 = vadd.f32 0.014752088, %v1660_v19  ;;  %v1686_v23 = vmin.f32 %v1685_v48, 16.0  ;;  %v1650_v45 = vadd.f32 0.0036580483, %v1649_v31 }
 0x613   :  { %v1662_v26 = vmul.f32 %v1661_v29, %v1646_v27  ;;  %v1687_v39 = vmul.f32 2.1237322e-06, %v1686_v23  ;;  %v1698_v44 = vmul.f32 3.8918573e-05, %v1686_v23  ;;  %v1651_v54 = vmul.f32 %v1650_v45, %v1646_v27 }
 0x615   :  { %v1663_v15 = vadd.f32 0.112945676, %v1662_v26  ;;  %v1688_v49 = vadd.f32 0.00028619796, %v1687_v39  ;;  %v1699_v62 = vadd.f32 0.001143296, %v1698_v44 }
 0x616   :  { %v1652_v35 = vadd.f32 0.05243302, %v1651_v54 }
 0x617   :  { %v1664_v20 = vmul.f32 %v1663_v15, %v1646_v27  ;;  %v1689_v30 = vmul.f32 %v1688_v49, %v1686_v23  ;;  %v1700_v33 = vmul.f32 %v1699_v62, %v1686_v23 }
 0x618   :  { %v1653_v17 = vmul.f32 %v1652_v35, %v1646_v27 }
 0x619   :  { %v1665_v60 = vadd.f32 0.4994258, %v1664_v20  ;;  %v1690_v13 = vadd.f32 0.0036580483, %v1689_v30  ;;  %v1701_v53 = vadd.f32 0.014752088, %v1700_v33 }
 0x61a   :  { %v1654_v57 = vadd.f32 0.18741608, %v1653_v17  ;;  %v1642_v30 = vmul.f32 0.5, %v2866_v7 }
 0x61b   :  { %v1666_v58 = vmul.f32 %v1665_v60, %v1646_v27  ;;  %v1702_v61 = vmul.f32 %v1701_v53, %v1686_v23  ;;  %v1691_v22 = vmul.f32 %v1690_v13, %v1686_v23  ;;  %v2055_v53 = vld [vmem:[%s2938_s12] ss:$0 sm:$0xff] }
 0x61c   :  { %v1655_v55 = vmul.f32 %v1654_v57, %v1646_v27 }
 0x61d   :  { %v1667_v6 = vadd.f32 1.0, %v1666_v58  ;;  %v1703_v41 = vadd.f32 0.112945676, %v1702_v61  ;;  %v1692_v36 = vadd.f32 0.05243302, %v1691_v22 }
 0x61e   :  { %v1656_v11 = vadd.f32 1.1283791, %v1655_v55 }
 0x61f   :  { %2096 = vrcp.f32 %v1667_v6  ;;  %v1704_v24 = vmul.f32 %v1703_v41, %v1686_v23  ;;  %v1693_v2 = vmul.f32 %v1692_v36, %v1686_v23  ;;  %v1679_v32 = vand.u32 2147483648, %v1667_v6 }
 0x620   :  { %v1677_v18 = vand.u32 2147483647, %v1667_v6  ;;  %vm1673_vm15 = vweird.f32 %v1667_v6  ;;  %v1657_v19 = vmul.f32 %v1656_v11, %v2862_v1 }
 0x621   :  { %v1705_v25 = vadd.f32 0.4994258, %v1704_v24  ;;  %v1694_v8 = vadd.f32 0.18741608, %v1693_v2  ;;  %v1680_v12 = vor.u32 1.1754944e-38, %v1679_v32 }
 0x622   :  { %vm1678_vm2 = vcmp.eq.f32.partialorder %v1677_v18, 8.507059e+37 }
 0x623   :  { %v1706_v42 = vmul.f32 %v1705_v25, %v1686_v23  ;;  %v1695_v28 = vmul.f32 %v1694_v8, %v1686_v23 }
 0x625   :  { %v2097_v38 = vpop.eup %2096  ;;  %v1707_v4 = vadd.f32 1.0, %v1706_v42  ;;  %v1696_v48 = vadd.f32 1.1283791, %v1695_v28 }
 0x626   :  { %v1669_v63 = vmul.f32 %v2097_v38, %v1667_v6  ;;  %vm1674_vm14 = vweird.f32 %v2097_v38 }
 0x627   :  { %2098 = vrcp.f32 %v1707_v4  ;;  %vm1675_vm1 = vmor %vm1673_vm15, %vm1674_vm14  ;;  %v1719_v31 = vand.u32 2147483648, %v1707_v4  ;;  %v1717_v21 = vand.u32 2147483647, %v1707_v4  ;;  %vm1713_vm4 = vweird.f32 %v1707_v4 }
 0x628   :  { %v1670_v5 = vsub.f32 1.0, %v1669_v63  ;;  %v1697_v15 = vmul.f32 %v1696_v48, %v2869_v16 }
 0x629   :  { %v1720_v44 = vor.u32 1.1754944e-38, %v1719_v31  ;;  %vm1718_vm6 = vcmp.eq.f32.partialorder %v1717_v21, 8.507059e+37 }
 0x62a   :  { %v1671_v51 = vmul.f32 %v2097_v38, %v1670_v5 }
 0x62c   :  { %v1672_v50 = vadd.f32 %v2097_v38, %v1671_v51 }
 0x62d   :  { %v2099_v10 = vpop.eup %2098 }
 0x62e   :  { %v1676_v14 = vsel %vm1675_vm1, %v2097_v38, %v1672_v50  ;;  %v1709_v27 = vmul.f32 %v2099_v10, %v1707_v4  ;;  %vm1714_vm3 = vweird.f32 %v2099_v10  ;;  %v2056_v50 = vld [vmem:[%s2933_s7] ss:$0 sm:$0xff] }
 0x62f   :  { %v1681_v43 = vsel %vm1678_vm2, %v1680_v12, %v1676_v14  ;;  %vm1715_vm5 = vmor %vm1713_vm4, %vm1714_vm3  ;;  %v2057_v14 = vld [vmem:[%s2934_s8] ss:$0 sm:$0xff]  ;;  %s2145_s8 = smov 128  }
 0x630   :  { %v1710_v3 = vsub.f32 1.0, %v1709_v27  ;;  %v1682_v29 = vmul.f32 %v1681_v43, %v1657_v19 }
 0x632   :  { %v1711_v26 = vmul.f32 %v2099_v10, %v1710_v3  ;;  %v1933_v45 = vclamps-f32 %v1682_v29, 1.0 }
 0x634   :  { %v1712_v39 = vadd.f32 %v2099_v10, %v1711_v26  ;;  %v1725_v20 = vadd.f32 1.0, %v1933_v45 }
 0x636   :  { %v1716_v23 = vsel %vm1715_vm5, %v2099_v10, %v1712_v39  ;;  %v1727_v54 = vmul.f32 %v1725_v20, %v1641_v56 }
 0x637   :  { %v1721_v49 = vsel %vm1718_vm6, %v1720_v44, %v1716_v23 }
 0x638   :  { %v1722_v62 = vmul.f32 %v1721_v49, %v1697_v15 }
 0x63a   :  { %v1934_v1 = vclamps-f32 %v1722_v62, 1.0 }
 0x63c   :  { %v1726_v33 = vadd.f32 1.0, %v1934_v1 }
 0x63e   :  { %v1728_v60 = vmul.f32 %v1726_v33, %v1642_v30 }
 0x640   :  { %v1729_v13 = vpack.c.bf16 %v1728_v60, %v1727_v54 }
 0x642   :  { %1806 = vmatmul.bf16.vlgmr.msra.gmra.mxu3 %v1729_v13 }
 0x6c5   :  { %v1807_v16 = vpop.f32.mrf.mxu3 }
 0x6c6   :  { %v1808_v58 = vadd.f32 %v2055_v53, %v1807_v16 }
 0x6c8   :  { %v1812_v34 = vadd.f32 %v1808_v58, %v2849_v0 }
 0x6ca   :  { %v1816_v61 = vsel %vm69_vm0, %v1812_v34, 0.0 }
 0x6cb   :  { %1817 = vadd.xlane.f32.xlu2 %v1816_v61 }
 0x6cd   :  { %v1809_v35 = vpop.f32.mrf.mxu3 }
 0x6ce   :  { %v1810_v52 = vadd.f32 %v2055_v53, %v1809_v35 }
 0x6d0   :  { %v1813_v7 = vadd.f32 %v1810_v52, %v2851_v59 }
 0x6d2   :  { %v1819_v6 = vsel %vm69_vm0, %v1813_v7, 0.0 }
 0x6d3   :  { %1820 = vadd.xlane.f32.xlu1 %v1819_v6 }
 0x73e   :  { %v1818_v22 = vpop.xlane.xlu2 %1817 }
 0x73f   :  { %v1822_v41 = vmul.f32 %v1818_v22, %v2829_v47 }
 0x741   :  { %v1824_v40 = vsub.f32 %v1812_v34, %v1822_v41 }
 0x743   :  { %v1826_v24 = vmul.f32 %v1824_v40, %v1824_v40 }
 0x745   :  { %v1828_v17 = vsel %vm69_vm0, %v1826_v24, 0.0 }
 0x746   :  { %v1821_v9 = vpop.xlane.xlu1 %1820  ;;  %1829 = vadd.xlane.f32.xlu0 %v1828_v17 }
 0x747   :  { %v1823_v0 = vmul.f32 %v1821_v9, %v2829_v47 }
 0x749   :  { %v1825_v36 = vsub.f32 %v1813_v7, %v1823_v0 }
 0x74b   :  { %v1827_v25 = vmul.f32 %v1825_v36, %v1825_v36 }
 0x74d   :  { %v1831_v42 = vsel %vm69_vm0, %v1827_v25, 0.0 }
 0x74e   :  { %1832 = vadd.xlane.f32.xlu2 %v1831_v42 }
 0x7b9   :  { %v1830_v59 = vpop.xlane.xlu0 %1829 }
 0x7ba   :  { %v1834_v38 = vmul.f32 %v1830_v59, %v2829_v47 }
 0x7bc   :  { %v1836_v57 = vadd.f32 1e-05, %v1834_v38 }
 0x7be   :  { %2100 = vrsqrt.f32 %v1836_v57  ;;  %vm1844_vm8 = vweird.f32 %v1836_v57 }
 0x7c1   :  { %v1833_v46 = vpop.xlane.xlu2 %1832 }
 0x7c2   :  { %v1835_v63 = vmul.f32 %v1833_v46, %v2829_v47 }
 0x7c4   :  { %v2101_v2 = vpop.eup %2100  ;;  %v1837_v4 = vadd.f32 1e-05, %v1835_v63 }
 0x7c5   :  { %v1839_v5 = vmul.f32 %v2101_v2, %v1836_v57  ;;  %vm1845_vm7 = vweird.f32 %v2101_v2 }
 0x7c6   :  { %2102 = vrsqrt.f32 %v1837_v4  ;;  %vm1846_vm9 = vmor %vm1844_vm8, %vm1845_vm7  ;;  %vm1854_vm11 = vweird.f32 %v1837_v4 }
 0x7c7   :  { %v1840_v55 = vmul.f32 %v2101_v2, %v1839_v5 }
 0x7c9   :  { %v1841_v37 = vmul.f32 0.5, %v1840_v55 }
 0x7cb   :  { %v1842_v51 = vsub.f32 1.5, %v1841_v37 }
 0x7cc   :  { %v2103_v32 = vpop.eup %2102 }
 0x7cd   :  { %v1843_v8 = vmul.f32 %v2101_v2, %v1842_v51  ;;  %v1849_v18 = vmul.f32 %v2103_v32, %v1837_v4  ;;  %vm1855_vm10 = vweird.f32 %v2103_v32 }
 0x7ce   :  { %vm1856_vm12 = vmor %vm1854_vm11, %vm1855_vm10 }
 0x7cf   :  { %v1847_v11 = vsel %vm1846_vm9, %v2101_v2, %v1843_v8  ;;  %v1850_v10 = vmul.f32 %v2103_v32, %v1849_v18 }
 0x7d0   :  { %v1858_v47 = vmul.f32 %v1847_v11, %v1824_v40 }
 0x7d1   :  { %v1851_v12 = vmul.f32 0.5, %v1850_v10 }
 0x7d2   :  { %v1863_v28 = vmul.f32 %v2056_v50, %v1858_v47 }
 0x7d3   :  { %v1852_v27 = vsub.f32 1.5, %v1851_v12 }
 0x7d4   :  { %v1868_v43 = vadd.f32 %v2057_v14, %v1863_v28 }
 0x7d5   :  { %v1853_v19 = vmul.f32 %v2103_v32, %v1852_v27 }
 0x7d6   :  { %1870 = vst.msk [vmem:[#allocation2] sm:$0xff] %vm69_vm0, %v1868_v43 }
 0x7d7   :  { %v1857_v3 = vsel %vm1856_vm12, %v2103_v32, %v1853_v19 }
 0x7d8   :  { %v1859_v48 = vmul.f32 %v1857_v3, %v1825_v36 }
 0x7da   :  { %v1864_v31 = vmul.f32 %v2056_v50, %v1859_v48 }
 0x7dc   :  { %v1869_v29 = vadd.f32 %v2057_v14, %v1864_v31 }
 0x7de   :  { %1871 = vst.msk [vmem:[#allocation2 + $0x8] sm:$0xff] %vm69_vm0, %v1869_v29 }
 0x7df   :  { %1884 = dma.vmem_to_hbm [thread:$0]  %s1877_s5, 256, %s1879_s18, [#allocation3], %s2145_s8, %s2145_s8, %s2142_s23  }
 0x7e0   :  { %2130 = dma.done.wait [#allocation3], 256  }
 0x7e1   :  { %2131 = vsyncadd [#allocation3], 4294967040 }
 0x7e2   :  { %1889 = vsyncpa [#allocation3], 1 }

// kernel: tpu_custom_call.1
= control target key start
LH: loop header
LB: loop body
LE: loop exit
PB: predicated region body
PF: predicated region fallthrough
CT: control target
= control target key end

     0   :  { %s2926_s0 = inlined_call_operand.vmem [shape: f32[2,8,32], index: 0, kind: input, shape index: {}]   ;;  %s2927_s1 = inlined_call_operand.vmem [shape: bf16[32,96], index: 1, kind: input, shape index: {}]   ;;  %s2928_s2 = inlined_call_operand.vmem [shape: f32[1,96], index: 2, kind: input, shape index: {}]   ;;  %s2929_s3 = inlined_call_operand.vmem [shape: bf16[32,32], index: 3, kind: input, shape index: {}]   ;;  %s2930_s4 = inlined_call_operand.vmem [shape: f32[1,32], index: 4, kind: input, shape index: {}]   ;;  %s2931_s5 = inlined_call_operand.vmem [shape: f32[1,32], index: 5, kind: input, shape index: {}]   ;;  %s2932_s6 = inlined_call_operand.vmem [shape: f32[1,32], index: 6, kind: input, shape index: {}]   ;;  %s2933_s7 = inlined_call_operand.vmem [shape: f32[1,32], index: 7, kind: input, shape index: {}]   ;;  %s2934_s8 = inlined_call_operand.vmem [shape: f32[1,32], index: 8, kind: input, shape index: {}]   ;;  %s2935_s9 = inlined_call_operand.vmem [shape: bf16[32,128], index: 9, kind: input, shape index: {}]   ;;  %s2936_s10 = inlined_call_operand.vmem [shape: f32[1,128], index: 10, kind: input, shape index: {}]   ;;  %s2937_s11 = inlined_call_operand.vmem [shape: bf16[128,32], index: 11, kind: input, shape index: {}]   ;;  %s2938_s12 = inlined_call_operand.vmem [shape: f32[1,32], index: 12, kind: input, shape index: {}]   ;;  %s2939_s13 = inlined_call_operand.hbm [shape: f32[2,8,32], index: 13, kind: output, shape index: {}]  }
   0x1   :  { %v1968_v0 = vld [vmem:[%s2927_s1 + $0x8] sm:$0xff]  ;;  %v1967_v1 = vld [vmem:[%s2927_s1] sm:$0xff] }
   0x2   :  { %v46_v2 = vld [vmem:[%s2926_s0] sm:$0xff]  ;;  %v47_v3 = vld [vmem:[%s2926_s0 + $0x8] sm:$0xff]  ;;  %79 = vmatpush.bf16.msra.mxu0 %v1968_v0 }
   0x3   :  { %18 = vsyncpa [#allocation3], 0  ;;  %v48_v4 = vpack.c.bf16 %v47_v3, %v46_v2  ;;  %vm69_vm0 = vcmask 261120   ;;  %v2050_v5 = vld [vmem:[%s2928_s2] ss:$0 sm:$0xff]  ;;  %s2132_s1 = smov 104  }
   0x4   :  { %s2133_s18 = smov 120   ;;  %s2134_s19 = smov 112   ;;  %vm114_vm1 = vcmask 1047556   ;;  %v2135_v16 = vmov 1983009808   ;;  %vm846_vm2 = vcmask 64512  }
   0x5   :  { %v119_v17 = vunpack.c.l.s4 %v2135_v16  ;;  %s2136_s2 = smov 96   ;;  %v2137_v26 = vmov 1934713408   ;;  %s2138_s20 = smov 64   ;;  %vm1082_vm3 = vcmask 1043456   ;;  %vm1494_vm5 = vcmask 130048  }
   0x6   :  { %80 = vmatpush.bf16.msra.mxu0 %v1967_v1  ;;  %v143_v27 = vunpack.c.l.s4 %v2137_v26  ;;  %s2140_s21 = smov 24   ;;  %s2141_s22 = smov 16   ;;  %vm1497_vm6 = vcmask 195584  }
   0x7   :  { %v2241_v20 = vunpack.c.0.s8 %v119_v17  ;;  %s2142_s23 = smov 8  }
   0x8   :  { %v2256_v38 = vunpack.c.0.s8 %v143_v27 }
   0x9   :  { %1898 = vmatmul.msk.bf16.vlgmr.msra.gmra.mxu0 %vm69_vm0, %v48_v4 }
  0x86   :  { %v82_v6 = vpop.f32.mrf.mxu0 }
  0x87   :  { %v83_v7 = vadd.f32 %v2050_v5, %v82_v6 }
  0x89   :  { %107 = vrot.lane.b32.xlu1 %v83_v7, %s2132_s1  ;;  %95 = vrot.lane.b32.xlu0 %v83_v7, %s2133_s18  ;;  %v116_v24 = vrot.slane %v83_v7, 4 }
  0x8e   :  { %v84_v8 = vpop.f32.mrf.mxu0 }
  0x8f   :  { %v2232_v9 = vadd.f32 %v2050_v5, %v84_v8 }
  0x91   :  { %103 = vrot.lane.b32.xlu2 %v2232_v9, %s2134_s19  ;;  %97 = vrot.lane.b32.xlu1 %v2232_v9, %s2133_s18  ;;  %s1878_s18 = sshll.u32 %s2939_s13, 4  ;;  %s1879_s18 = int_to_ptr.hbm [resolvable:$true] %s1878_s18 }
  0x92   :  { %101 = vrot.lane.b32.xlu0 %v83_v7, %s2134_s19  ;;  %s2144_s19 = smov [#allocation2]  }
  0x99   :  { %109 = vrot.lane.b32.xlu2 %v2232_v9, %s2132_s1 }
  0xeb   :  { %v2237_v10 = vpop.permute.xlu2 %103 }
  0xf3   :  { %v2243_v21 = vpop.permute.xlu2 %109 }
  0xf4   :  { %v2010_v30 = vpack.i.bf16 %v2243_v21, %v2237_v10 }
  0xfb   :  { %v108_v11 = vpop.permute.xlu1 %107  ;;  %v96_v12 = vpop.permute.xlu0 %95 }
  0xfc   :  { %v126_v13 = vrot.slane %v108_v11, 4  ;;  %v128_v14 = vrot.slane %v96_v12, 4  ;;  %v1995_v15 = vpack.i.bf16 %v96_v12, %v83_v7 }
  0xfe   :  { %v127_v18 = vsel %vm114_vm1, %v126_v13, %v96_v12  ;;  %v129_v19 = vsel %vm114_vm1, %v108_v11, %v128_v14  ;;  %1996 = vrot.lane.b32.xlu0 %v1995_v15, %s2136_s2 }
  0xff   :  { %v137_v22 = vperm.slane %v129_v19, %v2241_v20  ;;  %v133_v25 = vperm.slane %v127_v18, %v2241_v20 }
 0x101   :  { %v150_v35 = vrot.slane %v137_v22, 4  ;;  %v138_v37 = vrot.slane %v133_v25, 4 }
 0x103   :  { %v2246_v23 = vpop.permute.xlu1 %97 }
 0x104   :  { %v102_v28 = vpop.permute.xlu0 %101  ;;  %v2005_v29 = vpack.i.bf16 %v2246_v23, %v2232_v9 }
 0x105   :  { %v113_v31 = vrot.slane %v102_v28, 4  ;;  %v117_v32 = vsel %vm114_vm1, %v102_v28, %v116_v24  ;;  %v2000_v33 = vpack.i.bf16 %v108_v11, %v102_v28 }
 0x106   :  { %v125_v34 = vperm.slane %v117_v32, %v2241_v20  ;;  %2006 = vrot.lane.b32.xlu2 %v2005_v29, %s2136_s2  ;;  %2011 = vrot.lane.b32.xlu0 %v2010_v30, %s2136_s2 }
 0x107   :  { %v115_v36 = vsel %vm114_vm1, %v113_v31, %v83_v7  ;;  %2001 = vrot.lane.b32.xlu1 %v2000_v33, %s2136_s2  ;;  %v184_v31 = vrot.slane %v2246_v23, 4 }
 0x108   :  { %v121_v39 = vperm.slane %v115_v36, %v2241_v20  ;;  %v152_v40 = vrot.slane %v125_v34, 4  ;;  %v151_v41 = vsel %vm114_vm1, %v150_v35, %v125_v34  ;;  %v182_v34 = vrot.slane %v2243_v21, 4 }
 0x109   :  { %v157_v45 = vperm.slane %v151_v41, %v2256_v38  ;;  %v185_v35 = vsel %vm114_vm1, %v2243_v21, %v184_v31 }
 0x10a   :  { %v139_v42 = vsel %vm114_vm1, %v138_v37, %v121_v39  ;;  %v140_v43 = vrot.slane %v121_v39, 4  ;;  %v153_v44 = vsel %vm114_vm1, %v137_v22, %v152_v40  ;;  %v183_v37 = vsel %vm114_vm1, %v182_v34, %v2246_v23 }
 0x10b   :  { %v145_v47 = vperm.slane %v139_v42, %v2256_v38  ;;  %v161_v48 = vperm.slane %v153_v44, %v2256_v38  ;;  %v166_v50 = vrot.slane %v157_v45, 4  ;;  %v193_v40 = vperm.slane %v185_v35, %v2241_v20 }
 0x10c   :  { %v141_v46 = vsel %vm114_vm1, %v133_v25, %v140_v43  ;;  %v189_v41 = vperm.slane %v183_v37, %v2241_v20 }
 0x10d   :  { %v149_v49 = vperm.slane %v141_v46, %v2256_v38  ;;  %v168_v51 = vrot.slane %v161_v48, 4  ;;  %v162_v52 = vrot.slane %v145_v47, 4  ;;  %v167_v60 = vsel %vm114_vm1, 0.0, %v166_v50 }
 0x10e   :  { %2026 = vrot.lane.b32.xlu0 %v2005_v29, %s2138_s20  ;;  %2021 = vrot.lane.b32.xlu2 %v2000_v33, %s2138_s20  ;;  %v170_v29 = vrot.slane %v2237_v10, 4  ;;  %v206_v43 = vrot.slane %v193_v40, 4  ;;  %v194_v44 = vrot.slane %v189_v41, 4 }
 0x10f   :  { %2016 = vrot.lane.b32.xlu1 %v1995_v15, %s2138_s20  ;;  %v164_v53 = vrot.slane %v149_v49, 4  ;;  %v169_v54 = vsel %vm114_vm1, 0.0, %v168_v51  ;;  %v237_v55 = vsel %vm114_vm1, %v168_v51, %v157_v45  ;;  %v163_v63 = vsel %vm114_vm1, 0.0, %v162_v52 }
 0x110   :  { %v241_v56 = vperm.slane %v237_v55, %v2241_v20  ;;  %v242_v57 = vrot.slane %v169_v54, 4  ;;  %v171_v33 = vsel %vm114_vm1, %v170_v29, %v2232_v9 }
 0x111   :  { %v165_v58 = vsel %vm114_vm1, 0.0, %v164_v53  ;;  %v226_v59 = vsel %vm114_vm1, %v164_v53, %v145_v47  ;;  %v177_v39 = vperm.slane %v171_v33, %v2241_v20 }
 0x112   :  { %v230_v61 = vperm.slane %v226_v59, %v2241_v20  ;;  %v231_v62 = vrot.slane %v165_v58, 4  ;;  %v243_v0 = vsel %vm114_vm1, %v242_v57, %v167_v60  ;;  %v262_v1 = vrot.slane %v241_v56, 4 }
 0x113   :  { %v247_v3 = vperm.slane %v243_v0, %v2241_v20  ;;  %v196_v42 = vrot.slane %v177_v39, 4  ;;  %v195_v47 = vsel %vm114_vm1, %v194_v44, %v177_v39 }
 0x114   :  { %v232_v2 = vsel %vm114_vm1, %v231_v62, %v163_v63  ;;  %v250_v4 = vrot.slane %v230_v61, 4  ;;  %v201_v50 = vperm.slane %v195_v47, %v2256_v38 }
 0x115   :  { %v236_v5 = vperm.slane %v232_v2, %v2241_v20  ;;  %v263_v6 = vsel %vm114_vm1, %v247_v3, %v262_v1  ;;  %v260_v7 = vrot.slane %v247_v3, 4  ;;  %v197_v45 = vsel %vm114_vm1, %v189_v41, %v196_v42 }
 0x116   :  { %2031 = vrot.lane.b32.xlu2 %v2010_v30, %s2138_s20  ;;  %v271_v11 = vperm.slane %v263_v6, %v2256_v38  ;;  %v172_v30 = vrot.slane %v2232_v9, 4  ;;  %v205_v46 = vperm.slane %v197_v45, %v2256_v38  ;;  %v218_v54 = vrot.slane %v201_v50, 4 }
 0x117   :  { %v251_v8 = vsel %vm114_vm1, %v236_v5, %v250_v4  ;;  %v248_v12 = vrot.slane %v236_v5, 4  ;;  %v261_v14 = vsel %vm114_vm1, %v260_v7, %v241_v56 }
 0x118   :  { %v259_v13 = vperm.slane %v251_v8, %v2256_v38  ;;  %v276_v15 = vrot.slane %v271_v11, 4  ;;  %v267_v17 = vperm.slane %v261_v14, %v2256_v38  ;;  %v173_v32 = vsel %vm114_vm1, %v2237_v10, %v172_v30 }
 0x119   :  { %v249_v16 = vsel %vm114_vm1, %v248_v12, %v230_v61  ;;  %v181_v36 = vperm.slane %v173_v32, %v2241_v20  ;;  %v220_v51 = vrot.slane %v205_v46, 4  ;;  %v219_v62 = vsel %vm114_vm1, 0.0, %v218_v54 }
 0x11a   :  { %v278_v18 = vrot.slane %v259_v13, 4  ;;  %v255_v19 = vperm.slane %v249_v16, %v2256_v38  ;;  %v2288_v22 = vsel %vm114_vm1, %v276_v15, %v259_v13  ;;  %v272_v24 = vrot.slane %v267_v17, 4 }
 0x11b   :  { %v208_v10 = vrot.slane %v181_v36, 4  ;;  %v207_v23 = vsel %vm114_vm1, %v206_v43, %v181_v36  ;;  %v221_v55 = vsel %vm114_vm1, 0.0, %v220_v51  ;;  %v280_v59 = vsel %vm114_vm1, %v220_v51, %v201_v50 }
 0x11c   :  { %v2291_v25 = vsel %vm114_vm1, %v271_v11, %v278_v18  ;;  %v274_v26 = vrot.slane %v255_v19, 4  ;;  %v2294_v27 = vsel %vm114_vm1, %v272_v24, %v255_v19  ;;  %v213_v48 = vperm.slane %v207_v23, %v2256_v38 }
 0x11d   :  { %v209_v9 = vsel %vm114_vm1, %v193_v40, %v208_v10  ;;  %v285_v60 = vrot.slane %v221_v55, 4  ;;  %v284_v0 = vperm.slane %v280_v59, %v2241_v20  ;;  %v336_v40 = vpack.c.bf16 %v2288_v22, %v2288_v22 }
 0x11e   :  { %v2297_v28 = vsel %vm114_vm1, %v267_v17, %v274_v26  ;;  %v217_v21 = vperm.slane %v209_v9, %v2256_v38  ;;  %v222_v52 = vrot.slane %v213_v48, 4  ;;  %v334_v10 = vpack.c.bf16 %v2294_v27, %v2294_v27 }
 0x11f   :  { %v286_v2 = vsel %vm114_vm1, %v285_v60, %v219_v62  ;;  %v304_v6 = vrot.slane %v284_v0, 4  ;;  %v337_v42 = vpack.c.bf16 %v2291_v25, %v2291_v25  ;;  %v335_v43 = vpack.c.bf16 %v2297_v28, %v2297_v28 }
 0x120   :  { %v224_v49 = vrot.slane %v217_v21, 4  ;;  %v223_v58 = vsel %vm114_vm1, 0.0, %v222_v52  ;;  %v290_v5 = vperm.slane %v286_v2, %v2241_v20 }
 0x122   :  { %v225_v53 = vsel %vm114_vm1, 0.0, %v224_v49  ;;  %v291_v56 = vsel %vm114_vm1, %v224_v49, %v213_v48  ;;  %v305_v11 = vsel %vm114_vm1, %v290_v5, %v304_v6  ;;  %v302_v14 = vrot.slane %v290_v5, 4 }
 0x123   :  { %v296_v57 = vrot.slane %v225_v53, 4  ;;  %v295_v63 = vperm.slane %v291_v56, %v2241_v20  ;;  %v313_v13 = vperm.slane %v305_v11, %v2256_v38 }
 0x124   :  { %v303_v24 = vsel %vm114_vm1, %v302_v14, %v284_v0 }
 0x125   :  { %v297_v1 = vsel %vm114_vm1, %v296_v57, %v223_v58  ;;  %v316_v4 = vrot.slane %v295_v63, 4  ;;  %v332_v19 = vrot.slane %v313_v13, 4  ;;  %v2357_v36 = vperm.slane %v303_v24, %v2256_v38 }
 0x126   :  { %v301_v3 = vperm.slane %v297_v1, %v2241_v20 }
 0x128   :  { %v317_v8 = vsel %vm114_vm1, %v301_v3, %v316_v4  ;;  %v314_v15 = vrot.slane %v301_v3, 4 }
 0x129   :  { %v325_v12 = vperm.slane %v317_v8, %v2256_v38 }
 0x12a   :  { %v315_v26 = vsel %vm114_vm1, %v314_v15, %v295_v63 }
 0x12b   :  { %v330_v17 = vrot.slane %v325_v12, 4  ;;  %v2362_v41 = vsel %vm114_vm1, %v325_v12, %v332_v19  ;;  %v2371_v9 = vperm.slane %v315_v26, %v2256_v38 }
 0x12d   :  { %v2354_v35 = vsel %vm114_vm1, %v330_v17, %v313_v13 }
 0x160   :  { %v2328_v61 = vpop.permute.xlu2 %2006 }
 0x161   :  { %v2009_v29 = vunpack.i.h.bf16 %v2328_v61  ;;  %v2008_v30 = vunpack.i.l.bf16 %v2328_v61 }
 0x163   :  { %v436_v44 = vrot.slane %v2009_v29, 4  ;;  %v424_v45 = vrot.slane %v2008_v30, 4 }
 0x168   :  { %v2337_v7 = vpop.permute.xlu2 %2021 }
 0x169   :  { %v2024_v31 = vunpack.i.h.bf16 %v2337_v7  ;;  %v2023_v32 = vunpack.i.l.bf16 %v2337_v7 }
 0x16b   :  { %v2375_v21 = vrot.slane %v2024_v31, 4  ;;  %v2379_v46 = vrot.slane %v2023_v32, 4 }
 0x170   :  { %v1997_v16 = vpop.permute.xlu0 %1996  ;;  %v2343_v18 = vpop.permute.xlu2 %2031 }
 0x171   :  { %v2034_v33 = vunpack.i.h.bf16 %v2343_v18  ;;  %v2033_v34 = vunpack.i.l.bf16 %v2343_v18  ;;  %v1999_v37 = vunpack.i.h.bf16 %v1997_v16  ;;  %v1998_v39 = vunpack.i.l.bf16 %v1997_v16 }
 0x173   :  { %v2383_v47 = vrot.slane %v2034_v33, 4  ;;  %v2387_v48 = vrot.slane %v2033_v34, 4  ;;  %v380_v52 = vrot.slane %v1999_v37, 4  ;;  %v368_v53 = vrot.slane %v1998_v39, 4 }
 0x178   :  { %v2012_v23 = vpop.permute.xlu0 %2011 }
 0x179   :  { %v2002_v49 = vpop.permute.xlu1 %2001  ;;  %v2014_v50 = vunpack.i.h.bf16 %v2012_v23  ;;  %v2013_v51 = vunpack.i.l.bf16 %v2012_v23 }
 0x17a   :  { %v2004_v54 = vunpack.i.h.bf16 %v2002_v49  ;;  %v2003_v55 = vunpack.i.l.bf16 %v2002_v49 }
 0x17b   :  { %v434_v56 = vrot.slane %v2014_v50, 4  ;;  %v437_v57 = vsel %vm114_vm1, %v2014_v50, %v436_v44  ;;  %v422_v58 = vrot.slane %v2013_v51, 4  ;;  %v425_v59 = vsel %vm114_vm1, %v2013_v51, %v424_v45 }
 0x17c   :  { %v378_v60 = vrot.slane %v2004_v54, 4  ;;  %v366_v61 = vrot.slane %v2003_v55, 4  ;;  %v369_v62 = vsel %vm114_vm1, %v2003_v55, %v368_v53  ;;  %v381_v63 = vsel %vm114_vm1, %v2004_v54, %v380_v52 }
 0x17d   :  { %v377_v0 = vperm.slane %v369_v62, %v2241_v20  ;;  %v389_v1 = vperm.slane %v381_v63, %v2241_v20  ;;  %v435_v2 = vsel %vm114_vm1, %v434_v56, %v2009_v29  ;;  %v445_v3 = vperm.slane %v437_v57, %v2241_v20 }
 0x17e   :  { %v367_v4 = vsel %vm114_vm1, %v366_v61, %v1998_v39  ;;  %v379_v5 = vsel %vm114_vm1, %v378_v60, %v1999_v37  ;;  %v441_v6 = vperm.slane %v435_v2, %v2241_v20  ;;  %v423_v8 = vsel %vm114_vm1, %v422_v58, %v2008_v30 }
 0x17f   :  { %v373_v11 = vperm.slane %v367_v4, %v2241_v20  ;;  %v385_v12 = vperm.slane %v379_v5, %v2241_v20  ;;  %v402_v13 = vrot.slane %v389_v1, 4  ;;  %v404_v14 = vrot.slane %v377_v0, 4 }
 0x180   :  { %v446_v15 = vrot.slane %v441_v6, 4  ;;  %v458_v16 = vrot.slane %v445_v3, 4  ;;  %v429_v17 = vperm.slane %v423_v8, %v2241_v20  ;;  %v433_v19 = vperm.slane %v425_v59, %v2241_v20 }
 0x181   :  { %v390_v24 = vrot.slane %v385_v12, 4  ;;  %v392_v26 = vrot.slane %v373_v11, 4  ;;  %v403_v29 = vsel %vm114_vm1, %v402_v13, %v377_v0  ;;  %v405_v37 = vsel %vm114_vm1, %v389_v1, %v404_v14  ;;  %v2017_v60 = vpop.permute.xlu1 %2016  ;;  %v2027_v1 = vpop.permute.xlu0 %2026 }
 0x182   :  { %v2408_v30 = vperm.slane %v403_v29, %v2256_v38  ;;  %v413_v39 = vperm.slane %v405_v37, %v2256_v38  ;;  %v447_v44 = vsel %vm114_vm1, %v446_v15, %v429_v17  ;;  %v448_v45 = vrot.slane %v429_v17, 4 }
 0x183   :  { %v391_v23 = vsel %vm114_vm1, %v390_v24, %v373_v11  ;;  %v393_v49 = vsel %vm114_vm1, %v385_v12, %v392_v26  ;;  %v2415_v50 = vperm.slane %v447_v44, %v2256_v38  ;;  %v459_v51 = vsel %vm114_vm1, %v458_v16, %v433_v19 }
 0x184   :  { %v2419_v52 = vperm.slane %v391_v23, %v2256_v38  ;;  %v401_v53 = vperm.slane %v393_v49, %v2256_v38  ;;  %v418_v54 = vrot.slane %v2408_v30, 4  ;;  %v2423_v55 = vrot.slane %v413_v39, 4 }
 0x185   :  { %v449_v56 = vsel %vm114_vm1, %v441_v6, %v448_v45  ;;  %v460_v57 = vrot.slane %v433_v19, 4  ;;  %v465_v58 = vperm.slane %v459_v51, %v2256_v38  ;;  %v470_v59 = vrot.slane %v2415_v50, 4 }
 0x186   :  { %v414_v61 = vrot.slane %v2419_v52, 4  ;;  %v2429_v62 = vrot.slane %v401_v53, 4  ;;  %v2432_v63 = vsel %vm114_vm1, 0.0, %v418_v54  ;;  %v2436_v0 = vsel %vm114_vm1, 0.0, %v2423_v55 }
 0x187   :  { %v494_v2 = vrot.slane %v2436_v0, 4  ;;  %v457_v4 = vperm.slane %v449_v56, %v2256_v38  ;;  %v461_v5 = vsel %vm114_vm1, %v445_v3, %v460_v57  ;;  %v474_v6 = vrot.slane %v465_v58, 4 }
 0x188   :  { %v2443_v8 = vsel %vm114_vm1, 0.0, %v2429_v62  ;;  %v469_v11 = vperm.slane %v461_v5, %v2256_v38  ;;  %v2019_v12 = vunpack.i.h.bf16 %v2017_v60  ;;  %v2018_v13 = vunpack.i.l.bf16 %v2017_v60 }
 0x189   :  { %v2446_v14 = vrot.slane %v457_v4, 4  ;;  %v2449_v15 = vsel %vm114_vm1, 0.0, %v474_v6  ;;  %v2029_v16 = vunpack.i.h.bf16 %v2027_v1  ;;  %v2028_v17 = vunpack.i.l.bf16 %v2027_v1 }
 0x18a   :  { %v476_v19 = vrot.slane %v469_v11, 4  ;;  %v631_v3 = vsel %vm114_vm1, %v2375_v21, %v2019_v12  ;;  %v632_v24 = vrot.slane %v2019_v12, 4  ;;  %v619_v26 = vsel %vm114_vm1, %v2379_v46, %v2018_v13 }
 0x18b   :  { %v2457_v29 = vsel %vm114_vm1, 0.0, %v2446_v14  ;;  %v637_v37 = vperm.slane %v631_v3, %v2241_v20  ;;  %v620_v39 = vrot.slane %v2018_v13, 4  ;;  %v625_v44 = vperm.slane %v619_v26, %v2241_v20 }
 0x18c   :  { %v2462_v45 = vsel %vm114_vm1, 0.0, %v476_v19  ;;  %v537_v23 = vrot.slane %v2457_v29, 4  ;;  %v2466_v21 = vsel %vm114_vm1, %v476_v19, %v465_v58  ;;  %v633_v46 = vsel %vm114_vm1, %v2024_v31, %v632_v24 }
 0x18d   :  { %v548_v49 = vrot.slane %v2462_v45, 4  ;;  %v641_v51 = vperm.slane %v633_v46, %v2241_v20  ;;  %v642_v53 = vrot.slane %v637_v37, 4  ;;  %v621_v54 = vsel %vm114_vm1, %v2023_v32, %v620_v39 }
 0x18e   :  { %v629_v56 = vperm.slane %v621_v54, %v2241_v20  ;;  %v644_v57 = vrot.slane %v625_v44, 4  ;;  %v687_v58 = vsel %vm114_vm1, %v2383_v47, %v2029_v16  ;;  %v688_v60 = vrot.slane %v2029_v16, 4 }
 0x18f   :  { %v654_v1 = vrot.slane %v641_v51, 4  ;;  %v643_v4 = vsel %vm114_vm1, %v642_v53, %v625_v44  ;;  %v693_v31 = vperm.slane %v687_v58, %v2241_v20  ;;  %v675_v5 = vsel %vm114_vm1, %v2387_v48, %v2028_v17 }
 0x190   :  { %v645_v6 = vsel %vm114_vm1, %v637_v37, %v644_v57  ;;  %v649_v7 = vperm.slane %v643_v4, %v2256_v38  ;;  %v656_v32 = vrot.slane %v629_v56, 4  ;;  %v689_v11 = vsel %vm114_vm1, %v2034_v33, %v688_v60 }
 0x191   :  { %v653_v47 = vperm.slane %v645_v6, %v2256_v38  ;;  %v655_v12 = vsel %vm114_vm1, %v654_v1, %v629_v56  ;;  %v697_v13 = vperm.slane %v689_v11, %v2241_v20  ;;  %v698_v16 = vrot.slane %v693_v31, 4 }
 0x192   :  { %v657_v19 = vsel %vm114_vm1, %v641_v51, %v656_v32  ;;  %v661_v48 = vperm.slane %v655_v12, %v2256_v38  ;;  %v666_v3 = vrot.slane %v649_v7, 4  ;;  %v676_v24 = vrot.slane %v2028_v17, 4 }
 0x193   :  { %v665_v26 = vperm.slane %v657_v19, %v2256_v38  ;;  %v668_v37 = vrot.slane %v653_v47, 4  ;;  %v710_v39 = vrot.slane %v697_v13, 4  ;;  %v681_v44 = vperm.slane %v675_v5, %v2241_v20 }
 0x194   :  { %v2496_v33 = vsel %vm114_vm1, 0.0, %v666_v3  ;;  %v670_v46 = vrot.slane %v661_v48, 4  ;;  %v677_v53 = vsel %vm114_vm1, %v2033_v34, %v676_v24  ;;  %v415_v51 = vsel %vm114_vm1, 0.0, %v414_v61 }
 0x195   :  { %v2503_v54 = vsel %vm114_vm1, 0.0, %v668_v37  ;;  %v672_v17 = vrot.slane %v665_v26, 4  ;;  %v2506_v56 = vsel %vm114_vm1, %v668_v37, %v649_v7  ;;  %v685_v57 = vperm.slane %v677_v53, %v2241_v20 }
 0x196   :  { %v2510_v58 = vsel %vm114_vm1, 0.0, %v670_v46  ;;  %v735_v60 = vrot.slane %v2503_v54, 4  ;;  %v699_v18 = vsel %vm114_vm1, %v698_v16, %v681_v44  ;;  %v700_v1 = vrot.slane %v681_v44, 4 }
 0x197   :  { %v2515_v34 = vsel %vm114_vm1, 0.0, %v672_v17  ;;  %v2518_v61 = vsel %vm114_vm1, %v672_v17, %v661_v48  ;;  %v705_v4 = vperm.slane %v699_v18, %v2256_v38  ;;  %v711_v5 = vsel %vm114_vm1, %v710_v39, %v685_v57 }
 0x198   :  { %v746_v6 = vrot.slane %v2515_v34, 4  ;;  %v701_v7 = vsel %vm114_vm1, %v693_v31, %v700_v1  ;;  %v712_v32 = vrot.slane %v685_v57, 4  ;;  %v717_v11 = vperm.slane %v711_v5, %v2256_v38 }
 0x199   :  { %v709_v47 = vperm.slane %v701_v7, %v2256_v38  ;;  %v722_v12 = vrot.slane %v705_v4, 4  ;;  %v478_v16 = vsel %vm114_vm1, %v2429_v62, %v2419_v52  ;;  %v483_v19 = vrot.slane %v2443_v8, 4 }
 0x19a   :  { %v713_v48 = vsel %vm114_vm1, %v697_v13, %v712_v32  ;;  %v726_v3 = vrot.slane %v717_v11, 4  ;;  %v482_v24 = vperm.slane %v478_v16, %v2241_v20  ;;  %v489_v31 = vsel %vm114_vm1, %v2423_v55, %v2408_v30 }
 0x19b   :  { %v721_v26 = vperm.slane %v713_v48, %v2256_v38  ;;  %v2537_v37 = vsel %vm114_vm1, 0.0, %v722_v12  ;;  %v724_v39 = vrot.slane %v709_v47, 4  ;;  %v484_v44 = vsel %vm114_vm1, %v483_v19, %v415_v51 }
 0x19c   :  { %v2541_v52 = vsel %vm114_vm1, 0.0, %v726_v3  ;;  %v488_v62 = vperm.slane %v484_v44, %v2241_v20  ;;  %v493_v8 = vperm.slane %v489_v31, %v2241_v20  ;;  %v495_v30 = vsel %vm114_vm1, %v494_v2, %v2432_v63 }
 0x19d   :  { %v2550_v55 = vsel %vm114_vm1, 0.0, %v724_v39  ;;  %v728_v13 = vrot.slane %v721_v26, 4  ;;  %v2553_v46 = vsel %vm114_vm1, %v724_v39, %v705_v4  ;;  %v499_v53 = vperm.slane %v495_v30, %v2241_v20 }
 0x19e   :  { %v789_v51 = vrot.slane %v2550_v55, 4  ;;  %v502_v17 = vrot.slane %v482_v24, 4  ;;  %v514_v57 = vrot.slane %v493_v8, 4  ;;  %v471_v63 = vsel %vm114_vm1, 0.0, %v470_v59 }
 0x19f   :  { %v2558_v18 = vsel %vm114_vm1, 0.0, %v728_v13  ;;  %v2561_v0 = vsel %vm114_vm1, %v728_v13, %v717_v11  ;;  %v532_v2 = vsel %vm114_vm1, %v2446_v14, %v2415_v50  ;;  %v538_v59 = vsel %vm114_vm1, %v537_v23, %v471_v63 }
 0x1a0   :  { %v800_v1 = vrot.slane %v2558_v18, 4  ;;  %v503_v4 = vsel %vm114_vm1, %v488_v62, %v502_v17  ;;  %v515_v5 = vsel %vm114_vm1, %v499_v53, %v514_v57  ;;  %v536_v7 = vperm.slane %v532_v2, %v2241_v20 }
 0x1a1   :  { %v511_v32 = vperm.slane %v503_v4, %v2256_v38  ;;  %v523_v11 = vperm.slane %v515_v5, %v2256_v38  ;;  %v547_v47 = vperm.slane %v2466_v21, %v2241_v20  ;;  %v542_v50 = vperm.slane %v538_v59, %v2241_v20 }
 0x1a2   :  { %v549_v14 = vsel %vm114_vm1, %v548_v49, %v2449_v15  ;;  %v556_v12 = vrot.slane %v536_v7, 4  ;;  %v500_v16 = vrot.slane %v488_v62, 4  ;;  %v512_v31 = vrot.slane %v499_v53, 4 }
 0x1a3   :  { %v528_v19 = vrot.slane %v523_v11, 4  ;;  %v553_v48 = vperm.slane %v549_v14, %v2241_v20  ;;  %v568_v3 = vrot.slane %v547_v47, 4  ;;  %v530_v26 = vrot.slane %v511_v32, 4 }
 0x1a4   :  { %v557_v29 = vsel %vm114_vm1, %v542_v50, %v556_v12  ;;  %v501_v23 = vsel %vm114_vm1, %v500_v16, %v482_v24  ;;  %v554_v21 = vrot.slane %v542_v50, 4  ;;  %v513_v30 = vsel %vm114_vm1, %v512_v31, %v493_v8 }
 0x1a5   :  { %v529_v39 = vsel %vm114_vm1, %v528_v19, %v511_v32  ;;  %v565_v44 = vperm.slane %v557_v29, %v2256_v38  ;;  %v569_v45 = vsel %vm114_vm1, %v553_v48, %v568_v3  ;;  %v507_v15 = vperm.slane %v501_v23, %v2256_v38 }
 0x1a6   :  { %v588_v49 = vpack.c.bf16 %v529_v39, %v529_v39  ;;  %v577_v62 = vperm.slane %v569_v45, %v2256_v38  ;;  %v531_v13 = vsel %vm114_vm1, %v523_v11, %v530_v26  ;;  %v519_v24 = vperm.slane %v513_v30, %v2256_v38 }
 0x1a7   :  { %v584_v53 = vrot.slane %v565_v44, 4  ;;  %v589_v17 = vpack.c.bf16 %v531_v13, %v531_v13  ;;  %v555_v57 = vsel %vm114_vm1, %v554_v21, %v536_v7  ;;  %v566_v5 = vrot.slane %v553_v48, 4 }
 0x1a8   :  { %v889_v63 = vsel %vm846_vm2, %v588_v49, 0  ;;  %v582_v2 = vrot.slane %v577_v62, 4  ;;  %v561_v4 = vperm.slane %v555_v57, %v2256_v38  ;;  %v524_v32 = vrot.slane %v519_v24, 4 }
 0x1a9   :  { %898 = vmatpush.bf16.xpose.msra.mxu3 %v889_v63  ;;  %v908_v59 = vsel %vm846_vm2, %v589_v17, 0  ;;  %v585_v8 = vsel %vm114_vm1, %v577_v62, %v584_v53  ;;  %v526_v50 = vrot.slane %v507_v15, 4  ;;  %v567_v14 = vsel %vm114_vm1, %v566_v5, %v547_v47 }
 0x1aa   :  { %v583_v11 = vsel %vm114_vm1, %v582_v2, %v565_v44  ;;  %917 = vmatpush.bf16.xpose.msrb.mxu0 %v908_v59  ;;  %v593_v12 = vpack.c.bf16 %v585_v8, %v585_v8  ;;  %v580_v7 = vrot.slane %v561_v4, 4  ;;  %v525_v19 = vsel %vm114_vm1, %v524_v32, %v507_v15 }
 0x1ab   :  { %v592_v16 = vpack.c.bf16 %v583_v11, %v583_v11  ;;  %v573_v3 = vperm.slane %v567_v14, %v2256_v38  ;;  %v527_v48 = vsel %vm114_vm1, %v519_v24, %v526_v50  ;;  %v586_v31 = vpack.c.bf16 %v525_v19, %v525_v19 }
 0x1ac   :  { %v984_v29 = vsel %vm846_vm2, %v593_v12, 0  ;;  %v587_v23 = vpack.c.bf16 %v527_v48, %v527_v48  ;;  %v734_v26 = vperm.slane %v2506_v56, %v2241_v20  ;;  %v736_v44 = vsel %vm114_vm1, %v735_v60, %v2496_v33 }
 0x1ad   :  { %v965_v21 = vsel %vm846_vm2, %v592_v16, 0  ;;  %v578_v39 = vrot.slane %v573_v3, 4  ;;  %v581_v47 = vsel %vm114_vm1, %v573_v3, %v580_v7  ;;  %v851_v45 = vsel %vm846_vm2, %v586_v31, 0 }
 0x1ae   :  { %v870_v15 = vsel %vm846_vm2, %v587_v23, 0  ;;  %v591_v49 = vpack.c.bf16 %v581_v47, %v581_v47  ;;  %v740_v62 = vperm.slane %v736_v44, %v2241_v20  ;;  %860 = vmatpush.bf16.xpose.msra.mxu1 %v851_v45  ;;  %v745_v30 = vperm.slane %v2518_v61, %v2241_v20 }
 0x1af   :  { %v579_v56 = vsel %vm114_vm1, %v578_v39, %v561_v4  ;;  %879 = vmatpush.bf16.xpose.msra.mxu2 %v870_v15  ;;  %v747_v33 = vsel %vm114_vm1, %v746_v6, %v2510_v58  ;;  %v754_v54 = vrot.slane %v734_v26, 4  ;;  %v788_v6 = vperm.slane %v2553_v46, %v2241_v20 }
 0x1b0   :  { %v590_v60 = vpack.c.bf16 %v579_v56, %v579_v56  ;;  %v946_v13 = vsel %vm846_vm2, %v591_v49, 0  ;;  %1901 = vmatmul.msk.bf16.vlgmr.msra.gmra.mxu3 %vm846_vm2, %v336_v40  ;;  %v751_v53 = vperm.slane %v747_v33, %v2241_v20  ;;  %v766_v34 = vrot.slane %v745_v30, 4 }
 0x1b1   :  { %974 = vmatpush.bf16.xpose.msrb.mxu3 %v965_v21  ;;  %1902 = vmatmul.msk.bf16.vlgmr.msrb.gmra.mxu0 %vm846_vm2, %v337_v42  ;;  %v755_v58 = vsel %vm114_vm1, %v740_v62, %v754_v54  ;;  %v752_v61 = vrot.slane %v740_v62, 4  ;;  %v790_v17 = vsel %vm114_vm1, %v789_v51, %v2537_v37  ;;  %v799_v46 = vperm.slane %v2561_v0, %v2241_v20 }
 0x1b2   :  { %993 = vmatpush.bf16.xpose.msra.mxu0 %v984_v29  ;;  %v927_v22 = vsel %vm846_vm2, %v590_v60, 0  ;;  %v763_v40 = vperm.slane %v755_v58, %v2256_v38  ;;  %v764_v24 = vrot.slane %v751_v53, 4  ;;  %v767_v25 = vsel %vm114_vm1, %v751_v53, %v766_v34 }
 0x1b3   :  { %v753_v42 = vsel %vm114_vm1, %v752_v61, %v734_v26  ;;  %v794_v57 = vperm.slane %v790_v17, %v2241_v20  ;;  %v775_v63 = vperm.slane %v767_v25, %v2256_v38  ;;  %v801_v37 = vsel %vm114_vm1, %v800_v1, %v2541_v52 }
 0x1b4   :  { %v782_v2 = vrot.slane %v763_v40, 4  ;;  %v759_v4 = vperm.slane %v753_v42, %v2256_v38  ;;  %v765_v5 = vsel %vm114_vm1, %v764_v24, %v745_v30  ;;  %v808_v51 = vrot.slane %v788_v6, 4 }
 0x1b5   :  { %v771_v55 = vperm.slane %v765_v5, %v2256_v38  ;;  %v820_v32 = vrot.slane %v799_v46, 4  ;;  %1899 = vmatmul.msk.bf16.vlgmr.msra.gmra.mxu1 %vm846_vm2, %v334_v10  ;;  %v780_v0 = vrot.slane %v775_v63, 4  ;;  %v805_v18 = vperm.slane %v801_v37, %v2241_v20 }
 0x1b6   :  { %936 = vmatpush.bf16.xpose.msrb.mxu1 %v927_v22  ;;  %v783_v59 = vsel %vm114_vm1, %v775_v63, %v782_v2  ;;  %1900 = vmatmul.msk.bf16.vlgmr.msra.gmra.mxu2 %vm846_vm2, %v335_v43  ;;  %v778_v8 = vrot.slane %v759_v4, 4  ;;  %v809_v1 = vsel %vm114_vm1, %v794_v57, %v808_v51  ;;  %v806_v11 = vrot.slane %v794_v57, 4 }
 0x1b7   :  { %955 = vmatpush.bf16.xpose.msrb.mxu2 %v946_v13  ;;  %v841_v50 = vpack.c.bf16 %v783_v59, %v783_v59  ;;  %v776_v52 = vrot.slane %v771_v55, 4  ;;  %v781_v27 = vsel %vm114_vm1, %v780_v0, %v763_v40  ;;  %v817_v14 = vperm.slane %v809_v1, %v2256_v38 }
 0x1b8   :  { %v779_v10 = vsel %vm114_vm1, %v771_v55, %v778_v8  ;;  %v821_v12 = vsel %vm114_vm1, %v805_v18, %v820_v32  ;;  %v840_v7 = vpack.c.bf16 %v781_v27, %v781_v27  ;;  %v807_v48 = vsel %vm114_vm1, %v806_v11, %v788_v6 }
 0x1b9   :  { %v1141_v28 = vsel %vm1082_vm3, %v841_v50, 0  ;;  %v777_v43 = vsel %vm114_vm1, %v776_v52, %v759_v4  ;;  %v839_v16 = vpack.c.bf16 %v779_v10, %v779_v10  ;;  %v829_v3 = vperm.slane %v821_v12, %v2256_v38 }
 0x1ba   :  { %1150 = vmatpush.bf16.msrb.mxu0 %v1141_v28  ;;  %v838_v19 = vpack.c.bf16 %v777_v43, %v777_v43  ;;  %v818_v31 = vrot.slane %v805_v18, 4  ;;  %v1122_v29 = vsel %vm1082_vm3, %v840_v7, 0  ;;  %v813_v26 = vperm.slane %v807_v48, %v2256_v38 }
 0x1bb   :  { %v1103_v23 = vsel %vm1082_vm3, %v839_v16, 0  ;;  %v836_v21 = vrot.slane %v817_v14, 4  ;;  %1131 = vmatpush.bf16.msra.mxu3 %v1122_v29  ;;  %v834_v47 = vrot.slane %v829_v3, 4  ;;  %v328_v45 = vrot.slane %v2357_v36, 4 }
 0x1bc   :  { %v1084_v39 = vsel %vm1082_vm3, %v838_v19, 0  ;;  %v819_v44 = vsel %vm114_vm1, %v818_v31, %v799_v46  ;;  %v326_v15 = vrot.slane %v2371_v9, 4  ;;  %v832_v56 = vrot.slane %v813_v26, 4 }
 0x1bd   :  { %v825_v49 = vperm.slane %v819_v44, %v2256_v38  ;;  %v837_v62 = vsel %vm114_vm1, %v829_v3, %v836_v21  ;;  %v340_v30 = vpack.c.bf16 %v2354_v35, %v2354_v35  ;;  %v835_v33 = vsel %vm114_vm1, %v834_v47, %v817_v14 }
 0x1be   :  { %1093 = vmatpush.bf16.msra.mxu1 %v1084_v39  ;;  %v845_v54 = vpack.c.bf16 %v837_v62, %v837_v62  ;;  %v844_v60 = vpack.c.bf16 %v835_v33, %v835_v33  ;;  %v341_v13 = vpack.c.bf16 %v2362_v41, %v2362_v41  ;;  %v329_v34 = vsel %vm114_vm1, %v2371_v9, %v328_v45 }
 0x1bf   :  { %1112 = vmatpush.bf16.msra.mxu2 %v1103_v23  ;;  %v830_v53 = vrot.slane %v825_v49, 4  ;;  %v833_v58 = vsel %vm114_vm1, %v825_v49, %v832_v56  ;;  %v327_v35 = vsel %vm114_vm1, %v326_v15, %v2357_v36  ;;  %v339_v17 = vpack.c.bf16 %v329_v34, %v329_v34 }
 0x1c0   :  { %1905 = vmatmul.msk.bf16.vlgmr.msrb.gmra.mxu3 %vm846_vm2, %v340_v30  ;;  %v1198_v61 = vsel %vm1082_vm3, %v844_v60, 0  ;;  %v1217_v22 = vsel %vm1082_vm3, %v845_v54, 0  ;;  %v843_v40 = vpack.c.bf16 %v833_v58, %v833_v58  ;;  %v338_v24 = vpack.c.bf16 %v327_v35, %v327_v35 }
 0x1c1   :  { %1906 = vmatmul.msk.bf16.vlgmr.msra.gmra.mxu0 %vm846_vm2, %v341_v13  ;;  %v831_v6 = vsel %vm114_vm1, %v830_v53, %v813_v26  ;;  %1207 = vmatpush.bf16.msrb.mxu3 %v1198_v61  ;;  %v87_v25 = vlaneseq  ;;  %v2139_v63 = vmov -1e+30  }
 0x1c2   :  { %v842_v41 = vpack.c.bf16 %v831_v6, %v831_v6  ;;  %1226 = vmatpush.bf16.msra.mxu0 %v1217_v22  ;;  %v1179_v36 = vsel %vm1082_vm3, %v843_v40, 0 }
 0x1c3   :  { %v88_v42 = vshrl.u32 %v87_v25, 7  ;;  %v90_v57 = vand.u32 127, %v87_v25 }
 0x1c4   :  { %v1160_v9 = vsel %vm1082_vm3, %v842_v41, 0 }
 0x1c5   :  { %1903 = vmatmul.msk.bf16.vlgmr.msrb.gmra.mxu1 %vm846_vm2, %v338_v24  ;;  %vm91_vm4 = vcmp.le.s32.totalorder %v90_v57, %v88_v42 }
 0x1c6   :  { %1904 = vmatmul.msk.bf16.vlgmr.msrb.gmra.mxu2 %vm846_vm2, %v339_v17  ;;  %1169 = vmatpush.bf16.msrb.mxu1 %v1160_v9  ;;  %v92_v2 = vsel %vm91_vm4, 0.0, %v2139_v63 }
 0x1c7   :  { %1188 = vmatpush.bf16.msrb.mxu2 %v1179_v36 }
 0x22e   :  { %v919_v46 = vpop.f32.mrf.mxu0 }
 0x22f   :  { %v920_v8 = vadd.f32 %v919_v46, %v92_v2 }
 0x231   :  { %v1008_v27 = vsel %vm846_vm2, %v920_v8, -inf }
 0x232   :  { %v862_v4 = vpop.f32.mrf.mxu1 }
 0x233   :  { %v900_v5 = vpop.f32.mrf.mxu3  ;;  %v863_v55 = vadd.f32 %v862_v4, %v92_v2 }
 0x234   :  { %v901_v37 = vadd.f32 %v900_v5, %v92_v2 }
 0x235   :  { %v999_v51 = vsel %vm846_vm2, %v863_v55, -inf }
 0x236   :  { %v921_v32 = vpop.f32.mrf.mxu0  ;;  %v1005_v0 = vsel %vm846_vm2, %v901_v37, -inf  ;;  %1000 = vmax.xlane.f32.xlu2 %v999_v51 }
 0x237   :  { %1006 = vmax.xlane.f32.xlu1 %v1005_v0 }
 0x239   :  { %v881_v59 = vpop.f32.mrf.mxu2 }
 0x23a   :  { %v882_v18 = vadd.f32 %v881_v59, %v92_v2  ;;  %v864_v50 = vpop.f32.mrf.mxu1 }
 0x23b   :  { %v902_v52 = vpop.f32.mrf.mxu3 }
 0x23c   :  { %v1002_v1 = vsel %vm846_vm2, %v882_v18, -inf }
 0x23d   :  { %1003 = vmax.xlane.f32.xlu0 %v1002_v1 }
 0x23e   :  { %v995_v11 = vpop.f32.mrf.mxu0 }
 0x23f   :  { %1009 = vmax.xlane.f32.xlu1 %v1008_v27  ;;  %v996_v48 = vadd.f32 %v995_v11, %v92_v2 }
 0x241   :  { %v883_v10 = vpop.f32.mrf.mxu2  ;;  %v1020_v21 = vsel %vm846_vm2, %v996_v48, -inf }
 0x242   :  { %v938_v14 = vpop.f32.mrf.mxu1 }
 0x243   :  { %v976_v12 = vpop.f32.mrf.mxu3  ;;  %v939_v7 = vadd.f32 %v938_v14, %v92_v2 }
 0x244   :  { %v977_v28 = vadd.f32 %v976_v12, %v92_v2 }
 0x245   :  { %v1011_v16 = vsel %vm846_vm2, %v939_v7, -inf }
 0x246   :  { %v997_v43 = vpop.f32.mrf.mxu0  ;;  %v1017_v19 = vsel %vm846_vm2, %v977_v28, -inf }
 0x247   :  { %1012 = vmax.xlane.f32.xlu1 %v1011_v16  ;;  %1018 = vmax.xlane.f32.xlu2 %v1017_v19 }
 0x249   :  { %v957_v3 = vpop.f32.mrf.mxu2 }
 0x24a   :  { %v958_v31 = vadd.f32 %v957_v3, %v92_v2  ;;  %v940_v29 = vpop.f32.mrf.mxu1 }
 0x24b   :  { %v978_v23 = vpop.f32.mrf.mxu3 }
 0x24c   :  { %v1014_v26 = vsel %vm846_vm2, %v958_v31, -inf }
 0x24d   :  { %1015 = vmax.xlane.f32.xlu0 %v1014_v26 }
 0x24f   :  { %1021 = vmax.xlane.f32.xlu2 %v1020_v21 }
 0x251   :  { %v959_v39 = vpop.f32.mrf.mxu2 }
 0x2a9   :  { %v1001_v47 = vpop.xlane.xlu2 %1000 }
 0x2aa   :  { %v1007_v44 = vpop.xlane.xlu1 %1006  ;;  %v1023_v45 = vsub.f32 %v863_v55, %v1001_v47 }
 0x2ab   :  { %v1025_v15 = vsub.f32 %v901_v37, %v1007_v44 }
 0x2ac   :  { %v1031_v49 = vmul.f32 1.442695, %v1023_v45 }
 0x2ad   :  { %v1035_v62 = vmul.f32 1.442695, %v1025_v15 }
 0x2ae   :  { %2058 = vpow2.f32 %v1031_v49 }
 0x2af   :  { %2060 = vpow2.f32 %v1035_v62 }
 0x2b0   :  { %v1004_v56 = vpop.xlane.xlu0 %1003 }
 0x2b1   :  { %v1024_v30 = vsub.f32 %v882_v18, %v1004_v56 }
 0x2b2   :  { %v1010_v33 = vpop.xlane.xlu1 %1009 }
 0x2b3   :  { %v1033_v54 = vmul.f32 1.442695, %v1024_v30  ;;  %v1026_v60 = vsub.f32 %v920_v8, %v1010_v33 }
 0x2b4   :  { %v2059_v13 = vpop.eup %2058 }
 0x2b5   :  { %2062 = vpow2.f32 %v1033_v54  ;;  %v1037_v53 = vmul.f32 1.442695, %v1026_v60  ;;  %v2061_v58 = vpop.eup %2060  ;;  %v1071_v34 = vpack.c.bf16 %v2059_v13, %v2059_v13  ;;  %v1047_v61 = vsel %vm846_vm2, %v2059_v13, 0.0 }
 0x2b6   :  { %v1073_v35 = vpack.c.bf16 %v2061_v58, %v2061_v58  ;;  %1048 = vadd.xlane.f32.xlu2 %v1047_v61  ;;  %v1053_v0 = vsel %vm846_vm2, %v2061_v58, 0.0 }
 0x2b7   :  { %2064 = vpow2.f32 %v1037_v53  ;;  %1907 = vmatmul.msk.bf16.vlgmr.msra.gmra.mxu1 %vm846_vm2, %v1071_v34 }
 0x2b8   :  { %1909 = vmatmul.msk.bf16.vlgmr.msra.gmra.mxu3 %vm846_vm2, %v1073_v35 }
 0x2ba   :  { %v1013_v6 = vpop.xlane.xlu1 %1012  ;;  %v1019_v22 = vpop.xlane.xlu2 %1018 }
 0x2bb   :  { %v2063_v41 = vpop.eup %2062  ;;  %v1027_v40 = vsub.f32 %v939_v7, %v1013_v6  ;;  %v1029_v24 = vsub.f32 %v977_v28, %v1019_v22 }
 0x2bc   :  { %v1072_v17 = vpack.c.bf16 %v2063_v41, %v2063_v41  ;;  %v1050_v11 = vsel %vm846_vm2, %v2063_v41, 0.0 }
 0x2bd   :  { %v2065_v9 = vpop.eup %2064  ;;  %v1039_v36 = vmul.f32 1.442695, %v1027_v40  ;;  %v1043_v25 = vmul.f32 1.442695, %v1029_v24 }
 0x2be   :  { %v1074_v42 = vpack.c.bf16 %v2065_v9, %v2065_v9  ;;  %1908 = vmatmul.msk.bf16.vlgmr.msra.gmra.mxu2 %vm846_vm2, %v1072_v17  ;;  %v1056_v57 = vsel %vm846_vm2, %v2065_v9, 0.0 }
 0x2bf   :  { %2066 = vpow2.f32 %v1039_v36  ;;  %1057 = vadd.xlane.f32.xlu0 %v1056_v57 }
 0x2c0   :  { %2068 = vpow2.f32 %v1043_v25  ;;  %v1016_v46 = vpop.xlane.xlu0 %1015  ;;  %1910 = vmatmul.msk.bf16.vlgmr.msrb.gmra.mxu0 %vm846_vm2, %v1074_v42 }
 0x2c1   :  { %v1028_v63 = vsub.f32 %v958_v31, %v1016_v46 }
 0x2c2   :  { %v1022_v2 = vpop.xlane.xlu2 %1021 }
 0x2c3   :  { %v1041_v4 = vmul.f32 1.442695, %v1028_v63  ;;  %v1030_v5 = vsub.f32 %v996_v48, %v1022_v2 }
 0x2c5   :  { %v2067_v55 = vpop.eup %2066  ;;  %2070 = vpow2.f32 %v1041_v4  ;;  %v1045_v37 = vmul.f32 1.442695, %v1030_v5 }
 0x2c6   :  { %v2069_v51 = vpop.eup %2068  ;;  %v1075_v32 = vpack.c.bf16 %v2067_v55, %v2067_v55  ;;  %v1059_v59 = vsel %vm846_vm2, %v2067_v55, 0.0 }
 0x2c7   :  { %v1077_v8 = vpack.c.bf16 %v2069_v51, %v2069_v51  ;;  %2072 = vpow2.f32 %v1045_v37  ;;  %1054 = vadd.xlane.f32.xlu0 %v1053_v0  ;;  %1060 = vadd.xlane.f32.xlu1 %v1059_v59  ;;  %v1065_v27 = vsel %vm846_vm2, %v2069_v51, 0.0 }
 0x2c8   :  { %1911 = vmatmul.msk.bf16.vlgmr.msrb.gmra.mxu1 %vm846_vm2, %v1075_v32 }
 0x2c9   :  { %1913 = vmatmul.msk.bf16.vlgmr.msrb.gmra.mxu3 %vm846_vm2, %v1077_v8 }
 0x2cb   :  { %v2071_v18 = vpop.eup %2070 }
 0x2cc   :  { %v1076_v50 = vpack.c.bf16 %v2071_v18, %v2071_v18  ;;  %v1062_v14 = vsel %vm846_vm2, %v2071_v18, 0.0 }
 0x2cd   :  { %v2073_v52 = vpop.eup %2072 }
 0x2ce   :  { %v1078_v1 = vpack.c.bf16 %v2073_v52, %v2073_v52  ;;  %1912 = vmatmul.msk.bf16.vlgmr.msrb.gmra.mxu2 %vm846_vm2, %v1076_v50  ;;  %v1068_v10 = vsel %vm846_vm2, %v2073_v52, 0.0 }
 0x2cf   :  { %1051 = vadd.xlane.f32.xlu0 %v1050_v11  ;;  %1066 = vadd.xlane.f32.xlu1 %v1065_v27 }
 0x2d0   :  { %1069 = vadd.xlane.f32.xlu2 %v1068_v10  ;;  %1914 = vmatmul.msk.bf16.vlgmr.msra.gmra.mxu0 %vm846_vm2, %v1078_v1 }
 0x2d7   :  { %1063 = vadd.xlane.f32.xlu1 %v1062_v14 }
 0x329   :  { %v1049_v28 = vpop.xlane.xlu2 %1048 }
 0x32a   :  { %2074 = vrcp.f32 %v1049_v28 }
 0x330   :  { %v2075_v31 = vpop.eup %2074 }
 0x332   :  { %v1058_v12 = vpop.xlane.xlu0 %1057 }
 0x334   :  { %v1095_v7 = vpop.f32.mrf.mxu1 }
 0x335   :  { %v1240_v23 = vmul.f32 %v2075_v31, %v1095_v7 }
 0x337   :  { %v1250_v62 = vrot.slane %v1240_v23, 4 }
 0x33a   :  { %v1055_v43 = vpop.xlane.xlu0 %1054  ;;  %v1061_v16 = vpop.xlane.xlu1 %1060 }
 0x33b   :  { %2076 = vrcp.f32 %v1055_v43  ;;  %v1133_v19 = vpop.f32.mrf.mxu3 }
 0x33c   :  { %v1097_v3 = vpop.f32.mrf.mxu1  ;;  %2078 = vrcp.f32 %v1058_v12 }
 0x33d   :  { %v1152_v48 = vpop.f32.mrf.mxu0  ;;  %2080 = vrcp.f32 %v1061_v16 }
 0x341   :  { %v2077_v29 = vpop.eup %2076  ;;  %v1114_v26 = vpop.f32.mrf.mxu2 }
 0x342   :  { %v1242_v21 = vmul.f32 %v2077_v29, %v1133_v19  ;;  %v1052_v39 = vpop.xlane.xlu0 %1051  ;;  %v1067_v47 = vpop.xlane.xlu1 %1066 }
 0x343   :  { %2082 = vrcp.f32 %v1052_v39  ;;  %v1070_v45 = vpop.xlane.xlu2 %1069  ;;  %v1135_v15 = vpop.f32.mrf.mxu3 }
 0x344   :  { %v1248_v44 = vrot.slane %v1242_v21, 4  ;;  %v2079_v49 = vpop.eup %2078  ;;  %2084 = vrcp.f32 %v1067_v47  ;;  %v1251_v60 = vsel %vm114_vm1, %v1242_v21, %v1250_v62 }
 0x345   :  { %v1154_v56 = vpop.f32.mrf.mxu0  ;;  %v1171_v30 = vpop.f32.mrf.mxu1  ;;  %v1243_v54 = vmul.f32 %v2079_v49, %v1152_v48  ;;  %2086 = vrcp.f32 %v1070_v45  ;;  %v1259_v61 = vperm.slane %v1251_v60, %v2241_v20 }
 0x346   :  { %v1249_v33 = vsel %vm114_vm1, %v1248_v44, %v1240_v23  ;;  %v2081_v13 = vpop.eup %2080 }
 0x347   :  { %v1255_v58 = vperm.slane %v1249_v33, %v2241_v20  ;;  %v1260_v35 = vrot.slane %v1243_v54, 4  ;;  %v1244_v22 = vmul.f32 %v2081_v13, %v1171_v30  ;;  %v1286_v2 = vrot.slane %v1259_v61, 4 }
 0x349   :  { %v2083_v53 = vpop.eup %2082  ;;  %v1116_v34 = vpop.f32.mrf.mxu2  ;;  %v1274_v25 = vrot.slane %v1255_v58, 4  ;;  %v1306_v5 = vrot.slane %v1244_v22, 4 }
 0x34a   :  { %v1241_v6 = vmul.f32 %v2083_v53, %v1114_v26  ;;  %v1064_v41 = vpop.xlane.xlu1 %1063  ;;  %v2085_v40 = vpop.eup %2084 }
 0x34b   :  { %2088 = vrcp.f32 %v1064_v41  ;;  %v2087_v36 = vpop.eup %2086 }
 0x34c   :  { %v1261_v24 = vsel %vm114_vm1, %v1260_v35, %v1241_v6  ;;  %v1262_v17 = vrot.slane %v1241_v6, 4  ;;  %v1209_v9 = vpop.f32.mrf.mxu3 }
 0x34d   :  { %v1267_v42 = vperm.slane %v1261_v24, %v2241_v20  ;;  %v1246_v57 = vmul.f32 %v2085_v40, %v1209_v9  ;;  %v1173_v46 = vpop.f32.mrf.mxu1  ;;  %v1228_v63 = vpop.f32.mrf.mxu0 }
 0x34e   :  { %v1263_v4 = vsel %vm114_vm1, %v1243_v54, %v1262_v17  ;;  %v1247_v55 = vmul.f32 %v2087_v36, %v1228_v63 }
 0x34f   :  { %v1271_v37 = vperm.slane %v1263_v4, %v2241_v20  ;;  %v1272_v51 = vrot.slane %v1267_v42, 4  ;;  %v1275_v32 = vsel %vm114_vm1, %v1267_v42, %v1274_v25  ;;  %v1304_v0 = vrot.slane %v1246_v57, 4 }
 0x350   :  { %v1283_v59 = vperm.slane %v1275_v32, %v2256_v38  ;;  %v1307_v8 = vsel %vm114_vm1, %v1246_v57, %v1306_v5  ;;  %v1316_v16 = vrot.slane %v1247_v55, 4 }
 0x351   :  { %v2089_v18 = vpop.eup %2088  ;;  %v1273_v50 = vsel %vm114_vm1, %v1272_v51, %v1255_v58  ;;  %v1284_v52 = vrot.slane %v1271_v37, 4  ;;  %v1287_v1 = vsel %vm114_vm1, %v1271_v37, %v1286_v2  ;;  %v1305_v11 = vsel %vm114_vm1, %v1304_v0, %v1244_v22  ;;  %v1190_v27 = vpop.f32.mrf.mxu2 }
 0x352   :  { %v1279_v10 = vperm.slane %v1273_v50, %v2256_v38  ;;  %v1295_v14 = vperm.slane %v1287_v1, %v2256_v38  ;;  %v1298_v12 = vrot.slane %v1283_v59, 4  ;;  %v1311_v7 = vperm.slane %v1305_v11, %v2241_v20 }
 0x353   :  { %v1285_v28 = vsel %vm114_vm1, %v1284_v52, %v1259_v61  ;;  %v1315_v43 = vperm.slane %v1307_v8, %v2241_v20  ;;  %v1245_v19 = vmul.f32 %v2089_v18, %v1190_v27 }
 0x354   :  { %v1299_v3 = vsel %vm114_vm1, 0.0, %v1298_v12  ;;  %v1302_v48 = vrot.slane %v1295_v14, 4  ;;  %v1330_v31 = vrot.slane %v1311_v7, 4  ;;  %v1211_v29 = vpop.f32.mrf.mxu3  ;;  %v1291_v23 = vperm.slane %v1285_v28, %v2256_v38 }
 0x355   :  { %v1365_v26 = vrot.slane %v1299_v3, 4  ;;  %v1342_v21 = vrot.slane %v1315_v43, 4  ;;  %v1317_v39 = vsel %vm114_vm1, %v1316_v16, %v1245_v19  ;;  %v1318_v47 = vrot.slane %v1245_v19, 4  ;;  %v1230_v44 = vpop.f32.mrf.mxu0 }
 0x356   :  { %v1323_v45 = vperm.slane %v1317_v39, %v2241_v20  ;;  %v1296_v15 = vrot.slane %v1279_v10, 4  ;;  %v1300_v49 = vrot.slane %v1291_v23, 4  ;;  %v1303_v62 = vsel %vm114_vm1, 0.0, %v1302_v48 }
 0x357   :  { %v1319_v56 = vsel %vm114_vm1, %v1247_v55, %v1318_v47  ;;  %v1360_v30 = vsel %vm114_vm1, %v1298_v12, %v1279_v10  ;;  %v1371_v33 = vsel %vm114_vm1, %v1302_v48, %v1291_v23  ;;  %v1376_v54 = vrot.slane %v1303_v62, 4 }
 0x358   :  { %v1327_v60 = vperm.slane %v1319_v56, %v2241_v20  ;;  %v1328_v13 = vrot.slane %v1323_v45, 4  ;;  %v1331_v53 = vsel %vm114_vm1, %v1323_v45, %v1330_v31  ;;  %v1297_v58 = vsel %vm114_vm1, 0.0, %v1296_v15 }
 0x359   :  { %v1339_v34 = vperm.slane %v1331_v53, %v2256_v38  ;;  %v1192_v61 = vpop.f32.mrf.mxu2  ;;  %v1301_v35 = vsel %vm114_vm1, 0.0, %v1300_v49  ;;  %v1364_v6 = vperm.slane %v1360_v30, %v2241_v20  ;;  %v1366_v22 = vsel %vm114_vm1, %v1365_v26, %v1297_v58 }
 0x35a   :  { %v1329_v41 = vsel %vm114_vm1, %v1328_v13, %v1311_v7  ;;  %v1340_v40 = vrot.slane %v1327_v60, 4  ;;  %v1343_v24 = vsel %vm114_vm1, %v1327_v60, %v1342_v21  ;;  %v1370_v17 = vperm.slane %v1366_v22, %v2241_v20 }
 0x35b   :  { %v1335_v9 = vperm.slane %v1329_v41, %v2256_v38  ;;  %v1351_v36 = vperm.slane %v1343_v24, %v2256_v38  ;;  %v1354_v25 = vrot.slane %v1339_v34, 4  ;;  %v1375_v42 = vperm.slane %v1371_v33, %v2241_v20 }
 0x35c   :  { %v1341_v57 = vsel %vm114_vm1, %v1340_v40, %v1315_v43  ;;  %v1377_v46 = vsel %vm114_vm1, %v1376_v54, %v1301_v35  ;;  %v1384_v63 = vrot.slane %v1364_v6, 4  ;;  %v1382_v2 = vrot.slane %v1370_v17, 4 }
 0x35d   :  { %v1347_v4 = vperm.slane %v1341_v57, %v2256_v38  ;;  %v1352_v5 = vrot.slane %v1335_v9, 4  ;;  %v1355_v55 = vsel %vm114_vm1, 0.0, %v1354_v25  ;;  %v1358_v37 = vrot.slane %v1351_v36, 4  ;;  %v1970_v57 = vld [vmem:[%s2929_s3 + $0x8] sm:$0xff] }
 0x35e   :  { %v1414_v51 = vsel %vm114_vm1, %v1354_v25, %v1335_v9  ;;  %v1419_v32 = vrot.slane %v1355_v55, 4  ;;  %v1381_v0 = vperm.slane %v1377_v46, %v2241_v20  ;;  %v1385_v59 = vsel %vm114_vm1, %v1370_v17, %v1384_v63  ;;  %1530 = vmatpush.bf16.msra.mxu1 %v1970_v57  ;;  %v1969_v46 = vld [vmem:[%s2929_s3] sm:$0xff] }
 0x35f   :  { %v1353_v8 = vsel %vm114_vm1, 0.0, %v1352_v5  ;;  %v1356_v18 = vrot.slane %v1347_v4, 4  ;;  %v1359_v50 = vsel %vm114_vm1, 0.0, %v1358_v37  ;;  %v1418_v52 = vperm.slane %v1414_v51, %v2241_v20 }
 0x360   :  { %v1430_v1 = vrot.slane %v1359_v50, 4  ;;  %v1393_v11 = vperm.slane %v1385_v59, %v2256_v38  ;;  %v1396_v27 = vrot.slane %v1375_v42, 4  ;;  %v1420_v10 = vsel %vm114_vm1, %v1419_v32, %v1353_v8 }
 0x361   :  { %v1357_v14 = vsel %vm114_vm1, 0.0, %v1356_v18  ;;  %v1424_v12 = vperm.slane %v1420_v10, %v2241_v20  ;;  %v1425_v7 = vsel %vm114_vm1, %v1358_v37, %v1347_v4  ;;  %v1438_v28 = vrot.slane %v1418_v52, 4 }
 0x362   :  { %v1397_v43 = vsel %vm114_vm1, %v1381_v0, %v1396_v27  ;;  %v1429_v16 = vperm.slane %v1425_v7, %v2241_v20  ;;  %v1431_v19 = vsel %vm114_vm1, %v1430_v1, %v1357_v14  ;;  %v1383_v29 = vsel %vm114_vm1, %v1382_v2, %v1364_v6  ;;  %1531 = vmatpush.bf16.msra.mxu1 %v1969_v46  ;;  %v2051_v27 = vld [vmem:[%s2930_s4] ss:$0 sm:$0xff] }
 0x363   :  { %v1405_v3 = vperm.slane %v1397_v43, %v2256_v38  ;;  %v1435_v48 = vperm.slane %v1431_v19, %v2241_v20  ;;  %v1439_v31 = vsel %vm114_vm1, %v1424_v12, %v1438_v28  ;;  %v1389_v21 = vperm.slane %v1383_v29, %v2256_v38  ;;  %v2105_v19 = vld [vmem:[%s2926_s0 + $0x8] sm:$0xff] }
 0x364   :  { %v1447_v23 = vperm.slane %v1439_v31, %v2256_v38  ;;  %v1450_v26 = vrot.slane %v1429_v16, 4  ;;  %v1394_v39 = vrot.slane %v1381_v0, 4  ;;  %v1412_v47 = vrot.slane %v1393_v11, 4 }
 0x365   :  { %v1436_v44 = vrot.slane %v1424_v12, 4  ;;  %v1448_v45 = vrot.slane %v1435_v48, 4  ;;  %v1410_v56 = vrot.slane %v1405_v3, 4  ;;  %v1408_v54 = vrot.slane %v1389_v21, 4  ;;  %v2104_v12 = vld [vmem:[%s2926_s0] sm:$0xff] }
 0x366   :  { %v1451_v15 = vsel %vm114_vm1, %v1435_v48, %v1450_v26  ;;  %v1466_v49 = vrot.slane %v1447_v23, 4  ;;  %v1395_v62 = vsel %vm114_vm1, %v1394_v39, %v1375_v42  ;;  %v1413_v53 = vsel %vm114_vm1, %v1405_v3, %v1412_v47 }
 0x367   :  { %v1459_v20 = vperm.slane %v1451_v15, %v2256_v38  ;;  %v1401_v30 = vperm.slane %v1395_v62, %v2256_v38  ;;  %v1437_v33 = vsel %vm114_vm1, %v1436_v44, %v1418_v52  ;;  %v1449_v13 = vsel %vm114_vm1, %v1448_v45, %v1429_v16 }
 0x368   :  { %v1443_v60 = vperm.slane %v1437_v33, %v2256_v38  ;;  %v1455_v6 = vperm.slane %v1449_v13, %v2256_v38  ;;  %v1411_v41 = vsel %vm114_vm1, %v1410_v56, %v1393_v11  ;;  %v2143_v31 = vmov 32.0  }
 0x369   :  { %v1467_v58 = vsel %vm114_vm1, %v1459_v20, %v1466_v49  ;;  %v1464_v34 = vrot.slane %v1459_v20, 4  ;;  %v1406_v61 = vrot.slane %v1401_v30, 4  ;;  %v1409_v9 = vsel %vm114_vm1, %v1401_v30, %v1408_v54 }
 0x36a   :  { %v2045_v35 = vpack.i.bf16 %v1467_v58, %v1413_v53  ;;  %v1462_v22 = vrot.slane %v1443_v60, 4  ;;  %v1460_v36 = vrot.slane %v1455_v6, 4  ;;  %2090 = vrcp.f32 %v2143_v31  ;;  %v1972_v58 = vld [vmem:[%s2935_s9 + $0x8] sm:$0xff] }
 0x36b   :  { %v1465_v40 = vsel %vm114_vm1, %v1464_v34, %v1447_v23  ;;  %v1407_v24 = vsel %vm114_vm1, %v1406_v61, %v1389_v21  ;;  %1633 = vmatpush.bf16.msra.mxu2 %v1972_v58  ;;  %v1971_v34 = vld [vmem:[%s2935_s9] sm:$0xff] }
 0x36c   :  { %2046 = vrot.lane.b32.xlu1 %v2045_v35, %s2140_s21  ;;  %v2040_v17 = vpack.i.bf16 %v1465_v40, %v1411_v41  ;;  %v1463_v25 = vsel %vm114_vm1, %v1455_v6, %v1462_v22  ;;  %v1461_v38 = vsel %vm114_vm1, %v1460_v36, %v1443_v60 }
 0x36d   :  { %v2035_v42 = vpack.i.bf16 %v1463_v25, %v1409_v9 }
 0x36e   :  { %2041 = vrot.lane.b32.xlu0 %v2040_v17, %s2141_s22 }
 0x36f   :  { %2036 = vrot.lane.b32.xlu2 %v2035_v42, %s2142_s23  ;;  %1634 = vmatpush.bf16.msra.mxu2 %v1971_v34  ;;  %v1977_v34 = vld [vmem:[%s2937_s11 + $0x20] sm:$0xff] }
 0x370   :  { %v2091_v29 = vpop.eup %2090 }
 0x371   :  { %v1549_v23 = vmul.f32 32.0, %v2091_v29  ;;  %vm1553_vm7 = vweird.f32 %v2091_v29 }
 0x373   :  { %v1550_v26 = vsub.f32 1.0, %v1549_v23 }
 0x375   :  { %v1551_v21 = vmul.f32 %v2091_v29, %v1550_v26 }
 0x377   :  { %v1552_v39 = vadd.f32 %v2091_v29, %v1551_v21  ;;  %v1979_v21 = vld [vmem:[%s2937_s11 + $0x30] sm:$0xff] }
 0x379   :  { %v2829_v47 = vsel %vm1553_vm7, %v2091_v29, %v1552_v39 }
 0x3c9   :  { %v2037_v63 = vpop.permute.xlu2 %2036 }
 0x3ca   :  { %v2039_v2 = vunpack.i.h.bf16 %v2037_v63  ;;  %v2038_v4 = vunpack.i.l.bf16 %v2037_v63  ;;  %v2052_v63 = vld [vmem:[%s2931_s5] ss:$0 sm:$0xff]  ;;  %s1876_s5 = sshll.u32 %s2144_s19, 4  ;;  %s1877_s5 = int_to_ptr.vmem [resolvable:$true] %s1876_s5 }
 0x3cc   :  { %v1492_v32 = vsel %vm846_vm2, %v1407_v24, %v2038_v4  ;;  %v1493_v0 = vsel %vm846_vm2, %v1461_v38, %v2039_v2 }
 0x3de   :  { %v2047_v5 = vpop.permute.xlu1 %2046 }
 0x3df   :  { %v2049_v59 = vunpack.i.h.bf16 %v2047_v5  ;;  %v2048_v8 = vunpack.i.l.bf16 %v2047_v5 }
 0x3e0   :  { %v2042_v55 = vpop.permute.xlu0 %2041 }
 0x3e1   :  { %v2044_v37 = vunpack.i.h.bf16 %v2042_v55  ;;  %v2043_v51 = vunpack.i.l.bf16 %v2042_v55  ;;  %v2053_v55 = vld [vmem:[%s2932_s6] ss:$0 sm:$0xff] }
 0x3e3   :  { %v1495_v18 = vsel %vm1494_vm5, %v1492_v32, %v2043_v51  ;;  %v1496_v50 = vsel %vm1494_vm5, %v1493_v0, %v2044_v37 }
 0x3e4   :  { %v1498_v52 = vsel %vm1497_vm6, %v1495_v18, %v2048_v8  ;;  %v1499_v1 = vsel %vm1497_vm6, %v1496_v50, %v2049_v59  ;;  %v2054_v18 = vld [vmem:[%s2936_s10] ss:$0 sm:$0xff] }
 0x3e5   :  { %v1500_v11 = vpack.c.bf16 %v1499_v1, %v1498_v52 }
 0x3e7   :  { %1923 = vmatmul.msk.bf16.vlgmr.msra.gmra.mxu1 %vm69_vm0, %v1500_v11 }
 0x464   :  { %v1533_v10 = vpop.f32.mrf.mxu1 }
 0x465   :  { %v1534_v14 = vadd.f32 %v2051_v27, %v1533_v10 }
 0x467   :  { %v1538_v7 = vadd.f32 %v2104_v12, %v1534_v14 }
 0x469   :  { %v1542_v28 = vsel %vm69_vm0, %v1538_v7, 0.0 }
 0x46a   :  { %1543 = vadd.xlane.f32.xlu0 %v1542_v28 }
 0x46c   :  { %v1535_v43 = vpop.f32.mrf.mxu1 }
 0x46d   :  { %v1536_v16 = vadd.f32 %v2051_v27, %v1535_v43 }
 0x46f   :  { %v1539_v3 = vadd.f32 %v2105_v19, %v1536_v16 }
 0x471   :  { %v1545_v48 = vsel %vm69_vm0, %v1539_v3, 0.0 }
 0x472   :  { %1546 = vadd.xlane.f32.xlu2 %v1545_v48 }
 0x4dd   :  { %v1544_v44 = vpop.xlane.xlu0 %1543 }
 0x4de   :  { %v1555_v45 = vmul.f32 %v2829_v47, %v1544_v44 }
 0x4e0   :  { %v1557_v15 = vsub.f32 %v1538_v7, %v1555_v45 }
 0x4e2   :  { %v1559_v49 = vmul.f32 %v1557_v15, %v1557_v15 }
 0x4e4   :  { %v1561_v62 = vsel %vm69_vm0, %v1559_v49, 0.0 }
 0x4e5   :  { %v1547_v20 = vpop.xlane.xlu2 %1546  ;;  %1562 = vadd.xlane.f32.xlu1 %v1561_v62 }
 0x4e6   :  { %v1556_v56 = vmul.f32 %v2829_v47, %v1547_v20 }
 0x4e8   :  { %v1558_v30 = vsub.f32 %v1539_v3, %v1556_v56  ;;  %v1980_v3 = vld [vmem:[%s2937_s11 + $0x38] sm:$0xff]  ;;  %v1978_v56 = vld [vmem:[%s2937_s11 + $0x28] sm:$0xff] }
 0x4e9   :  { %1798 = vmatpush.bf16.msra.mxu3 %v1980_v3 }
 0x4ea   :  { %v1560_v33 = vmul.f32 %v1558_v30, %v1558_v30 }
 0x4ec   :  { %v1564_v54 = vsel %vm69_vm0, %v1560_v33, 0.0 }
 0x4ed   :  { %1565 = vadd.xlane.f32.xlu0 %v1564_v54  ;;  %1799 = vmatpush.bf16.msra.mxu3 %v1979_v21 }
 0x4f1   :  { %1800 = vmatpush.bf16.msra.mxu3 %v1978_v56 }
 0x4f5   :  { %1801 = vmatpush.bf16.msra.mxu3 %v1977_v34 }
 0x558   :  { %v1563_v60 = vpop.xlane.xlu1 %1562 }
 0x559   :  { %v1567_v13 = vmul.f32 %v1563_v60, %v2829_v47 }
 0x55b   :  { %v1569_v53 = vadd.f32 1e-05, %v1567_v13 }
 0x55d   :  { %2092 = vrsqrt.f32 %v1569_v53  ;;  %vm1577_vm9 = vweird.f32 %v1569_v53 }
 0x560   :  { %v1566_v61 = vpop.xlane.xlu0 %1565 }
 0x561   :  { %v1568_v35 = vmul.f32 %v1566_v61, %v2829_v47 }
 0x563   :  { %v2093_v6 = vpop.eup %2092  ;;  %v1570_v22 = vadd.f32 1e-05, %v1568_v35 }
 0x564   :  { %v1572_v41 = vmul.f32 %v2093_v6, %v1569_v53  ;;  %vm1578_vm8 = vweird.f32 %v2093_v6 }
 0x565   :  { %2094 = vrsqrt.f32 %v1570_v22  ;;  %vm1579_vm10 = vmor %vm1577_vm9, %vm1578_vm8  ;;  %vm1587_vm12 = vweird.f32 %v1570_v22 }
 0x566   :  { %v1573_v40 = vmul.f32 %v2093_v6, %v1572_v41 }
 0x568   :  { %v1574_v24 = vmul.f32 0.5, %v1573_v40  ;;  %v1976_v40 = vld [vmem:[%s2937_s11 + $0x18] sm:$0xff] }
 0x569   :  { %1802 = vmatpush.bf16.msra.mxu3 %v1976_v40 }
 0x56a   :  { %v1575_v17 = vsub.f32 1.5, %v1574_v24 }
 0x56b   :  { %v2095_v9 = vpop.eup %2094 }
 0x56c   :  { %v1576_v36 = vmul.f32 %v2093_v6, %v1575_v17  ;;  %v1582_v25 = vmul.f32 %v2095_v9, %v1570_v22  ;;  %vm1588_vm11 = vweird.f32 %v2095_v9 }
 0x56d   :  { %vm1589_vm13 = vmor %vm1587_vm12, %vm1588_vm11 }
 0x56e   :  { %v1583_v42 = vmul.f32 %v2095_v9, %v1582_v25  ;;  %v1580_v38 = vsel %vm1579_vm10, %v2093_v6, %v1576_v36 }
 0x56f   :  { %v1591_v2 = vmul.f32 %v1580_v38, %v1557_v15 }
 0x570   :  { %v1584_v57 = vmul.f32 0.5, %v1583_v42 }
 0x571   :  { %v1596_v37 = vmul.f32 %v2052_v63, %v1591_v2 }
 0x572   :  { %v1585_v46 = vsub.f32 1.5, %v1584_v57 }
 0x573   :  { %v2849_v0 = vadd.f32 %v2053_v55, %v1596_v37  ;;  %v1973_v37 = vld [vmem:[%s2937_s11] sm:$0xff] }
 0x574   :  { %v1586_v4 = vmul.f32 %v2095_v9, %v1585_v46  ;;  %v1974_v46 = vld [vmem:[%s2937_s11 + $0x8] sm:$0xff] }
 0x576   :  { %v1590_v5 = vsel %vm1589_vm13, %v2095_v9, %v1586_v4  ;;  %v1975_v9 = vld [vmem:[%s2937_s11 + $0x10] sm:$0xff] }
 0x577   :  { %v1592_v51 = vmul.f32 %v1590_v5, %v1558_v30  ;;  %1803 = vmatpush.bf16.msra.mxu3 %v1975_v9 }
 0x579   :  { %v1597_v32 = vmul.f32 %v2052_v63, %v1592_v51 }
 0x57b   :  { %v2851_v59 = vadd.f32 %v2053_v55, %v1597_v32  ;;  %1804 = vmatpush.bf16.msra.mxu3 %v1974_v46 }
 0x57d   :  { %v1603_v8 = vpack.c.bf16 %v2851_v59, %v2849_v0 }
 0x57f   :  { %1932 = vmatmul.msk.bf16.vlgmr.msra.gmra.mxu2 %vm69_vm0, %v1603_v8  ;;  %1805 = vmatpush.bf16.msra.mxu3 %v1973_v37 }
 0x602   :  { %v1636_v50 = vpop.f32.mrf.mxu2 }
 0x603   :  { %v2859_v52 = vadd.f32 %v2054_v18, %v1636_v50 }
 0x605   :  { %v2862_v1 = vmul.f32 0.70710677, %v2859_v52  ;;  %v1641_v56 = vmul.f32 0.5, %v2859_v52 }
 0x607   :  { %v1645_v11 = vmul.f32 %v2862_v1, %v2862_v1 }
 0x609   :  { %v1646_v27 = vmin.f32 %v1645_v11, 16.0 }
 0x60a   :  { %v1638_v10 = vpop.f32.mrf.mxu2 }
 0x60b   :  { %v1647_v14 = vmul.f32 2.1237322e-06, %v1646_v27  ;;  %v1658_v12 = vmul.f32 3.8918573e-05, %v1646_v27  ;;  %v2866_v7 = vadd.f32 %v2054_v18, %v1638_v10 }
 0x60d   :  { %v1648_v28 = vadd.f32 0.00028619796, %v1647_v14  ;;  %v1659_v43 = vadd.f32 0.001143296, %v1658_v12  ;;  %v2869_v16 = vmul.f32 0.70710677, %v2866_v7 }
 0x60f   :  { %v1660_v19 = vmul.f32 %v1659_v43, %v1646_v27  ;;  %v1685_v48 = vmul.f32 %v2869_v16, %v2869_v16  ;;  %v1649_v31 = vmul.f32 %v1648_v28, %v1646_v27 }
 0x611   :  { %v1661_v29 = vadd.f32 0.014752088, %v1660_v19  ;;  %v1686_v23 = vmin.f32 %v1685_v48, 16.0  ;;  %v1650_v45 = vadd.f32 0.0036580483, %v1649_v31 }
 0x613   :  { %v1662_v26 = vmul.f32 %v1661_v29, %v1646_v27  ;;  %v1687_v39 = vmul.f32 2.1237322e-06, %v1686_v23  ;;  %v1698_v44 = vmul.f32 3.8918573e-05, %v1686_v23  ;;  %v1651_v54 = vmul.f32 %v1650_v45, %v1646_v27 }
 0x615   :  { %v1663_v15 = vadd.f32 0.112945676, %v1662_v26  ;;  %v1688_v49 = vadd.f32 0.00028619796, %v1687_v39  ;;  %v1699_v62 = vadd.f32 0.001143296, %v1698_v44 }
 0x616   :  { %v1652_v35 = vadd.f32 0.05243302, %v1651_v54 }
 0x617   :  { %v1664_v20 = vmul.f32 %v1663_v15, %v1646_v27  ;;  %v1689_v30 = vmul.f32 %v1688_v49, %v1686_v23  ;;  %v1700_v33 = vmul.f32 %v1699_v62, %v1686_v23 }
 0x618   :  { %v1653_v17 = vmul.f32 %v1652_v35, %v1646_v27 }
 0x619   :  { %v1665_v60 = vadd.f32 0.4994258, %v1664_v20  ;;  %v1690_v13 = vadd.f32 0.0036580483, %v1689_v30  ;;  %v1701_v53 = vadd.f32 0.014752088, %v1700_v33 }
 0x61a   :  { %v1654_v57 = vadd.f32 0.18741608, %v1653_v17  ;;  %v1642_v30 = vmul.f32 0.5, %v2866_v7 }
 0x61b   :  { %v1666_v58 = vmul.f32 %v1665_v60, %v1646_v27  ;;  %v1702_v61 = vmul.f32 %v1701_v53, %v1686_v23  ;;  %v1691_v22 = vmul.f32 %v1690_v13, %v1686_v23  ;;  %v2055_v53 = vld [vmem:[%s2938_s12] ss:$0 sm:$0xff] }
 0x61c   :  { %v1655_v55 = vmul.f32 %v1654_v57, %v1646_v27 }
 0x61d   :  { %v1667_v6 = vadd.f32 1.0, %v1666_v58  ;;  %v1703_v41 = vadd.f32 0.112945676, %v1702_v61  ;;  %v1692_v36 = vadd.f32 0.05243302, %v1691_v22 }
 0x61e   :  { %v1656_v11 = vadd.f32 1.1283791, %v1655_v55 }
 0x61f   :  { %2096 = vrcp.f32 %v1667_v6  ;;  %v1704_v24 = vmul.f32 %v1703_v41, %v1686_v23  ;;  %v1693_v2 = vmul.f32 %v1692_v36, %v1686_v23  ;;  %v1679_v32 = vand.u32 2147483648, %v1667_v6 }
 0x620   :  { %v1677_v18 = vand.u32 2147483647, %v1667_v6  ;;  %vm1673_vm15 = vweird.f32 %v1667_v6  ;;  %v1657_v19 = vmul.f32 %v1656_v11, %v2862_v1 }
 0x621   :  { %v1705_v25 = vadd.f32 0.4994258, %v1704_v24  ;;  %v1694_v8 = vadd.f32 0.18741608, %v1693_v2  ;;  %v1680_v12 = vor.u32 1.1754944e-38, %v1679_v32 }
 0x622   :  { %vm1678_vm2 = vcmp.eq.f32.partialorder %v1677_v18, 8.507059e+37 }
 0x623   :  { %v1706_v42 = vmul.f32 %v1705_v25, %v1686_v23  ;;  %v1695_v28 = vmul.f32 %v1694_v8, %v1686_v23 }
 0x625   :  { %v2097_v38 = vpop.eup %2096  ;;  %v1707_v4 = vadd.f32 1.0, %v1706_v42  ;;  %v1696_v48 = vadd.f32 1.1283791, %v1695_v28 }
 0x626   :  { %v1669_v63 = vmul.f32 %v2097_v38, %v1667_v6  ;;  %vm1674_vm14 = vweird.f32 %v2097_v38 }
 0x627   :  { %2098 = vrcp.f32 %v1707_v4  ;;  %vm1675_vm1 = vmor %vm1673_vm15, %vm1674_vm14  ;;  %v1719_v31 = vand.u32 2147483648, %v1707_v4  ;;  %v1717_v21 = vand.u32 2147483647, %v1707_v4  ;;  %vm1713_vm4 = vweird.f32 %v1707_v4 }
 0x628   :  { %v1670_v5 = vsub.f32 1.0, %v1669_v63  ;;  %v1697_v15 = vmul.f32 %v1696_v48, %v2869_v16 }
 0x629   :  { %v1720_v44 = vor.u32 1.1754944e-38, %v1719_v31  ;;  %vm1718_vm6 = vcmp.eq.f32.partialorder %v1717_v21, 8.507059e+37 }
 0x62a   :  { %v1671_v51 = vmul.f32 %v2097_v38, %v1670_v5 }
 0x62c   :  { %v1672_v50 = vadd.f32 %v2097_v38, %v1671_v51 }
 0x62d   :  { %v2099_v10 = vpop.eup %2098 }
 0x62e   :  { %v1676_v14 = vsel %vm1675_vm1, %v2097_v38, %v1672_v50  ;;  %v1709_v27 = vmul.f32 %v2099_v10, %v1707_v4  ;;  %vm1714_vm3 = vweird.f32 %v2099_v10  ;;  %v2056_v50 = vld [vmem:[%s2933_s7] ss:$0 sm:$0xff] }
 0x62f   :  { %v1681_v43 = vsel %vm1678_vm2, %v1680_v12, %v1676_v14  ;;  %vm1715_vm5 = vmor %vm1713_vm4, %vm1714_vm3  ;;  %v2057_v14 = vld [vmem:[%s2934_s8] ss:$0 sm:$0xff]  ;;  %s2145_s8 = smov 128  }
 0x630   :  { %v1710_v3 = vsub.f32 1.0, %v1709_v27  ;;  %v1682_v29 = vmul.f32 %v1681_v43, %v1657_v19 }
 0x632   :  { %v1711_v26 = vmul.f32 %v2099_v10, %v1710_v3  ;;  %v1933_v45 = vclamps-f32 %v1682_v29, 1.0 }
 0x634   :  { %v1712_v39 = vadd.f32 %v2099_v10, %v1711_v26  ;;  %v1725_v20 = vadd.f32 1.0, %v1933_v45 }
 0x636   :  { %v1716_v23 = vsel %vm1715_vm5, %v2099_v10, %v1712_v39  ;;  %v1727_v54 = vmul.f32 %v1725_v20, %v1641_v56 }
 0x637   :  { %v1721_v49 = vsel %vm1718_vm6, %v1720_v44, %v1716_v23 }
 0x638   :  { %v1722_v62 = vmul.f32 %v1721_v49, %v1697_v15 }
 0x63a   :  { %v1934_v1 = vclamps-f32 %v1722_v62, 1.0 }
 0x63c   :  { %v1726_v33 = vadd.f32 1.0, %v1934_v1 }
 0x63e   :  { %v1728_v60 = vmul.f32 %v1726_v33, %v1642_v30 }
 0x640   :  { %v1729_v13 = vpack.c.bf16 %v1728_v60, %v1727_v54 }
 0x642   :  { %1806 = vmatmul.bf16.vlgmr.msra.gmra.mxu3 %v1729_v13 }
 0x6c5   :  { %v1807_v16 = vpop.f32.mrf.mxu3 }
 0x6c6   :  { %v1808_v58 = vadd.f32 %v2055_v53, %v1807_v16 }
 0x6c8   :  { %v1812_v34 = vadd.f32 %v1808_v58, %v2849_v0 }
 0x6ca   :  { %v1816_v61 = vsel %vm69_vm0, %v1812_v34, 0.0 }
 0x6cb   :  { %1817 = vadd.xlane.f32.xlu2 %v1816_v61 }
 0x6cd   :  { %v1809_v35 = vpop.f32.mrf.mxu3 }
 0x6ce   :  { %v1810_v52 = vadd.f32 %v2055_v53, %v1809_v35 }
 0x6d0   :  { %v1813_v7 = vadd.f32 %v1810_v52, %v2851_v59 }
 0x6d2   :  { %v1819_v6 = vsel %vm69_vm0, %v1813_v7, 0.0 }
 0x6d3   :  { %1820 = vadd.xlane.f32.xlu1 %v1819_v6 }
 0x73e   :  { %v1818_v22 = vpop.xlane.xlu2 %1817 }
 0x73f   :  { %v1822_v41 = vmul.f32 %v1818_v22, %v2829_v47 }
 0x741   :  { %v1824_v40 = vsub.f32 %v1812_v34, %v1822_v41 }
 0x743   :  { %v1826_v24 = vmul.f32 %v1824_v40, %v1824_v40 }
 0x745   :  { %v1828_v17 = vsel %vm69_vm0, %v1826_v24, 0.0 }
 0x746   :  { %v1821_v9 = vpop.xlane.xlu1 %1820  ;;  %1829 = vadd.xlane.f32.xlu0 %v1828_v17 }
 0x747   :  { %v1823_v0 = vmul.f32 %v1821_v9, %v2829_v47 }
 0x749   :  { %v1825_v36 = vsub.f32 %v1813_v7, %v1823_v0 }
 0x74b   :  { %v1827_v25 = vmul.f32 %v1825_v36, %v1825_v36 }
 0x74d   :  { %v1831_v42 = vsel %vm69_vm0, %v1827_v25, 0.0 }
 0x74e   :  { %1832 = vadd.xlane.f32.xlu2 %v1831_v42 }
 0x7b9   :  { %v1830_v59 = vpop.xlane.xlu0 %1829 }
 0x7ba   :  { %v1834_v38 = vmul.f32 %v1830_v59, %v2829_v47 }
 0x7bc   :  { %v1836_v57 = vadd.f32 1e-05, %v1834_v38 }
 0x7be   :  { %2100 = vrsqrt.f32 %v1836_v57  ;;  %vm1844_vm8 = vweird.f32 %v1836_v57 }
 0x7c1   :  { %v1833_v46 = vpop.xlane.xlu2 %1832 }
 0x7c2   :  { %v1835_v63 = vmul.f32 %v1833_v46, %v2829_v47 }
 0x7c4   :  { %v2101_v2 = vpop.eup %2100  ;;  %v1837_v4 = vadd.f32 1e-05, %v1835_v63 }
 0x7c5   :  { %v1839_v5 = vmul.f32 %v2101_v2, %v1836_v57  ;;  %vm1845_vm7 = vweird.f32 %v2101_v2 }
 0x7c6   :  { %2102 = vrsqrt.f32 %v1837_v4  ;;  %vm1846_vm9 = vmor %vm1844_vm8, %vm1845_vm7  ;;  %vm1854_vm11 = vweird.f32 %v1837_v4 }
 0x7c7   :  { %v1840_v55 = vmul.f32 %v2101_v2, %v1839_v5 }
 0x7c9   :  { %v1841_v37 = vmul.f32 0.5, %v1840_v55 }
 0x7cb   :  { %v1842_v51 = vsub.f32 1.5, %v1841_v37 }
 0x7cc   :  { %v2103_v32 = vpop.eup %2102 }
 0x7cd   :  { %v1843_v8 = vmul.f32 %v2101_v2, %v1842_v51  ;;  %v1849_v18 = vmul.f32 %v2103_v32, %v1837_v4  ;;  %vm1855_vm10 = vweird.f32 %v2103_v32 }
 0x7ce   :  { %vm1856_vm12 = vmor %vm1854_vm11, %vm1855_vm10 }
 0x7cf   :  { %v1847_v11 = vsel %vm1846_vm9, %v2101_v2, %v1843_v8  ;;  %v1850_v10 = vmul.f32 %v2103_v32, %v1849_v18 }
 0x7d0   :  { %v1858_v47 = vmul.f32 %v1847_v11, %v1824_v40 }
 0x7d1   :  { %v1851_v12 = vmul.f32 0.5, %v1850_v10 }
 0x7d2   :  { %v1863_v28 = vmul.f32 %v2056_v50, %v1858_v47 }
 0x7d3   :  { %v1852_v27 = vsub.f32 1.5, %v1851_v12 }
 0x7d4   :  { %v1868_v43 = vadd.f32 %v2057_v14, %v1863_v28 }
 0x7d5   :  { %v1853_v19 = vmul.f32 %v2103_v32, %v1852_v27 }
 0x7d6   :  { %1870 = vst.msk [vmem:[#allocation2] sm:$0xff] %vm69_vm0, %v1868_v43 }
 0x7d7   :  { %v1857_v3 = vsel %vm1856_vm12, %v2103_v32, %v1853_v19 }
 0x7d8   :  { %v1859_v48 = vmul.f32 %v1857_v3, %v1825_v36 }
 0x7da   :  { %v1864_v31 = vmul.f32 %v2056_v50, %v1859_v48 }
 0x7dc   :  { %v1869_v29 = vadd.f32 %v2057_v14, %v1864_v31 }
 0x7de   :  { %1871 = vst.msk [vmem:[#allocation2 + $0x8] sm:$0xff] %vm69_vm0, %v1869_v29 }
 0x7df   :  { %1884 = dma.vmem_to_hbm [thread:$0]  %s1877_s5, 256, %s1879_s18, [#allocation3], %s2145_s8, %s2145_s8, %s2142_s23  }
 0x7e0   :  { %2130 = dma.done.wait [#allocation3], 256  }
 0x7e1   :  { %2131 = vsyncadd [#allocation3], 4294967040 }
 0x7e2   :  { %1889 = vsyncpa [#allocation3], 1 }

// kernel: tpu_custom_call.1
= control target key start
LH: loop header
LB: loop body
LE: loop exit
PB: predicated region body
PF: predicated region fallthrough
CT: control target
= control target key end

     0   :  { %s1501_s0 = inlined_call_operand.vmem [shape: f32[2,8,32], index: 0, kind: input, shape index: {}]   ;;  %s1502_s1 = inlined_call_operand.vmem [shape: bf16[32,96], index: 1, kind: input, shape index: {}]   ;;  %s1503_s2 = inlined_call_operand.vmem [shape: f32[1,96], index: 2, kind: input, shape index: {}]   ;;  %s1504_s3 = inlined_call_operand.vmem [shape: bf16[32,32], index: 3, kind: input, shape index: {}]   ;;  %s1505_s4 = inlined_call_operand.vmem [shape: f32[1,32], index: 4, kind: input, shape index: {}]   ;;  %s1506_s5 = inlined_call_operand.vmem [shape: f32[1,32], index: 5, kind: input, shape index: {}]   ;;  %s1507_s6 = inlined_call_operand.vmem [shape: f32[1,32], index: 6, kind: input, shape index: {}]   ;;  %s1508_s7 = inlined_call_operand.vmem [shape: f32[1,32], index: 7, kind: input, shape index: {}]   ;;  %s1509_s8 = inlined_call_operand.vmem [shape: f32[1,32], index: 8, kind: input, shape index: {}]   ;;  %s1510_s9 = inlined_call_operand.vmem [shape: bf16[32,128], index: 9, kind: input, shape index: {}]   ;;  %s1511_s10 = inlined_call_operand.vmem [shape: f32[1,128], index: 10, kind: input, shape index: {}]   ;;  %s1512_s11 = inlined_call_operand.vmem [shape: bf16[128,32], index: 11, kind: input, shape index: {}]   ;;  %s1513_s12 = inlined_call_operand.vmem [shape: f32[1,32], index: 12, kind: input, shape index: {}]   ;;  %s1514_s13 = inlined_call_operand.hbm [shape: f32[2,8,32], index: 13, kind: output, shape index: {}]  }
   0x1   :  { %v1047_v0 = vld [vmem:[%s1502_s1 + $0x8] sm:$0xff]  ;;  %v1046_v1 = vld [vmem:[%s1502_s1] sm:$0xff] }
   0x2   :  { %v1270_v2 = vld [vmem:[%s1501_s0] sm:$0xff]  ;;  %v1275_v3 = vld [vmem:[%s1501_s0 + $0x8] sm:$0xff]  ;;  %79 = vmatpush.bf16.msra.mxu0 %v1047_v0 }
   0x3   :  { %18 = vsyncpa [#allocation3], 0  ;;  %v48_v4 = vpack.c.bf16 %v1275_v3, %v1270_v2  ;;  %vm69_vm0 = vcmask 261120   ;;  %v1093_v5 = vld [vmem:[%s1503_s2] ss:$0 sm:$0xff]  ;;  %s1173_s0 = smov 88   ;;  %v87_v42 = vlaneseq }
   0x4   :  { %s1174_s17 = smov 96   ;;  %s1175_s2 = smov 120   ;;  %vm100_vm1 = vcmask 64512   ;;  %vm169_vm2 = vcmask 1043456   ;;  %v1182_v45 = vmov -1e+30  }
   0x5   :  { %s1176_s18 = smov 80   ;;  %s1177_s19 = smov 112   ;;  %v88_v43 = vshrl.u32 %v87_v42, 7  ;;  %v90_v44 = vand.u32 127, %v87_v42  ;;  %vm573_vm4 = vcmask 130048   ;;  %vm576_vm5 = vcmask 195584  }
   0x6   :  { %80 = vmatpush.bf16.msra.mxu0 %v1046_v1  ;;  %s1178_s20 = smov 72   ;;  %s1179_s21 = smov 104  }
   0x7   :  { %s1180_s22 = smov 56   ;;  %s1181_s23 = smov 64   ;;  %vm91_vm3 = vcmp.le.s32.totalorder %v90_v44, %v88_v43 }
   0x8   :  { %v92_v46 = vsel %vm91_vm3, 0.0, %v1182_v45  ;;  %s1183_s24 = smov 48   ;;  %s1184_s25 = smov 40  }
   0x9   :  { %977 = vmatmul.msk.bf16.vlgmr.msra.gmra.mxu0 %vm69_vm0, %v48_v4  ;;  %s1185_s26 = smov 8   ;;  %s1186_s27 = smov 16  }
   0xa   :  { %s1187_s28 = smov 24  }
  0x86   :  { %v82_v6 = vpop.f32.mrf.mxu0 }
  0x87   :  { %v83_v7 = vadd.f32 %v1093_v5, %v82_v6 }
  0x89   :  { %v93_v8 = vpack.c.bf16 %v83_v7, %v83_v7 }
  0x8b   :  { %v96_v9 = vunpack.c.l.b16 %v93_v8 }
  0x8d   :  { %v1283_v10 = vpack.c.b16 %v96_v9, %v96_v9 }
  0x8e   :  { %v84_v11 = vpop.f32.mrf.mxu0 }
  0x8f   :  { %v85_v12 = vadd.f32 %v1093_v5, %v84_v11  ;;  %213 = vrot.lane.b32.xlu1 %v1283_v10, %s1173_s0  ;;  %98 = vrot.lane.b32.xlu0 %v1283_v10, %s1174_s17 }
  0x91   :  { %v94_v13 = vpack.c.bf16 %v85_v12, %v85_v12 }
  0x93   :  { %v121_v14 = vunpack.c.l.b16 %v94_v13 }
  0x95   :  { %v1287_v15 = vpack.c.b16 %v121_v14, %v121_v14 }
  0x97   :  { %236 = vrot.lane.b32.xlu2 %v1287_v15, %s1173_s0  ;;  %211 = vrot.lane.b32.xlu1 %v1283_v10, %s1175_s2 }
  0x98   :  { %123 = vrot.lane.b32.xlu0 %v1287_v15, %s1174_s17 }
  0x9f   :  { %234 = vrot.lane.b32.xlu2 %v1287_v15, %s1175_s2  ;;  %348 = vrot.lane.b32.xlu1 %v1287_v15, %s1176_s18 }
  0xa0   :  { %325 = vrot.lane.b32.xlu0 %v1283_v10, %s1176_s18 }
  0xa7   :  { %323 = vrot.lane.b32.xlu2 %v1283_v10, %s1177_s19  ;;  %437 = vrot.lane.b32.xlu1 %v1283_v10, %s1178_s20 }
  0xa8   :  { %346 = vrot.lane.b32.xlu0 %v1287_v15, %s1177_s19 }
  0xaf   :  { %460 = vrot.lane.b32.xlu2 %v1287_v15, %s1178_s20  ;;  %458 = vrot.lane.b32.xlu1 %v1287_v15, %s1179_s21 }
  0xb0   :  { %435 = vrot.lane.b32.xlu0 %v1283_v10, %s1179_s21 }
  0xb7   :  { %298 = vrot.lane.b32.xlu1 %v1287_v15, %s1180_s22 }
  0xb8   :  { %164 = vrot.lane.b32.xlu0 %v1283_v10, %s1181_s23 }
  0xc0   :  { %186 = vrot.lane.b32.xlu0 %v1287_v15, %s1181_s23 }
  0xf1   :  { %v237_v16 = vpop.permute.xlu2 %236 }
  0xf2   :  { %v242_v22 = vsel %vm100_vm1, %v237_v16, 0 }
  0xf9   :  { %v235_v21 = vpop.permute.xlu2 %234 }
 0x101   :  { %v214_v17 = vpop.permute.xlu1 %213  ;;  %v99_v18 = vpop.permute.xlu0 %98 }
 0x102   :  { %v219_v19 = vsel %vm100_vm1, %v214_v17, 0  ;;  %v105_v20 = vsel %vm100_vm1, %v99_v18, 0  ;;  %v324_v26 = vpop.permute.xlu2 %323 }
 0x103   :  { %228 = vmatpush.bf16.xpose.msrb.mxu0 %v219_v19  ;;  %114 = vmatpush.bf16.xpose.msra.mxu1 %v105_v20 }
 0x109   :  { %v212_v23 = vpop.permute.xlu1 %211 }
 0x10a   :  { %v124_v24 = vpop.permute.xlu0 %123  ;;  %982 = vmatmul.msk.bf16.vlgmr.msrb.gmra.mxu0 %vm100_vm1, %v212_v23  ;;  %978 = vmatmul.msk.bf16.vlgmr.msra.gmra.mxu1 %vm100_vm1, %v93_v8  ;;  %v461_v31 = vpop.permute.xlu2 %460 }
 0x10b   :  { %251 = vmatpush.bf16.xpose.msrb.mxu1 %v242_v22  ;;  %v129_v25 = vsel %vm100_vm1, %v124_v24, 0  ;;  %v466_v35 = vsel %vm100_vm1, %v461_v31, 0 }
 0x10c   :  { %138 = vmatpush.bf16.xpose.msra.mxu2 %v129_v25 }
 0x111   :  { %v349_v27 = vpop.permute.xlu1 %348 }
 0x112   :  { %v354_v28 = vsel %vm100_vm1, %v349_v27, 0  ;;  %v326_v29 = vpop.permute.xlu0 %325 }
 0x113   :  { %v331_v30 = vsel %vm100_vm1, %v326_v29, 0  ;;  %979 = vmatmul.msk.bf16.vlgmr.msra.gmra.mxu2 %vm100_vm1, %v94_v13  ;;  %363 = vmatpush.bf16.xpose.msra.mxu1 %v354_v28 }
 0x114   :  { %340 = vmatpush.bf16.xpose.msra.mxu0 %v331_v30 }
 0x119   :  { %v438_v32 = vpop.permute.xlu1 %437 }
 0x11a   :  { %v443_v33 = vsel %vm100_vm1, %v438_v32, 0  ;;  %v347_v34 = vpop.permute.xlu0 %346  ;;  %983 = vmatmul.msk.bf16.vlgmr.msrb.gmra.mxu1 %vm100_vm1, %v235_v21 }
 0x11b   :  { %986 = vmatmul.msk.bf16.vlgmr.msra.gmra.mxu0 %vm100_vm1, %v324_v26  ;;  %475 = vmatpush.bf16.xpose.msrb.mxu1 %v466_v35 }
 0x11c   :  { %452 = vmatpush.bf16.xpose.msrb.mxu0 %v443_v33 }
 0x121   :  { %v459_v41 = vpop.permute.xlu1 %458 }
 0x122   :  { %v436_v36 = vpop.permute.xlu0 %435 }
 0x129   :  { %v299_v25 = vpop.permute.xlu1 %298 }
 0x12a   :  { %v165_v37 = vpop.permute.xlu0 %164  ;;  %987 = vmatmul.msk.bf16.vlgmr.msra.gmra.mxu1 %vm100_vm1, %v347_v34 }
 0x12b   :  { %990 = vmatmul.msk.bf16.vlgmr.msrb.gmra.mxu0 %vm100_vm1, %v436_v36  ;;  %v171_v38 = vsel %vm169_vm2, %v165_v37, 0 }
 0x12c   :  { %180 = vmatpush.bf16.msra.mxu3 %v171_v38  ;;  %v304_v38 = vsel %vm169_vm2, %v299_v25, 0 }
 0x132   :  { %v187_v39 = vpop.permute.xlu0 %186 }
 0x133   :  { %v192_v40 = vsel %vm169_vm2, %v187_v39, 0 }
 0x134   :  { %201 = vmatpush.bf16.msrb.mxu3 %v192_v40 }
 0x13a   :  { %991 = vmatmul.msk.bf16.vlgmr.msrb.gmra.mxu1 %vm100_vm1, %v459_v41 }
 0x187   :  { %v230_v47 = vpop.f32.mrf.mxu0  ;;  %v116_v48 = vpop.f32.mrf.mxu1 }
 0x188   :  { %v231_v49 = vadd.f32 %v230_v47, %v92_v46  ;;  %v117_v50 = vadd.f32 %v116_v48, %v92_v46 }
 0x18a   :  { %v257_v51 = vsel %vm100_vm1, %v231_v49, -inf  ;;  %v144_v52 = vsel %vm100_vm1, %v117_v50, -inf }
 0x18b   :  { %258 = vmax.xlane.f32.xlu0 %v257_v51  ;;  %145 = vmax.xlane.f32.xlu2 %v144_v52 }
 0x18f   :  { %v232_v53 = vpop.f32.mrf.mxu0  ;;  %v118_v54 = vpop.f32.mrf.mxu1 }
 0x196   :  { %v140_v55 = vpop.f32.mrf.mxu2 }
 0x197   :  { %v141_v56 = vadd.f32 %v140_v55, %v92_v46  ;;  %v253_v57 = vpop.f32.mrf.mxu1 }
 0x198   :  { %v342_v58 = vpop.f32.mrf.mxu0  ;;  %v254_v60 = vadd.f32 %v253_v57, %v92_v46 }
 0x199   :  { %v147_v59 = vsel %vm100_vm1, %v141_v56, -inf  ;;  %v1332_v12 = vadd.f32 %v342_v58, %v92_v46 }
 0x19a   :  { %148 = vmax.xlane.f32.xlu1 %v147_v59  ;;  %v260_v0 = vsel %vm100_vm1, %v254_v60, -inf }
 0x19b   :  { %v369_v13 = vsel %vm100_vm1, %v1332_v12, -inf }
 0x19e   :  { %v142_v61 = vpop.f32.mrf.mxu2 }
 0x19f   :  { %v255_v62 = vpop.f32.mrf.mxu1 }
 0x1a0   :  { %v344_v63 = vpop.f32.mrf.mxu0 }
 0x1a2   :  { %261 = vmax.xlane.f32.xlu1 %v260_v0 }
 0x1a3   :  { %277 = vrot.lane.b32.xlu2 %v1283_v10, %s1180_s22 }
 0x1a7   :  { %v365_v1 = vpop.f32.mrf.mxu1 }
 0x1a8   :  { %v454_v4 = vpop.f32.mrf.mxu0  ;;  %v366_v5 = vadd.f32 %v365_v1, %v92_v46 }
 0x1a9   :  { %v1336_v14 = vadd.f32 %v454_v4, %v92_v46 }
 0x1aa   :  { %v372_v6 = vsel %vm100_vm1, %v366_v5, -inf }
 0x1ab   :  { %373 = vmax.xlane.f32.xlu0 %v372_v6  ;;  %v481_v16 = vsel %vm100_vm1, %v1336_v14, -inf }
 0x1af   :  { %v367_v7 = vpop.f32.mrf.mxu1 }
 0x1b0   :  { %v456_v8 = vpop.f32.mrf.mxu0 }
 0x1b7   :  { %v477_v9 = vpop.f32.mrf.mxu1 }
 0x1b8   :  { %v1340_v17 = vadd.f32 %v477_v9, %v92_v46 }
 0x1ba   :  { %v484_v18 = vsel %vm100_vm1, %v1340_v17, -inf }
 0x1bb   :  { %410 = vrot.lane.b32.xlu1 %v1287_v15, %s1183_s24 }
 0x1bf   :  { %v479_v11 = vpop.f32.mrf.mxu1  ;;  %389 = vrot.lane.b32.xlu0 %v1283_v10, %s1183_s24 }
 0x1cc   :  { %370 = vmax.xlane.f32.xlu2 %v369_v13 }
 0x1e4   :  { %501 = vrot.lane.b32.xlu2 %v1283_v10, %s1184_s25 }
 0x1e5   :  { %482 = vmax.xlane.f32.xlu1 %v481_v16 }
 0x1e9   :  { %485 = vmax.xlane.f32.xlu0 %v484_v18 }
 0x1ec   :  { %522 = vrot.lane.b32.xlu2 %v1287_v15, %s1184_s25 }
 0x1fe   :  { %v259_v19 = vpop.xlane.xlu0 %258  ;;  %v146_v20 = vpop.xlane.xlu2 %145 }
 0x1ff   :  { %v263_v21 = vsub.f32 %v231_v49, %v259_v19  ;;  %v150_v22 = vsub.f32 %v117_v50, %v146_v20 }
 0x201   :  { %v265_v23 = vmul.f32 1.442695, %v263_v21  ;;  %v152_v24 = vmul.f32 1.442695, %v150_v22 }
 0x203   :  { %1101 = vpow2.f32 %v265_v23 }
 0x204   :  { %1103 = vpow2.f32 %v152_v24 }
 0x206   :  { %v278_v10 = vpop.permute.xlu2 %277 }
 0x207   :  { %v283_v15 = vsel %vm169_vm2, %v278_v10, 0 }
 0x209   :  { %v1102_v26 = vpop.eup %1101 }
 0x20a   :  { %v1346_v27 = vpop.eup %1103  ;;  %v269_v28 = vsel %vm100_vm1, %v1102_v26, 0.0  ;;  %v275_v45 = vpack.c.bf16 %v1102_v26, %v1102_v26 }
 0x20b   :  { %270 = vadd.xlane.f32.xlu1 %v269_v28  ;;  %v162_v29 = vpack.c.bf16 %v1346_v27, %v1346_v27 }
 0x20d   :  { %v149_v30 = vpop.xlane.xlu1 %148  ;;  %980 = vmatmul.msk.bf16.vlgmr.msra.gmra.mxu3 %vm100_vm1, %v162_v29 }
 0x20e   :  { %v151_v31 = vsub.f32 %v141_v56, %v149_v30  ;;  %292 = vmatpush.bf16.msra.mxu3 %v283_v15 }
 0x210   :  { %v154_v32 = vmul.f32 1.442695, %v151_v31 }
 0x212   :  { %1105 = vpow2.f32 %v154_v32 }
 0x215   :  { %v262_v33 = vpop.xlane.xlu1 %261 }
 0x216   :  { %v264_v34 = vsub.f32 %v254_v60, %v262_v33 }
 0x218   :  { %v1353_v35 = vpop.eup %1105  ;;  %v267_v36 = vmul.f32 1.442695, %v264_v34 }
 0x219   :  { %v163_v37 = vpack.c.bf16 %v1353_v35, %v1353_v35  ;;  %v159_v16 = vsel %vm100_vm1, %v1353_v35, 0.0 }
 0x21a   :  { %1107 = vpow2.f32 %v267_v36 }
 0x21d   :  { %981 = vmatmul.msk.bf16.vlgmr.msrb.gmra.mxu3 %vm100_vm1, %v163_v37 }
 0x21e   :  { %313 = vmatpush.bf16.msrb.mxu3 %v304_v38  ;;  %v374_v39 = vpop.xlane.xlu0 %373 }
 0x21f   :  { %v376_v41 = vsub.f32 %v366_v5, %v374_v39 }
 0x220   :  { %v1108_v40 = vpop.eup %1107 }
 0x221   :  { %v272_v42 = vsel %vm100_vm1, %v1108_v40, 0.0  ;;  %v379_v43 = vmul.f32 1.442695, %v376_v41  ;;  %v276_v51 = vpack.c.bf16 %v1108_v40, %v1108_v40 }
 0x222   :  { %273 = vadd.xlane.f32.xlu0 %v272_v42 }
 0x223   :  { %1109 = vpow2.f32 %v379_v43 }
 0x229   :  { %v1110_v44 = vpop.eup %1109 }
 0x22a   :  { %v384_v46 = vsel %vm100_vm1, %v1110_v44, 0.0  ;;  %v388_v58 = vpack.c.bf16 %v1110_v44, %v1110_v44 }
 0x22b   :  { %385 = vadd.xlane.f32.xlu1 %v384_v46 }
 0x22d   :  { %v411_v47 = vpop.permute.xlu1 %410  ;;  %984 = vmatmul.msk.bf16.vlgmr.msra.gmra.mxu3 %vm100_vm1, %v275_v45 }
 0x22e   :  { %v416_v48 = vsel %vm169_vm2, %v411_v47, 0 }
 0x22f   :  { %425 = vmatpush.bf16.msra.mxu3 %v416_v48 }
 0x231   :  { %v390_v49 = vpop.permute.xlu0 %389 }
 0x232   :  { %v395_v50 = vsel %vm169_vm2, %v390_v49, 0 }
 0x233   :  { %404 = vmatpush.bf16.msrb.mxu2 %v395_v50 }
 0x23d   :  { %985 = vmatmul.msk.bf16.vlgmr.msrb.gmra.mxu3 %vm100_vm1, %v276_v51 }
 0x23f   :  { %v371_v52 = vpop.xlane.xlu2 %370 }
 0x240   :  { %v375_v53 = vsub.f32 %v1332_v12, %v371_v52  ;;  %v1049_v52 = vld [vmem:[%s1504_s3 + $0x8] sm:$0xff] }
 0x241   :  { %609 = vmatpush.bf16.msra.mxu0 %v1049_v52 }
 0x242   :  { %v377_v54 = vmul.f32 1.442695, %v375_v53  ;;  %v1048_v53 = vld [vmem:[%s1504_s3] sm:$0xff] }
 0x244   :  { %1111 = vpow2.f32 %v377_v54 }
 0x245   :  { %610 = vmatpush.bf16.msra.mxu0 %v1048_v53 }
 0x247   :  { %v502_v55 = vpop.permute.xlu2 %501 }
 0x248   :  { %v507_v56 = vsel %vm169_vm2, %v502_v55, 0 }
 0x249   :  { %516 = vmatpush.bf16.msra.mxu2 %v507_v56 }
 0x24a   :  { %v1112_v57 = vpop.eup %1111 }
 0x24b   :  { %v381_v59 = vsel %vm100_vm1, %v1112_v57, 0.0  ;;  %v387_v60 = vpack.c.bf16 %v1112_v57, %v1112_v57 }
 0x24c   :  { %382 = vadd.xlane.f32.xlu2 %v381_v59 }
 0x24d   :  { %989 = vmatmul.msk.bf16.vlgmr.msra.gmra.mxu3 %vm100_vm1, %v388_v58  ;;  %988 = vmatmul.msk.bf16.vlgmr.msrb.gmra.mxu2 %vm100_vm1, %v387_v60 }
 0x24f   :  { %v523_v61 = vpop.permute.xlu2 %522 }
 0x250   :  { %v528_v62 = vsel %vm169_vm2, %v523_v61, 0 }
 0x251   :  { %537 = vmatpush.bf16.msrb.mxu3 %v528_v62 }
 0x258   :  { %v483_v63 = vpop.xlane.xlu1 %482 }
 0x259   :  { %v487_v0 = vsub.f32 %v1336_v14, %v483_v63  ;;  %v156_v14 = vsel %vm100_vm1, %v1346_v27, 0.0 }
 0x25b   :  { %v489_v1 = vmul.f32 1.442695, %v487_v0 }
 0x25c   :  { %v486_v4 = vpop.xlane.xlu0 %485 }
 0x25d   :  { %1113 = vpow2.f32 %v489_v1  ;;  %v488_v5 = vsub.f32 %v1340_v17, %v486_v4 }
 0x25f   :  { %v491_v6 = vmul.f32 1.442695, %v488_v5 }
 0x261   :  { %1115 = vpow2.f32 %v491_v6 }
 0x263   :  { %v1114_v7 = vpop.eup %1113 }
 0x264   :  { %v499_v8 = vpack.c.bf16 %v1114_v7, %v1114_v7  ;;  %v493_v9 = vsel %vm100_vm1, %v1114_v7, 0.0 }
 0x265   :  { %494 = vadd.xlane.f32.xlu0 %v493_v9 }
 0x266   :  { %992 = vmatmul.msk.bf16.vlgmr.msra.gmra.mxu2 %vm100_vm1, %v499_v8 }
 0x267   :  { %v1116_v11 = vpop.eup %1115 }
 0x268   :  { %v500_v12 = vpack.c.bf16 %v1116_v11, %v1116_v11  ;;  %v496_v13 = vsel %vm100_vm1, %v1116_v11, 0.0 }
 0x269   :  { %497 = vadd.xlane.f32.xlu1 %v496_v13 }
 0x26a   :  { %993 = vmatmul.msk.bf16.vlgmr.msrb.gmra.mxu3 %vm100_vm1, %v500_v12 }
 0x26d   :  { %157 = vadd.xlane.f32.xlu0 %v156_v14 }
 0x271   :  { %160 = vadd.xlane.f32.xlu1 %v159_v16  ;;  %v1094_v16 = vld [vmem:[%s1505_s4] ss:$0 sm:$0xff] }
 0x27e   :  { %v271_v22 = vpop.xlane.xlu1 %270 }
 0x27f   :  { %1117 = vrcp.f32 %v271_v22 }
 0x285   :  { %v1118_v25 = vpop.eup %1117 }
 0x290   :  { %v1381_v17 = vpop.f32.mrf.mxu3 }
 0x295   :  { %v274_v23 = vpop.xlane.xlu0 %273 }
 0x296   :  { %1119 = vrcp.f32 %v274_v23 }
 0x298   :  { %v184_v18 = vpop.f32.mrf.mxu3 }
 0x29c   :  { %v1120_v26 = vpop.eup %1119 }
 0x29e   :  { %v386_v15 = vpop.xlane.xlu1 %385 }
 0x29f   :  { %1121 = vrcp.f32 %v386_v15 }
 0x2a0   :  { %v1383_v19 = vpop.f32.mrf.mxu3 }
 0x2a5   :  { %v1122_v32 = vpop.eup %1121 }
 0x2a8   :  { %v205_v20 = vpop.f32.mrf.mxu3 }
 0x2b0   :  { %v294_v21 = vpop.f32.mrf.mxu3 }
 0x2b1   :  { %v321_v10 = vmul.f32 %v1118_v25, %v294_v21  ;;  %v1188_v25 = vmov 32.0  }
 0x2b8   :  { %v296_v24 = vpop.f32.mrf.mxu3 }
 0x2bf   :  { %v383_v30 = vpop.xlane.xlu2 %382 }
 0x2c0   :  { %v315_v27 = vpop.f32.mrf.mxu3  ;;  %1123 = vrcp.f32 %v383_v30 }
 0x2c1   :  { %v322_v28 = vmul.f32 %v1120_v26, %v315_v27 }
 0x2c3   :  { %v1078_v29 = vpack.i.bf16 %v322_v28, %v321_v10 }
 0x2c5   :  { %1079 = vrot.lane.b32.xlu0 %v1078_v29, %s1185_s26 }
 0x2c6   :  { %v1124_v34 = vpop.eup %1123 }
 0x2c8   :  { %v317_v31 = vpop.f32.mrf.mxu3 }
 0x2d0   :  { %v427_v33 = vpop.f32.mrf.mxu3  ;;  %v406_v36 = vpop.f32.mrf.mxu2 }
 0x2d1   :  { %v434_v35 = vmul.f32 %v1122_v32, %v427_v33  ;;  %v433_v37 = vmul.f32 %v1124_v34, %v406_v36 }
 0x2d3   :  { %v1083_v38 = vpack.i.bf16 %v434_v35, %v433_v37 }
 0x2d5   :  { %1084 = vrot.lane.b32.xlu1 %v1083_v38, %s1186_s27  ;;  %v1051_v38 = vld [vmem:[%s1510_s9 + $0x8] sm:$0xff] }
 0x2d6   :  { %712 = vmatpush.bf16.msra.mxu1 %v1051_v38 }
 0x2d8   :  { %v429_v39 = vpop.f32.mrf.mxu3  ;;  %v408_v40 = vpop.f32.mrf.mxu2 }
 0x2d9   :  { %v495_v41 = vpop.xlane.xlu0 %494 }
 0x2da   :  { %1125 = vrcp.f32 %v495_v41 }
 0x2dc   :  { %v498_v42 = vpop.xlane.xlu1 %497 }
 0x2dd   :  { %1127 = vrcp.f32 %v498_v42  ;;  %v1050_v42 = vld [vmem:[%s1510_s9] sm:$0xff] }
 0x2de   :  { %713 = vmatpush.bf16.msra.mxu1 %v1050_v42 }
 0x2e0   :  { %v1126_v44 = vpop.eup %1125 }
 0x2e1   :  { %v158_v54 = vpop.xlane.xlu0 %157 }
 0x2e2   :  { %1129 = vrcp.f32 %v158_v54 }
 0x2e3   :  { %v1128_v45 = vpop.eup %1127 }
 0x2e4   :  { %v161_v55 = vpop.xlane.xlu1 %160 }
 0x2e5   :  { %1131 = vrcp.f32 %v161_v55 }
 0x2e6   :  { %1133 = vrcp.f32 %v1188_v25 }
 0x2e8   :  { %v1130_v57 = vpop.eup %1129 }
 0x2e9   :  { %v518_v43 = vpop.f32.mrf.mxu2  ;;  %v209_v0 = vmul.f32 %v1130_v57, %v1381_v17 }
 0x2ea   :  { %v545_v47 = vmul.f32 %v1126_v44, %v518_v43 }
 0x2eb   :  { %v1132_v59 = vpop.eup %1131 }
 0x2ec   :  { %v210_v1 = vmul.f32 %v1132_v59, %v1383_v19  ;;  %v1134_v26 = vpop.eup %1133 }
 0x2ed   :  { %v539_v46 = vpop.f32.mrf.mxu3  ;;  %v628_v27 = vmul.f32 32.0, %v1134_v26  ;;  %vm632_vm6 = vweird.f32 %v1134_v26 }
 0x2ee   :  { %v546_v48 = vmul.f32 %v1128_v45, %v539_v46 }
 0x2ef   :  { %v629_v10 = vsub.f32 1.0, %v628_v27 }
 0x2f0   :  { %v1088_v49 = vpack.i.bf16 %v546_v48, %v545_v47 }
 0x2f1   :  { %v520_v50 = vpop.f32.mrf.mxu2  ;;  %v630_v28 = vmul.f32 %v1134_v26, %v629_v10 }
 0x2f2   :  { %1089 = vrot.lane.b32.xlu2 %v1088_v49, %s1187_s28 }
 0x2f3   :  { %v631_v29 = vadd.f32 %v1134_v26, %v630_v28 }
 0x2f5   :  { %v541_v51 = vpop.f32.mrf.mxu3  ;;  %v1404_v15 = vsel %vm632_vm6, %v1134_v26, %v631_v29  ;;  %v1056_v26 = vld [vmem:[%s1512_s11 + $0x20] sm:$0xff] }
 0x337   :  { %v1080_v56 = vpop.permute.xlu0 %1079 }
 0x338   :  { %v1082_v60 = vunpack.i.h.bf16 %v1080_v56  ;;  %v1081_v61 = vunpack.i.l.bf16 %v1080_v56 }
 0x33a   :  { %v572_v5 = vsel %vm100_vm1, %v210_v1, %v1082_v60  ;;  %v571_v6 = vsel %vm100_vm1, %v209_v0, %v1081_v61 }
 0x347   :  { %v1085_v58 = vpop.permute.xlu1 %1084 }
 0x348   :  { %v1087_v62 = vunpack.i.h.bf16 %v1085_v58  ;;  %v1086_v63 = vunpack.i.l.bf16 %v1085_v58  ;;  %v1095_v58 = vld [vmem:[%s1506_s5] ss:$0 sm:$0xff]  ;;  %s957_s5 = sshll.u32 %s1514_s13, 4  ;;  %s958_s5 = int_to_ptr.hbm [resolvable:$true] %s957_s5 }
 0x34a   :  { %v574_v9 = vsel %vm573_vm4, %v571_v6, %v1086_v63  ;;  %v575_v11 = vsel %vm573_vm4, %v572_v5, %v1087_v62  ;;  %v1096_v62 = vld [vmem:[%s1507_s6] ss:$0 sm:$0xff] }
 0x34c   :  { %v1090_v4 = vpop.permute.xlu2 %1089 }
 0x34d   :  { %v1092_v7 = vunpack.i.h.bf16 %v1090_v4  ;;  %v1091_v8 = vunpack.i.l.bf16 %v1090_v4 }
 0x34f   :  { %v577_v12 = vsel %vm576_vm5, %v574_v9, %v1091_v8  ;;  %v578_v13 = vsel %vm576_vm5, %v575_v11, %v1092_v7  ;;  %v1097_v7 = vld [vmem:[%s1511_s10] ss:$0 sm:$0xff]  ;;  %v1059_v11 = vld [vmem:[%s1512_s11 + $0x38] sm:$0xff] }
 0x350   :  { %v579_v14 = vpack.c.bf16 %v578_v13, %v577_v12  ;;  %877 = vmatpush.bf16.msrb.mxu2 %v1059_v11 }
 0x352   :  { %1002 = vmatmul.msk.bf16.vlgmr.msra.gmra.mxu0 %vm69_vm0, %v579_v14  ;;  %v1058_v14 = vld [vmem:[%s1512_s11 + $0x30] sm:$0xff] }
 0x354   :  { %878 = vmatpush.bf16.msrb.mxu2 %v1058_v14 }
 0x3cf   :  { %v612_v17 = vpop.f32.mrf.mxu0 }
 0x3d0   :  { %v613_v18 = vadd.f32 %v1094_v16, %v612_v17 }
 0x3d2   :  { %v617_v19 = vadd.f32 %v613_v18, %v1270_v2 }
 0x3d4   :  { %v621_v20 = vsel %vm69_vm0, %v617_v19, 0.0 }
 0x3d5   :  { %622 = vadd.xlane.f32.xlu0 %v621_v20 }
 0x3d7   :  { %v614_v21 = vpop.f32.mrf.mxu0 }
 0x3d8   :  { %v615_v22 = vadd.f32 %v1094_v16, %v614_v21  ;;  %v1057_v21 = vld [vmem:[%s1512_s11 + $0x28] sm:$0xff] }
 0x3d9   :  { %879 = vmatpush.bf16.msrb.mxu2 %v1057_v21 }
 0x3da   :  { %v618_v23 = vadd.f32 %v615_v22, %v1275_v3 }
 0x3dc   :  { %v624_v24 = vsel %vm69_vm0, %v618_v23, 0.0 }
 0x3dd   :  { %625 = vadd.xlane.f32.xlu1 %v624_v24  ;;  %880 = vmatpush.bf16.msrb.mxu2 %v1056_v26 }
 0x448   :  { %v623_v2 = vpop.xlane.xlu0 %622 }
 0x449   :  { %v634_v30 = vmul.f32 %v1404_v15, %v623_v2 }
 0x44b   :  { %v636_v31 = vsub.f32 %v617_v19, %v634_v30  ;;  %v1055_v30 = vld [vmem:[%s1512_s11 + $0x18] sm:$0xff] }
 0x44c   :  { %881 = vmatpush.bf16.msrb.mxu2 %v1055_v30 }
 0x44d   :  { %v638_v32 = vmul.f32 %v636_v31, %v636_v31 }
 0x44f   :  { %v640_v3 = vsel %vm69_vm0, %v638_v32, 0.0 }
 0x450   :  { %v626_v33 = vpop.xlane.xlu1 %625  ;;  %641 = vadd.xlane.f32.xlu2 %v640_v3 }
 0x451   :  { %v635_v34 = vmul.f32 %v1404_v15, %v626_v33 }
 0x453   :  { %v637_v35 = vsub.f32 %v618_v23, %v635_v34 }
 0x455   :  { %v639_v36 = vmul.f32 %v637_v35, %v637_v35 }
 0x457   :  { %v643_v37 = vsel %vm69_vm0, %v639_v36, 0.0 }
 0x458   :  { %644 = vadd.xlane.f32.xlu0 %v643_v37  ;;  %v1054_v37 = vld [vmem:[%s1512_s11 + $0x10] sm:$0xff] }
 0x459   :  { %882 = vmatpush.bf16.msrb.mxu2 %v1054_v37 }
 0x4c3   :  { %v642_v39 = vpop.xlane.xlu2 %641 }
 0x4c4   :  { %v646_v40 = vmul.f32 %v642_v39, %v1404_v15 }
 0x4c6   :  { %v648_v41 = vadd.f32 1e-05, %v646_v40 }
 0x4c8   :  { %1135 = vrsqrt.f32 %v648_v41  ;;  %vm656_vm8 = vweird.f32 %v648_v41 }
 0x4cb   :  { %v645_v43 = vpop.xlane.xlu0 %644 }
 0x4cc   :  { %v647_v44 = vmul.f32 %v645_v43, %v1404_v15 }
 0x4ce   :  { %v1136_v45 = vpop.eup %1135  ;;  %v649_v46 = vadd.f32 1e-05, %v647_v44 }
 0x4cf   :  { %v651_v47 = vmul.f32 %v1136_v45, %v648_v41  ;;  %vm657_vm7 = vweird.f32 %v1136_v45 }
 0x4d0   :  { %1137 = vrsqrt.f32 %v649_v46  ;;  %vm658_vm9 = vmor %vm656_vm8, %vm657_vm7  ;;  %vm666_vm11 = vweird.f32 %v649_v46 }
 0x4d1   :  { %v652_v48 = vmul.f32 %v1136_v45, %v651_v47 }
 0x4d3   :  { %v653_v49 = vmul.f32 0.5, %v652_v48 }
 0x4d5   :  { %v654_v50 = vsub.f32 1.5, %v653_v49 }
 0x4d6   :  { %v1138_v51 = vpop.eup %1137 }
 0x4d7   :  { %v655_v52 = vmul.f32 %v1136_v45, %v654_v50  ;;  %v661_v53 = vmul.f32 %v1138_v51, %v649_v46  ;;  %vm667_vm10 = vweird.f32 %v1138_v51 }
 0x4d8   :  { %vm668_vm12 = vmor %vm666_vm11, %vm667_vm10 }
 0x4d9   :  { %v662_v54 = vmul.f32 %v1138_v51, %v661_v53  ;;  %v659_v55 = vsel %vm658_vm9, %v1136_v45, %v655_v52  ;;  %v1053_v45 = vld [vmem:[%s1512_s11 + $0x8] sm:$0xff] }
 0x4da   :  { %v670_v59 = vmul.f32 %v659_v55, %v636_v31  ;;  %883 = vmatpush.bf16.msrb.mxu2 %v1053_v45 }
 0x4db   :  { %v663_v56 = vmul.f32 0.5, %v662_v54 }
 0x4dc   :  { %v675_v63 = vmul.f32 %v1095_v58, %v670_v59 }
 0x4dd   :  { %v664_v57 = vsub.f32 1.5, %v663_v56 }
 0x4de   :  { %v1424_v4 = vadd.f32 %v1096_v62, %v675_v63 }
 0x4df   :  { %v665_v60 = vmul.f32 %v1138_v51, %v664_v57 }
 0x4e1   :  { %v669_v61 = vsel %vm668_vm12, %v1138_v51, %v665_v60  ;;  %v1052_v51 = vld [vmem:[%s1512_s11] sm:$0xff] }
 0x4e2   :  { %v671_v0 = vmul.f32 %v669_v61, %v637_v35  ;;  %884 = vmatpush.bf16.msrb.mxu2 %v1052_v51 }
 0x4e4   :  { %v676_v1 = vmul.f32 %v1095_v58, %v671_v0 }
 0x4e6   :  { %v1426_v5 = vadd.f32 %v1096_v62, %v676_v1 }
 0x4e8   :  { %v682_v6 = vpack.c.bf16 %v1426_v5, %v1424_v4 }
 0x4ea   :  { %1011 = vmatmul.msk.bf16.vlgmr.msra.gmra.mxu1 %vm69_vm0, %v682_v6 }
 0x567   :  { %v715_v8 = vpop.f32.mrf.mxu1 }
 0x568   :  { %v1434_v9 = vadd.f32 %v1097_v7, %v715_v8 }
 0x56a   :  { %v1440_v12 = vmul.f32 0.70710677, %v1434_v9 }
 0x56c   :  { %v724_v13 = vmul.f32 %v1440_v12, %v1440_v12 }
 0x56e   :  { %v725_v16 = vmin.f32 %v724_v13, 16.0 }
 0x56f   :  { %v717_v17 = vpop.f32.mrf.mxu1 }
 0x570   :  { %v726_v18 = vmul.f32 2.1237322e-06, %v725_v16  ;;  %v737_v19 = vmul.f32 3.8918573e-05, %v725_v16  ;;  %v1447_v20 = vadd.f32 %v1097_v7, %v717_v17 }
 0x572   :  { %v727_v22 = vadd.f32 0.00028619796, %v726_v18  ;;  %v738_v23 = vadd.f32 0.001143296, %v737_v19  ;;  %v1453_v24 = vmul.f32 0.70710677, %v1447_v20 }
 0x574   :  { %v739_v25 = vmul.f32 %v738_v23, %v725_v16  ;;  %v764_v27 = vmul.f32 %v1453_v24, %v1453_v24  ;;  %v728_v10 = vmul.f32 %v727_v22, %v725_v16 }
 0x576   :  { %v740_v28 = vadd.f32 0.014752088, %v739_v25  ;;  %v765_v29 = vmin.f32 %v764_v27, 16.0  ;;  %v729_v3 = vadd.f32 0.0036580483, %v728_v10 }
 0x578   :  { %v741_v2 = vmul.f32 %v740_v28, %v725_v16  ;;  %v766_v31 = vmul.f32 2.1237322e-06, %v765_v29  ;;  %v777_v32 = vmul.f32 3.8918573e-05, %v765_v29  ;;  %v730_v40 = vmul.f32 %v729_v3, %v725_v16 }
 0x57a   :  { %v742_v33 = vadd.f32 0.112945676, %v741_v2  ;;  %v767_v34 = vadd.f32 0.00028619796, %v766_v31  ;;  %v778_v35 = vadd.f32 0.001143296, %v777_v32 }
 0x57b   :  { %v731_v47 = vadd.f32 0.05243302, %v730_v40  ;;  %v1098_v40 = vld [vmem:[%s1513_s12] ss:$0 sm:$0xff] }
 0x57c   :  { %v743_v36 = vmul.f32 %v742_v33, %v725_v16  ;;  %v768_v38 = vmul.f32 %v767_v34, %v765_v29  ;;  %v779_v39 = vmul.f32 %v778_v35, %v765_v29  ;;  %v720_v34 = vmul.f32 0.5, %v1434_v9 }
 0x57d   :  { %v732_v53 = vmul.f32 %v731_v47, %v725_v16  ;;  %v721_v35 = vmul.f32 0.5, %v1447_v20 }
 0x57e   :  { %v744_v41 = vadd.f32 0.4994258, %v743_v36  ;;  %v769_v42 = vadd.f32 0.0036580483, %v768_v38  ;;  %v780_v43 = vadd.f32 0.014752088, %v779_v39 }
 0x57f   :  { %v733_v58 = vadd.f32 0.18741608, %v732_v53 }
 0x580   :  { %v745_v44 = vmul.f32 %v744_v41, %v725_v16  ;;  %v781_v46 = vmul.f32 %v780_v43, %v765_v29  ;;  %v770_v49 = vmul.f32 %v769_v42, %v765_v29 }
 0x581   :  { %v734_v63 = vmul.f32 %v733_v58, %v725_v16 }
 0x582   :  { %v746_v48 = vadd.f32 1.0, %v745_v44  ;;  %v782_v50 = vadd.f32 0.112945676, %v781_v46  ;;  %v771_v54 = vadd.f32 0.05243302, %v770_v49 }
 0x583   :  { %v735_v11 = vadd.f32 1.1283791, %v734_v63 }
 0x584   :  { %1139 = vrcp.f32 %v746_v48  ;;  %v783_v52 = vmul.f32 %v782_v50, %v765_v29  ;;  %v772_v60 = vmul.f32 %v771_v54, %v765_v29  ;;  %v758_v1 = vand.u32 2147483648, %v746_v48 }
 0x585   :  { %v756_v7 = vand.u32 2147483647, %v746_v48  ;;  %vm752_vm14 = vweird.f32 %v746_v48  ;;  %v736_v22 = vmul.f32 %v735_v11, %v1440_v12 }
 0x586   :  { %v784_v55 = vadd.f32 0.4994258, %v783_v52  ;;  %v773_v6 = vadd.f32 0.18741608, %v772_v60  ;;  %v759_v17 = vor.u32 1.1754944e-38, %v758_v1 }
 0x587   :  { %vm757_vm1 = vcmp.eq.f32.partialorder %v756_v7, 8.507059e+37 }
 0x588   :  { %v785_v56 = vmul.f32 %v784_v55, %v765_v29  ;;  %v774_v18 = vmul.f32 %v773_v6, %v765_v29 }
 0x58a   :  { %v1140_v57 = vpop.eup %1139  ;;  %v786_v61 = vadd.f32 1.0, %v785_v56  ;;  %v775_v16 = vadd.f32 1.1283791, %v774_v18 }
 0x58b   :  { %v748_v59 = vmul.f32 %v1140_v57, %v746_v48  ;;  %vm753_vm13 = vweird.f32 %v1140_v57 }
 0x58c   :  { %1141 = vrcp.f32 %v786_v61  ;;  %vm754_vm15 = vmor %vm752_vm14, %vm753_vm13  ;;  %v798_v25 = vand.u32 2147483648, %v786_v61  ;;  %v796_v10 = vand.u32 2147483647, %v786_v61  ;;  %vm792_vm3 = vweird.f32 %v786_v61 }
 0x58d   :  { %v749_v62 = vsub.f32 1.0, %v748_v59  ;;  %v776_v31 = vmul.f32 %v775_v16, %v1453_v24 }
 0x58e   :  { %v799_v2 = vor.u32 1.1754944e-38, %v798_v25  ;;  %vm797_vm5 = vcmp.eq.f32.partialorder %v796_v10, 8.507059e+37 }
 0x58f   :  { %v750_v0 = vmul.f32 %v1140_v57, %v749_v62 }
 0x591   :  { %v751_v8 = vadd.f32 %v1140_v57, %v750_v0 }
 0x592   :  { %v1142_v13 = vpop.eup %1141 }
 0x593   :  { %v755_v14 = vsel %vm754_vm15, %v1140_v57, %v751_v8  ;;  %v788_v19 = vmul.f32 %v1142_v13, %v786_v61  ;;  %vm793_vm2 = vweird.f32 %v1142_v13  ;;  %v1099_v8 = vld [vmem:[%s1508_s7] ss:$0 sm:$0xff]  ;;  %s1189_s7 = smov [#allocation2]  }
 0x594   :  { %v760_v21 = vsel %vm757_vm1, %v759_v17, %v755_v14  ;;  %vm794_vm4 = vmor %vm792_vm3, %vm793_vm2  ;;  %v1100_v14 = vld [vmem:[%s1509_s8] ss:$0 sm:$0xff]  ;;  %s955_s2 = sshll.u32 %s1189_s7, 4  ;;  %s1190_s8 = smov 128   ;;  %s956_s2 = int_to_ptr.vmem [resolvable:$true] %s955_s2 }
 0x595   :  { %v789_v23 = vsub.f32 1.0, %v788_v19  ;;  %v761_v26 = vmul.f32 %v760_v21, %v736_v22 }
 0x597   :  { %v790_v27 = vmul.f32 %v1142_v13, %v789_v23  ;;  %v1012_v30 = vclamps-f32 %v761_v26, 1.0 }
 0x599   :  { %v791_v28 = vadd.f32 %v1142_v13, %v790_v27  ;;  %v804_v33 = vadd.f32 1.0, %v1012_v30 }
 0x59b   :  { %v795_v29 = vsel %vm794_vm4, %v1142_v13, %v791_v28  ;;  %v806_v37 = vmul.f32 %v804_v33, %v720_v34 }
 0x59c   :  { %v800_v32 = vsel %vm797_vm5, %v799_v2, %v795_v29 }
 0x59d   :  { %v801_v3 = vmul.f32 %v800_v32, %v776_v31 }
 0x59f   :  { %v1013_v12 = vclamps-f32 %v801_v3, 1.0 }
 0x5a1   :  { %v805_v36 = vadd.f32 1.0, %v1013_v12 }
 0x5a3   :  { %v807_v38 = vmul.f32 %v805_v36, %v721_v35 }
 0x5a5   :  { %v808_v39 = vpack.c.bf16 %v807_v38, %v806_v37 }
 0x5a7   :  { %885 = vmatmul.bf16.vlgmr.msrb.gmra.mxu2 %v808_v39 }
 0x62a   :  { %v886_v24 = vpop.f32.mrf.mxu2 }
 0x62b   :  { %v887_v41 = vadd.f32 %v1098_v40, %v886_v24 }
 0x62d   :  { %v891_v42 = vadd.f32 %v887_v41, %v1424_v4 }
 0x62f   :  { %v895_v43 = vsel %vm69_vm0, %v891_v42, 0.0 }
 0x630   :  { %896 = vadd.xlane.f32.xlu0 %v895_v43 }
 0x632   :  { %v888_v44 = vpop.f32.mrf.mxu2 }
 0x633   :  { %v889_v9 = vadd.f32 %v1098_v40, %v888_v44 }
 0x635   :  { %v892_v20 = vadd.f32 %v889_v9, %v1426_v5 }
 0x637   :  { %v898_v45 = vsel %vm69_vm0, %v892_v20, 0.0 }
 0x638   :  { %899 = vadd.xlane.f32.xlu1 %v898_v45 }
 0x6a3   :  { %v897_v46 = vpop.xlane.xlu0 %896 }
 0x6a4   :  { %v901_v47 = vmul.f32 %v897_v46, %v1404_v15 }
 0x6a6   :  { %v903_v48 = vsub.f32 %v891_v42, %v901_v47 }
 0x6a8   :  { %v905_v49 = vmul.f32 %v903_v48, %v903_v48 }
 0x6aa   :  { %v907_v50 = vsel %vm69_vm0, %v905_v49, 0.0 }
 0x6ab   :  { %v900_v51 = vpop.xlane.xlu1 %899  ;;  %908 = vadd.xlane.f32.xlu0 %v907_v50 }
 0x6ac   :  { %v902_v4 = vmul.f32 %v900_v51, %v1404_v15 }
 0x6ae   :  { %v904_v52 = vsub.f32 %v892_v20, %v902_v4 }
 0x6b0   :  { %v906_v53 = vmul.f32 %v904_v52, %v904_v52 }
 0x6b2   :  { %v910_v54 = vsel %vm69_vm0, %v906_v53, 0.0 }
 0x6b3   :  { %911 = vadd.xlane.f32.xlu1 %v910_v54 }
 0x71e   :  { %v909_v5 = vpop.xlane.xlu0 %908 }
 0x71f   :  { %v913_v55 = vmul.f32 %v909_v5, %v1404_v15 }
 0x721   :  { %v915_v56 = vadd.f32 1e-05, %v913_v55 }
 0x723   :  { %1143 = vrsqrt.f32 %v915_v56  ;;  %vm923_vm7 = vweird.f32 %v915_v56 }
 0x726   :  { %v912_v57 = vpop.xlane.xlu1 %911 }
 0x727   :  { %v914_v58 = vmul.f32 %v912_v57, %v1404_v15 }
 0x729   :  { %v1144_v59 = vpop.eup %1143  ;;  %v916_v60 = vadd.f32 1e-05, %v914_v58 }
 0x72a   :  { %v918_v61 = vmul.f32 %v1144_v59, %v915_v56  ;;  %vm924_vm6 = vweird.f32 %v1144_v59 }
 0x72b   :  { %1145 = vrsqrt.f32 %v916_v60  ;;  %vm925_vm8 = vmor %vm923_vm7, %vm924_vm6  ;;  %vm933_vm10 = vweird.f32 %v916_v60 }
 0x72c   :  { %v919_v62 = vmul.f32 %v1144_v59, %v918_v61 }
 0x72e   :  { %v920_v63 = vmul.f32 0.5, %v919_v62 }
 0x730   :  { %v921_v0 = vsub.f32 1.5, %v920_v63 }
 0x731   :  { %v1146_v1 = vpop.eup %1145 }
 0x732   :  { %v922_v6 = vmul.f32 %v1144_v59, %v921_v0  ;;  %v928_v7 = vmul.f32 %v1146_v1, %v916_v60  ;;  %vm934_vm9 = vweird.f32 %v1146_v1 }
 0x733   :  { %vm935_vm11 = vmor %vm933_vm10, %vm934_vm9 }
 0x734   :  { %v926_v11 = vsel %vm925_vm8, %v1144_v59, %v922_v6  ;;  %v929_v13 = vmul.f32 %v1146_v1, %v928_v7 }
 0x735   :  { %v937_v15 = vmul.f32 %v926_v11, %v903_v48 }
 0x736   :  { %v930_v17 = vmul.f32 0.5, %v929_v13 }
 0x737   :  { %v942_v18 = vmul.f32 %v1099_v8, %v937_v15 }
 0x738   :  { %v931_v19 = vsub.f32 1.5, %v930_v17 }
 0x739   :  { %v947_v21 = vadd.f32 %v1100_v14, %v942_v18 }
 0x73a   :  { %v932_v22 = vmul.f32 %v1146_v1, %v931_v19 }
 0x73b   :  { %949 = vst.msk [vmem:[#allocation2] sm:$0xff] %vm69_vm0, %v947_v21 }
 0x73c   :  { %v936_v23 = vsel %vm935_vm11, %v1146_v1, %v932_v22 }
 0x73d   :  { %v938_v16 = vmul.f32 %v936_v23, %v904_v52 }
 0x73f   :  { %v943_v25 = vmul.f32 %v1099_v8, %v938_v16 }
 0x741   :  { %v948_v26 = vadd.f32 %v1100_v14, %v943_v25 }
 0x743   :  { %950 = vst.msk [vmem:[#allocation2 + $0x8] sm:$0xff] %vm69_vm0, %v948_v26 }
 0x744   :  { %963 = dma.vmem_to_hbm [thread:$0]  %s956_s2, 256, %s958_s5, [#allocation3], %s1190_s8, %s1190_s8, %s1185_s26  }
 0x745   :  { %1171 = dma.done.wait [#allocation3], 256  }
 0x746   :  { %1172 = vsyncadd [#allocation3], 4294967040 }
 0x747   :  { %968 = vsyncpa [#allocation3], 1 }

// kernel: tpu_custom_call.1
= control target key start
LH: loop header
LB: loop body
LE: loop exit
PB: predicated region body
PF: predicated region fallthrough
CT: control target
= control target key end

     0   :  { %s1501_s0 = inlined_call_operand.vmem [shape: f32[2,8,32], index: 0, kind: input, shape index: {}]   ;;  %s1502_s1 = inlined_call_operand.vmem [shape: bf16[32,96], index: 1, kind: input, shape index: {}]   ;;  %s1503_s2 = inlined_call_operand.vmem [shape: f32[1,96], index: 2, kind: input, shape index: {}]   ;;  %s1504_s3 = inlined_call_operand.vmem [shape: bf16[32,32], index: 3, kind: input, shape index: {}]   ;;  %s1505_s4 = inlined_call_operand.vmem [shape: f32[1,32], index: 4, kind: input, shape index: {}]   ;;  %s1506_s5 = inlined_call_operand.vmem [shape: f32[1,32], index: 5, kind: input, shape index: {}]   ;;  %s1507_s6 = inlined_call_operand.vmem [shape: f32[1,32], index: 6, kind: input, shape index: {}]   ;;  %s1508_s7 = inlined_call_operand.vmem [shape: f32[1,32], index: 7, kind: input, shape index: {}]   ;;  %s1509_s8 = inlined_call_operand.vmem [shape: f32[1,32], index: 8, kind: input, shape index: {}]   ;;  %s1510_s9 = inlined_call_operand.vmem [shape: bf16[32,128], index: 9, kind: input, shape index: {}]   ;;  %s1511_s10 = inlined_call_operand.vmem [shape: f32[1,128], index: 10, kind: input, shape index: {}]   ;;  %s1512_s11 = inlined_call_operand.vmem [shape: bf16[128,32], index: 11, kind: input, shape index: {}]   ;;  %s1513_s12 = inlined_call_operand.vmem [shape: f32[1,32], index: 12, kind: input, shape index: {}]   ;;  %s1514_s13 = inlined_call_operand.hbm [shape: f32[2,8,32], index: 13, kind: output, shape index: {}]  }
   0x1   :  { %v1047_v0 = vld [vmem:[%s1502_s1 + $0x8] sm:$0xff]  ;;  %v1046_v1 = vld [vmem:[%s1502_s1] sm:$0xff] }
   0x2   :  { %v1270_v2 = vld [vmem:[%s1501_s0] sm:$0xff]  ;;  %v1275_v3 = vld [vmem:[%s1501_s0 + $0x8] sm:$0xff]  ;;  %79 = vmatpush.bf16.msra.mxu0 %v1047_v0 }
   0x3   :  { %18 = vsyncpa [#allocation3], 0  ;;  %v48_v4 = vpack.c.bf16 %v1275_v3, %v1270_v2  ;;  %vm69_vm0 = vcmask 261120   ;;  %v1093_v5 = vld [vmem:[%s1503_s2] ss:$0 sm:$0xff]  ;;  %s1173_s0 = smov 88   ;;  %v87_v42 = vlaneseq }
   0x4   :  { %s1174_s17 = smov 96   ;;  %s1175_s2 = smov 120   ;;  %vm100_vm1 = vcmask 64512   ;;  %vm169_vm2 = vcmask 1043456   ;;  %v1182_v45 = vmov -1e+30  }
   0x5   :  { %s1176_s18 = smov 80   ;;  %s1177_s19 = smov 112   ;;  %v88_v43 = vshrl.u32 %v87_v42, 7  ;;  %v90_v44 = vand.u32 127, %v87_v42  ;;  %vm573_vm4 = vcmask 130048   ;;  %vm576_vm5 = vcmask 195584  }
   0x6   :  { %80 = vmatpush.bf16.msra.mxu0 %v1046_v1  ;;  %s1178_s20 = smov 72   ;;  %s1179_s21 = smov 104  }
   0x7   :  { %s1180_s22 = smov 56   ;;  %s1181_s23 = smov 64   ;;  %vm91_vm3 = vcmp.le.s32.totalorder %v90_v44, %v88_v43 }
   0x8   :  { %v92_v46 = vsel %vm91_vm3, 0.0, %v1182_v45  ;;  %s1183_s24 = smov 48   ;;  %s1184_s25 = smov 40  }
   0x9   :  { %977 = vmatmul.msk.bf16.vlgmr.msra.gmra.mxu0 %vm69_vm0, %v48_v4  ;;  %s1185_s26 = smov 8   ;;  %s1186_s27 = smov 16  }
   0xa   :  { %s1187_s28 = smov 24  }
  0x86   :  { %v82_v6 = vpop.f32.mrf.mxu0 }
  0x87   :  { %v83_v7 = vadd.f32 %v1093_v5, %v82_v6 }
  0x89   :  { %v93_v8 = vpack.c.bf16 %v83_v7, %v83_v7 }
  0x8b   :  { %v96_v9 = vunpack.c.l.b16 %v93_v8 }
  0x8d   :  { %v1283_v10 = vpack.c.b16 %v96_v9, %v96_v9 }
  0x8e   :  { %v84_v11 = vpop.f32.mrf.mxu0 }
  0x8f   :  { %v85_v12 = vadd.f32 %v1093_v5, %v84_v11  ;;  %213 = vrot.lane.b32.xlu1 %v1283_v10, %s1173_s0  ;;  %98 = vrot.lane.b32.xlu0 %v1283_v10, %s1174_s17 }
  0x91   :  { %v94_v13 = vpack.c.bf16 %v85_v12, %v85_v12 }
  0x93   :  { %v121_v14 = vunpack.c.l.b16 %v94_v13 }
  0x95   :  { %v1287_v15 = vpack.c.b16 %v121_v14, %v121_v14 }
  0x97   :  { %236 = vrot.lane.b32.xlu2 %v1287_v15, %s1173_s0  ;;  %211 = vrot.lane.b32.xlu1 %v1283_v10, %s1175_s2 }
  0x98   :  { %123 = vrot.lane.b32.xlu0 %v1287_v15, %s1174_s17 }
  0x9f   :  { %234 = vrot.lane.b32.xlu2 %v1287_v15, %s1175_s2  ;;  %348 = vrot.lane.b32.xlu1 %v1287_v15, %s1176_s18 }
  0xa0   :  { %325 = vrot.lane.b32.xlu0 %v1283_v10, %s1176_s18 }
  0xa7   :  { %323 = vrot.lane.b32.xlu2 %v1283_v10, %s1177_s19  ;;  %437 = vrot.lane.b32.xlu1 %v1283_v10, %s1178_s20 }
  0xa8   :  { %346 = vrot.lane.b32.xlu0 %v1287_v15, %s1177_s19 }
  0xaf   :  { %460 = vrot.lane.b32.xlu2 %v1287_v15, %s1178_s20  ;;  %458 = vrot.lane.b32.xlu1 %v1287_v15, %s1179_s21 }
  0xb0   :  { %435 = vrot.lane.b32.xlu0 %v1283_v10, %s1179_s21 }
  0xb7   :  { %298 = vrot.lane.b32.xlu1 %v1287_v15, %s1180_s22 }
  0xb8   :  { %164 = vrot.lane.b32.xlu0 %v1283_v10, %s1181_s23 }
  0xc0   :  { %186 = vrot.lane.b32.xlu0 %v1287_v15, %s1181_s23 }
  0xf1   :  { %v237_v16 = vpop.permute.xlu2 %236 }
  0xf2   :  { %v242_v22 = vsel %vm100_vm1, %v237_v16, 0 }
  0xf9   :  { %v235_v21 = vpop.permute.xlu2 %234 }
 0x101   :  { %v214_v17 = vpop.permute.xlu1 %213  ;;  %v99_v18 = vpop.permute.xlu0 %98 }
 0x102   :  { %v219_v19 = vsel %vm100_vm1, %v214_v17, 0  ;;  %v105_v20 = vsel %vm100_vm1, %v99_v18, 0  ;;  %v324_v26 = vpop.permute.xlu2 %323 }
 0x103   :  { %228 = vmatpush.bf16.xpose.msrb.mxu0 %v219_v19  ;;  %114 = vmatpush.bf16.xpose.msra.mxu1 %v105_v20 }
 0x109   :  { %v212_v23 = vpop.permute.xlu1 %211 }
 0x10a   :  { %v124_v24 = vpop.permute.xlu0 %123  ;;  %982 = vmatmul.msk.bf16.vlgmr.msrb.gmra.mxu0 %vm100_vm1, %v212_v23  ;;  %978 = vmatmul.msk.bf16.vlgmr.msra.gmra.mxu1 %vm100_vm1, %v93_v8  ;;  %v461_v31 = vpop.permute.xlu2 %460 }
 0x10b   :  { %251 = vmatpush.bf16.xpose.msrb.mxu1 %v242_v22  ;;  %v129_v25 = vsel %vm100_vm1, %v124_v24, 0  ;;  %v466_v35 = vsel %vm100_vm1, %v461_v31, 0 }
 0x10c   :  { %138 = vmatpush.bf16.xpose.msra.mxu2 %v129_v25 }
 0x111   :  { %v349_v27 = vpop.permute.xlu1 %348 }
 0x112   :  { %v354_v28 = vsel %vm100_vm1, %v349_v27, 0  ;;  %v326_v29 = vpop.permute.xlu0 %325 }
 0x113   :  { %v331_v30 = vsel %vm100_vm1, %v326_v29, 0  ;;  %979 = vmatmul.msk.bf16.vlgmr.msra.gmra.mxu2 %vm100_vm1, %v94_v13  ;;  %363 = vmatpush.bf16.xpose.msra.mxu1 %v354_v28 }
 0x114   :  { %340 = vmatpush.bf16.xpose.msra.mxu0 %v331_v30 }
 0x119   :  { %v438_v32 = vpop.permute.xlu1 %437 }
 0x11a   :  { %v443_v33 = vsel %vm100_vm1, %v438_v32, 0  ;;  %v347_v34 = vpop.permute.xlu0 %346  ;;  %983 = vmatmul.msk.bf16.vlgmr.msrb.gmra.mxu1 %vm100_vm1, %v235_v21 }
 0x11b   :  { %986 = vmatmul.msk.bf16.vlgmr.msra.gmra.mxu0 %vm100_vm1, %v324_v26  ;;  %475 = vmatpush.bf16.xpose.msrb.mxu1 %v466_v35 }
 0x11c   :  { %452 = vmatpush.bf16.xpose.msrb.mxu0 %v443_v33 }
 0x121   :  { %v459_v41 = vpop.permute.xlu1 %458 }
 0x122   :  { %v436_v36 = vpop.permute.xlu0 %435 }
 0x129   :  { %v299_v25 = vpop.permute.xlu1 %298 }
 0x12a   :  { %v165_v37 = vpop.permute.xlu0 %164  ;;  %987 = vmatmul.msk.bf16.vlgmr.msra.gmra.mxu1 %vm100_vm1, %v347_v34 }
 0x12b   :  { %990 = vmatmul.msk.bf16.vlgmr.msrb.gmra.mxu0 %vm100_vm1, %v436_v36  ;;  %v171_v38 = vsel %vm169_vm2, %v165_v37, 0 }
 0x12c   :  { %180 = vmatpush.bf16.msra.mxu3 %v171_v38  ;;  %v304_v38 = vsel %vm169_vm2, %v299_v25, 0 }
 0x132   :  { %v187_v39 = vpop.permute.xlu0 %186 }
 0x133   :  { %v192_v40 = vsel %vm169_vm2, %v187_v39, 0 }
 0x134   :  { %201 = vmatpush.bf16.msrb.mxu3 %v192_v40 }
 0x13a   :  { %991 = vmatmul.msk.bf16.vlgmr.msrb.gmra.mxu1 %vm100_vm1, %v459_v41 }
 0x187   :  { %v230_v47 = vpop.f32.mrf.mxu0  ;;  %v116_v48 = vpop.f32.mrf.mxu1 }
 0x188   :  { %v231_v49 = vadd.f32 %v230_v47, %v92_v46  ;;  %v117_v50 = vadd.f32 %v116_v48, %v92_v46 }
 0x18a   :  { %v257_v51 = vsel %vm100_vm1, %v231_v49, -inf  ;;  %v144_v52 = vsel %vm100_vm1, %v117_v50, -inf }
 0x18b   :  { %258 = vmax.xlane.f32.xlu0 %v257_v51  ;;  %145 = vmax.xlane.f32.xlu2 %v144_v52 }
 0x18f   :  { %v232_v53 = vpop.f32.mrf.mxu0  ;;  %v118_v54 = vpop.f32.mrf.mxu1 }
 0x196   :  { %v140_v55 = vpop.f32.mrf.mxu2 }
 0x197   :  { %v141_v56 = vadd.f32 %v140_v55, %v92_v46  ;;  %v253_v57 = vpop.f32.mrf.mxu1 }
 0x198   :  { %v342_v58 = vpop.f32.mrf.mxu0  ;;  %v254_v60 = vadd.f32 %v253_v57, %v92_v46 }
 0x199   :  { %v147_v59 = vsel %vm100_vm1, %v141_v56, -inf  ;;  %v1332_v12 = vadd.f32 %v342_v58, %v92_v46 }
 0x19a   :  { %148 = vmax.xlane.f32.xlu1 %v147_v59  ;;  %v260_v0 = vsel %vm100_vm1, %v254_v60, -inf }
 0x19b   :  { %v369_v13 = vsel %vm100_vm1, %v1332_v12, -inf }
 0x19e   :  { %v142_v61 = vpop.f32.mrf.mxu2 }
 0x19f   :  { %v255_v62 = vpop.f32.mrf.mxu1 }
 0x1a0   :  { %v344_v63 = vpop.f32.mrf.mxu0 }
 0x1a2   :  { %261 = vmax.xlane.f32.xlu1 %v260_v0 }
 0x1a3   :  { %277 = vrot.lane.b32.xlu2 %v1283_v10, %s1180_s22 }
 0x1a7   :  { %v365_v1 = vpop.f32.mrf.mxu1 }
 0x1a8   :  { %v454_v4 = vpop.f32.mrf.mxu0  ;;  %v366_v5 = vadd.f32 %v365_v1, %v92_v46 }
 0x1a9   :  { %v1336_v14 = vadd.f32 %v454_v4, %v92_v46 }
 0x1aa   :  { %v372_v6 = vsel %vm100_vm1, %v366_v5, -inf }
 0x1ab   :  { %373 = vmax.xlane.f32.xlu0 %v372_v6  ;;  %v481_v16 = vsel %vm100_vm1, %v1336_v14, -inf }
 0x1af   :  { %v367_v7 = vpop.f32.mrf.mxu1 }
 0x1b0   :  { %v456_v8 = vpop.f32.mrf.mxu0 }
 0x1b7   :  { %v477_v9 = vpop.f32.mrf.mxu1 }
 0x1b8   :  { %v1340_v17 = vadd.f32 %v477_v9, %v92_v46 }
 0x1ba   :  { %v484_v18 = vsel %vm100_vm1, %v1340_v17, -inf }
 0x1bb   :  { %410 = vrot.lane.b32.xlu1 %v1287_v15, %s1183_s24 }
 0x1bf   :  { %v479_v11 = vpop.f32.mrf.mxu1  ;;  %389 = vrot.lane.b32.xlu0 %v1283_v10, %s1183_s24 }
 0x1cc   :  { %370 = vmax.xlane.f32.xlu2 %v369_v13 }
 0x1e4   :  { %501 = vrot.lane.b32.xlu2 %v1283_v10, %s1184_s25 }
 0x1e5   :  { %482 = vmax.xlane.f32.xlu1 %v481_v16 }
 0x1e9   :  { %485 = vmax.xlane.f32.xlu0 %v484_v18 }
 0x1ec   :  { %522 = vrot.lane.b32.xlu2 %v1287_v15, %s1184_s25 }
 0x1fe   :  { %v259_v19 = vpop.xlane.xlu0 %258  ;;  %v146_v20 = vpop.xlane.xlu2 %145 }
 0x1ff   :  { %v263_v21 = vsub.f32 %v231_v49, %v259_v19  ;;  %v150_v22 = vsub.f32 %v117_v50, %v146_v20 }
 0x201   :  { %v265_v23 = vmul.f32 1.442695, %v263_v21  ;;  %v152_v24 = vmul.f32 1.442695, %v150_v22 }
 0x203   :  { %1101 = vpow2.f32 %v265_v23 }
 0x204   :  { %1103 = vpow2.f32 %v152_v24 }
 0x206   :  { %v278_v10 = vpop.permute.xlu2 %277 }
 0x207   :  { %v283_v15 = vsel %vm169_vm2, %v278_v10, 0 }
 0x209   :  { %v1102_v26 = vpop.eup %1101 }
 0x20a   :  { %v1346_v27 = vpop.eup %1103  ;;  %v269_v28 = vsel %vm100_vm1, %v1102_v26, 0.0  ;;  %v275_v45 = vpack.c.bf16 %v1102_v26, %v1102_v26 }
 0x20b   :  { %270 = vadd.xlane.f32.xlu1 %v269_v28  ;;  %v162_v29 = vpack.c.bf16 %v1346_v27, %v1346_v27 }
 0x20d   :  { %v149_v30 = vpop.xlane.xlu1 %148  ;;  %980 = vmatmul.msk.bf16.vlgmr.msra.gmra.mxu3 %vm100_vm1, %v162_v29 }
 0x20e   :  { %v151_v31 = vsub.f32 %v141_v56, %v149_v30  ;;  %292 = vmatpush.bf16.msra.mxu3 %v283_v15 }
 0x210   :  { %v154_v32 = vmul.f32 1.442695, %v151_v31 }
 0x212   :  { %1105 = vpow2.f32 %v154_v32 }
 0x215   :  { %v262_v33 = vpop.xlane.xlu1 %261 }
 0x216   :  { %v264_v34 = vsub.f32 %v254_v60, %v262_v33 }
 0x218   :  { %v1353_v35 = vpop.eup %1105  ;;  %v267_v36 = vmul.f32 1.442695, %v264_v34 }
 0x219   :  { %v163_v37 = vpack.c.bf16 %v1353_v35, %v1353_v35  ;;  %v159_v16 = vsel %vm100_vm1, %v1353_v35, 0.0 }
 0x21a   :  { %1107 = vpow2.f32 %v267_v36 }
 0x21d   :  { %981 = vmatmul.msk.bf16.vlgmr.msrb.gmra.mxu3 %vm100_vm1, %v163_v37 }
 0x21e   :  { %313 = vmatpush.bf16.msrb.mxu3 %v304_v38  ;;  %v374_v39 = vpop.xlane.xlu0 %373 }
 0x21f   :  { %v376_v41 = vsub.f32 %v366_v5, %v374_v39 }
 0x220   :  { %v1108_v40 = vpop.eup %1107 }
 0x221   :  { %v272_v42 = vsel %vm100_vm1, %v1108_v40, 0.0  ;;  %v379_v43 = vmul.f32 1.442695, %v376_v41  ;;  %v276_v51 = vpack.c.bf16 %v1108_v40, %v1108_v40 }
 0x222   :  { %273 = vadd.xlane.f32.xlu0 %v272_v42 }
 0x223   :  { %1109 = vpow2.f32 %v379_v43 }
 0x229   :  { %v1110_v44 = vpop.eup %1109 }
 0x22a   :  { %v384_v46 = vsel %vm100_vm1, %v1110_v44, 0.0  ;;  %v388_v58 = vpack.c.bf16 %v1110_v44, %v1110_v44 }
 0x22b   :  { %385 = vadd.xlane.f32.xlu1 %v384_v46 }
 0x22d   :  { %v411_v47 = vpop.permute.xlu1 %410  ;;  %984 = vmatmul.msk.bf16.vlgmr.msra.gmra.mxu3 %vm100_vm1, %v275_v45 }
 0x22e   :  { %v416_v48 = vsel %vm169_vm2, %v411_v47, 0 }
 0x22f   :  { %425 = vmatpush.bf16.msra.mxu3 %v416_v48 }
 0x231   :  { %v390_v49 = vpop.permute.xlu0 %389 }
 0x232   :  { %v395_v50 = vsel %vm169_vm2, %v390_v49, 0 }
 0x233   :  { %404 = vmatpush.bf16.msrb.mxu2 %v395_v50 }
 0x23d   :  { %985 = vmatmul.msk.bf16.vlgmr.msrb.gmra.mxu3 %vm100_vm1, %v276_v51 }
 0x23f   :  { %v371_v52 = vpop.xlane.xlu2 %370 }
 0x240   :  { %v375_v53 = vsub.f32 %v1332_v12, %v371_v52  ;;  %v1049_v52 = vld [vmem:[%s1504_s3 + $0x8] sm:$0xff] }
 0x241   :  { %609 = vmatpush.bf16.msra.mxu0 %v1049_v52 }
 0x242   :  { %v377_v54 = vmul.f32 1.442695, %v375_v53  ;;  %v1048_v53 = vld [vmem:[%s1504_s3] sm:$0xff] }
 0x244   :  { %1111 = vpow2.f32 %v377_v54 }
 0x245   :  { %610 = vmatpush.bf16.msra.mxu0 %v1048_v53 }
 0x247   :  { %v502_v55 = vpop.permute.xlu2 %501 }
 0x248   :  { %v507_v56 = vsel %vm169_vm2, %v502_v55, 0 }
 0x249   :  { %516 = vmatpush.bf16.msra.mxu2 %v507_v56 }
 0x24a   :  { %v1112_v57 = vpop.eup %1111 }
 0x24b   :  { %v381_v59 = vsel %vm100_vm1, %v1112_v57, 0.0  ;;  %v387_v60 = vpack.c.bf16 %v1112_v57, %v1112_v57 }
 0x24c   :  { %382 = vadd.xlane.f32.xlu2 %v381_v59 }
 0x24d   :  { %989 = vmatmul.msk.bf16.vlgmr.msra.gmra.mxu3 %vm100_vm1, %v388_v58  ;;  %988 = vmatmul.msk.bf16.vlgmr.msrb.gmra.mxu2 %vm100_vm1, %v387_v60 }
 0x24f   :  { %v523_v61 = vpop.permute.xlu2 %522 }
 0x250   :  { %v528_v62 = vsel %vm169_vm2, %v523_v61, 0 }
 0x251   :  { %537 = vmatpush.bf16.msrb.mxu3 %v528_v62 }
 0x258   :  { %v483_v63 = vpop.xlane.xlu1 %482 }
 0x259   :  { %v487_v0 = vsub.f32 %v1336_v14, %v483_v63  ;;  %v156_v14 = vsel %vm100_vm1, %v1346_v27, 0.0 }
 0x25b   :  { %v489_v1 = vmul.f32 1.442695, %v487_v0 }
 0x25c   :  { %v486_v4 = vpop.xlane.xlu0 %485 }
 0x25d   :  { %1113 = vpow2.f32 %v489_v1  ;;  %v488_v5 = vsub.f32 %v1340_v17, %v486_v4 }
 0x25f   :  { %v491_v6 = vmul.f32 1.442695, %v488_v5 }
 0x261   :  { %1115 = vpow2.f32 %v491_v6 }
 0x263   :  { %v1114_v7 = vpop.eup %1113 }
 0x264   :  { %v499_v8 = vpack.c.bf16 %v1114_v7, %v1114_v7  ;;  %v493_v9 = vsel %vm100_vm1, %v1114_v7, 0.0 }
 0x265   :  { %494 = vadd.xlane.f32.xlu0 %v493_v9 }
 0x266   :  { %992 = vmatmul.msk.bf16.vlgmr.msra.gmra.mxu2 %vm100_vm1, %v499_v8 }
 0x267   :  { %v1116_v11 = vpop.eup %1115 }
 0x268   :  { %v500_v12 = vpack.c.bf16 %v1116_v11, %v1116_v11  ;;  %v496_v13 = vsel %vm100_vm1, %v1116_v11, 0.0 }
 0x269   :  { %497 = vadd.xlane.f32.xlu1 %v496_v13 }
 0x26a   :  { %993 = vmatmul.msk.bf16.vlgmr.msrb.gmra.mxu3 %vm100_vm1, %v500_v12 }
 0x26d   :  { %157 = vadd.xlane.f32.xlu0 %v156_v14 }
 0x271   :  { %160 = vadd.xlane.f32.xlu1 %v159_v16  ;;  %v1094_v16 = vld [vmem:[%s1505_s4] ss:$0 sm:$0xff] }
 0x27e   :  { %v271_v22 = vpop.xlane.xlu1 %270 }
 0x27f   :  { %1117 = vrcp.f32 %v271_v22 }
 0x285   :  { %v1118_v25 = vpop.eup %1117 }
 0x290   :  { %v1381_v17 = vpop.f32.mrf.mxu3 }
 0x295   :  { %v274_v23 = vpop.xlane.xlu0 %273 }
 0x296   :  { %1119 = vrcp.f32 %v274_v23 }
 0x298   :  { %v184_v18 = vpop.f32.mrf.mxu3 }
 0x29c   :  { %v1120_v26 = vpop.eup %1119 }
 0x29e   :  { %v386_v15 = vpop.xlane.xlu1 %385 }
 0x29f   :  { %1121 = vrcp.f32 %v386_v15 }
 0x2a0   :  { %v1383_v19 = vpop.f32.mrf.mxu3 }
 0x2a5   :  { %v1122_v32 = vpop.eup %1121 }
 0x2a8   :  { %v205_v20 = vpop.f32.mrf.mxu3 }
 0x2b0   :  { %v294_v21 = vpop.f32.mrf.mxu3 }
 0x2b1   :  { %v321_v10 = vmul.f32 %v1118_v25, %v294_v21  ;;  %v1188_v25 = vmov 32.0  }
 0x2b8   :  { %v296_v24 = vpop.f32.mrf.mxu3 }
 0x2bf   :  { %v383_v30 = vpop.xlane.xlu2 %382 }
 0x2c0   :  { %v315_v27 = vpop.f32.mrf.mxu3  ;;  %1123 = vrcp.f32 %v383_v30 }
 0x2c1   :  { %v322_v28 = vmul.f32 %v1120_v26, %v315_v27 }
 0x2c3   :  { %v1078_v29 = vpack.i.bf16 %v322_v28, %v321_v10 }
 0x2c5   :  { %1079 = vrot.lane.b32.xlu0 %v1078_v29, %s1185_s26 }
 0x2c6   :  { %v1124_v34 = vpop.eup %1123 }
 0x2c8   :  { %v317_v31 = vpop.f32.mrf.mxu3 }
 0x2d0   :  { %v427_v33 = vpop.f32.mrf.mxu3  ;;  %v406_v36 = vpop.f32.mrf.mxu2 }
 0x2d1   :  { %v434_v35 = vmul.f32 %v1122_v32, %v427_v33  ;;  %v433_v37 = vmul.f32 %v1124_v34, %v406_v36 }
 0x2d3   :  { %v1083_v38 = vpack.i.bf16 %v434_v35, %v433_v37 }
 0x2d5   :  { %1084 = vrot.lane.b32.xlu1 %v1083_v38, %s1186_s27  ;;  %v1051_v38 = vld [vmem:[%s1510_s9 + $0x8] sm:$0xff] }
 0x2d6   :  { %712 = vmatpush.bf16.msra.mxu1 %v1051_v38 }
 0x2d8   :  { %v429_v39 = vpop.f32.mrf.mxu3  ;;  %v408_v40 = vpop.f32.mrf.mxu2 }
 0x2d9   :  { %v495_v41 = vpop.xlane.xlu0 %494 }
 0x2da   :  { %1125 = vrcp.f32 %v495_v41 }
 0x2dc   :  { %v498_v42 = vpop.xlane.xlu1 %497 }
 0x2dd   :  { %1127 = vrcp.f32 %v498_v42  ;;  %v1050_v42 = vld [vmem:[%s1510_s9] sm:$0xff] }
 0x2de   :  { %713 = vmatpush.bf16.msra.mxu1 %v1050_v42 }
 0x2e0   :  { %v1126_v44 = vpop.eup %1125 }
 0x2e1   :  { %v158_v54 = vpop.xlane.xlu0 %157 }
 0x2e2   :  { %1129 = vrcp.f32 %v158_v54 }
 0x2e3   :  { %v1128_v45 = vpop.eup %1127 }
 0x2e4   :  { %v161_v55 = vpop.xlane.xlu1 %160 }
 0x2e5   :  { %1131 = vrcp.f32 %v161_v55 }
 0x2e6   :  { %1133 = vrcp.f32 %v1188_v25 }
 0x2e8   :  { %v1130_v57 = vpop.eup %1129 }
 0x2e9   :  { %v518_v43 = vpop.f32.mrf.mxu2  ;;  %v209_v0 = vmul.f32 %v1130_v57, %v1381_v17 }
 0x2ea   :  { %v545_v47 = vmul.f32 %v1126_v44, %v518_v43 }
 0x2eb   :  { %v1132_v59 = vpop.eup %1131 }
 0x2ec   :  { %v210_v1 = vmul.f32 %v1132_v59, %v1383_v19  ;;  %v1134_v26 = vpop.eup %1133 }
 0x2ed   :  { %v539_v46 = vpop.f32.mrf.mxu3  ;;  %v628_v27 = vmul.f32 32.0, %v1134_v26  ;;  %vm632_vm6 = vweird.f32 %v1134_v26 }
 0x2ee   :  { %v546_v48 = vmul.f32 %v1128_v45, %v539_v46 }
 0x2ef   :  { %v629_v10 = vsub.f32 1.0, %v628_v27 }
 0x2f0   :  { %v1088_v49 = vpack.i.bf16 %v546_v48, %v545_v47 }
 0x2f1   :  { %v520_v50 = vpop.f32.mrf.mxu2  ;;  %v630_v28 = vmul.f32 %v1134_v26, %v629_v10 }
 0x2f2   :  { %1089 = vrot.lane.b32.xlu2 %v1088_v49, %s1187_s28 }
 0x2f3   :  { %v631_v29 = vadd.f32 %v1134_v26, %v630_v28 }
 0x2f5   :  { %v541_v51 = vpop.f32.mrf.mxu3  ;;  %v1404_v15 = vsel %vm632_vm6, %v1134_v26, %v631_v29  ;;  %v1056_v26 = vld [vmem:[%s1512_s11 + $0x20] sm:$0xff] }
 0x337   :  { %v1080_v56 = vpop.permute.xlu0 %1079 }
 0x338   :  { %v1082_v60 = vunpack.i.h.bf16 %v1080_v56  ;;  %v1081_v61 = vunpack.i.l.bf16 %v1080_v56 }
 0x33a   :  { %v572_v5 = vsel %vm100_vm1, %v210_v1, %v1082_v60  ;;  %v571_v6 = vsel %vm100_vm1, %v209_v0, %v1081_v61 }
 0x347   :  { %v1085_v58 = vpop.permute.xlu1 %1084 }
 0x348   :  { %v1087_v62 = vunpack.i.h.bf16 %v1085_v58  ;;  %v1086_v63 = vunpack.i.l.bf16 %v1085_v58  ;;  %v1095_v58 = vld [vmem:[%s1506_s5] ss:$0 sm:$0xff]  ;;  %s957_s5 = sshll.u32 %s1514_s13, 4  ;;  %s958_s5 = int_to_ptr.hbm [resolvable:$true] %s957_s5 }
 0x34a   :  { %v574_v9 = vsel %vm573_vm4, %v571_v6, %v1086_v63  ;;  %v575_v11 = vsel %vm573_vm4, %v572_v5, %v1087_v62  ;;  %v1096_v62 = vld [vmem:[%s1507_s6] ss:$0 sm:$0xff] }
 0x34c   :  { %v1090_v4 = vpop.permute.xlu2 %1089 }
 0x34d   :  { %v1092_v7 = vunpack.i.h.bf16 %v1090_v4  ;;  %v1091_v8 = vunpack.i.l.bf16 %v1090_v4 }
 0x34f   :  { %v577_v12 = vsel %vm576_vm5, %v574_v9, %v1091_v8  ;;  %v578_v13 = vsel %vm576_vm5, %v575_v11, %v1092_v7  ;;  %v1097_v7 = vld [vmem:[%s1511_s10] ss:$0 sm:$0xff]  ;;  %v1059_v11 = vld [vmem:[%s1512_s11 + $0x38] sm:$0xff] }
 0x350   :  { %v579_v14 = vpack.c.bf16 %v578_v13, %v577_v12  ;;  %877 = vmatpush.bf16.msrb.mxu2 %v1059_v11 }
 0x352   :  { %1002 = vmatmul.msk.bf16.vlgmr.msra.gmra.mxu0 %vm69_vm0, %v579_v14  ;;  %v1058_v14 = vld [vmem:[%s1512_s11 + $0x30] sm:$0xff] }
 0x354   :  { %878 = vmatpush.bf16.msrb.mxu2 %v1058_v14 }
 0x3cf   :  { %v612_v17 = vpop.f32.mrf.mxu0 }
 0x3d0   :  { %v613_v18 = vadd.f32 %v1094_v16, %v612_v17 }
 0x3d2   :  { %v617_v19 = vadd.f32 %v613_v18, %v1270_v2 }
 0x3d4   :  { %v621_v20 = vsel %vm69_vm0, %v617_v19, 0.0 }
 0x3d5   :  { %622 = vadd.xlane.f32.xlu0 %v621_v20 }
 0x3d7   :  { %v614_v21 = vpop.f32.mrf.mxu0 }
 0x3d8   :  { %v615_v22 = vadd.f32 %v1094_v16, %v614_v21  ;;  %v1057_v21 = vld [vmem:[%s1512_s11 + $0x28] sm:$0xff] }
 0x3d9   :  { %879 = vmatpush.bf16.msrb.mxu2 %v1057_v21 }
 0x3da   :  { %v618_v23 = vadd.f32 %v615_v22, %v1275_v3 }
 0x3dc   :  { %v624_v24 = vsel %vm69_vm0, %v618_v23, 0.0 }
 0x3dd   :  { %625 = vadd.xlane.f32.xlu1 %v624_v24  ;;  %880 = vmatpush.bf16.msrb.mxu2 %v1056_v26 }
 0x448   :  { %v623_v2 = vpop.xlane.xlu0 %622 }
 0x449   :  { %v634_v30 = vmul.f32 %v1404_v15, %v623_v2 }
 0x44b   :  { %v636_v31 = vsub.f32 %v617_v19, %v634_v30  ;;  %v1055_v30 = vld [vmem:[%s1512_s11 + $0x18] sm:$0xff] }
 0x44c   :  { %881 = vmatpush.bf16.msrb.mxu2 %v1055_v30 }
 0x44d   :  { %v638_v32 = vmul.f32 %v636_v31, %v636_v31 }
 0x44f   :  { %v640_v3 = vsel %vm69_vm0, %v638_v32, 0.0 }
 0x450   :  { %v626_v33 = vpop.xlane.xlu1 %625  ;;  %641 = vadd.xlane.f32.xlu2 %v640_v3 }
 0x451   :  { %v635_v34 = vmul.f32 %v1404_v15, %v626_v33 }
 0x453   :  { %v637_v35 = vsub.f32 %v618_v23, %v635_v34 }
 0x455   :  { %v639_v36 = vmul.f32 %v637_v35, %v637_v35 }
 0x457   :  { %v643_v37 = vsel %vm69_vm0, %v639_v36, 0.0 }
 0x458   :  { %644 = vadd.xlane.f32.xlu0 %v643_v37  ;;  %v1054_v37 = vld [vmem:[%s1512_s11 + $0x10] sm:$0xff] }
 0x459   :  { %882 = vmatpush.bf16.msrb.mxu2 %v1054_v37 }
 0x4c3   :  { %v642_v39 = vpop.xlane.xlu2 %641 }
 0x4c4   :  { %v646_v40 = vmul.f32 %v642_v39, %v1404_v15 }
 0x4c6   :  { %v648_v41 = vadd.f32 1e-05, %v646_v40 }
 0x4c8   :  { %1135 = vrsqrt.f32 %v648_v41  ;;  %vm656_vm8 = vweird.f32 %v648_v41 }
 0x4cb   :  { %v645_v43 = vpop.xlane.xlu0 %644 }
 0x4cc   :  { %v647_v44 = vmul.f32 %v645_v43, %v1404_v15 }
 0x4ce   :  { %v1136_v45 = vpop.eup %1135  ;;  %v649_v46 = vadd.f32 1e-05, %v647_v44 }
 0x4cf   :  { %v651_v47 = vmul.f32 %v1136_v45, %v648_v41  ;;  %vm657_vm7 = vweird.f32 %v1136_v45 }
 0x4d0   :  { %1137 = vrsqrt.f32 %v649_v46  ;;  %vm658_vm9 = vmor %vm656_vm8, %vm657_vm7  ;;  %vm666_vm11 = vweird.f32 %v649_v46 }
 0x4d1   :  { %v652_v48 = vmul.f32 %v1136_v45, %v651_v47 }
 0x4d3   :  { %v653_v49 = vmul.f32 0.5, %v652_v48 }
 0x4d5   :  { %v654_v50 = vsub.f32 1.5, %v653_v49 }
 0x4d6   :  { %v1138_v51 = vpop.eup %1137 }
 0x4d7   :  { %v655_v52 = vmul.f32 %v1136_v45, %v654_v50  ;;  %v661_v53 = vmul.f32 %v1138_v51, %v649_v46  ;;  %vm667_vm10 = vweird.f32 %v1138_v51 }
 0x4d8   :  { %vm668_vm12 = vmor %vm666_vm11, %vm667_vm10 }
 0x4d9   :  { %v662_v54 = vmul.f32 %v1138_v51, %v661_v53  ;;  %v659_v55 = vsel %vm658_vm9, %v1136_v45, %v655_v52  ;;  %v1053_v45 = vld [vmem:[%s1512_s11 + $0x8] sm:$0xff] }
 0x4da   :  { %v670_v59 = vmul.f32 %v659_v55, %v636_v31  ;;  %883 = vmatpush.bf16.msrb.mxu2 %v1053_v45 }
 0x4db   :  { %v663_v56 = vmul.f32 0.5, %v662_v54 }
 0x4dc   :  { %v675_v63 = vmul.f32 %v1095_v58, %v670_v59 }
 0x4dd   :  { %v664_v57 = vsub.f32 1.5, %v663_v56 }
 0x4de   :  { %v1424_v4 = vadd.f32 %v1096_v62, %v675_v63 }
 0x4df   :  { %v665_v60 = vmul.f32 %v1138_v51, %v664_v57 }
 0x4e1   :  { %v669_v61 = vsel %vm668_vm12, %v1138_v51, %v665_v60  ;;  %v1052_v51 = vld [vmem:[%s1512_s11] sm:$0xff] }
 0x4e2   :  { %v671_v0 = vmul.f32 %v669_v61, %v637_v35  ;;  %884 = vmatpush.bf16.msrb.mxu2 %v1052_v51 }
 0x4e4   :  { %v676_v1 = vmul.f32 %v1095_v58, %v671_v0 }
 0x4e6   :  { %v1426_v5 = vadd.f32 %v1096_v62, %v676_v1 }
 0x4e8   :  { %v682_v6 = vpack.c.bf16 %v1426_v5, %v1424_v4 }
 0x4ea   :  { %1011 = vmatmul.msk.bf16.vlgmr.msra.gmra.mxu1 %vm69_vm0, %v682_v6 }
 0x567   :  { %v715_v8 = vpop.f32.mrf.mxu1 }
 0x568   :  { %v1434_v9 = vadd.f32 %v1097_v7, %v715_v8 }
 0x56a   :  { %v1440_v12 = vmul.f32 0.70710677, %v1434_v9 }
 0x56c   :  { %v724_v13 = vmul.f32 %v1440_v12, %v1440_v12 }
 0x56e   :  { %v725_v16 = vmin.f32 %v724_v13, 16.0 }
 0x56f   :  { %v717_v17 = vpop.f32.mrf.mxu1 }
 0x570   :  { %v726_v18 = vmul.f32 2.1237322e-06, %v725_v16  ;;  %v737_v19 = vmul.f32 3.8918573e-05, %v725_v16  ;;  %v1447_v20 = vadd.f32 %v1097_v7, %v717_v17 }
 0x572   :  { %v727_v22 = vadd.f32 0.00028619796, %v726_v18  ;;  %v738_v23 = vadd.f32 0.001143296, %v737_v19  ;;  %v1453_v24 = vmul.f32 0.70710677, %v1447_v20 }
 0x574   :  { %v739_v25 = vmul.f32 %v738_v23, %v725_v16  ;;  %v764_v27 = vmul.f32 %v1453_v24, %v1453_v24  ;;  %v728_v10 = vmul.f32 %v727_v22, %v725_v16 }
 0x576   :  { %v740_v28 = vadd.f32 0.014752088, %v739_v25  ;;  %v765_v29 = vmin.f32 %v764_v27, 16.0  ;;  %v729_v3 = vadd.f32 0.0036580483, %v728_v10 }
 0x578   :  { %v741_v2 = vmul.f32 %v740_v28, %v725_v16  ;;  %v766_v31 = vmul.f32 2.1237322e-06, %v765_v29  ;;  %v777_v32 = vmul.f32 3.8918573e-05, %v765_v29  ;;  %v730_v40 = vmul.f32 %v729_v3, %v725_v16 }
 0x57a   :  { %v742_v33 = vadd.f32 0.112945676, %v741_v2  ;;  %v767_v34 = vadd.f32 0.00028619796, %v766_v31  ;;  %v778_v35 = vadd.f32 0.001143296, %v777_v32 }
 0x57b   :  { %v731_v47 = vadd.f32 0.05243302, %v730_v40  ;;  %v1098_v40 = vld [vmem:[%s1513_s12] ss:$0 sm:$0xff] }
 0x57c   :  { %v743_v36 = vmul.f32 %v742_v33, %v725_v16  ;;  %v768_v38 = vmul.f32 %v767_v34, %v765_v29  ;;  %v779_v39 = vmul.f32 %v778_v35, %v765_v29  ;;  %v720_v34 = vmul.f32 0.5, %v1434_v9 }
 0x57d   :  { %v732_v53 = vmul.f32 %v731_v47, %v725_v16  ;;  %v721_v35 = vmul.f32 0.5, %v1447_v20 }
 0x57e   :  { %v744_v41 = vadd.f32 0.4994258, %v743_v36  ;;  %v769_v42 = vadd.f32 0.0036580483, %v768_v38  ;;  %v780_v43 = vadd.f32 0.014752088, %v779_v39 }
 0x57f   :  { %v733_v58 = vadd.f32 0.18741608, %v732_v53 }
 0x580   :  { %v745_v44 = vmul.f32 %v744_v41, %v725_v16  ;;  %v781_v46 = vmul.f32 %v780_v43, %v765_v29  ;;  %v770_v49 = vmul.f32 %v769_v42, %v765_v29 }
 0x581   :  { %v734_v63 = vmul.f32 %v733_v58, %v725_v16 }
 0x582   :  { %v746_v48 = vadd.f32 1.0, %v745_v44  ;;  %v782_v50 = vadd.f32 0.112945676, %v781_v46  ;;  %v771_v54 = vadd.f32 0.05243302, %v770_v49 }
 0x583   :  { %v735_v11 = vadd.f32 1.1283791, %v734_v63 }
 0x584   :  { %1139 = vrcp.f32 %v746_v48  ;;  %v783_v52 = vmul.f32 %v782_v50, %v765_v29  ;;  %v772_v60 = vmul.f32 %v771_v54, %v765_v29  ;;  %v758_v1 = vand.u32 2147483648, %v746_v48 }
 0x585   :  { %v756_v7 = vand.u32 2147483647, %v746_v48  ;;  %vm752_vm14 = vweird.f32 %v746_v48  ;;  %v736_v22 = vmul.f32 %v735_v11, %v1440_v12 }
 0x586   :  { %v784_v55 = vadd.f32 0.4994258, %v783_v52  ;;  %v773_v6 = vadd.f32 0.18741608, %v772_v60  ;;  %v759_v17 = vor.u32 1.1754944e-38, %v758_v1 }
 0x587   :  { %vm757_vm1 = vcmp.eq.f32.partialorder %v756_v7, 8.507059e+37 }
 0x588   :  { %v785_v56 = vmul.f32 %v784_v55, %v765_v29  ;;  %v774_v18 = vmul.f32 %v773_v6, %v765_v29 }
 0x58a   :  { %v1140_v57 = vpop.eup %1139  ;;  %v786_v61 = vadd.f32 1.0, %v785_v56  ;;  %v775_v16 = vadd.f32 1.1283791, %v774_v18 }
 0x58b   :  { %v748_v59 = vmul.f32 %v1140_v57, %v746_v48  ;;  %vm753_vm13 = vweird.f32 %v1140_v57 }
 0x58c   :  { %1141 = vrcp.f32 %v786_v61  ;;  %vm754_vm15 = vmor %vm752_vm14, %vm753_vm13  ;;  %v798_v25 = vand.u32 2147483648, %v786_v61  ;;  %v796_v10 = vand.u32 2147483647, %v786_v61  ;;  %vm792_vm3 = vweird.f32 %v786_v61 }
 0x58d   :  { %v749_v62 = vsub.f32 1.0, %v748_v59  ;;  %v776_v31 = vmul.f32 %v775_v16, %v1453_v24 }
 0x58e   :  { %v799_v2 = vor.u32 1.1754944e-38, %v798_v25  ;;  %vm797_vm5 = vcmp.eq.f32.partialorder %v796_v10, 8.507059e+37 }
 0x58f   :  { %v750_v0 = vmul.f32 %v1140_v57, %v749_v62 }
 0x591   :  { %v751_v8 = vadd.f32 %v1140_v57, %v750_v0 }
 0x592   :  { %v1142_v13 = vpop.eup %1141 }
 0x593   :  { %v755_v14 = vsel %vm754_vm15, %v1140_v57, %v751_v8  ;;  %v788_v19 = vmul.f32 %v1142_v13, %v786_v61  ;;  %vm793_vm2 = vweird.f32 %v1142_v13  ;;  %v1099_v8 = vld [vmem:[%s1508_s7] ss:$0 sm:$0xff]  ;;  %s1189_s7 = smov [#allocation2]  }
 0x594   :  { %v760_v21 = vsel %vm757_vm1, %v759_v17, %v755_v14  ;;  %vm794_vm4 = vmor %vm792_vm3, %vm793_vm2  ;;  %v1100_v14 = vld [vmem:[%s1509_s8] ss:$0 sm:$0xff]  ;;  %s955_s2 = sshll.u32 %s1189_s7, 4  ;;  %s1190_s8 = smov 128   ;;  %s956_s2 = int_to_ptr.vmem [resolvable:$true] %s955_s2 }
 0x595   :  { %v789_v23 = vsub.f32 1.0, %v788_v19  ;;  %v761_v26 = vmul.f32 %v760_v21, %v736_v22 }
 0x597   :  { %v790_v27 = vmul.f32 %v1142_v13, %v789_v23  ;;  %v1012_v30 = vclamps-f32 %v761_v26, 1.0 }
 0x599   :  { %v791_v28 = vadd.f32 %v1142_v13, %v790_v27  ;;  %v804_v33 = vadd.f32 1.0, %v1012_v30 }
 0x59b   :  { %v795_v29 = vsel %vm794_vm4, %v1142_v13, %v791_v28  ;;  %v806_v37 = vmul.f32 %v804_v33, %v720_v34 }
 0x59c   :  { %v800_v32 = vsel %vm797_vm5, %v799_v2, %v795_v29 }
 0x59d   :  { %v801_v3 = vmul.f32 %v800_v32, %v776_v31 }
 0x59f   :  { %v1013_v12 = vclamps-f32 %v801_v3, 1.0 }
 0x5a1   :  { %v805_v36 = vadd.f32 1.0, %v1013_v12 }
 0x5a3   :  { %v807_v38 = vmul.f32 %v805_v36, %v721_v35 }
 0x5a5   :  { %v808_v39 = vpack.c.bf16 %v807_v38, %v806_v37 }
 0x5a7   :  { %885 = vmatmul.bf16.vlgmr.msrb.gmra.mxu2 %v808_v39 }
 0x62a   :  { %v886_v24 = vpop.f32.mrf.mxu2 }
 0x62b   :  { %v887_v41 = vadd.f32 %v1098_v40, %v886_v24 }
 0x62d   :  { %v891_v42 = vadd.f32 %v887_v41, %v1424_v4 }
 0x62f   :  { %v895_v43 = vsel %vm69_vm0, %v891_v42, 0.0 }
 0x630   :  { %896 = vadd.xlane.f32.xlu0 %v895_v43 }
 0x632   :  { %v888_v44 = vpop.f32.mrf.mxu2 }
 0x633   :  { %v889_v9 = vadd.f32 %v1098_v40, %v888_v44 }
 0x635   :  { %v892_v20 = vadd.f32 %v889_v9, %v1426_v5 }
 0x637   :  { %v898_v45 = vsel %vm69_vm0, %v892_v20, 0.0 }
 0x638   :  { %899 = vadd.xlane.f32.xlu1 %v898_v45 }
 0x6a3   :  { %v897_v46 = vpop.xlane.xlu0 %896 }
 0x6a4   :  { %v901_v47 = vmul.f32 %v897_v46, %v1404_v15 }
 0x6a6   :  { %v903_v48 = vsub.f32 %v891_v42, %v901_v47 }
 0x6a8   :  { %v905_v49 = vmul.f32 %v903_v48, %v903_v48 }
 0x6aa   :  { %v907_v50 = vsel %vm69_vm0, %v905_v49, 0.0 }
 0x6ab   :  { %v900_v51 = vpop.xlane.xlu1 %899  ;;  %908 = vadd.xlane.f32.xlu0 %v907_v50 }
 0x6ac   :  { %v902_v4 = vmul.f32 %v900_v51, %v1404_v15 }
 0x6ae   :  { %v904_v52 = vsub.f32 %v892_v20, %v902_v4 }
 0x6b0   :  { %v906_v53 = vmul.f32 %v904_v52, %v904_v52 }
 0x6b2   :  { %v910_v54 = vsel %vm69_vm0, %v906_v53, 0.0 }
 0x6b3   :  { %911 = vadd.xlane.f32.xlu1 %v910_v54 }
 0x71e   :  { %v909_v5 = vpop.xlane.xlu0 %908 }
 0x71f   :  { %v913_v55 = vmul.f32 %v909_v5, %v1404_v15 }
 0x721   :  { %v915_v56 = vadd.f32 1e-05, %v913_v55 }
 0x723   :  { %1143 = vrsqrt.f32 %v915_v56  ;;  %vm923_vm7 = vweird.f32 %v915_v56 }
 0x726   :  { %v912_v57 = vpop.xlane.xlu1 %911 }
 0x727   :  { %v914_v58 = vmul.f32 %v912_v57, %v1404_v15 }
 0x729   :  { %v1144_v59 = vpop.eup %1143  ;;  %v916_v60 = vadd.f32 1e-05, %v914_v58 }
 0x72a   :  { %v918_v61 = vmul.f32 %v1144_v59, %v915_v56  ;;  %vm924_vm6 = vweird.f32 %v1144_v59 }
 0x72b   :  { %1145 = vrsqrt.f32 %v916_v60  ;;  %vm925_vm8 = vmor %vm923_vm7, %vm924_vm6  ;;  %vm933_vm10 = vweird.f32 %v916_v60 }
 0x72c   :  { %v919_v62 = vmul.f32 %v1144_v59, %v918_v61 }
 0x72e   :  { %v920_v63 = vmul.f32 0.5, %v919_v62 }
 0x730   :  { %v921_v0 = vsub.f32 1.5, %v920_v63 }
 0x731   :  { %v1146_v1 = vpop.eup %1145 }
 0x732   :  { %v922_v6 = vmul.f32 %v1144_v59, %v921_v0  ;;  %v928_v7 = vmul.f32 %v1146_v1, %v916_v60  ;;  %vm934_vm9 = vweird.f32 %v1146_v1 }
 0x733   :  { %vm935_vm11 = vmor %vm933_vm10, %vm934_vm9 }
 0x734   :  { %v926_v11 = vsel %vm925_vm8, %v1144_v59, %v922_v6  ;;  %v929_v13 = vmul.f32 %v1146_v1, %v928_v7 }
 0x735   :  { %v937_v15 = vmul.f32 %v926_v11, %v903_v48 }
 0x736   :  { %v930_v17 = vmul.f32 0.5, %v929_v13 }
 0x737   :  { %v942_v18 = vmul.f32 %v1099_v8, %v937_v15 }
 0x738   :  { %v931_v19 = vsub.f32 1.5, %v930_v17 }
 0x739   :  { %v947_v21 = vadd.f32 %v1100_v14, %v942_v18 }
 0x73a   :  { %v932_v22 = vmul.f32 %v1146_v1, %v931_v19 }
 0x73b   :  { %949 = vst.msk [vmem:[#allocation2] sm:$0xff] %vm69_vm0, %v947_v21 }
 0x73c   :  { %v936_v23 = vsel %vm935_vm11, %v1146_v1, %v932_v22 }
 0x73d   :  { %v938_v16 = vmul.f32 %v936_v23, %v904_v52 }
 0x73f   :  { %v943_v25 = vmul.f32 %v1099_v8, %v938_v16 }
 0x741   :  { %v948_v26 = vadd.f32 %v1100_v14, %v943_v25 }
 0x743   :  { %950 = vst.msk [vmem:[#allocation2 + $0x8] sm:$0xff] %vm69_vm0, %v948_v26 }
 0x744   :  { %963 = dma.vmem_to_hbm [thread:$0]  %s956_s2, 256, %s958_s5, [#allocation3], %s1190_s8, %s1190_s8, %s1185_s26  }
 0x745   :  { %1171 = dma.done.wait [#allocation3], 256  }
 0x746   :  { %1172 = vsyncadd [#allocation3], 4294967040 }
 0x747   :  { %968 = vsyncpa [#allocation3], 1 }

</bundles_post_ra>
